<compile_context>
chip_gen: v7x
topology: tpu7x:2x2x1
jax: 0.10.0
libtpu: 0.0.40
codegen_flags: <defaults>
</compile_context>

<pallas_src>
import functools
import math

import jax
import jax.numpy as jnp
from jax.experimental import pallas as pl
from jax.experimental.pallas import tpu as pltpu

_TM_MAX = 512                     # pixel-row tile
_TN_MAX = 256                     # output-channel tile (deconv Cout = 2048)
_TK_MAX = 2048                    # reduction tile (8x8/s4 conv K = 128*64 = 8192)
_VMEM_LIMIT = 48 * 1024 * 1024    # > v5e 16 MiB default scoped, < v7x 64 MiB physical


def _round_up(x, m):
    return ((x + m - 1) // m) * m


# -----------------------------------------------------------------------------
# Kernel 1: tiled matmul + bias + LeakyReLU (used by all 3x3 / 8x8 convs)
#   grid = (row tiles, col tiles, K tiles); K innermost / "arbitrary",
#   accumulated in a f32 VMEM scratch; output written once at the last K step.
# -----------------------------------------------------------------------------
def _matmul_bias_act_kernel(x_ref, w_ref, b_ref, o_ref, acc_ref, *, act, alpha):
    k = pl.program_id(2)

    @pl.when(k == 0)
    def _():
        acc_ref[...] = jnp.zeros_like(acc_ref)

    acc_ref[...] += jnp.dot(x_ref[...], w_ref[...],
                            preferred_element_type=jnp.float32)

    @pl.when(k == pl.num_programs(2) - 1)
    def _():
        y = acc_ref[...] + b_ref[...]
        if act == "leaky":
            y = jnp.where(y >= 0.0, y, alpha * y)
        o_ref[...] = y.astype(o_ref.dtype)


def matmul_bias_act(x, w, b, act="none", alpha=0.2):
    """x: (N, K), w: (K, Cout), b: (Cout,) -> (N, Cout) f32 with fused bias+act."""
    N, K = x.shape
    Cout = w.shape[1]

    TM = _TM_MAX if N >= _TM_MAX else max(8, _round_up(N, 8))
    Np = _round_up(N, TM)
    TN = _TN_MAX if Cout > _TN_MAX else max(128, _round_up(Cout, 128))
    Cp = _round_up(Cout, TN)
    TK = _TK_MAX if K > _TK_MAX else max(128, _round_up(K, 128))
    Kp = _round_up(K, TK)

    x = x.astype(jnp.float32)
    w = w.astype(jnp.float32)
    if (Np, Kp) != (N, K):
        x = jnp.pad(x, ((0, Np - N), (0, Kp - K)))
    if (Kp, Cp) != (K, Cout):
        w = jnp.pad(w, ((0, Kp - K), (0, Cp - Cout)))
    b2 = jnp.pad(b.astype(jnp.float32), (0, Cp - Cout)).reshape(1, Cp)

    kern = functools.partial(_matmul_bias_act_kernel, act=act, alpha=alpha)
    out = pl.pallas_call(
        kern,
        out_shape=jax.ShapeDtypeStruct((Np, Cp), jnp.float32),
        grid=(Np // TM, Cp // TN, Kp // TK),
        in_specs=[
            pl.BlockSpec((TM, TK), lambda i, j, k: (i, k)),
            pl.BlockSpec((TK, TN), lambda i, j, k: (k, j)),
            pl.BlockSpec((1, TN), lambda i, j, k: (0, j)),
        ],
        out_specs=pl.BlockSpec((TM, TN), lambda i, j, k: (i, j)),
        scratch_shapes=[pltpu.VMEM((TM, TN), jnp.float32)],
        compiler_params=pltpu.CompilerParams(
            dimension_semantics=("parallel", "parallel", "arbitrary"),
            vmem_limit_bytes=_VMEM_LIMIT),
    )(x, w, b2)
    if (Np, Cp) != (N, Cout):
        out = out[:N, :Cout]
    return out


# -----------------------------------------------------------------------------
# Kernel 2: fused SCM gate  out = x * sigmoid(x @ W_bd + b) [+ residual]
#   W_bd is the block-diagonal of the two 1x1-conv weights; K = Cout = C fits
#   in a single tile, so no K loop / accumulator is needed.  The optional
#   residual add fuses UpBlock's final `h1 + h0_1` into the SCM2 epilogue.
# -----------------------------------------------------------------------------
def _scm_gate_kernel(*refs, add_res):
    if add_res:
        x_ref, w_ref, b_ref, r_ref, o_ref = refs
    else:
        x_ref, w_ref, b_ref, o_ref = refs
    x = x_ref[...].astype(jnp.float32)
    y = jnp.dot(x, w_ref[...], preferred_element_type=jnp.float32) + b_ref[...]
    g = x * jax.nn.sigmoid(y)
    if add_res:
        g = g + r_ref[...].astype(jnp.float32)
    o_ref[...] = g.astype(o_ref.dtype)


def scm_gate(x2d, wbd, bbd, residual=None):
    """x2d: (N, C), wbd: (C, C) block-diag, bbd: (C,), residual: (N, C) or None."""
    N, C = x2d.shape
    TM = _TM_MAX if N >= _TM_MAX else max(8, _round_up(N, 8))
    Np = _round_up(N, TM)

    x2d = x2d.astype(jnp.float32)
    if residual is not None:
        residual = residual.astype(jnp.float32)
    if Np != N:
        x2d = jnp.pad(x2d, ((0, Np - N), (0, 0)))
        if residual is not None:
            residual = jnp.pad(residual, ((0, Np - N), (0, 0)))

    ins = [x2d, wbd.astype(jnp.float32), bbd.astype(jnp.float32).reshape(1, C)]
    in_specs = [
        pl.BlockSpec((TM, C), lambda i: (i, 0)),
        pl.BlockSpec((C, C), lambda i: (0, 0)),
        pl.BlockSpec((1, C), lambda i: (0, 0)),
    ]
    if residual is not None:
        ins.append(residual)
        in_specs.append(pl.BlockSpec((TM, C), lambda i: (i, 0)))

    out = pl.pallas_call(
        functools.partial(_scm_gate_kernel, add_res=residual is not None),
        out_shape=jax.ShapeDtypeStruct((Np, C), jnp.float32),
        grid=(Np // TM,),
        in_specs=in_specs,
        out_specs=pl.BlockSpec((TM, C), lambda i: (i, 0)),
        compiler_params=pltpu.CompilerParams(
            dimension_semantics=("parallel",),
            vmem_limit_bytes=_VMEM_LIMIT),
    )(*ins)
    if Np != N:
        out = out[:N]
    return out


# -----------------------------------------------------------------------------
# NHWC layer helpers (layout glue in JAX, all contractions in Pallas kernels)
# -----------------------------------------------------------------------------
def conv2d_refpad(x, w, b, kernel, stride, pad, act="none"):
    # x: (B, H, W, Cin) NHWC; w: (Cout, Cin, kh, kw); ReflectionPad2d(pad) + conv.
    B, H, W, C = x.shape
    xp = x if pad == 0 else jnp.pad(
        x, ((0, 0), (pad, pad), (pad, pad), (0, 0)), mode="reflect")
    Hp, Wp = xp.shape[1], xp.shape[2]
    Ho = (Hp - kernel) // stride + 1
    Wo = (Wp - kernel) // stride + 1
    # TODO(synk): fold this im2col into the matmul kernel (shifted-window
    # index_map or manual DMA over the k*k taps) to avoid the expanded buffer.
    cols = []
    for di in range(kernel):
        for dj in range(kernel):
            cols.append(xp[:, di:di + Ho * stride:stride,
                           dj:dj + Wo * stride:stride, :])
    col = jnp.stack(cols, axis=3)                          # (B, Ho, Wo, k*k, Cin)
    col = col.reshape(B * Ho * Wo, kernel * kernel * C)
    wmat = w.transpose(2, 3, 1, 0).reshape(kernel * kernel * C, -1)  # (k*k*Cin, Cout)
    y = matmul_bias_act(col, wmat, b, act)
    return y.reshape(B, Ho, Wo, -1)


def pixel_shuffle(x, r):
    # NHWC pixel shuffle matching PyTorch's NCHW PixelShuffle on the channel dim.
    B, H, W, Cr2 = x.shape
    C = Cr2 // (r * r)
    x = x.reshape(B, H, W, C, r, r)
    x = x.transpose(0, 1, 4, 2, 5, 3)                      # (B, H, r, W, r, C)
    return x.reshape(B, H * r, W * r, C)


# -----------------------------------------------------------------------------
# Module forwards (mirror the PyTorch modules, NHWC internally)
# -----------------------------------------------------------------------------
def conv_block(p, x, kernel=8, stride=4, pad=2):
    # ReflectionPad2d(pad) -> Conv2d(kernel, stride) -> LeakyReLU(0.2)
    return conv2d_refpad(x, p["w"], p["b"], kernel, stride, pad, act="leaky")


def deconv_block(p, x):
    # ReflectionPad2d(1) -> Conv2d(C, 16*C, 3) -> PixelShuffle(4)
    y = conv2d_refpad(x, p["w"], p["b"], 3, 1, 1, act="none")
    return pixel_shuffle(y, 4)


def scm(p, x, residual=None):
    # cat(x1*sigmoid(conv(x1)), x2*sigmoid(conv(x2)))
    #   == x * sigmoid(x @ blockdiag(w1.T, w2.T) + cat(b1, b2))
    # -> one fused Pallas call; optional residual add fused into the epilogue.
    B, H, W, C = x.shape
    half = C // 2
    wbd = jnp.zeros((C, C), jnp.float32)
    wbd = wbd.at[:half, :half].set(p["w1"].T)
    wbd = wbd.at[half:, half:].set(p["w2"].T)
    bbd = jnp.concatenate([p["b1"], p["b2"]])
    res2d = None if residual is None else residual.reshape(B * H * W, C)
    y = scm_gate(x.reshape(B * H * W, C), wbd, bbd, res2d)
    return y.reshape(B, H, W, C)


def up_block(params, x_nchw):
    """UpBlock.forward: (B, nf, H, W) -> (B, nf, 4H, 4W)."""
    x = jnp.transpose(x_nchw, (0, 2, 3, 1))                # NCHW -> NHWC once
    h0_1 = scm(params["scm1"], deconv_block(params["c1"], x))      # SCM1(up_conv1(x))
    l0 = conv_block(params["c2"], h0_1, 8, 4, 2)                   # up_conv2(h0_1)
    # h1 + h0_1 fused into SCM2's epilogue:
    out = scm(params["scm2"], deconv_block(params["c3"], l0 - x), residual=h0_1)
    return jnp.transpose(out, (0, 3, 1, 2))                # NHWC -> NCHW once


# -----------------------------------------------------------------------------
# Deterministic parameter init (shapes from UpBlock(num_filter=128).__init__)
# -----------------------------------------------------------------------------
def init_params(key, nf=128):
    state = {"key": key}

    def _next():
        state["key"], sub = jax.random.split(state["key"])
        return sub

    def conv2d_p(cout, cin, k):
        fan = cin * k * k
        return {
            "w": jax.random.normal(_next(), (cout, cin, k, k), jnp.float32) / math.sqrt(fan),
            "b": jax.random.normal(_next(), (cout,), jnp.float32) * 0.01,
        }

    def conv1x1_p(cout, cin):
        return {
            "w": jax.random.normal(_next(), (cout, cin), jnp.float32) / math.sqrt(cin),
            "b": jax.random.normal(_next(), (cout,), jnp.float32) * 0.01,
        }

    def scm_p():
        a, c = conv1x1_p(64, 64), conv1x1_p(64, 64)   # SCM hard-codes 64 channels
        return {"w1": a["w"], "b1": a["b"], "w2": c["w"], "b2": c["b"]}

    return {
        "c1": conv2d_p(nf * 16, nf, 3),    # up_conv1 (DeconvBlock)
        "c2": conv2d_p(nf, nf, 8),         # up_conv2 (ConvBlock 8x8 / s4 / pad2)
        "c3": conv2d_p(nf * 16, nf, 3),    # up_conv3 (DeconvBlock)
        "scm1": scm_p(),
        "scm2": scm_p(),
    }


# -----------------------------------------------------------------------------
if __name__ == "__main__":
    key = jax.random.PRNGKey(0)
    kp, kx = jax.random.split(key)

    nf = 128            # SCM hard-codes two 64-channel halves -> num_filter = 128
    B, H, W = 2, 4, 4
    params = init_params(kp, nf)
    x = jax.random.normal(kx, (B, nf, H, W), jnp.float32)

    fwd = jax.jit(up_block)
    out = jax.block_until_ready(fwd(params, x))

    assert out.shape == (B, nf, 4 * H, 4 * W), out.shape
    assert bool(jnp.all(jnp.isfinite(out)))
    print("KERNEL_OK")
</pallas_src>

<mosaic_0001>
module attributes {stable_mosaic.version = 11 : i64} {
  func.func @_matmul_bias_act_kernel(%arg0: i32, %arg1: i32, %arg2: i32, %arg3: memref<32x1152xf32, #tpu.memory_space<vmem>>, %arg4: memref<1152x256xf32, #tpu.memory_space<vmem>>, %arg5: memref<1x256xf32, #tpu.memory_space<vmem>>, %arg6: memref<32x256xf32, #tpu.memory_space<vmem>>, %arg7: memref<32x256xf32, #tpu.memory_space<vmem>>) attributes {dimension_semantics = [#tpu.dimension_semantics<parallel>, #tpu.dimension_semantics<parallel>, #tpu.dimension_semantics<arbitrary>], iteration_bounds = array<i64: 1, 8, 1>, scalar_prefetch = 0 : i64, scratch_operands = 1 : i64, tpu.core_type = #tpu.core_type<tc>, window_params = [{transform_indices = @transform_0, window_bounds = array<i64: 32, 1152>}, {transform_indices = @transform_1, window_bounds = array<i64: 1152, 256>}, {transform_indices = @transform_2, window_bounds = array<i64: 1, 256>}, {transform_indices = @transform_3, window_bounds = array<i64: 32, 256>}]} {
    %c0_i32 = arith.constant 0 : i32
    %0 = arith.cmpi eq, %arg2, %c0_i32 : i32
    %1 = arith.extui %0 : i1 to i32
    %c0_i32_0 = arith.constant 0 : i32
    %2 = arith.cmpi ne, %1, %c0_i32_0 : i32
    scf.if %2 {
      %cst_10 = arith.constant 0.000000e+00 : f32
      %12 = vector.broadcast %cst_10 : f32 to vector<32x256xf32>
      %c0_11 = arith.constant 0 : index
      %c0_12 = arith.constant 0 : index
      %13 = vector.load %arg7[%c0_11, %c0_12] : memref<32x256xf32, #tpu.memory_space<vmem>>, vector<32x256xf32>
      tpu.vector_store %arg7[%c0_11, %c0_12], %12 {strides = array<i32>} : memref<32x256xf32, #tpu.memory_space<vmem>>, vector<32x256xf32>,
    } else {
    }
    %c0 = arith.constant 0 : index
    %c0_1 = arith.constant 0 : index
    %3 = vector.load %arg7[%c0, %c0_1] : memref<32x256xf32, #tpu.memory_space<vmem>>, vector<32x256xf32>
    %c0_2 = arith.constant 0 : index
    %c0_3 = arith.constant 0 : index
    %4 = vector.load %arg3[%c0_2, %c0_3] : memref<32x1152xf32, #tpu.memory_space<vmem>>, vector<32x1152xf32>
    %c0_4 = arith.constant 0 : index
    %c0_5 = arith.constant 0 : index
    %5 = vector.load %arg4[%c0_4, %c0_5] : memref<1152x256xf32, #tpu.memory_space<vmem>>, vector<1152x256xf32>
    %cst = arith.constant dense<0.000000e+00> : vector<32x256xf32>
    %6 = tpu.matmul %4, %5, %cst {dimension_numbers = #tpu.dot_dimension_numbers<[1], [0], [0], [1], [0, 0, 1, 1], [], []>} : vector<32x1152xf32>, vector<1152x256xf32>, vector<32x256xf32> -> vector<32x256xf32>
    %7 = arith.addf %3, %6 : vector<32x256xf32>
    %c0_6 = arith.constant 0 : index
    %c0_7 = arith.constant 0 : index
    %8 = vector.load %arg7[%c0_6, %c0_7] : memref<32x256xf32, #tpu.memory_space<vmem>>, vector<32x256xf32>
    tpu.vector_store %arg7[%c0_6, %c0_7], %7 {strides = array<i32>} : memref<32x256xf32, #tpu.memory_space<vmem>>, vector<32x256xf32>,
    %c0_i32_8 = arith.constant 0 : i32
    %9 = arith.cmpi eq, %arg2, %c0_i32_8 : i32
    %10 = arith.extui %9 : i1 to i32
    %c0_i32_9 = arith.constant 0 : i32
    %11 = arith.cmpi ne, %10, %c0_i32_9 : i32
    scf.if %11 {
      %c0_10 = arith.constant 0 : index
      %c0_11 = arith.constant 0 : index
      %12 = vector.load %arg7[%c0_10, %c0_11] : memref<32x256xf32, #tpu.memory_space<vmem>>, vector<32x256xf32>
      %c0_12 = arith.constant 0 : index
      %c0_13 = arith.constant 0 : index
      %13 = vector.load %arg5[%c0_12, %c0_13] : memref<1x256xf32, #tpu.memory_space<vmem>>, vector<1x256xf32>
      %14 = vector.broadcast %13 : vector<1x256xf32> to vector<32x256xf32>
      %15 = arith.addf %12, %14 : vector<32x256xf32>
      %c0_14 = arith.constant 0 : index
      %c0_15 = arith.constant 0 : index
      %16 = vector.load %arg6[%c0_14, %c0_15] : memref<32x256xf32, #tpu.memory_space<vmem>>, vector<32x256xf32>
      tpu.vector_store %arg6[%c0_14, %c0_15], %15 {strides = array<i32>} : memref<32x256xf32, #tpu.memory_space<vmem>>, vector<32x256xf32>,
    } else {
    }
    return
  }
  func.func @transform_0(%arg0: i32, %arg1: i32, %arg2: i32) -> (i32, i32) {
    %c0_i32 = arith.constant 0 : i32
    return %arg0, %arg2 : i32, i32
  }
  func.func @transform_1(%arg0: i32, %arg1: i32, %arg2: i32) -> (i32, i32) {
    %c0_i32 = arith.constant 0 : i32
    return %arg2, %arg1 : i32, i32
  }
  func.func @transform_2(%arg0: i32, %arg1: i32, %arg2: i32) -> (i32, i32) {
    %c0_i32 = arith.constant 0 : i32
    %c0_i32_0 = arith.constant 0 : i32
    return %c0_i32, %arg1 : i32, i32
  }
  func.func @transform_3(%arg0: i32, %arg1: i32, %arg2: i32) -> (i32, i32) {
    %c0_i32 = arith.constant 0 : i32
    return %arg0, %arg1 : i32, i32
  }
}

module attributes {stable_mosaic.version = 11 : i64} {
  func.func @_scm_gate_kernel(%arg0: i32, %arg1: memref<512x128xf32, #tpu.memory_space<vmem>>, %arg2: memref<128x128xf32, #tpu.memory_space<vmem>>, %arg3: memref<1x128xf32, #tpu.memory_space<vmem>>, %arg4: memref<512x128xf32, #tpu.memory_space<vmem>>) attributes {dimension_semantics = [#tpu.dimension_semantics<parallel>], iteration_bounds = array<i64: 1>, scalar_prefetch = 0 : i64, scratch_operands = 0 : i64, tpu.core_type = #tpu.core_type<tc>, window_params = [{transform_indices = @transform_0, window_bounds = array<i64: 512, 128>}, {pipeline_mode = #tpu.pipeline_mode<synchronous>, transform_indices = @transform_1, window_bounds = array<i64: 128, 128>}, {pipeline_mode = #tpu.pipeline_mode<synchronous>, transform_indices = @transform_2, window_bounds = array<i64: 1, 128>}, {transform_indices = @transform_3, window_bounds = array<i64: 512, 128>}]} {
    %c0 = arith.constant 0 : index
    %c0_0 = arith.constant 0 : index
    %0 = vector.load %arg1[%c0, %c0_0] : memref<512x128xf32, #tpu.memory_space<vmem>>, vector<512x128xf32>
    %c0_1 = arith.constant 0 : index
    %c0_2 = arith.constant 0 : index
    %1 = vector.load %arg2[%c0_1, %c0_2] : memref<128x128xf32, #tpu.memory_space<vmem>>, vector<128x128xf32>
    %cst = arith.constant dense<0.000000e+00> : vector<512x128xf32>
    %2 = tpu.matmul %0, %1, %cst {dimension_numbers = #tpu.dot_dimension_numbers<[1], [0], [0], [1], [0, 0, 1, 1], [], []>} : vector<512x128xf32>, vector<128x128xf32>, vector<512x128xf32> -> vector<512x128xf32>
    %c0_3 = arith.constant 0 : index
    %c0_4 = arith.constant 0 : index
    %3 = vector.load %arg3[%c0_3, %c0_4] : memref<1x128xf32, #tpu.memory_space<vmem>>, vector<1x128xf32>
    %4 = vector.broadcast %3 : vector<1x128xf32> to vector<512x128xf32>
    %5 = arith.addf %2, %4 : vector<512x128xf32>
    %6 = arith.negf %5 : vector<512x128xf32>
    %7 = math.exp %6 : vector<512x128xf32>
    %cst_5 = arith.constant 1.000000e+00 : f32
    %8 = vector.broadcast %cst_5 : f32 to vector<512x128xf32>
    %9 = arith.addf %8, %7 : vector<512x128xf32>
    %10 = arith.divf %8, %9 : vector<512x128xf32>
    %11 = arith.mulf %0, %10 : vector<512x128xf32>
    %c0_6 = arith.constant 0 : index
    %c0_7 = arith.constant 0 : index
    %12 = vector.load %arg4[%c0_6, %c0_7] : memref<512x128xf32, #tpu.memory_space<vmem>>, vector<512x128xf32>
    tpu.vector_store %arg4[%c0_6, %c0_7], %11 {strides = array<i32>} : memref<512x128xf32, #tpu.memory_space<vmem>>, vector<512x128xf32>,
    return
  }
  func.func @transform_0(%arg0: i32) -> (i32, i32) {
    %c0_i32 = arith.constant 0 : i32
    %c0_i32_0 = arith.constant 0 : i32
    return %arg0, %c0_i32 : i32, i32
  }
  func.func @transform_1(%arg0: i32) -> (i32, i32) {
    %c0_i32 = arith.constant 0 : i32
    %c0_i32_0 = arith.constant 0 : i32
    %c0_i32_1 = arith.constant 0 : i32
    return %c0_i32, %c0_i32_0 : i32, i32
  }
  func.func @transform_2(%arg0: i32) -> (i32, i32) {
    %c0_i32 = arith.constant 0 : i32
    %c0_i32_0 = arith.constant 0 : i32
    %c0_i32_1 = arith.constant 0 : i32
    return %c0_i32, %c0_i32_0 : i32, i32
  }
  func.func @transform_3(%arg0: i32) -> (i32, i32) {
    %c0_i32 = arith.constant 0 : i32
    %c0_i32_0 = arith.constant 0 : i32
    return %arg0, %c0_i32 : i32, i32
  }
}

module attributes {stable_mosaic.version = 11 : i64} {
  func.func @_matmul_bias_act_kernel(%arg0: i32, %arg1: i32, %arg2: i32, %arg3: memref<32x2048xf32, #tpu.memory_space<vmem>>, %arg4: memref<2048x128xf32, #tpu.memory_space<vmem>>, %arg5: memref<1x128xf32, #tpu.memory_space<vmem>>, %arg6: memref<32x128xf32, #tpu.memory_space<vmem>>, %arg7: memref<32x128xf32, #tpu.memory_space<vmem>>) attributes {dimension_semantics = [#tpu.dimension_semantics<parallel>, #tpu.dimension_semantics<parallel>, #tpu.dimension_semantics<arbitrary>], iteration_bounds = array<i64: 1, 1, 4>, scalar_prefetch = 0 : i64, scratch_operands = 1 : i64, tpu.core_type = #tpu.core_type<tc>, window_params = [{transform_indices = @transform_0, window_bounds = array<i64: 32, 2048>}, {transform_indices = @transform_1, window_bounds = array<i64: 2048, 128>}, {transform_indices = @transform_2, window_bounds = array<i64: 1, 128>}, {transform_indices = @transform_3, window_bounds = array<i64: 32, 128>}]} {
    %c0_i32 = arith.constant 0 : i32
    %0 = arith.cmpi eq, %arg2, %c0_i32 : i32
    %1 = arith.extui %0 : i1 to i32
    %c0_i32_0 = arith.constant 0 : i32
    %2 = arith.cmpi ne, %1, %c0_i32_0 : i32
    scf.if %2 {
      %cst_9 = arith.constant 0.000000e+00 : f32
      %12 = vector.broadcast %cst_9 : f32 to vector<32x128xf32>
      %c0_10 = arith.constant 0 : index
      %c0_11 = arith.constant 0 : index
      %13 = vector.load %arg7[%c0_10, %c0_11] : memref<32x128xf32, #tpu.memory_space<vmem>>, vector<32x128xf32>
      tpu.vector_store %arg7[%c0_10, %c0_11], %12 {strides = array<i32>} : memref<32x128xf32, #tpu.memory_space<vmem>>, vector<32x128xf32>,
    } else {
    }
    %c0 = arith.constant 0 : index
    %c0_1 = arith.constant 0 : index
    %3 = vector.load %arg7[%c0, %c0_1] : memref<32x128xf32, #tpu.memory_space<vmem>>, vector<32x128xf32>
    %c0_2 = arith.constant 0 : index
    %c0_3 = arith.constant 0 : index
    %4 = vector.load %arg3[%c0_2, %c0_3] : memref<32x2048xf32, #tpu.memory_space<vmem>>, vector<32x2048xf32>
    %c0_4 = arith.constant 0 : index
    %c0_5 = arith.constant 0 : index
    %5 = vector.load %arg4[%c0_4, %c0_5] : memref<2048x128xf32, #tpu.memory_space<vmem>>, vector<2048x128xf32>
    %cst = arith.constant dense<0.000000e+00> : vector<32x128xf32>
    %6 = tpu.matmul %4, %5, %cst {dimension_numbers = #tpu.dot_dimension_numbers<[1], [0], [0], [1], [0, 0, 1, 1], [], []>} : vector<32x2048xf32>, vector<2048x128xf32>, vector<32x128xf32> -> vector<32x128xf32>
    %7 = arith.addf %3, %6 : vector<32x128xf32>
    %c0_6 = arith.constant 0 : index
    %c0_7 = arith.constant 0 : index
    %8 = vector.load %arg7[%c0_6, %c0_7] : memref<32x128xf32, #tpu.memory_space<vmem>>, vector<32x128xf32>
    tpu.vector_store %arg7[%c0_6, %c0_7], %7 {strides = array<i32>} : memref<32x128xf32, #tpu.memory_space<vmem>>, vector<32x128xf32>,
    %c3_i32 = arith.constant 3 : i32
    %9 = arith.cmpi eq, %arg2, %c3_i32 : i32
    %10 = arith.extui %9 : i1 to i32
    %c0_i32_8 = arith.constant 0 : i32
    %11 = arith.cmpi ne, %10, %c0_i32_8 : i32
    scf.if %11 {
      %c0_9 = arith.constant 0 : index
      %c0_10 = arith.constant 0 : index
      %12 = vector.load %arg7[%c0_9, %c0_10] : memref<32x128xf32, #tpu.memory_space<vmem>>, vector<32x128xf32>
      %c0_11 = arith.constant 0 : index
      %c0_12 = arith.constant 0 : index
      %13 = vector.load %arg5[%c0_11, %c0_12] : memref<1x128xf32, #tpu.memory_space<vmem>>, vector<1x128xf32>
      %14 = vector.broadcast %13 : vector<1x128xf32> to vector<32x128xf32>
      %15 = arith.addf %12, %14 : vector<32x128xf32>
      %cst_13 = arith.constant 0.000000e+00 : f32
      %16 = vector.broadcast %cst_13 : f32 to vector<32x128xf32>
      %17 = arith.cmpf oge, %15, %16 : vector<32x128xf32>
      %cst_14 = arith.constant 2.000000e-01 : f32
      %18 = vector.broadcast %cst_14 : f32 to vector<32x128xf32>
      %19 = arith.mulf %18, %15 : vector<32x128xf32>
      %20 = arith.select %17, %15, %19 : vector<32x128xi1>, vector<32x128xf32>
      %c0_15 = arith.constant 0 : index
      %c0_16 = arith.constant 0 : index
      %21 = vector.load %arg6[%c0_15, %c0_16] : memref<32x128xf32, #tpu.memory_space<vmem>>, vector<32x128xf32>
      tpu.vector_store %arg6[%c0_15, %c0_16], %20 {strides = array<i32>} : memref<32x128xf32, #tpu.memory_space<vmem>>, vector<32x128xf32>,
    } else {
    }
    return
  }
  func.func @transform_0(%arg0: i32, %arg1: i32, %arg2: i32) -> (i32, i32) {
    %c0_i32 = arith.constant 0 : i32
    return %arg0, %arg2 : i32, i32
  }
  func.func @transform_1(%arg0: i32, %arg1: i32, %arg2: i32) -> (i32, i32) {
    %c0_i32 = arith.constant 0 : i32
    return %arg2, %arg1 : i32, i32
  }
  func.func @transform_2(%arg0: i32, %arg1: i32, %arg2: i32) -> (i32, i32) {
    %c0_i32 = arith.constant 0 : i32
    %c0_i32_0 = arith.constant 0 : i32
    return %c0_i32, %arg1 : i32, i32
  }
  func.func @transform_3(%arg0: i32, %arg1: i32, %arg2: i32) -> (i32, i32) {
    %c0_i32 = arith.constant 0 : i32
    return %arg0, %arg1 : i32, i32
  }
}

module attributes {stable_mosaic.version = 11 : i64} {
  func.func @_scm_gate_kernel(%arg0: i32, %arg1: memref<512x128xf32, #tpu.memory_space<vmem>>, %arg2: memref<128x128xf32, #tpu.memory_space<vmem>>, %arg3: memref<1x128xf32, #tpu.memory_space<vmem>>, %arg4: memref<512x128xf32, #tpu.memory_space<vmem>>, %arg5: memref<512x128xf32, #tpu.memory_space<vmem>>) attributes {dimension_semantics = [#tpu.dimension_semantics<parallel>], iteration_bounds = array<i64: 1>, scalar_prefetch = 0 : i64, scratch_operands = 0 : i64, tpu.core_type = #tpu.core_type<tc>, window_params = [{transform_indices = @transform_0, window_bounds = array<i64: 512, 128>}, {pipeline_mode = #tpu.pipeline_mode<synchronous>, transform_indices = @transform_1, window_bounds = array<i64: 128, 128>}, {pipeline_mode = #tpu.pipeline_mode<synchronous>, transform_indices = @transform_2, window_bounds = array<i64: 1, 128>}, {transform_indices = @transform_3, window_bounds = array<i64: 512, 128>}, {transform_indices = @transform_4, window_bounds = array<i64: 512, 128>}]} {
    %c0 = arith.constant 0 : index
    %c0_0 = arith.constant 0 : index
    %0 = vector.load %arg1[%c0, %c0_0] : memref<512x128xf32, #tpu.memory_space<vmem>>, vector<512x128xf32>
    %c0_1 = arith.constant 0 : index
    %c0_2 = arith.constant 0 : index
    %1 = vector.load %arg2[%c0_1, %c0_2] : memref<128x128xf32, #tpu.memory_space<vmem>>, vector<128x128xf32>
    %cst = arith.constant dense<0.000000e+00> : vector<512x128xf32>
    %2 = tpu.matmul %0, %1, %cst {dimension_numbers = #tpu.dot_dimension_numbers<[1], [0], [0], [1], [0, 0, 1, 1], [], []>} : vector<512x128xf32>, vector<128x128xf32>, vector<512x128xf32> -> vector<512x128xf32>
    %c0_3 = arith.constant 0 : index
    %c0_4 = arith.constant 0 : index
    %3 = vector.load %arg3[%c0_3, %c0_4] : memref<1x128xf32, #tpu.memory_space<vmem>>, vector<1x128xf32>
    %4 = vector.broadcast %3 : vector<1x128xf32> to vector<512x128xf32>
    %5 = arith.addf %2, %4 : vector<512x128xf32>
    %6 = arith.negf %5 : vector<512x128xf32>
    %7 = math.exp %6 : vector<512x128xf32>
    %cst_5 = arith.constant 1.000000e+00 : f32
    %8 = vector.broadcast %cst_5 : f32 to vector<512x128xf32>
    %9 = arith.addf %8, %7 : vector<512x128xf32>
    %10 = arith.divf %8, %9 : vector<512x128xf32>
    %11 = arith.mulf %0, %10 : vector<512x128xf32>
    %c0_6 = arith.constant 0 : index
    %c0_7 = arith.constant 0 : index
    %12 = vector.load %arg4[%c0_6, %c0_7] : memref<512x128xf32, #tpu.memory_space<vmem>>, vector<512x128xf32>
    %13 = arith.addf %11, %12 : vector<512x128xf32>
    %c0_8 = arith.constant 0 : index
    %c0_9 = arith.constant 0 : index
    %14 = vector.load %arg5[%c0_8, %c0_9] : memref<512x128xf32, #tpu.memory_space<vmem>>, vector<512x128xf32>
    tpu.vector_store %arg5[%c0_8, %c0_9], %13 {strides = array<i32>} : memref<512x128xf32, #tpu.memory_space<vmem>>, vector<512x128xf32>,
    return
  }
  func.func @transform_0(%arg0: i32) -> (i32, i32) {
    %c0_i32 = arith.constant 0 : i32
    %c0_i32_0 = arith.constant 0 : i32
    return %arg0, %c0_i32 : i32, i32
  }
  func.func @transform_1(%arg0: i32) -> (i32, i32) {
    %c0_i32 = arith.constant 0 : i32
    %c0_i32_0 = arith.constant 0 : i32
    %c0_i32_1 = arith.constant 0 : i32
    return %c0_i32, %c0_i32_0 : i32, i32
  }
  func.func @transform_2(%arg0: i32) -> (i32, i32) {
    %c0_i32 = arith.constant 0 : i32
    %c0_i32_0 = arith.constant 0 : i32
    %c0_i32_1 = arith.constant 0 : i32
    return %c0_i32, %c0_i32_0 : i32, i32
  }
  func.func @transform_3(%arg0: i32) -> (i32, i32) {
    %c0_i32 = arith.constant 0 : i32
    %c0_i32_0 = arith.constant 0 : i32
    return %arg0, %c0_i32 : i32, i32
  }
  func.func @transform_4(%arg0: i32) -> (i32, i32) {
    %c0_i32 = arith.constant 0 : i32
    %c0_i32_0 = arith.constant 0 : i32
    return %arg0, %c0_i32 : i32, i32
  }
}

</mosaic_0001>

<bundles_post_ra>
// kernel: up_block.5
= control target key start
LH: loop header
LB: loop body
LE: loop exit
PB: predicated region body
PF: predicated region fallthrough
CT: control target
= control target key end

     0   :  { %s2298_s12 = smov 0   ;;  %s2300_s13 = smov 0   ;;  %s3374_s0 = inlined_call_operand.vmem [shape: f32[32,1152], index: 0, kind: input, shape index: {}]   ;;  %s3375_s1 = inlined_call_operand.vmem [shape: f32[1152,2048], index: 1, kind: input, shape index: {}]   ;;  %s3376_s2 = inlined_call_operand.vmem [shape: f32[1,2048], index: 2, kind: input, shape index: {}]   ;;  %s3377_s3 = inlined_call_operand.vmem [shape: f32[32,2048], index: 3, kind: output, shape index: {}]  }
   0x1   :  { %s2302_s14 = smov 0   ;;  %s2304_s15 = smov 0  }
   0x2   :  { %s2306_s16 = smov 0  }
   0x3 LB: > { %s28_s17 = sadd.s32 1, %s2271_s15  ;;  %s1841_s18 = sadd.s32 4294967295, %s2275_s16   ;;  %s2275_s16 = sphi %s2306_s16, %s13_s16   ;;  %s2271_s15 = sphi %s2304_s15, %s3382_s15   ;;  %s2267_s14 = sphi %s2302_s14, %s3381_s14   ;;  %s2263_s13 = sphi %s2300_s13, %s3380_s13   ;;  %s2259_s12 = sphi %s2298_s12, %s3379_s12  }
   0x4   : > { %p30_p0 = scmp.ge.s32.totalorder %s28_s17, 8  ;;  %p76_p1 = scmp.ne.s32.totalorder %s2263_s13, %s2259_s12 }
   0x5   : > { %p77_p2 = scmp.eq.s32.totalorder %s2275_s16, 0  ;;  %p134_p4 = scmp.eq.s32.totalorder %s1841_s18, 7 }
   0x6   : > { %s3384_s17 = smov (%p30_p0, %s28_s17), 0  ;;  %s69_s20 = sadd.s32 1, %s2263_s13 }
   0x7   : > { %p78_p3 = por %p77_p2, %p76_p1  ;;  %s65_s19 = ssub.s32 %s2271_s15, %s3384_s17 }
   0x8   : > { %p67_p5 = scmp.eq.s32.totalorder %s65_s19, 0  ;;  %p2333_p6 = por %p134_p4, %p76_p1 }
   0x9   : > { %p1845_p7 = scmp.ge.s32.totalorder %s2275_s16, 8 }
   0xa   : > { %s2338_s22 = scalar_select %p67_p5, %s2263_s13, %s69_s20  }
   0xb   : > { %171 = sbr.rel (%p1845_p7) target bundleno = 166 (0xa6), region = 20 }
  0x12   : > { %174 = sbr.rel (!%p78_p3) target bundleno = 166 (0xa6), region = 24  ;;  %s176_s23 = sand.u32 (%p78_p3), 1, %s2263_s13  }
  0x13   : > { %s1856_s24 = sshll.u32 (%p78_p3), %s2271_s15, 4  ;;  %s2194_s25 = smul.u32 (%p78_p3), 2304, %s176_s23 }
  0x14   : > { %s2346_s28 = scalar_lea.vmem (%p78_p3), %s3375_s1, %s1856_s24 }
  0x15   : > { %v197_v0 = vld [vmem:[%s2346_s28] sm:$0xff] (%p78_p3)  ;;  %v199_v1 = vld [vmem:[%s2346_s28 + $0x8] sm:$0xff] (%p78_p3)  ;;  %s2354_s29 = scalar_lea.vmem (%p78_p3), [#allocation3], %s2194_s25 }
  0x16   : > { %v201_v2 = vld [vmem:[%s2346_s28 + $0x80] sm:$0xff] (%p78_p3)  ;;  %v203_v3 = vld [vmem:[%s2346_s28 + $0x88] sm:$0xff] (%p78_p3)  ;;  %198 = vst [vmem:[%s2354_s29] sm:$0xff] (%p78_p3), %v197_v0  ;;  %200 = vst [vmem:[%s2354_s29 + $0x8] sm:$0xff] (%p78_p3), %v199_v1 }
  0x17   : > { %v205_v4 = vld [vmem:[%s2346_s28 + $0x100] sm:$0xff] (%p78_p3)  ;;  %v207_v5 = vld [vmem:[%s2346_s28 + $0x108] sm:$0xff] (%p78_p3)  ;;  %202 = vst [vmem:[%s2354_s29 + $0x10] sm:$0xff] (%p78_p3), %v201_v2  ;;  %204 = vst [vmem:[%s2354_s29 + $0x18] sm:$0xff] (%p78_p3), %v203_v3 }
  0x18   : > { %206 = vst [vmem:[%s2354_s29 + $0x20] sm:$0xff] (%p78_p3), %v205_v4  ;;  %208 = vst [vmem:[%s2354_s29 + $0x28] sm:$0xff] (%p78_p3), %v207_v5  ;;  %v209_v6 = vld [vmem:[%s2346_s28 + $0x180] sm:$0xff] (%p78_p3)  ;;  %v211_v7 = vld [vmem:[%s2346_s28 + $0x188] sm:$0xff] (%p78_p3) }
  0x19   : > { %v213_v8 = vld [vmem:[%s2346_s28 + $0x200] sm:$0xff]  ;;  %210 = vst [vmem:[%s2354_s29 + $0x30] sm:$0xff] %v209_v6  ;;  %212 = vst [vmem:[%s2354_s29 + $0x38] sm:$0xff] %v211_v7  ;;  %v215_v9 = vld [vmem:[%s2346_s28 + $0x208] sm:$0xff] }
  0x1a   : > { %214 = vst [vmem:[%s2354_s29 + $0x40] sm:$0xff] %v213_v8  ;;  %v217_v10 = vld [vmem:[%s2346_s28 + $0x280] sm:$0xff]  ;;  %v219_v11 = vld [vmem:[%s2346_s28 + $0x288] sm:$0xff]  ;;  %216 = vst [vmem:[%s2354_s29 + $0x48] sm:$0xff] %v215_v9 }
  0x1b   : > { %218 = vst [vmem:[%s2354_s29 + $0x50] sm:$0xff] %v217_v10  ;;  %220 = vst [vmem:[%s2354_s29 + $0x58] sm:$0xff] %v219_v11  ;;  %v221_v12 = vld [vmem:[%s2346_s28 + $0x300] sm:$0xff]  ;;  %v223_v13 = vld [vmem:[%s2346_s28 + $0x308] sm:$0xff] }
  0x1c   : > { %v225_v14 = vld [vmem:[%s2346_s28 + $0x380] sm:$0xff]  ;;  %222 = vst [vmem:[%s2354_s29 + $0x60] sm:$0xff] %v221_v12  ;;  %224 = vst [vmem:[%s2354_s29 + $0x68] sm:$0xff] %v223_v13  ;;  %v227_v15 = vld [vmem:[%s2346_s28 + $0x388] sm:$0xff] }
  0x1d   : > { %226 = vst [vmem:[%s2354_s29 + $0x70] sm:$0xff] %v225_v14  ;;  %v229_v16 = vld [vmem:[%s2346_s28 + $0x400] sm:$0xff]  ;;  %v231_v17 = vld [vmem:[%s2346_s28 + $0x408] sm:$0xff]  ;;  %228 = vst [vmem:[%s2354_s29 + $0x78] sm:$0xff] %v227_v15 }
  0x1e   : > { %230 = vst [vmem:[%s2354_s29 + $0x80] sm:$0xff] %v229_v16  ;;  %232 = vst [vmem:[%s2354_s29 + $0x88] sm:$0xff] %v231_v17  ;;  %v233_v18 = vld [vmem:[%s2346_s28 + $0x480] sm:$0xff]  ;;  %v235_v19 = vld [vmem:[%s2346_s28 + $0x488] sm:$0xff] }
  0x1f   : > { %v237_v20 = vld [vmem:[%s2346_s28 + $0x500] sm:$0xff]  ;;  %234 = vst [vmem:[%s2354_s29 + $0x90] sm:$0xff] %v233_v18  ;;  %236 = vst [vmem:[%s2354_s29 + $0x98] sm:$0xff] %v235_v19  ;;  %v239_v21 = vld [vmem:[%s2346_s28 + $0x508] sm:$0xff] }
  0x20   : > { %238 = vst [vmem:[%s2354_s29 + $0xa0] sm:$0xff] %v237_v20  ;;  %v241_v22 = vld [vmem:[%s2346_s28 + $0x580] sm:$0xff]  ;;  %v243_v23 = vld [vmem:[%s2346_s28 + $0x588] sm:$0xff]  ;;  %240 = vst [vmem:[%s2354_s29 + $0xa8] sm:$0xff] %v239_v21 }
  0x21   : > { %242 = vst [vmem:[%s2354_s29 + $0xb0] sm:$0xff] %v241_v22  ;;  %244 = vst [vmem:[%s2354_s29 + $0xb8] sm:$0xff] %v243_v23  ;;  %v245_v24 = vld [vmem:[%s2346_s28 + $0x600] sm:$0xff]  ;;  %v247_v25 = vld [vmem:[%s2346_s28 + $0x608] sm:$0xff] }
  0x22   : > { %v249_v26 = vld [vmem:[%s2346_s28 + $0x680] sm:$0xff]  ;;  %246 = vst [vmem:[%s2354_s29 + $0xc0] sm:$0xff] %v245_v24  ;;  %248 = vst [vmem:[%s2354_s29 + $0xc8] sm:$0xff] %v247_v25  ;;  %v251_v27 = vld [vmem:[%s2346_s28 + $0x688] sm:$0xff] }
  0x23   : > { %250 = vst [vmem:[%s2354_s29 + $0xd0] sm:$0xff] %v249_v26  ;;  %v253_v28 = vld [vmem:[%s2346_s28 + $0x700] sm:$0xff]  ;;  %v255_v29 = vld [vmem:[%s2346_s28 + $0x708] sm:$0xff]  ;;  %252 = vst [vmem:[%s2354_s29 + $0xd8] sm:$0xff] %v251_v27 }
  0x24   : > { %254 = vst [vmem:[%s2354_s29 + $0xe0] sm:$0xff] %v253_v28  ;;  %256 = vst [vmem:[%s2354_s29 + $0xe8] sm:$0xff] %v255_v29  ;;  %v257_v30 = vld [vmem:[%s2346_s28 + $0x780] sm:$0xff]  ;;  %v259_v31 = vld [vmem:[%s2346_s28 + $0x788] sm:$0xff] }
  0x25   : > { %v261_v32 = vld [vmem:[%s2346_s28 + $0x800] sm:$0xff]  ;;  %258 = vst [vmem:[%s2354_s29 + $0xf0] sm:$0xff] %v257_v30  ;;  %260 = vst [vmem:[%s2354_s29 + $0xf8] sm:$0xff] %v259_v31  ;;  %v263_v33 = vld [vmem:[%s2346_s28 + $0x808] sm:$0xff] }
  0x26   : > { %262 = vst [vmem:[%s2354_s29 + $0x100] sm:$0xff] %v261_v32  ;;  %v265_v34 = vld [vmem:[%s2346_s28 + $0x880] sm:$0xff]  ;;  %v267_v35 = vld [vmem:[%s2346_s28 + $0x888] sm:$0xff]  ;;  %264 = vst [vmem:[%s2354_s29 + $0x108] sm:$0xff] %v263_v33 }
  0x27   : > { %266 = vst [vmem:[%s2354_s29 + $0x110] sm:$0xff] %v265_v34  ;;  %268 = vst [vmem:[%s2354_s29 + $0x118] sm:$0xff] %v267_v35  ;;  %v269_v36 = vld [vmem:[%s2346_s28 + $0x900] sm:$0xff]  ;;  %v271_v37 = vld [vmem:[%s2346_s28 + $0x908] sm:$0xff] }
  0x28   : > { %v273_v38 = vld [vmem:[%s2346_s28 + $0x980] sm:$0xff]  ;;  %270 = vst [vmem:[%s2354_s29 + $0x120] sm:$0xff] %v269_v36  ;;  %272 = vst [vmem:[%s2354_s29 + $0x128] sm:$0xff] %v271_v37  ;;  %v275_v39 = vld [vmem:[%s2346_s28 + $0x988] sm:$0xff] }
  0x29   : > { %274 = vst [vmem:[%s2354_s29 + $0x130] sm:$0xff] %v273_v38  ;;  %v277_v40 = vld [vmem:[%s2346_s28 + $0xa00] sm:$0xff]  ;;  %v279_v41 = vld [vmem:[%s2346_s28 + $0xa08] sm:$0xff]  ;;  %276 = vst [vmem:[%s2354_s29 + $0x138] sm:$0xff] %v275_v39 }
  0x2a   : > { %278 = vst [vmem:[%s2354_s29 + $0x140] sm:$0xff] %v277_v40  ;;  %280 = vst [vmem:[%s2354_s29 + $0x148] sm:$0xff] %v279_v41  ;;  %v281_v42 = vld [vmem:[%s2346_s28 + $0xa80] sm:$0xff]  ;;  %v283_v43 = vld [vmem:[%s2346_s28 + $0xa88] sm:$0xff] }
  0x2b   : > { %v285_v44 = vld [vmem:[%s2346_s28 + $0xb00] sm:$0xff]  ;;  %282 = vst [vmem:[%s2354_s29 + $0x150] sm:$0xff] %v281_v42  ;;  %284 = vst [vmem:[%s2354_s29 + $0x158] sm:$0xff] %v283_v43  ;;  %v287_v45 = vld [vmem:[%s2346_s28 + $0xb08] sm:$0xff] }
  0x2c   : > { %286 = vst [vmem:[%s2354_s29 + $0x160] sm:$0xff] %v285_v44  ;;  %v289_v46 = vld [vmem:[%s2346_s28 + $0xb80] sm:$0xff]  ;;  %v291_v47 = vld [vmem:[%s2346_s28 + $0xb88] sm:$0xff]  ;;  %288 = vst [vmem:[%s2354_s29 + $0x168] sm:$0xff] %v287_v45 }
  0x2d   : > { %290 = vst [vmem:[%s2354_s29 + $0x170] sm:$0xff] %v289_v46  ;;  %292 = vst [vmem:[%s2354_s29 + $0x178] sm:$0xff] %v291_v47  ;;  %v293_v48 = vld [vmem:[%s2346_s28 + $0xc00] sm:$0xff]  ;;  %v295_v49 = vld [vmem:[%s2346_s28 + $0xc08] sm:$0xff] }
  0x2e   : > { %v297_v50 = vld [vmem:[%s2346_s28 + $0xc80] sm:$0xff]  ;;  %294 = vst [vmem:[%s2354_s29 + $0x180] sm:$0xff] %v293_v48  ;;  %296 = vst [vmem:[%s2354_s29 + $0x188] sm:$0xff] %v295_v49  ;;  %v299_v51 = vld [vmem:[%s2346_s28 + $0xc88] sm:$0xff] }
  0x2f   : > { %298 = vst [vmem:[%s2354_s29 + $0x190] sm:$0xff] %v297_v50  ;;  %v301_v52 = vld [vmem:[%s2346_s28 + $0xd00] sm:$0xff]  ;;  %v303_v53 = vld [vmem:[%s2346_s28 + $0xd08] sm:$0xff]  ;;  %300 = vst [vmem:[%s2354_s29 + $0x198] sm:$0xff] %v299_v51 }
  0x30   : > { %302 = vst [vmem:[%s2354_s29 + $0x1a0] sm:$0xff] %v301_v52  ;;  %304 = vst [vmem:[%s2354_s29 + $0x1a8] sm:$0xff] %v303_v53  ;;  %v305_v54 = vld [vmem:[%s2346_s28 + $0xd80] sm:$0xff]  ;;  %v307_v55 = vld [vmem:[%s2346_s28 + $0xd88] sm:$0xff] }
  0x31   : > { %v309_v56 = vld [vmem:[%s2346_s28 + $0xe00] sm:$0xff]  ;;  %306 = vst [vmem:[%s2354_s29 + $0x1b0] sm:$0xff] %v305_v54  ;;  %308 = vst [vmem:[%s2354_s29 + $0x1b8] sm:$0xff] %v307_v55  ;;  %v311_v57 = vld [vmem:[%s2346_s28 + $0xe08] sm:$0xff] }
  0x32   : > { %310 = vst [vmem:[%s2354_s29 + $0x1c0] sm:$0xff] %v309_v56  ;;  %v313_v58 = vld [vmem:[%s2346_s28 + $0xe80] sm:$0xff]  ;;  %v315_v59 = vld [vmem:[%s2346_s28 + $0xe88] sm:$0xff]  ;;  %312 = vst [vmem:[%s2354_s29 + $0x1c8] sm:$0xff] %v311_v57 }
  0x33   : > { %314 = vst [vmem:[%s2354_s29 + $0x1d0] sm:$0xff] %v313_v58  ;;  %316 = vst [vmem:[%s2354_s29 + $0x1d8] sm:$0xff] %v315_v59  ;;  %v317_v60 = vld [vmem:[%s2346_s28 + $0xf00] sm:$0xff]  ;;  %v319_v61 = vld [vmem:[%s2346_s28 + $0xf08] sm:$0xff] }
  0x34   : > { %v321_v62 = vld [vmem:[%s2346_s28 + $0xf80] sm:$0xff]  ;;  %318 = vst [vmem:[%s2354_s29 + $0x1e0] sm:$0xff] %v317_v60  ;;  %320 = vst [vmem:[%s2354_s29 + $0x1e8] sm:$0xff] %v319_v61  ;;  %v323_v63 = vld [vmem:[%s2346_s28 + $0xf88] sm:$0xff] }
  0x35   : > { %322 = vst [vmem:[%s2354_s29 + $0x1f0] sm:$0xff] %v321_v62  ;;  %v325_v0 = vld [vmem:[%s2346_s28 + $0x1000] sm:$0xff]  ;;  %v327_v1 = vld [vmem:[%s2346_s28 + $0x1008] sm:$0xff]  ;;  %324 = vst [vmem:[%s2354_s29 + $0x1f8] sm:$0xff] %v323_v63 }
  0x36   : > { %326 = vst [vmem:[%s2354_s29 + $0x200] sm:$0xff] %v325_v0  ;;  %328 = vst [vmem:[%s2354_s29 + $0x208] sm:$0xff] %v327_v1  ;;  %v329_v2 = vld [vmem:[%s2346_s28 + $0x1080] sm:$0xff]  ;;  %v331_v3 = vld [vmem:[%s2346_s28 + $0x1088] sm:$0xff] }
  0x37   : > { %v333_v4 = vld [vmem:[%s2346_s28 + $0x1100] sm:$0xff]  ;;  %330 = vst [vmem:[%s2354_s29 + $0x210] sm:$0xff] %v329_v2  ;;  %332 = vst [vmem:[%s2354_s29 + $0x218] sm:$0xff] %v331_v3  ;;  %v335_v5 = vld [vmem:[%s2346_s28 + $0x1108] sm:$0xff] }
  0x38   : > { %334 = vst [vmem:[%s2354_s29 + $0x220] sm:$0xff] %v333_v4  ;;  %v337_v6 = vld [vmem:[%s2346_s28 + $0x1180] sm:$0xff]  ;;  %v339_v7 = vld [vmem:[%s2346_s28 + $0x1188] sm:$0xff]  ;;  %336 = vst [vmem:[%s2354_s29 + $0x228] sm:$0xff] %v335_v5 }
  0x39   : > { %338 = vst [vmem:[%s2354_s29 + $0x230] sm:$0xff] %v337_v6  ;;  %340 = vst [vmem:[%s2354_s29 + $0x238] sm:$0xff] %v339_v7  ;;  %v341_v8 = vld [vmem:[%s2346_s28 + $0x1200] sm:$0xff]  ;;  %v343_v9 = vld [vmem:[%s2346_s28 + $0x1208] sm:$0xff] }
  0x3a   : > { %v345_v10 = vld [vmem:[%s2346_s28 + $0x1280] sm:$0xff]  ;;  %342 = vst [vmem:[%s2354_s29 + $0x240] sm:$0xff] %v341_v8  ;;  %344 = vst [vmem:[%s2354_s29 + $0x248] sm:$0xff] %v343_v9  ;;  %v347_v11 = vld [vmem:[%s2346_s28 + $0x1288] sm:$0xff] }
  0x3b   : > { %346 = vst [vmem:[%s2354_s29 + $0x250] sm:$0xff] %v345_v10  ;;  %v349_v12 = vld [vmem:[%s2346_s28 + $0x1300] sm:$0xff]  ;;  %v351_v13 = vld [vmem:[%s2346_s28 + $0x1308] sm:$0xff]  ;;  %348 = vst [vmem:[%s2354_s29 + $0x258] sm:$0xff] %v347_v11 }
  0x3c   : > { %350 = vst [vmem:[%s2354_s29 + $0x260] sm:$0xff] %v349_v12  ;;  %352 = vst [vmem:[%s2354_s29 + $0x268] sm:$0xff] %v351_v13  ;;  %v353_v14 = vld [vmem:[%s2346_s28 + $0x1380] sm:$0xff]  ;;  %v355_v15 = vld [vmem:[%s2346_s28 + $0x1388] sm:$0xff] }
  0x3d   : > { %v357_v16 = vld [vmem:[%s2346_s28 + $0x1400] sm:$0xff]  ;;  %354 = vst [vmem:[%s2354_s29 + $0x270] sm:$0xff] %v353_v14  ;;  %356 = vst [vmem:[%s2354_s29 + $0x278] sm:$0xff] %v355_v15  ;;  %v359_v17 = vld [vmem:[%s2346_s28 + $0x1408] sm:$0xff] }
  0x3e   : > { %358 = vst [vmem:[%s2354_s29 + $0x280] sm:$0xff] %v357_v16  ;;  %v361_v18 = vld [vmem:[%s2346_s28 + $0x1480] sm:$0xff]  ;;  %v363_v19 = vld [vmem:[%s2346_s28 + $0x1488] sm:$0xff]  ;;  %360 = vst [vmem:[%s2354_s29 + $0x288] sm:$0xff] %v359_v17 }
  0x3f   : > { %362 = vst [vmem:[%s2354_s29 + $0x290] sm:$0xff] %v361_v18  ;;  %364 = vst [vmem:[%s2354_s29 + $0x298] sm:$0xff] %v363_v19  ;;  %v365_v20 = vld [vmem:[%s2346_s28 + $0x1500] sm:$0xff]  ;;  %v367_v21 = vld [vmem:[%s2346_s28 + $0x1508] sm:$0xff] }
  0x40   : > { %v369_v22 = vld [vmem:[%s2346_s28 + $0x1580] sm:$0xff]  ;;  %366 = vst [vmem:[%s2354_s29 + $0x2a0] sm:$0xff] %v365_v20  ;;  %368 = vst [vmem:[%s2354_s29 + $0x2a8] sm:$0xff] %v367_v21  ;;  %v371_v23 = vld [vmem:[%s2346_s28 + $0x1588] sm:$0xff] }
  0x41   : > { %370 = vst [vmem:[%s2354_s29 + $0x2b0] sm:$0xff] %v369_v22  ;;  %v373_v24 = vld [vmem:[%s2346_s28 + $0x1600] sm:$0xff]  ;;  %v375_v25 = vld [vmem:[%s2346_s28 + $0x1608] sm:$0xff]  ;;  %372 = vst [vmem:[%s2354_s29 + $0x2b8] sm:$0xff] %v371_v23 }
  0x42   : > { %374 = vst [vmem:[%s2354_s29 + $0x2c0] sm:$0xff] %v373_v24  ;;  %376 = vst [vmem:[%s2354_s29 + $0x2c8] sm:$0xff] %v375_v25  ;;  %v377_v26 = vld [vmem:[%s2346_s28 + $0x1680] sm:$0xff]  ;;  %v379_v27 = vld [vmem:[%s2346_s28 + $0x1688] sm:$0xff] }
  0x43   : > { %v381_v28 = vld [vmem:[%s2346_s28 + $0x1700] sm:$0xff]  ;;  %378 = vst [vmem:[%s2354_s29 + $0x2d0] sm:$0xff] %v377_v26  ;;  %380 = vst [vmem:[%s2354_s29 + $0x2d8] sm:$0xff] %v379_v27  ;;  %v383_v29 = vld [vmem:[%s2346_s28 + $0x1708] sm:$0xff] }
  0x44   : > { %382 = vst [vmem:[%s2354_s29 + $0x2e0] sm:$0xff] %v381_v28  ;;  %v385_v30 = vld [vmem:[%s2346_s28 + $0x1780] sm:$0xff]  ;;  %v387_v31 = vld [vmem:[%s2346_s28 + $0x1788] sm:$0xff]  ;;  %384 = vst [vmem:[%s2354_s29 + $0x2e8] sm:$0xff] %v383_v29 }
  0x45   : > { %386 = vst [vmem:[%s2354_s29 + $0x2f0] sm:$0xff] %v385_v30  ;;  %388 = vst [vmem:[%s2354_s29 + $0x2f8] sm:$0xff] %v387_v31  ;;  %v389_v32 = vld [vmem:[%s2346_s28 + $0x1800] sm:$0xff]  ;;  %v391_v33 = vld [vmem:[%s2346_s28 + $0x1808] sm:$0xff] }
  0x46   : > { %v393_v34 = vld [vmem:[%s2346_s28 + $0x1880] sm:$0xff]  ;;  %390 = vst [vmem:[%s2354_s29 + $0x300] sm:$0xff] %v389_v32  ;;  %392 = vst [vmem:[%s2354_s29 + $0x308] sm:$0xff] %v391_v33  ;;  %v395_v35 = vld [vmem:[%s2346_s28 + $0x1888] sm:$0xff] }
  0x47   : > { %394 = vst [vmem:[%s2354_s29 + $0x310] sm:$0xff] %v393_v34  ;;  %v397_v36 = vld [vmem:[%s2346_s28 + $0x1900] sm:$0xff]  ;;  %v399_v37 = vld [vmem:[%s2346_s28 + $0x1908] sm:$0xff]  ;;  %396 = vst [vmem:[%s2354_s29 + $0x318] sm:$0xff] %v395_v35 }
  0x48   : > { %398 = vst [vmem:[%s2354_s29 + $0x320] sm:$0xff] %v397_v36  ;;  %400 = vst [vmem:[%s2354_s29 + $0x328] sm:$0xff] %v399_v37  ;;  %v401_v38 = vld [vmem:[%s2346_s28 + $0x1980] sm:$0xff]  ;;  %v403_v39 = vld [vmem:[%s2346_s28 + $0x1988] sm:$0xff] }
  0x49   : > { %v405_v40 = vld [vmem:[%s2346_s28 + $0x1a00] sm:$0xff]  ;;  %402 = vst [vmem:[%s2354_s29 + $0x330] sm:$0xff] %v401_v38  ;;  %404 = vst [vmem:[%s2354_s29 + $0x338] sm:$0xff] %v403_v39  ;;  %v407_v41 = vld [vmem:[%s2346_s28 + $0x1a08] sm:$0xff] }
  0x4a   : > { %406 = vst [vmem:[%s2354_s29 + $0x340] sm:$0xff] %v405_v40  ;;  %v409_v42 = vld [vmem:[%s2346_s28 + $0x1a80] sm:$0xff]  ;;  %v411_v43 = vld [vmem:[%s2346_s28 + $0x1a88] sm:$0xff]  ;;  %408 = vst [vmem:[%s2354_s29 + $0x348] sm:$0xff] %v407_v41 }
  0x4b   : > { %410 = vst [vmem:[%s2354_s29 + $0x350] sm:$0xff] %v409_v42  ;;  %412 = vst [vmem:[%s2354_s29 + $0x358] sm:$0xff] %v411_v43  ;;  %v413_v44 = vld [vmem:[%s2346_s28 + $0x1b00] sm:$0xff]  ;;  %v415_v45 = vld [vmem:[%s2346_s28 + $0x1b08] sm:$0xff] }
  0x4c   : > { %v417_v46 = vld [vmem:[%s2346_s28 + $0x1b80] sm:$0xff]  ;;  %414 = vst [vmem:[%s2354_s29 + $0x360] sm:$0xff] %v413_v44  ;;  %416 = vst [vmem:[%s2354_s29 + $0x368] sm:$0xff] %v415_v45  ;;  %v419_v47 = vld [vmem:[%s2346_s28 + $0x1b88] sm:$0xff] }
  0x4d   : > { %418 = vst [vmem:[%s2354_s29 + $0x370] sm:$0xff] %v417_v46  ;;  %v421_v48 = vld [vmem:[%s2346_s28 + $0x1c00] sm:$0xff]  ;;  %v423_v49 = vld [vmem:[%s2346_s28 + $0x1c08] sm:$0xff]  ;;  %420 = vst [vmem:[%s2354_s29 + $0x378] sm:$0xff] %v419_v47 }
  0x4e   : > { %422 = vst [vmem:[%s2354_s29 + $0x380] sm:$0xff] %v421_v48  ;;  %424 = vst [vmem:[%s2354_s29 + $0x388] sm:$0xff] %v423_v49  ;;  %v425_v50 = vld [vmem:[%s2346_s28 + $0x1c80] sm:$0xff]  ;;  %v427_v51 = vld [vmem:[%s2346_s28 + $0x1c88] sm:$0xff] }
  0x4f   : > { %v429_v52 = vld [vmem:[%s2346_s28 + $0x1d00] sm:$0xff]  ;;  %426 = vst [vmem:[%s2354_s29 + $0x390] sm:$0xff] %v425_v50  ;;  %428 = vst [vmem:[%s2354_s29 + $0x398] sm:$0xff] %v427_v51  ;;  %v431_v53 = vld [vmem:[%s2346_s28 + $0x1d08] sm:$0xff] }
  0x50   : > { %430 = vst [vmem:[%s2354_s29 + $0x3a0] sm:$0xff] %v429_v52  ;;  %v433_v54 = vld [vmem:[%s2346_s28 + $0x1d80] sm:$0xff]  ;;  %v435_v55 = vld [vmem:[%s2346_s28 + $0x1d88] sm:$0xff]  ;;  %432 = vst [vmem:[%s2354_s29 + $0x3a8] sm:$0xff] %v431_v53 }
  0x51   : > { %434 = vst [vmem:[%s2354_s29 + $0x3b0] sm:$0xff] %v433_v54  ;;  %436 = vst [vmem:[%s2354_s29 + $0x3b8] sm:$0xff] %v435_v55  ;;  %v437_v56 = vld [vmem:[%s2346_s28 + $0x1e00] sm:$0xff]  ;;  %v439_v57 = vld [vmem:[%s2346_s28 + $0x1e08] sm:$0xff] }
  0x52   : > { %v441_v58 = vld [vmem:[%s2346_s28 + $0x1e80] sm:$0xff]  ;;  %438 = vst [vmem:[%s2354_s29 + $0x3c0] sm:$0xff] %v437_v56  ;;  %440 = vst [vmem:[%s2354_s29 + $0x3c8] sm:$0xff] %v439_v57  ;;  %v443_v59 = vld [vmem:[%s2346_s28 + $0x1e88] sm:$0xff] }
  0x53   : > { %442 = vst [vmem:[%s2354_s29 + $0x3d0] sm:$0xff] %v441_v58  ;;  %v445_v60 = vld [vmem:[%s2346_s28 + $0x1f00] sm:$0xff]  ;;  %v447_v61 = vld [vmem:[%s2346_s28 + $0x1f08] sm:$0xff]  ;;  %444 = vst [vmem:[%s2354_s29 + $0x3d8] sm:$0xff] %v443_v59 }
  0x54   : > { %446 = vst [vmem:[%s2354_s29 + $0x3e0] sm:$0xff] %v445_v60  ;;  %448 = vst [vmem:[%s2354_s29 + $0x3e8] sm:$0xff] %v447_v61  ;;  %v449_v62 = vld [vmem:[%s2346_s28 + $0x1f80] sm:$0xff]  ;;  %v451_v63 = vld [vmem:[%s2346_s28 + $0x1f88] sm:$0xff] }
  0x55   : > { %v453_v0 = vld [vmem:[%s2346_s28 + $0x2000] sm:$0xff]  ;;  %450 = vst [vmem:[%s2354_s29 + $0x3f0] sm:$0xff] %v449_v62  ;;  %452 = vst [vmem:[%s2354_s29 + $0x3f8] sm:$0xff] %v451_v63  ;;  %v455_v1 = vld [vmem:[%s2346_s28 + $0x2008] sm:$0xff] }
  0x56   : > { %454 = vst [vmem:[%s2354_s29 + $0x400] sm:$0xff] %v453_v0  ;;  %v457_v2 = vld [vmem:[%s2346_s28 + $0x2080] sm:$0xff]  ;;  %v459_v3 = vld [vmem:[%s2346_s28 + $0x2088] sm:$0xff]  ;;  %456 = vst [vmem:[%s2354_s29 + $0x408] sm:$0xff] %v455_v1 }
  0x57   : > { %458 = vst [vmem:[%s2354_s29 + $0x410] sm:$0xff] %v457_v2  ;;  %460 = vst [vmem:[%s2354_s29 + $0x418] sm:$0xff] %v459_v3  ;;  %v461_v4 = vld [vmem:[%s2346_s28 + $0x2100] sm:$0xff]  ;;  %v463_v5 = vld [vmem:[%s2346_s28 + $0x2108] sm:$0xff] }
  0x58   : > { %v465_v6 = vld [vmem:[%s2346_s28 + $0x2180] sm:$0xff]  ;;  %462 = vst [vmem:[%s2354_s29 + $0x420] sm:$0xff] %v461_v4  ;;  %464 = vst [vmem:[%s2354_s29 + $0x428] sm:$0xff] %v463_v5  ;;  %v467_v7 = vld [vmem:[%s2346_s28 + $0x2188] sm:$0xff] }
  0x59   : > { %466 = vst [vmem:[%s2354_s29 + $0x430] sm:$0xff] %v465_v6  ;;  %v469_v8 = vld [vmem:[%s2346_s28 + $0x2200] sm:$0xff]  ;;  %v471_v9 = vld [vmem:[%s2346_s28 + $0x2208] sm:$0xff]  ;;  %468 = vst [vmem:[%s2354_s29 + $0x438] sm:$0xff] %v467_v7 }
  0x5a   : > { %470 = vst [vmem:[%s2354_s29 + $0x440] sm:$0xff] %v469_v8  ;;  %472 = vst [vmem:[%s2354_s29 + $0x448] sm:$0xff] %v471_v9  ;;  %v473_v10 = vld [vmem:[%s2346_s28 + $0x2280] sm:$0xff]  ;;  %v475_v11 = vld [vmem:[%s2346_s28 + $0x2288] sm:$0xff] }
  0x5b   : > { %v477_v12 = vld [vmem:[%s2346_s28 + $0x2300] sm:$0xff]  ;;  %474 = vst [vmem:[%s2354_s29 + $0x450] sm:$0xff] %v473_v10  ;;  %476 = vst [vmem:[%s2354_s29 + $0x458] sm:$0xff] %v475_v11  ;;  %v479_v13 = vld [vmem:[%s2346_s28 + $0x2308] sm:$0xff] }
  0x5c   : > { %478 = vst [vmem:[%s2354_s29 + $0x460] sm:$0xff] %v477_v12  ;;  %v481_v14 = vld [vmem:[%s2346_s28 + $0x2380] sm:$0xff]  ;;  %v483_v15 = vld [vmem:[%s2346_s28 + $0x2388] sm:$0xff]  ;;  %480 = vst [vmem:[%s2354_s29 + $0x468] sm:$0xff] %v479_v13 }
  0x5d   : > { %482 = vst [vmem:[%s2354_s29 + $0x470] sm:$0xff] %v481_v14  ;;  %484 = vst [vmem:[%s2354_s29 + $0x478] sm:$0xff] %v483_v15  ;;  %v485_v16 = vld [vmem:[%s2346_s28 + $0x2400] sm:$0xff]  ;;  %v487_v17 = vld [vmem:[%s2346_s28 + $0x2408] sm:$0xff] }
  0x5e   : > { %v489_v18 = vld [vmem:[%s2346_s28 + $0x2480] sm:$0xff]  ;;  %486 = vst [vmem:[%s2354_s29 + $0x480] sm:$0xff] %v485_v16  ;;  %488 = vst [vmem:[%s2354_s29 + $0x488] sm:$0xff] %v487_v17  ;;  %v491_v19 = vld [vmem:[%s2346_s28 + $0x2488] sm:$0xff] }
  0x5f   : > { %490 = vst [vmem:[%s2354_s29 + $0x490] sm:$0xff] %v489_v18  ;;  %v493_v20 = vld [vmem:[%s2346_s28 + $0x2500] sm:$0xff]  ;;  %v495_v21 = vld [vmem:[%s2346_s28 + $0x2508] sm:$0xff]  ;;  %492 = vst [vmem:[%s2354_s29 + $0x498] sm:$0xff] %v491_v19 }
  0x60   : > { %494 = vst [vmem:[%s2354_s29 + $0x4a0] sm:$0xff] %v493_v20  ;;  %496 = vst [vmem:[%s2354_s29 + $0x4a8] sm:$0xff] %v495_v21  ;;  %v497_v22 = vld [vmem:[%s2346_s28 + $0x2580] sm:$0xff]  ;;  %v499_v23 = vld [vmem:[%s2346_s28 + $0x2588] sm:$0xff] }
  0x61   : > { %v501_v24 = vld [vmem:[%s2346_s28 + $0x2600] sm:$0xff]  ;;  %498 = vst [vmem:[%s2354_s29 + $0x4b0] sm:$0xff] %v497_v22  ;;  %500 = vst [vmem:[%s2354_s29 + $0x4b8] sm:$0xff] %v499_v23  ;;  %v503_v25 = vld [vmem:[%s2346_s28 + $0x2608] sm:$0xff] }
  0x62   : > { %502 = vst [vmem:[%s2354_s29 + $0x4c0] sm:$0xff] %v501_v24  ;;  %v505_v26 = vld [vmem:[%s2346_s28 + $0x2680] sm:$0xff]  ;;  %v507_v27 = vld [vmem:[%s2346_s28 + $0x2688] sm:$0xff]  ;;  %504 = vst [vmem:[%s2354_s29 + $0x4c8] sm:$0xff] %v503_v25 }
  0x63   : > { %506 = vst [vmem:[%s2354_s29 + $0x4d0] sm:$0xff] %v505_v26  ;;  %508 = vst [vmem:[%s2354_s29 + $0x4d8] sm:$0xff] %v507_v27  ;;  %v509_v28 = vld [vmem:[%s2346_s28 + $0x2700] sm:$0xff]  ;;  %v511_v29 = vld [vmem:[%s2346_s28 + $0x2708] sm:$0xff] }
  0x64   : > { %v513_v30 = vld [vmem:[%s2346_s28 + $0x2780] sm:$0xff]  ;;  %510 = vst [vmem:[%s2354_s29 + $0x4e0] sm:$0xff] %v509_v28  ;;  %512 = vst [vmem:[%s2354_s29 + $0x4e8] sm:$0xff] %v511_v29  ;;  %v515_v31 = vld [vmem:[%s2346_s28 + $0x2788] sm:$0xff] }
  0x65   : > { %514 = vst [vmem:[%s2354_s29 + $0x4f0] sm:$0xff] %v513_v30  ;;  %v517_v32 = vld [vmem:[%s2346_s28 + $0x2800] sm:$0xff]  ;;  %v519_v33 = vld [vmem:[%s2346_s28 + $0x2808] sm:$0xff]  ;;  %516 = vst [vmem:[%s2354_s29 + $0x4f8] sm:$0xff] %v515_v31 }
  0x66   : > { %518 = vst [vmem:[%s2354_s29 + $0x500] sm:$0xff] %v517_v32  ;;  %520 = vst [vmem:[%s2354_s29 + $0x508] sm:$0xff] %v519_v33  ;;  %v521_v34 = vld [vmem:[%s2346_s28 + $0x2880] sm:$0xff]  ;;  %v523_v35 = vld [vmem:[%s2346_s28 + $0x2888] sm:$0xff] }
  0x67   : > { %v525_v36 = vld [vmem:[%s2346_s28 + $0x2900] sm:$0xff]  ;;  %522 = vst [vmem:[%s2354_s29 + $0x510] sm:$0xff] %v521_v34  ;;  %524 = vst [vmem:[%s2354_s29 + $0x518] sm:$0xff] %v523_v35  ;;  %v527_v37 = vld [vmem:[%s2346_s28 + $0x2908] sm:$0xff] }
  0x68   : > { %526 = vst [vmem:[%s2354_s29 + $0x520] sm:$0xff] %v525_v36  ;;  %v529_v38 = vld [vmem:[%s2346_s28 + $0x2980] sm:$0xff]  ;;  %v531_v39 = vld [vmem:[%s2346_s28 + $0x2988] sm:$0xff]  ;;  %528 = vst [vmem:[%s2354_s29 + $0x528] sm:$0xff] %v527_v37 }
  0x69   : > { %530 = vst [vmem:[%s2354_s29 + $0x530] sm:$0xff] %v529_v38  ;;  %532 = vst [vmem:[%s2354_s29 + $0x538] sm:$0xff] %v531_v39  ;;  %v533_v40 = vld [vmem:[%s2346_s28 + $0x2a00] sm:$0xff]  ;;  %v535_v41 = vld [vmem:[%s2346_s28 + $0x2a08] sm:$0xff] }
  0x6a   : > { %v537_v42 = vld [vmem:[%s2346_s28 + $0x2a80] sm:$0xff]  ;;  %534 = vst [vmem:[%s2354_s29 + $0x540] sm:$0xff] %v533_v40  ;;  %536 = vst [vmem:[%s2354_s29 + $0x548] sm:$0xff] %v535_v41  ;;  %v539_v43 = vld [vmem:[%s2346_s28 + $0x2a88] sm:$0xff] }
  0x6b   : > { %538 = vst [vmem:[%s2354_s29 + $0x550] sm:$0xff] %v537_v42  ;;  %v541_v44 = vld [vmem:[%s2346_s28 + $0x2b00] sm:$0xff]  ;;  %v543_v45 = vld [vmem:[%s2346_s28 + $0x2b08] sm:$0xff]  ;;  %540 = vst [vmem:[%s2354_s29 + $0x558] sm:$0xff] %v539_v43 }
  0x6c   : > { %542 = vst [vmem:[%s2354_s29 + $0x560] sm:$0xff] %v541_v44  ;;  %544 = vst [vmem:[%s2354_s29 + $0x568] sm:$0xff] %v543_v45  ;;  %v545_v46 = vld [vmem:[%s2346_s28 + $0x2b80] sm:$0xff]  ;;  %v547_v47 = vld [vmem:[%s2346_s28 + $0x2b88] sm:$0xff] }
  0x6d   : > { %v549_v48 = vld [vmem:[%s2346_s28 + $0x2c00] sm:$0xff]  ;;  %546 = vst [vmem:[%s2354_s29 + $0x570] sm:$0xff] %v545_v46  ;;  %548 = vst [vmem:[%s2354_s29 + $0x578] sm:$0xff] %v547_v47  ;;  %v551_v49 = vld [vmem:[%s2346_s28 + $0x2c08] sm:$0xff] }
  0x6e   : > { %550 = vst [vmem:[%s2354_s29 + $0x580] sm:$0xff] %v549_v48  ;;  %v553_v50 = vld [vmem:[%s2346_s28 + $0x2c80] sm:$0xff]  ;;  %v555_v51 = vld [vmem:[%s2346_s28 + $0x2c88] sm:$0xff]  ;;  %552 = vst [vmem:[%s2354_s29 + $0x588] sm:$0xff] %v551_v49 }
  0x6f   : > { %554 = vst [vmem:[%s2354_s29 + $0x590] sm:$0xff] %v553_v50  ;;  %556 = vst [vmem:[%s2354_s29 + $0x598] sm:$0xff] %v555_v51  ;;  %v557_v52 = vld [vmem:[%s2346_s28 + $0x2d00] sm:$0xff]  ;;  %v559_v53 = vld [vmem:[%s2346_s28 + $0x2d08] sm:$0xff] }
  0x70   : > { %v561_v54 = vld [vmem:[%s2346_s28 + $0x2d80] sm:$0xff]  ;;  %558 = vst [vmem:[%s2354_s29 + $0x5a0] sm:$0xff] %v557_v52  ;;  %560 = vst [vmem:[%s2354_s29 + $0x5a8] sm:$0xff] %v559_v53  ;;  %v563_v55 = vld [vmem:[%s2346_s28 + $0x2d88] sm:$0xff] }
  0x71   : > { %562 = vst [vmem:[%s2354_s29 + $0x5b0] sm:$0xff] %v561_v54  ;;  %v565_v56 = vld [vmem:[%s2346_s28 + $0x2e00] sm:$0xff]  ;;  %v567_v57 = vld [vmem:[%s2346_s28 + $0x2e08] sm:$0xff]  ;;  %564 = vst [vmem:[%s2354_s29 + $0x5b8] sm:$0xff] %v563_v55 }
  0x72   : > { %566 = vst [vmem:[%s2354_s29 + $0x5c0] sm:$0xff] %v565_v56  ;;  %568 = vst [vmem:[%s2354_s29 + $0x5c8] sm:$0xff] %v567_v57  ;;  %v569_v58 = vld [vmem:[%s2346_s28 + $0x2e80] sm:$0xff]  ;;  %v571_v59 = vld [vmem:[%s2346_s28 + $0x2e88] sm:$0xff] }
  0x73   : > { %v573_v60 = vld [vmem:[%s2346_s28 + $0x2f00] sm:$0xff]  ;;  %570 = vst [vmem:[%s2354_s29 + $0x5d0] sm:$0xff] %v569_v58  ;;  %572 = vst [vmem:[%s2354_s29 + $0x5d8] sm:$0xff] %v571_v59  ;;  %v575_v61 = vld [vmem:[%s2346_s28 + $0x2f08] sm:$0xff] }
  0x74   : > { %574 = vst [vmem:[%s2354_s29 + $0x5e0] sm:$0xff] %v573_v60  ;;  %v577_v62 = vld [vmem:[%s2346_s28 + $0x2f80] sm:$0xff]  ;;  %v579_v63 = vld [vmem:[%s2346_s28 + $0x2f88] sm:$0xff]  ;;  %576 = vst [vmem:[%s2354_s29 + $0x5e8] sm:$0xff] %v575_v61 }
  0x75   : > { %578 = vst [vmem:[%s2354_s29 + $0x5f0] sm:$0xff] %v577_v62  ;;  %580 = vst [vmem:[%s2354_s29 + $0x5f8] sm:$0xff] %v579_v63  ;;  %v581_v0 = vld [vmem:[%s2346_s28 + $0x3000] sm:$0xff]  ;;  %v583_v1 = vld [vmem:[%s2346_s28 + $0x3008] sm:$0xff] }
  0x76   : > { %v585_v2 = vld [vmem:[%s2346_s28 + $0x3080] sm:$0xff]  ;;  %582 = vst [vmem:[%s2354_s29 + $0x600] sm:$0xff] %v581_v0  ;;  %584 = vst [vmem:[%s2354_s29 + $0x608] sm:$0xff] %v583_v1  ;;  %v587_v3 = vld [vmem:[%s2346_s28 + $0x3088] sm:$0xff] }
  0x77   : > { %586 = vst [vmem:[%s2354_s29 + $0x610] sm:$0xff] %v585_v2  ;;  %v589_v4 = vld [vmem:[%s2346_s28 + $0x3100] sm:$0xff]  ;;  %v591_v5 = vld [vmem:[%s2346_s28 + $0x3108] sm:$0xff]  ;;  %588 = vst [vmem:[%s2354_s29 + $0x618] sm:$0xff] %v587_v3 }
  0x78   : > { %590 = vst [vmem:[%s2354_s29 + $0x620] sm:$0xff] %v589_v4  ;;  %592 = vst [vmem:[%s2354_s29 + $0x628] sm:$0xff] %v591_v5  ;;  %v593_v6 = vld [vmem:[%s2346_s28 + $0x3180] sm:$0xff]  ;;  %v595_v7 = vld [vmem:[%s2346_s28 + $0x3188] sm:$0xff] }
  0x79   : > { %v597_v8 = vld [vmem:[%s2346_s28 + $0x3200] sm:$0xff]  ;;  %594 = vst [vmem:[%s2354_s29 + $0x630] sm:$0xff] %v593_v6  ;;  %596 = vst [vmem:[%s2354_s29 + $0x638] sm:$0xff] %v595_v7  ;;  %v599_v9 = vld [vmem:[%s2346_s28 + $0x3208] sm:$0xff] }
  0x7a   : > { %598 = vst [vmem:[%s2354_s29 + $0x640] sm:$0xff] %v597_v8  ;;  %v601_v10 = vld [vmem:[%s2346_s28 + $0x3280] sm:$0xff]  ;;  %v603_v11 = vld [vmem:[%s2346_s28 + $0x3288] sm:$0xff]  ;;  %600 = vst [vmem:[%s2354_s29 + $0x648] sm:$0xff] %v599_v9 }
  0x7b   : > { %602 = vst [vmem:[%s2354_s29 + $0x650] sm:$0xff] %v601_v10  ;;  %604 = vst [vmem:[%s2354_s29 + $0x658] sm:$0xff] %v603_v11  ;;  %v605_v12 = vld [vmem:[%s2346_s28 + $0x3300] sm:$0xff]  ;;  %v607_v13 = vld [vmem:[%s2346_s28 + $0x3308] sm:$0xff] }
  0x7c   : > { %v609_v14 = vld [vmem:[%s2346_s28 + $0x3380] sm:$0xff]  ;;  %606 = vst [vmem:[%s2354_s29 + $0x660] sm:$0xff] %v605_v12  ;;  %608 = vst [vmem:[%s2354_s29 + $0x668] sm:$0xff] %v607_v13  ;;  %v611_v15 = vld [vmem:[%s2346_s28 + $0x3388] sm:$0xff] }
  0x7d   : > { %610 = vst [vmem:[%s2354_s29 + $0x670] sm:$0xff] %v609_v14  ;;  %v613_v16 = vld [vmem:[%s2346_s28 + $0x3400] sm:$0xff]  ;;  %v615_v17 = vld [vmem:[%s2346_s28 + $0x3408] sm:$0xff]  ;;  %612 = vst [vmem:[%s2354_s29 + $0x678] sm:$0xff] %v611_v15 }
  0x7e   : > { %614 = vst [vmem:[%s2354_s29 + $0x680] sm:$0xff] %v613_v16  ;;  %616 = vst [vmem:[%s2354_s29 + $0x688] sm:$0xff] %v615_v17  ;;  %v617_v18 = vld [vmem:[%s2346_s28 + $0x3480] sm:$0xff]  ;;  %v619_v19 = vld [vmem:[%s2346_s28 + $0x3488] sm:$0xff] }
  0x7f   : > { %v621_v20 = vld [vmem:[%s2346_s28 + $0x3500] sm:$0xff]  ;;  %618 = vst [vmem:[%s2354_s29 + $0x690] sm:$0xff] %v617_v18  ;;  %620 = vst [vmem:[%s2354_s29 + $0x698] sm:$0xff] %v619_v19  ;;  %v623_v21 = vld [vmem:[%s2346_s28 + $0x3508] sm:$0xff] }
  0x80   : > { %622 = vst [vmem:[%s2354_s29 + $0x6a0] sm:$0xff] %v621_v20  ;;  %v625_v22 = vld [vmem:[%s2346_s28 + $0x3580] sm:$0xff]  ;;  %v627_v23 = vld [vmem:[%s2346_s28 + $0x3588] sm:$0xff]  ;;  %624 = vst [vmem:[%s2354_s29 + $0x6a8] sm:$0xff] %v623_v21 }
  0x81   : > { %626 = vst [vmem:[%s2354_s29 + $0x6b0] sm:$0xff] %v625_v22  ;;  %628 = vst [vmem:[%s2354_s29 + $0x6b8] sm:$0xff] %v627_v23  ;;  %v629_v24 = vld [vmem:[%s2346_s28 + $0x3600] sm:$0xff]  ;;  %v631_v25 = vld [vmem:[%s2346_s28 + $0x3608] sm:$0xff] }
  0x82   : > { %v633_v26 = vld [vmem:[%s2346_s28 + $0x3680] sm:$0xff]  ;;  %630 = vst [vmem:[%s2354_s29 + $0x6c0] sm:$0xff] %v629_v24  ;;  %632 = vst [vmem:[%s2354_s29 + $0x6c8] sm:$0xff] %v631_v25  ;;  %v635_v27 = vld [vmem:[%s2346_s28 + $0x3688] sm:$0xff] }
  0x83   : > { %634 = vst [vmem:[%s2354_s29 + $0x6d0] sm:$0xff] %v633_v26  ;;  %v637_v28 = vld [vmem:[%s2346_s28 + $0x3700] sm:$0xff]  ;;  %v639_v29 = vld [vmem:[%s2346_s28 + $0x3708] sm:$0xff]  ;;  %636 = vst [vmem:[%s2354_s29 + $0x6d8] sm:$0xff] %v635_v27 }
  0x84   : > { %638 = vst [vmem:[%s2354_s29 + $0x6e0] sm:$0xff] %v637_v28  ;;  %640 = vst [vmem:[%s2354_s29 + $0x6e8] sm:$0xff] %v639_v29  ;;  %v641_v30 = vld [vmem:[%s2346_s28 + $0x3780] sm:$0xff]  ;;  %v643_v31 = vld [vmem:[%s2346_s28 + $0x3788] sm:$0xff] }
  0x85   : > { %v645_v32 = vld [vmem:[%s2346_s28 + $0x3800] sm:$0xff]  ;;  %642 = vst [vmem:[%s2354_s29 + $0x6f0] sm:$0xff] %v641_v30  ;;  %644 = vst [vmem:[%s2354_s29 + $0x6f8] sm:$0xff] %v643_v31  ;;  %v647_v33 = vld [vmem:[%s2346_s28 + $0x3808] sm:$0xff] }
  0x86   : > { %646 = vst [vmem:[%s2354_s29 + $0x700] sm:$0xff] %v645_v32  ;;  %v649_v34 = vld [vmem:[%s2346_s28 + $0x3880] sm:$0xff]  ;;  %v651_v35 = vld [vmem:[%s2346_s28 + $0x3888] sm:$0xff]  ;;  %648 = vst [vmem:[%s2354_s29 + $0x708] sm:$0xff] %v647_v33 }
  0x87   : > { %650 = vst [vmem:[%s2354_s29 + $0x710] sm:$0xff] %v649_v34  ;;  %652 = vst [vmem:[%s2354_s29 + $0x718] sm:$0xff] %v651_v35  ;;  %v653_v36 = vld [vmem:[%s2346_s28 + $0x3900] sm:$0xff]  ;;  %v655_v37 = vld [vmem:[%s2346_s28 + $0x3908] sm:$0xff] }
  0x88   : > { %v657_v38 = vld [vmem:[%s2346_s28 + $0x3980] sm:$0xff]  ;;  %654 = vst [vmem:[%s2354_s29 + $0x720] sm:$0xff] %v653_v36  ;;  %656 = vst [vmem:[%s2354_s29 + $0x728] sm:$0xff] %v655_v37  ;;  %v659_v39 = vld [vmem:[%s2346_s28 + $0x3988] sm:$0xff] }
  0x89   : > { %658 = vst [vmem:[%s2354_s29 + $0x730] sm:$0xff] %v657_v38  ;;  %v661_v40 = vld [vmem:[%s2346_s28 + $0x3a00] sm:$0xff]  ;;  %v663_v41 = vld [vmem:[%s2346_s28 + $0x3a08] sm:$0xff]  ;;  %660 = vst [vmem:[%s2354_s29 + $0x738] sm:$0xff] %v659_v39 }
  0x8a   : > { %662 = vst [vmem:[%s2354_s29 + $0x740] sm:$0xff] %v661_v40  ;;  %664 = vst [vmem:[%s2354_s29 + $0x748] sm:$0xff] %v663_v41  ;;  %v665_v42 = vld [vmem:[%s2346_s28 + $0x3a80] sm:$0xff]  ;;  %v667_v43 = vld [vmem:[%s2346_s28 + $0x3a88] sm:$0xff] }
  0x8b   : > { %v669_v44 = vld [vmem:[%s2346_s28 + $0x3b00] sm:$0xff]  ;;  %666 = vst [vmem:[%s2354_s29 + $0x750] sm:$0xff] %v665_v42  ;;  %668 = vst [vmem:[%s2354_s29 + $0x758] sm:$0xff] %v667_v43  ;;  %v671_v45 = vld [vmem:[%s2346_s28 + $0x3b08] sm:$0xff] }
  0x8c   : > { %670 = vst [vmem:[%s2354_s29 + $0x760] sm:$0xff] %v669_v44  ;;  %v673_v46 = vld [vmem:[%s2346_s28 + $0x3b80] sm:$0xff]  ;;  %v675_v47 = vld [vmem:[%s2346_s28 + $0x3b88] sm:$0xff]  ;;  %672 = vst [vmem:[%s2354_s29 + $0x768] sm:$0xff] %v671_v45 }
  0x8d   : > { %674 = vst [vmem:[%s2354_s29 + $0x770] sm:$0xff] %v673_v46  ;;  %676 = vst [vmem:[%s2354_s29 + $0x778] sm:$0xff] %v675_v47  ;;  %v677_v48 = vld [vmem:[%s2346_s28 + $0x3c00] sm:$0xff]  ;;  %v679_v49 = vld [vmem:[%s2346_s28 + $0x3c08] sm:$0xff] }
  0x8e   : > { %v681_v50 = vld [vmem:[%s2346_s28 + $0x3c80] sm:$0xff]  ;;  %678 = vst [vmem:[%s2354_s29 + $0x780] sm:$0xff] %v677_v48  ;;  %680 = vst [vmem:[%s2354_s29 + $0x788] sm:$0xff] %v679_v49  ;;  %v683_v51 = vld [vmem:[%s2346_s28 + $0x3c88] sm:$0xff] }
  0x8f   : > { %682 = vst [vmem:[%s2354_s29 + $0x790] sm:$0xff] %v681_v50  ;;  %v685_v52 = vld [vmem:[%s2346_s28 + $0x3d00] sm:$0xff]  ;;  %v687_v53 = vld [vmem:[%s2346_s28 + $0x3d08] sm:$0xff]  ;;  %684 = vst [vmem:[%s2354_s29 + $0x798] sm:$0xff] %v683_v51 }
  0x90   : > { %686 = vst [vmem:[%s2354_s29 + $0x7a0] sm:$0xff] %v685_v52  ;;  %688 = vst [vmem:[%s2354_s29 + $0x7a8] sm:$0xff] %v687_v53  ;;  %v689_v54 = vld [vmem:[%s2346_s28 + $0x3d80] sm:$0xff]  ;;  %v691_v55 = vld [vmem:[%s2346_s28 + $0x3d88] sm:$0xff] }
  0x91   : > { %v693_v56 = vld [vmem:[%s2346_s28 + $0x3e00] sm:$0xff]  ;;  %690 = vst [vmem:[%s2354_s29 + $0x7b0] sm:$0xff] %v689_v54  ;;  %692 = vst [vmem:[%s2354_s29 + $0x7b8] sm:$0xff] %v691_v55  ;;  %v695_v57 = vld [vmem:[%s2346_s28 + $0x3e08] sm:$0xff] }
  0x92   : > { %694 = vst [vmem:[%s2354_s29 + $0x7c0] sm:$0xff] %v693_v56  ;;  %v697_v58 = vld [vmem:[%s2346_s28 + $0x3e80] sm:$0xff]  ;;  %v699_v59 = vld [vmem:[%s2346_s28 + $0x3e88] sm:$0xff]  ;;  %696 = vst [vmem:[%s2354_s29 + $0x7c8] sm:$0xff] %v695_v57 }
  0x93   : > { %698 = vst [vmem:[%s2354_s29 + $0x7d0] sm:$0xff] %v697_v58  ;;  %700 = vst [vmem:[%s2354_s29 + $0x7d8] sm:$0xff] %v699_v59  ;;  %v701_v60 = vld [vmem:[%s2346_s28 + $0x3f00] sm:$0xff]  ;;  %v703_v61 = vld [vmem:[%s2346_s28 + $0x3f08] sm:$0xff] }
  0x94   : > { %v705_v62 = vld [vmem:[%s2346_s28 + $0x3f80] sm:$0xff]  ;;  %702 = vst [vmem:[%s2354_s29 + $0x7e0] sm:$0xff] %v701_v60  ;;  %704 = vst [vmem:[%s2354_s29 + $0x7e8] sm:$0xff] %v703_v61  ;;  %v707_v63 = vld [vmem:[%s2346_s28 + $0x3f88] sm:$0xff] }
  0x95   : > { %706 = vst [vmem:[%s2354_s29 + $0x7f0] sm:$0xff] %v705_v62  ;;  %v709_v0 = vld [vmem:[%s2346_s28 + $0x4000] sm:$0xff]  ;;  %v711_v1 = vld [vmem:[%s2346_s28 + $0x4008] sm:$0xff]  ;;  %708 = vst [vmem:[%s2354_s29 + $0x7f8] sm:$0xff] %v707_v63 }
  0x96   : > { %710 = vst [vmem:[%s2354_s29 + $0x800] sm:$0xff] %v709_v0  ;;  %712 = vst [vmem:[%s2354_s29 + $0x808] sm:$0xff] %v711_v1  ;;  %v713_v2 = vld [vmem:[%s2346_s28 + $0x4080] sm:$0xff]  ;;  %v715_v3 = vld [vmem:[%s2346_s28 + $0x4088] sm:$0xff] }
  0x97   : > { %v717_v4 = vld [vmem:[%s2346_s28 + $0x4100] sm:$0xff]  ;;  %714 = vst [vmem:[%s2354_s29 + $0x810] sm:$0xff] %v713_v2  ;;  %716 = vst [vmem:[%s2354_s29 + $0x818] sm:$0xff] %v715_v3  ;;  %v719_v5 = vld [vmem:[%s2346_s28 + $0x4108] sm:$0xff] }
  0x98   : > { %718 = vst [vmem:[%s2354_s29 + $0x820] sm:$0xff] %v717_v4  ;;  %v721_v6 = vld [vmem:[%s2346_s28 + $0x4180] sm:$0xff]  ;;  %v723_v7 = vld [vmem:[%s2346_s28 + $0x4188] sm:$0xff]  ;;  %720 = vst [vmem:[%s2354_s29 + $0x828] sm:$0xff] %v719_v5 }
  0x99   : > { %722 = vst [vmem:[%s2354_s29 + $0x830] sm:$0xff] %v721_v6  ;;  %724 = vst [vmem:[%s2354_s29 + $0x838] sm:$0xff] %v723_v7  ;;  %v725_v8 = vld [vmem:[%s2346_s28 + $0x4200] sm:$0xff]  ;;  %v727_v9 = vld [vmem:[%s2346_s28 + $0x4208] sm:$0xff] }
  0x9a   : > { %v729_v10 = vld [vmem:[%s2346_s28 + $0x4280] sm:$0xff]  ;;  %726 = vst [vmem:[%s2354_s29 + $0x840] sm:$0xff] %v725_v8  ;;  %728 = vst [vmem:[%s2354_s29 + $0x848] sm:$0xff] %v727_v9  ;;  %v731_v11 = vld [vmem:[%s2346_s28 + $0x4288] sm:$0xff] }
  0x9b   : > { %730 = vst [vmem:[%s2354_s29 + $0x850] sm:$0xff] %v729_v10  ;;  %v733_v12 = vld [vmem:[%s2346_s28 + $0x4300] sm:$0xff]  ;;  %v735_v13 = vld [vmem:[%s2346_s28 + $0x4308] sm:$0xff]  ;;  %732 = vst [vmem:[%s2354_s29 + $0x858] sm:$0xff] %v731_v11 }
  0x9c   : > { %734 = vst [vmem:[%s2354_s29 + $0x860] sm:$0xff] %v733_v12  ;;  %736 = vst [vmem:[%s2354_s29 + $0x868] sm:$0xff] %v735_v13  ;;  %v737_v14 = vld [vmem:[%s2346_s28 + $0x4380] sm:$0xff]  ;;  %v739_v15 = vld [vmem:[%s2346_s28 + $0x4388] sm:$0xff] }
  0x9d   : > { %v741_v16 = vld [vmem:[%s2346_s28 + $0x4400] sm:$0xff]  ;;  %738 = vst [vmem:[%s2354_s29 + $0x870] sm:$0xff] %v737_v14  ;;  %740 = vst [vmem:[%s2354_s29 + $0x878] sm:$0xff] %v739_v15  ;;  %v743_v17 = vld [vmem:[%s2346_s28 + $0x4408] sm:$0xff] }
  0x9e   : > { %742 = vst [vmem:[%s2354_s29 + $0x880] sm:$0xff] %v741_v16  ;;  %v745_v18 = vld [vmem:[%s2346_s28 + $0x4480] sm:$0xff]  ;;  %v747_v19 = vld [vmem:[%s2346_s28 + $0x4488] sm:$0xff]  ;;  %744 = vst [vmem:[%s2354_s29 + $0x888] sm:$0xff] %v743_v17 }
  0x9f   : > { %746 = vst [vmem:[%s2354_s29 + $0x890] sm:$0xff] %v745_v18  ;;  %748 = vst [vmem:[%s2354_s29 + $0x898] sm:$0xff] %v747_v19  ;;  %v749_v20 = vld [vmem:[%s2346_s28 + $0x4500] sm:$0xff]  ;;  %v751_v21 = vld [vmem:[%s2346_s28 + $0x4508] sm:$0xff] }
  0xa0   : > { %v753_v22 = vld [vmem:[%s2346_s28 + $0x4580] sm:$0xff]  ;;  %750 = vst [vmem:[%s2354_s29 + $0x8a0] sm:$0xff] %v749_v20  ;;  %752 = vst [vmem:[%s2354_s29 + $0x8a8] sm:$0xff] %v751_v21  ;;  %v755_v23 = vld [vmem:[%s2346_s28 + $0x4588] sm:$0xff] }
  0xa1   : > { %754 = vst [vmem:[%s2354_s29 + $0x8b0] sm:$0xff] %v753_v22  ;;  %v757_v24 = vld [vmem:[%s2346_s28 + $0x4600] sm:$0xff]  ;;  %v759_v25 = vld [vmem:[%s2346_s28 + $0x4608] sm:$0xff]  ;;  %756 = vst [vmem:[%s2354_s29 + $0x8b8] sm:$0xff] %v755_v23 }
  0xa2   : > { %758 = vst [vmem:[%s2354_s29 + $0x8c0] sm:$0xff] %v757_v24  ;;  %760 = vst [vmem:[%s2354_s29 + $0x8c8] sm:$0xff] %v759_v25  ;;  %v761_v26 = vld [vmem:[%s2346_s28 + $0x4680] sm:$0xff]  ;;  %v763_v27 = vld [vmem:[%s2346_s28 + $0x4688] sm:$0xff] }
  0xa3   : > { %v765_v28 = vld [vmem:[%s2346_s28 + $0x4700] sm:$0xff]  ;;  %762 = vst [vmem:[%s2354_s29 + $0x8d0] sm:$0xff] %v761_v26  ;;  %764 = vst [vmem:[%s2354_s29 + $0x8d8] sm:$0xff] %v763_v27  ;;  %v767_v29 = vld [vmem:[%s2346_s28 + $0x4708] sm:$0xff] }
  0xa4   : > { %766 = vst [vmem:[%s2354_s29 + $0x8e0] sm:$0xff] %v765_v28  ;;  %v769_v30 = vld [vmem:[%s2346_s28 + $0x4780] sm:$0xff]  ;;  %v771_v31 = vld [vmem:[%s2346_s28 + $0x4788] sm:$0xff]  ;;  %768 = vst [vmem:[%s2354_s29 + $0x8e8] sm:$0xff] %v767_v29 }
  0xa5   : > { %770 = vst [vmem:[%s2354_s29 + $0x8f0] sm:$0xff] %v769_v30  ;;  %772 = vst [vmem:[%s2354_s29 + $0x8f8] sm:$0xff] %v771_v31 }
  0xa6 PF: > { %p1848_p8 = scmp.ge.s32.totalorder %s2275_s16, 1  ;;  %p785_p9 = scmp.lt.s32.totalorder %s2275_s16, 9 }
  0xa8   : > { %p786_p10 = pnand %p1848_p8, %p785_p9 }
  0xa9   : > { %s792_s30 = sand.u32 (!%p786_p10), 1, %s2259_s12   ;;  %v870_v32 = vld [vmem:[%s3374_s0 + $0x8] sm:$0xff] (!%p786_p10) }
  0xaa   : > { %789 = sbr.rel (%p786_p10) target bundleno = 568 (0x238), region = 51  ;;  %v874_v33 = vld [vmem:[%s3374_s0 + $0x28] sm:$0xff] (!%p786_p10)  ;;  %1257 = vmatprep.mubr.f32.mxu1 (!%p786_p10), %v870_v32  ;;  %s1849_s19 = sshll.u32 (!%p786_p10), %s792_s30, 6 }
  0xab   : > { %s2195_s8 = smul.u32 (!%p786_p10), 2304, %s792_s30  ;;  %1435 = vmatprep.mubr.f32.mxu0 (!%p786_p10), %v874_v33  ;;  %s3335_s20 = scalar_lea.vmem (!%p786_p10), [#allocation4], %s1849_s19 }
  0xad   : > { %s2937_s9 = scalar_lea.vmem (!%p786_p10), [#allocation3], %s2195_s8  ;;  %s1850_s8 = sshll.u32 (!%p786_p10), %s2267_s14, 1 }
  0xae   : > { %v906_v34 = vld [vmem:[%s2937_s9 + $0x8] sm:$0xff] (!%p786_p10)  ;;  %v908_v35 = vld [vmem:[%s2937_s9 + $0x18] sm:$0xff] (!%p786_p10)  ;;  %v905_v39 = vld [vmem:[%s2937_s9] sm:$0xff] (!%p786_p10)  ;;  %p843_p11 = scmp.lt.s32.totalorder (!%p786_p10), %s1850_s8, 15 }
  0xaf   : > { %v1034_v36 = vld [vmem:[%s2937_s9 + $0x408] sm:$0xff] (!%p786_p10)  ;;  %v1858_v37 = vpack.c.bf16 (!%p786_p10), %v908_v35, %v906_v34  ;;  %v1036_v38 = vld [vmem:[%s2937_s9 + $0x418] sm:$0xff] (!%p786_p10)  ;;  %v907_v40 = vld [vmem:[%s2937_s9 + $0x10] sm:$0xff] (!%p786_p10) }
  0xb0   : > { %v1986_v41 = vpack.c.bf16 (!%p786_p10), %v1036_v38, %v1034_v36  ;;  %v1860_v42 = vpack.c.bf16 (!%p786_p10), %v907_v40, %v905_v39  ;;  %v1033_v43 = vld [vmem:[%s2937_s9 + $0x400] sm:$0xff] (!%p786_p10)  ;;  %v1035_v44 = vld [vmem:[%s2937_s9 + $0x410] sm:$0xff] (!%p786_p10)  ;;  %v910_v45 = vld [vmem:[%s2937_s9 + $0x28] sm:$0xff] (!%p786_p10) }
  0xb1   : > { %1859 = vmatprep.subr.bf16.mxu1 %v1858_v37  ;;  %v1988_v46 = vpack.c.bf16 %v1035_v44, %v1033_v43  ;;  %v912_v47 = vld [vmem:[%s2937_s9 + $0x38] sm:$0xff]  ;;  %v1038_v48 = vld [vmem:[%s2937_s9 + $0x428] sm:$0xff]  ;;  %v909_v52 = vld [vmem:[%s2937_s9 + $0x20] sm:$0xff]  ;;  %s3386_s8 = smov (!%p843_p11, %s1850_s8), 15  ;;  %s1857_s12 = sshll.u32 (%p2333_p6), %s2267_s14, 4 }
  0xb2   : > { %v1040_v49 = vld [vmem:[%s2937_s9 + $0x438] sm:$0xff]  ;;  %1987 = vmatprep.subr.bf16.mxu0 %v1986_v41  ;;  %1861 = vmatpush1.bf16.msra.mxu1 %v1860_v42  ;;  %v1862_v50 = vpack.c.bf16 %v912_v47, %v910_v45  ;;  %v911_v53 = vld [vmem:[%s2937_s9 + $0x30] sm:$0xff]  ;;  %v1037_v54 = vld [vmem:[%s2937_s9 + $0x420] sm:$0xff]  ;;  %s845_s18 = scalar_lea.vmem %s3376_s2, %s3386_s8  ;;  %s1705_s24 = scalar_lea.vmem (%p2333_p6), %s3377_s3, %s1857_s12 }
  0xb3   : > { %v1990_v51 = vpack.c.bf16 %v1040_v49, %v1038_v48  ;;  %1989 = vmatpush1.bf16.msra.mxu0 %v1988_v46  ;;  %v1864_v55 = vpack.c.bf16 %v911_v53, %v909_v52  ;;  %v1039_v56 = vld [vmem:[%s2937_s9 + $0x430] sm:$0xff]  ;;  %v914_v57 = vld [vmem:[%s2937_s9 + $0x48] sm:$0xff]  ;;  %v916_v58 = vld [vmem:[%s2937_s9 + $0x58] sm:$0xff] }
  0xb4   : > { %1863 = vmatprep.subr.bf16.mxu1 %v1862_v50  ;;  %v1992_v59 = vpack.c.bf16 %v1039_v56, %v1037_v54  ;;  %v1866_v60 = vpack.c.bf16 %v916_v58, %v914_v57  ;;  %v1042_v61 = vld [vmem:[%s2937_s9 + $0x448] sm:$0xff]  ;;  %v1044_v62 = vld [vmem:[%s2937_s9 + $0x458] sm:$0xff]  ;;  %v913_v63 = vld [vmem:[%s2937_s9 + $0x40] sm:$0xff] }
  0xb5   : > { %1991 = vmatprep.subr.bf16.mxu0 %v1990_v51  ;;  %v1994_v0 = vpack.c.bf16 %v1044_v62, %v1042_v61  ;;  %v915_v1 = vld [vmem:[%s2937_s9 + $0x50] sm:$0xff]  ;;  %v1041_v2 = vld [vmem:[%s2937_s9 + $0x440] sm:$0xff]  ;;  %v918_v5 = vld [vmem:[%s2937_s9 + $0x68] sm:$0xff] }
  0xb6   : > { %v1043_v3 = vld [vmem:[%s2937_s9 + $0x450] sm:$0xff]  ;;  %1865 = vmatpush1.bf16.msra.mxu1 %v1864_v55  ;;  %v1868_v4 = vpack.c.bf16 %v915_v1, %v913_v63  ;;  %v920_v6 = vld [vmem:[%s2937_s9 + $0x78] sm:$0xff]  ;;  %v1046_v7 = vld [vmem:[%s2937_s9 + $0x468] sm:$0xff] }
  0xb7   : > { %1993 = vmatpush1.bf16.msra.mxu0 %v1992_v59  ;;  %1867 = vmatprep.subr.bf16.mxu1 %v1866_v60  ;;  %v1996_v8 = vpack.c.bf16 %v1043_v3, %v1041_v2  ;;  %v1870_v9 = vpack.c.bf16 %v920_v6, %v918_v5  ;;  %v1048_v10 = vld [vmem:[%s2937_s9 + $0x478] sm:$0xff]  ;;  %v917_v11 = vld [vmem:[%s2937_s9 + $0x60] sm:$0xff]  ;;  %v919_v12 = vld [vmem:[%s2937_s9 + $0x70] sm:$0xff] }
  0xb8   : > { %1995 = vmatprep.subr.bf16.mxu0 %v1994_v0  ;;  %v1998_v13 = vpack.c.bf16 %v1048_v10, %v1046_v7  ;;  %v1045_v14 = vld [vmem:[%s2937_s9 + $0x460] sm:$0xff]  ;;  %v1047_v15 = vld [vmem:[%s2937_s9 + $0x470] sm:$0xff]  ;;  %v922_v16 = vld [vmem:[%s2937_s9 + $0x88] sm:$0xff]  ;;  %v1872_v20 = vpack.c.bf16 %v919_v12, %v917_v11 }
  0xb9   : > { %v924_v17 = vld [vmem:[%s2937_s9 + $0x98] sm:$0xff]  ;;  %v1050_v18 = vld [vmem:[%s2937_s9 + $0x488] sm:$0xff]  ;;  %v2000_v21 = vpack.c.bf16 %v1047_v15, %v1045_v14  ;;  %v921_v23 = vld [vmem:[%s2937_s9 + $0x80] sm:$0xff] }
  0xba   : > { %v1052_v19 = vld [vmem:[%s2937_s9 + $0x498] sm:$0xff]  ;;  %1869 = vmatpush1.bf16.msra.mxu1 %v1868_v4  ;;  %v1874_v22 = vpack.c.bf16 %v924_v17, %v922_v16  ;;  %v923_v24 = vld [vmem:[%s2937_s9 + $0x90] sm:$0xff]  ;;  %v1049_v25 = vld [vmem:[%s2937_s9 + $0x480] sm:$0xff] }
  0xbb   : > { %1997 = vmatpush1.bf16.msra.mxu0 %v1996_v8  ;;  %1871 = vmatprep.subr.bf16.mxu1 %v1870_v9  ;;  %v2002_v26 = vpack.c.bf16 %v1052_v19, %v1050_v18  ;;  %v1051_v27 = vld [vmem:[%s2937_s9 + $0x490] sm:$0xff]  ;;  %v926_v28 = vld [vmem:[%s2937_s9 + $0xa8] sm:$0xff]  ;;  %v928_v29 = vld [vmem:[%s2937_s9 + $0xb8] sm:$0xff]  ;;  %v1876_v32 = vpack.c.bf16 %v923_v24, %v921_v23 }
  0xbc   : > { %1999 = vmatprep.subr.bf16.mxu0 %v1998_v13  ;;  %v1054_v30 = vld [vmem:[%s2937_s9 + $0x4a8] sm:$0xff]  ;;  %v1056_v31 = vld [vmem:[%s2937_s9 + $0x4b8] sm:$0xff]  ;;  %v2004_v33 = vpack.c.bf16 %v1051_v27, %v1049_v25  ;;  %v1878_v34 = vpack.c.bf16 %v928_v29, %v926_v28  ;;  %v925_v35 = vld [vmem:[%s2937_s9 + $0xa0] sm:$0xff] }
  0xbd   : > { %v927_v36 = vld [vmem:[%s2937_s9 + $0xb0] sm:$0xff]  ;;  %v1053_v37 = vld [vmem:[%s2937_s9 + $0x4a0] sm:$0xff]  ;;  %v2006_v38 = vpack.c.bf16 %v1056_v31, %v1054_v30  ;;  %v930_v40 = vld [vmem:[%s2937_s9 + $0xc8] sm:$0xff] }
  0xbe   : > { %1873 = vmatpush1.bf16.msra.mxu1 %v1872_v20  ;;  %v1055_v39 = vld [vmem:[%s2937_s9 + $0x4b0] sm:$0xff]  ;;  %v932_v41 = vld [vmem:[%s2937_s9 + $0xd8] sm:$0xff]  ;;  %v1058_v42 = vld [vmem:[%s2937_s9 + $0x4c8] sm:$0xff]  ;;  %v1880_v44 = vpack.c.bf16 %v927_v36, %v925_v35 }
  0xbf   : > { %2001 = vmatpush1.bf16.msra.mxu0 %v2000_v21  ;;  %1875 = vmatprep.subr.bf16.mxu1 %v1874_v22  ;;  %v1060_v43 = vld [vmem:[%s2937_s9 + $0x4d8] sm:$0xff]  ;;  %v2008_v45 = vpack.c.bf16 %v1055_v39, %v1053_v37  ;;  %v1882_v46 = vpack.c.bf16 %v932_v41, %v930_v40  ;;  %v929_v47 = vld [vmem:[%s2937_s9 + $0xc0] sm:$0xff]  ;;  %v931_v48 = vld [vmem:[%s2937_s9 + $0xd0] sm:$0xff] }
  0xc0   : > { %2003 = vmatprep.subr.bf16.mxu0 %v2002_v26  ;;  %v1057_v49 = vld [vmem:[%s2937_s9 + $0x4c0] sm:$0xff]  ;;  %v2010_v50 = vpack.c.bf16 %v1060_v43, %v1058_v42  ;;  %v1059_v51 = vld [vmem:[%s2937_s9 + $0x4d0] sm:$0xff]  ;;  %v934_v52 = vld [vmem:[%s2937_s9 + $0xe8] sm:$0xff]  ;;  %v1884_v56 = vpack.c.bf16 %v931_v48, %v929_v47 }
  0xc1   : > { %v936_v53 = vld [vmem:[%s2937_s9 + $0xf8] sm:$0xff]  ;;  %v1062_v54 = vld [vmem:[%s2937_s9 + $0x4e8] sm:$0xff]  ;;  %v2012_v57 = vpack.c.bf16 %v1059_v51, %v1057_v49  ;;  %v933_v59 = vld [vmem:[%s2937_s9 + $0xe0] sm:$0xff] }
  0xc2   : > { %1877 = vmatpush1.bf16.msra.mxu1 %v1876_v32  ;;  %v1064_v55 = vld [vmem:[%s2937_s9 + $0x4f8] sm:$0xff]  ;;  %v1886_v58 = vpack.c.bf16 %v936_v53, %v934_v52  ;;  %v935_v60 = vld [vmem:[%s2937_s9 + $0xf0] sm:$0xff]  ;;  %v1061_v61 = vld [vmem:[%s2937_s9 + $0x4e0] sm:$0xff] }
  0xc3   : > { %2005 = vmatpush1.bf16.msra.mxu0 %v2004_v33  ;;  %1879 = vmatprep.subr.bf16.mxu1 %v1878_v34  ;;  %v2014_v62 = vpack.c.bf16 %v1064_v55, %v1062_v54  ;;  %v1063_v63 = vld [vmem:[%s2937_s9 + $0x4f0] sm:$0xff]  ;;  %v938_v0 = vld [vmem:[%s2937_s9 + $0x108] sm:$0xff]  ;;  %v940_v1 = vld [vmem:[%s2937_s9 + $0x118] sm:$0xff]  ;;  %v1888_v4 = vpack.c.bf16 %v935_v60, %v933_v59 }
  0xc4   : > { %2007 = vmatprep.subr.bf16.mxu0 %v2006_v38  ;;  %v1066_v2 = vld [vmem:[%s2937_s9 + $0x508] sm:$0xff]  ;;  %v1068_v3 = vld [vmem:[%s2937_s9 + $0x518] sm:$0xff]  ;;  %v2016_v5 = vpack.c.bf16 %v1063_v63, %v1061_v61  ;;  %v1890_v6 = vpack.c.bf16 %v940_v1, %v938_v0  ;;  %v937_v7 = vld [vmem:[%s2937_s9 + $0x100] sm:$0xff] }
  0xc5   : > { %v939_v8 = vld [vmem:[%s2937_s9 + $0x110] sm:$0xff]  ;;  %v1065_v9 = vld [vmem:[%s2937_s9 + $0x500] sm:$0xff]  ;;  %v2018_v10 = vpack.c.bf16 %v1068_v3, %v1066_v2  ;;  %v942_v12 = vld [vmem:[%s2937_s9 + $0x128] sm:$0xff] }
  0xc6   : > { %1881 = vmatpush1.bf16.msra.mxu1 %v1880_v44  ;;  %v1067_v11 = vld [vmem:[%s2937_s9 + $0x510] sm:$0xff]  ;;  %v944_v13 = vld [vmem:[%s2937_s9 + $0x138] sm:$0xff]  ;;  %v1070_v14 = vld [vmem:[%s2937_s9 + $0x528] sm:$0xff]  ;;  %v1892_v16 = vpack.c.bf16 %v939_v8, %v937_v7 }
  0xc7   : > { %2009 = vmatpush1.bf16.msra.mxu0 %v2008_v45  ;;  %1883 = vmatprep.subr.bf16.mxu1 %v1882_v46  ;;  %v1072_v15 = vld [vmem:[%s2937_s9 + $0x538] sm:$0xff]  ;;  %v2020_v17 = vpack.c.bf16 %v1067_v11, %v1065_v9  ;;  %v1894_v18 = vpack.c.bf16 %v944_v13, %v942_v12  ;;  %v941_v19 = vld [vmem:[%s2937_s9 + $0x120] sm:$0xff]  ;;  %v943_v20 = vld [vmem:[%s2937_s9 + $0x130] sm:$0xff] }
  0xc8   : > { %2011 = vmatprep.subr.bf16.mxu0 %v2010_v50  ;;  %v1069_v21 = vld [vmem:[%s2937_s9 + $0x520] sm:$0xff]  ;;  %v2022_v22 = vpack.c.bf16 %v1072_v15, %v1070_v14  ;;  %v1071_v23 = vld [vmem:[%s2937_s9 + $0x530] sm:$0xff]  ;;  %v946_v24 = vld [vmem:[%s2937_s9 + $0x148] sm:$0xff]  ;;  %v1896_v28 = vpack.c.bf16 %v943_v20, %v941_v19 }
  0xc9   : > { %v948_v25 = vld [vmem:[%s2937_s9 + $0x158] sm:$0xff]  ;;  %v1074_v26 = vld [vmem:[%s2937_s9 + $0x548] sm:$0xff]  ;;  %v2024_v29 = vpack.c.bf16 %v1071_v23, %v1069_v21  ;;  %v945_v31 = vld [vmem:[%s2937_s9 + $0x140] sm:$0xff] }
  0xca   : > { %1885 = vmatpush1.bf16.msra.mxu1 %v1884_v56  ;;  %v1076_v27 = vld [vmem:[%s2937_s9 + $0x558] sm:$0xff]  ;;  %v1898_v30 = vpack.c.bf16 %v948_v25, %v946_v24  ;;  %v947_v32 = vld [vmem:[%s2937_s9 + $0x150] sm:$0xff]  ;;  %v1073_v33 = vld [vmem:[%s2937_s9 + $0x540] sm:$0xff] }
  0xcb   : > { %2013 = vmatpush1.bf16.msra.mxu0 %v2012_v57  ;;  %1887 = vmatprep.subr.bf16.mxu1 %v1886_v58  ;;  %v2026_v34 = vpack.c.bf16 %v1076_v27, %v1074_v26  ;;  %v1075_v35 = vld [vmem:[%s2937_s9 + $0x550] sm:$0xff]  ;;  %v950_v36 = vld [vmem:[%s2937_s9 + $0x168] sm:$0xff]  ;;  %v952_v37 = vld [vmem:[%s2937_s9 + $0x178] sm:$0xff]  ;;  %v1900_v40 = vpack.c.bf16 %v947_v32, %v945_v31 }
  0xcc   : > { %2015 = vmatprep.subr.bf16.mxu0 %v2014_v62  ;;  %v1078_v38 = vld [vmem:[%s2937_s9 + $0x568] sm:$0xff]  ;;  %v1080_v39 = vld [vmem:[%s2937_s9 + $0x578] sm:$0xff]  ;;  %v2028_v41 = vpack.c.bf16 %v1075_v35, %v1073_v33  ;;  %v1902_v42 = vpack.c.bf16 %v952_v37, %v950_v36  ;;  %v949_v43 = vld [vmem:[%s2937_s9 + $0x160] sm:$0xff] }
  0xcd   : > { %v951_v44 = vld [vmem:[%s2937_s9 + $0x170] sm:$0xff]  ;;  %v1077_v45 = vld [vmem:[%s2937_s9 + $0x560] sm:$0xff]  ;;  %v2030_v46 = vpack.c.bf16 %v1080_v39, %v1078_v38  ;;  %v954_v48 = vld [vmem:[%s2937_s9 + $0x188] sm:$0xff] }
  0xce   : > { %1889 = vmatpush1.bf16.msra.mxu1 %v1888_v4  ;;  %v1079_v47 = vld [vmem:[%s2937_s9 + $0x570] sm:$0xff]  ;;  %v956_v49 = vld [vmem:[%s2937_s9 + $0x198] sm:$0xff]  ;;  %v1082_v50 = vld [vmem:[%s2937_s9 + $0x588] sm:$0xff]  ;;  %v1904_v52 = vpack.c.bf16 %v951_v44, %v949_v43 }
  0xcf   : > { %2017 = vmatpush1.bf16.msra.mxu0 %v2016_v5  ;;  %1891 = vmatprep.subr.bf16.mxu1 %v1890_v6  ;;  %v1084_v51 = vld [vmem:[%s2937_s9 + $0x598] sm:$0xff]  ;;  %v2032_v53 = vpack.c.bf16 %v1079_v47, %v1077_v45  ;;  %v1906_v54 = vpack.c.bf16 %v956_v49, %v954_v48  ;;  %v953_v55 = vld [vmem:[%s2937_s9 + $0x180] sm:$0xff]  ;;  %v955_v56 = vld [vmem:[%s2937_s9 + $0x190] sm:$0xff] }
  0xd0   : > { %2019 = vmatprep.subr.bf16.mxu0 %v2018_v10  ;;  %v1081_v57 = vld [vmem:[%s2937_s9 + $0x580] sm:$0xff]  ;;  %v2034_v58 = vpack.c.bf16 %v1084_v51, %v1082_v50  ;;  %v1083_v59 = vld [vmem:[%s2937_s9 + $0x590] sm:$0xff]  ;;  %v958_v60 = vld [vmem:[%s2937_s9 + $0x1a8] sm:$0xff]  ;;  %v1908_v0 = vpack.c.bf16 %v955_v56, %v953_v55 }
  0xd1   : > { %v960_v61 = vld [vmem:[%s2937_s9 + $0x1b8] sm:$0xff]  ;;  %v1086_v62 = vld [vmem:[%s2937_s9 + $0x5a8] sm:$0xff]  ;;  %v2036_v1 = vpack.c.bf16 %v1083_v59, %v1081_v57  ;;  %v957_v3 = vld [vmem:[%s2937_s9 + $0x1a0] sm:$0xff] }
  0xd2   : > { %1893 = vmatpush1.bf16.msra.mxu1 %v1892_v16  ;;  %v1088_v63 = vld [vmem:[%s2937_s9 + $0x5b8] sm:$0xff]  ;;  %v1910_v2 = vpack.c.bf16 %v960_v61, %v958_v60  ;;  %v959_v4 = vld [vmem:[%s2937_s9 + $0x1b0] sm:$0xff]  ;;  %v1085_v5 = vld [vmem:[%s2937_s9 + $0x5a0] sm:$0xff] }
  0xd3   : > { %2021 = vmatpush1.bf16.msra.mxu0 %v2020_v17  ;;  %1895 = vmatprep.subr.bf16.mxu1 %v1894_v18  ;;  %v2038_v6 = vpack.c.bf16 %v1088_v63, %v1086_v62  ;;  %v1087_v7 = vld [vmem:[%s2937_s9 + $0x5b0] sm:$0xff]  ;;  %v962_v8 = vld [vmem:[%s2937_s9 + $0x1c8] sm:$0xff]  ;;  %v964_v9 = vld [vmem:[%s2937_s9 + $0x1d8] sm:$0xff]  ;;  %v1912_v12 = vpack.c.bf16 %v959_v4, %v957_v3 }
  0xd4   : > { %2023 = vmatprep.subr.bf16.mxu0 %v2022_v22  ;;  %v1090_v10 = vld [vmem:[%s2937_s9 + $0x5c8] sm:$0xff]  ;;  %v1092_v11 = vld [vmem:[%s2937_s9 + $0x5d8] sm:$0xff]  ;;  %v2040_v13 = vpack.c.bf16 %v1087_v7, %v1085_v5  ;;  %v1914_v14 = vpack.c.bf16 %v964_v9, %v962_v8  ;;  %v961_v15 = vld [vmem:[%s2937_s9 + $0x1c0] sm:$0xff] }
  0xd5   : > { %v963_v16 = vld [vmem:[%s2937_s9 + $0x1d0] sm:$0xff]  ;;  %v1089_v17 = vld [vmem:[%s2937_s9 + $0x5c0] sm:$0xff]  ;;  %v2042_v18 = vpack.c.bf16 %v1092_v11, %v1090_v10  ;;  %v966_v20 = vld [vmem:[%s2937_s9 + $0x1e8] sm:$0xff] }
  0xd6   : > { %1897 = vmatpush1.bf16.msra.mxu1 %v1896_v28  ;;  %v1091_v19 = vld [vmem:[%s2937_s9 + $0x5d0] sm:$0xff]  ;;  %v968_v21 = vld [vmem:[%s2937_s9 + $0x1f8] sm:$0xff]  ;;  %v1094_v22 = vld [vmem:[%s2937_s9 + $0x5e8] sm:$0xff]  ;;  %v1916_v24 = vpack.c.bf16 %v963_v16, %v961_v15 }
  0xd7   : > { %2025 = vmatpush1.bf16.msra.mxu0 %v2024_v29  ;;  %1899 = vmatprep.subr.bf16.mxu1 %v1898_v30  ;;  %v1096_v23 = vld [vmem:[%s2937_s9 + $0x5f8] sm:$0xff]  ;;  %v2044_v25 = vpack.c.bf16 %v1091_v19, %v1089_v17  ;;  %v1918_v26 = vpack.c.bf16 %v968_v21, %v966_v20  ;;  %v965_v27 = vld [vmem:[%s2937_s9 + $0x1e0] sm:$0xff]  ;;  %v967_v28 = vld [vmem:[%s2937_s9 + $0x1f0] sm:$0xff] }
  0xd8   : > { %2027 = vmatprep.subr.bf16.mxu0 %v2026_v34  ;;  %v1093_v29 = vld [vmem:[%s2937_s9 + $0x5e0] sm:$0xff]  ;;  %v2046_v30 = vpack.c.bf16 %v1096_v23, %v1094_v22  ;;  %v1095_v31 = vld [vmem:[%s2937_s9 + $0x5f0] sm:$0xff]  ;;  %v970_v32 = vld [vmem:[%s2937_s9 + $0x208] sm:$0xff]  ;;  %v1920_v36 = vpack.c.bf16 %v967_v28, %v965_v27 }
  0xd9   : > { %v972_v33 = vld [vmem:[%s2937_s9 + $0x218] sm:$0xff]  ;;  %v1098_v34 = vld [vmem:[%s2937_s9 + $0x608] sm:$0xff]  ;;  %v2048_v37 = vpack.c.bf16 %v1095_v31, %v1093_v29  ;;  %v969_v39 = vld [vmem:[%s2937_s9 + $0x200] sm:$0xff] }
  0xda   : > { %1901 = vmatpush1.bf16.msra.mxu1 %v1900_v40  ;;  %v1100_v35 = vld [vmem:[%s2937_s9 + $0x618] sm:$0xff]  ;;  %v1922_v38 = vpack.c.bf16 %v972_v33, %v970_v32  ;;  %v971_v40 = vld [vmem:[%s2937_s9 + $0x210] sm:$0xff]  ;;  %v974_v44 = vld [vmem:[%s2937_s9 + $0x228] sm:$0xff] }
  0xdb   : > { %2029 = vmatpush1.bf16.msra.mxu0 %v2028_v41  ;;  %1903 = vmatprep.subr.bf16.mxu1 %v1902_v42  ;;  %v1097_v41 = vld [vmem:[%s2937_s9 + $0x600] sm:$0xff]  ;;  %v2050_v42 = vpack.c.bf16 %v1100_v35, %v1098_v34  ;;  %v1099_v43 = vld [vmem:[%s2937_s9 + $0x610] sm:$0xff]  ;;  %v976_v45 = vld [vmem:[%s2937_s9 + $0x238] sm:$0xff]  ;;  %v1924_v49 = vpack.c.bf16 %v971_v40, %v969_v39 }
  0xdc   : > { %2031 = vmatprep.subr.bf16.mxu0 %v2030_v46  ;;  %v1102_v46 = vld [vmem:[%s2937_s9 + $0x628] sm:$0xff]  ;;  %v1104_v47 = vld [vmem:[%s2937_s9 + $0x638] sm:$0xff]  ;;  %v869_v48 = vld [vmem:[%s3374_s0] sm:$0xff]  ;;  %v2052_v51 = vpack.c.bf16 %v1099_v43, %v1097_v41 }
  0xdd   : > { %v873_v50 = vld [vmem:[%s3374_s0 + $0x20] sm:$0xff]  ;;  %v2054_v56 = vpack.c.bf16 %v1104_v47, %v1102_v46  ;;  %v1103_v57 = vld [vmem:[%s2937_s9 + $0x630] sm:$0xff]  ;;  %v980_v59 = vld [vmem:[%s2937_s9 + $0x258] sm:$0xff] }
  0xde   : > { %1905 = vmatpush1.bf16.msra.mxu1 %v1904_v52  ;;  %v1926_v52 = vpack.c.bf16 %v976_v45, %v974_v44  ;;  %v1101_v55 = vld [vmem:[%s2937_s9 + $0x620] sm:$0xff]  ;;  %v1106_v60 = vld [vmem:[%s2937_s9 + $0x648] sm:$0xff]  ;;  %v1108_v61 = vld [vmem:[%s2937_s9 + $0x658] sm:$0xff] }
  0xdf   : > { %2033 = vmatpush1.bf16.msra.mxu0 %v2032_v53  ;;  %1907 = vmatprep.subr.bf16.mxu1 %v1906_v54  ;;  %v973_v53 = vld [vmem:[%s2937_s9 + $0x220] sm:$0xff]  ;;  %v975_v54 = vld [vmem:[%s2937_s9 + $0x230] sm:$0xff]  ;;  %v2056_v3 = vpack.c.bf16 %v1103_v57, %v1101_v55  ;;  %v2058_v8 = vpack.c.bf16 %v1108_v61, %v1106_v60  ;;  %v982_v10 = vld [vmem:[%s2937_s9 + $0x268] sm:$0xff] }
  0xe0   : > { %2035 = vmatprep.subr.bf16.mxu0 %v2034_v58  ;;  %v978_v58 = vld [vmem:[%s2937_s9 + $0x248] sm:$0xff]  ;;  %v879_v62 = vld [vmem:[%s3374_s0 + $0x50] sm:$0xff]  ;;  %v1928_v63 = vpack.c.bf16 %v975_v54, %v973_v53  ;;  %v977_v5 = vld [vmem:[%s2937_s9 + $0x240] sm:$0xff] }
  0xe1   : > { %v1930_v4 = vpack.c.bf16 %v980_v59, %v978_v58  ;;  %v1105_v7 = vld [vmem:[%s2937_s9 + $0x640] sm:$0xff]  ;;  %v1107_v9 = vld [vmem:[%s2937_s9 + $0x650] sm:$0xff]  ;;  %v984_v11 = vld [vmem:[%s2937_s9 + $0x278] sm:$0xff] }
  0xe2   : > { %1909 = vmatpush1.bf16.msra.mxu1 %v1908_v0  ;;  %v883_v0 = vld [vmem:[%s3374_s0 + $0x70] sm:$0xff]  ;;  %v892_v16 = vld [vmem:[%s3374_s0 + $0xb8] sm:$0xff]  ;;  %v2060_v19 = vpack.c.bf16 %v1107_v9, %v1105_v7  ;;  %v1934_v20 = vpack.c.bf16 %v984_v11, %v982_v10  ;;  %v981_v21 = vld [vmem:[%s2937_s9 + $0x260] sm:$0xff] }
  0xe3   : > { %2037 = vmatpush1.bf16.msra.mxu0 %v2036_v1  ;;  %1911 = vmatprep.subr.bf16.mxu1 %v1910_v2  ;;  %v878_v1 = vld [vmem:[%s3374_s0 + $0x48] sm:$0xff]  ;;  %v887_v17 = vld [vmem:[%s3374_s0 + $0x90] sm:$0xff]  ;;  %v1109_v23 = vld [vmem:[%s2937_s9 + $0x660] sm:$0xff] }
  0xe4   : > { %2039 = vmatprep.subr.bf16.mxu0 %v2038_v6  ;;  %v882_v2 = vld [vmem:[%s3374_s0 + $0x68] sm:$0xff]  ;;  %v979_v6 = vld [vmem:[%s2937_s9 + $0x250] sm:$0xff]  ;;  %v988_v27 = vld [vmem:[%s2937_s9 + $0x298] sm:$0xff] }
  0xe5   : > { %v1932_v15 = vpack.c.bf16 %v979_v6, %v977_v5  ;;  %v983_v22 = vld [vmem:[%s2937_s9 + $0x270] sm:$0xff]  ;;  %v1114_v28 = vld [vmem:[%s2937_s9 + $0x688] sm:$0xff]  ;;  %v1116_v29 = vld [vmem:[%s2937_s9 + $0x698] sm:$0xff] }
  0xe6   : > { %1913 = vmatpush1.bf16.msra.mxu1 %v1912_v12  ;;  %v1110_v12 = vld [vmem:[%s2937_s9 + $0x668] sm:$0xff]  ;;  %v985_v33 = vld [vmem:[%s2937_s9 + $0x280] sm:$0xff]  ;;  %v987_v34 = vld [vmem:[%s2937_s9 + $0x290] sm:$0xff] }
  0xe7   : > { %2041 = vmatpush1.bf16.msra.mxu0 %v2040_v13  ;;  %1915 = vmatprep.subr.bf16.mxu1 %v1914_v14  ;;  %v1112_v13 = vld [vmem:[%s2937_s9 + $0x678] sm:$0xff]  ;;  %v1113_v35 = vld [vmem:[%s2937_s9 + $0x680] sm:$0xff]  ;;  %v1118_v40 = vld [vmem:[%s2937_s9 + $0x6a8] sm:$0xff] }
  0xe8   : > { %2043 = vmatprep.subr.bf16.mxu0 %v2042_v18  ;;  %v888_v14 = vld [vmem:[%s3374_s0 + $0x98] sm:$0xff]  ;;  %v891_v18 = vld [vmem:[%s3374_s0 + $0xb0] sm:$0xff]  ;;  %v989_v43 = vld [vmem:[%s2937_s9 + $0x2a0] sm:$0xff] }
  0xe9   : > { %v992_v39 = vld [vmem:[%s2937_s9 + $0x2b8] sm:$0xff]  ;;  %v991_v44 = vld [vmem:[%s2937_s9 + $0x2b0] sm:$0xff]  ;;  %v1117_v47 = vld [vmem:[%s2937_s9 + $0x6a0] sm:$0xff] }
  0xea   : > { %1917 = vmatpush1.bf16.msra.mxu1 %v1916_v24  ;;  %v2062_v24 = vpack.c.bf16 %v1112_v13, %v1110_v12  ;;  %v1120_v41 = vld [vmem:[%s2937_s9 + $0x6b8] sm:$0xff]  ;;  %v897_v53 = vld [vmem:[%s3374_s0 + $0xe0] sm:$0xff]  ;;  %v1944_v57 = vpack.c.bf16 %v991_v44, %v989_v43  ;;  %v1126_v5 = vld [vmem:[%s2937_s9 + $0x6e8] sm:$0xff] }
  0xeb   : > { %2045 = vmatpush1.bf16.msra.mxu0 %v2044_v25  ;;  %1919 = vmatprep.subr.bf16.mxu1 %v1918_v26  ;;  %v1111_v25 = vld [vmem:[%s2937_s9 + $0x670] sm:$0xff]  ;;  %v986_v26 = vld [vmem:[%s2937_s9 + $0x288] sm:$0xff]  ;;  %v1124_v54 = vld [vmem:[%s2937_s9 + $0x6d8] sm:$0xff] }
  0xec   : > { %2047 = vmatprep.subr.bf16.mxu0 %v2046_v30  ;;  %v1936_v30 = vpack.c.bf16 %v983_v22, %v981_v21  ;;  %v2064_v31 = vpack.c.bf16 %v1111_v25, %v1109_v23  ;;  %v1938_v32 = vpack.c.bf16 %v988_v27, %v986_v26  ;;  %v901_v55 = vld [vmem:[%s3374_s0 + $0x100] sm:$0xff]  ;;  %v900_v59 = vld [vmem:[%s3374_s0 + $0xf8] sm:$0xff]  ;;  %v999_v12 = vld [vmem:[%s2937_s9 + $0x2f0] sm:$0xff] }
  0xed   : > { %v993_v58 = vld [vmem:[%s2937_s9 + $0x2c0] sm:$0xff]  ;;  %v1128_v6 = vld [vmem:[%s2937_s9 + $0x6f8] sm:$0xff]  ;;  %v1131_v27 = vld [vmem:[%s2937_s9 + $0x710] sm:$0xff] }
  0xee   : > { %1921 = vmatpush1.bf16.msra.mxu1 %v1920_v36  ;;  %v2066_v36 = vpack.c.bf16 %v1116_v29, %v1114_v28  ;;  %v876_v7 = vld [vmem:[%s3374_s0 + $0x38] sm:$0xff]  ;;  %v997_v11 = vld [vmem:[%s2937_s9 + $0x2e0] sm:$0xff]  ;;  %v1006_v28 = vld [vmem:[%s2937_s9 + $0x328] sm:$0xff] }
  0xef   : > { %2049 = vmatpush1.bf16.msra.mxu0 %v2048_v37  ;;  %1923 = vmatprep.subr.bf16.mxu1 %v1922_v38  ;;  %v1115_v37 = vld [vmem:[%s2937_s9 + $0x690] sm:$0xff]  ;;  %v990_v38 = vld [vmem:[%s2937_s9 + $0x2a8] sm:$0xff]  ;;  %v1125_v13 = vld [vmem:[%s2937_s9 + $0x6e0] sm:$0xff] }
  0xf0   : > { %2051 = vmatprep.subr.bf16.mxu0 %v2050_v42  ;;  %v1940_v42 = vpack.c.bf16 %v987_v34, %v985_v33  ;;  %v2068_v45 = vpack.c.bf16 %v1115_v37, %v1113_v35  ;;  %v1942_v46 = vpack.c.bf16 %v992_v39, %v990_v38  ;;  %v1001_v23 = vld [vmem:[%s2937_s9 + $0x300] sm:$0xff]  ;;  %v1008_v29 = vld [vmem:[%s2937_s9 + $0x338] sm:$0xff]  ;;  %v1135_v39 = vld [vmem:[%s2937_s9 + $0x730] sm:$0xff] }
  0xf1   : > { %1258 = vmatmul.mubr.f32.vlgmr.msra.gmra.mrb[0].mxu1 %v869_v48  ;;  %v1119_v48 = vld [vmem:[%s2937_s9 + $0x6b0] sm:$0xff]  ;;  %v1129_v25 = vld [vmem:[%s2937_s9 + $0x700] sm:$0xff]  ;;  %v1958_v34 = vpack.c.bf16 %v1008_v29, %v1006_v28  ;;  %v1140_v43 = vld [vmem:[%s2937_s9 + $0x758] sm:$0xff] }
  0xf2   : > { %1925 = vmatpush1.bf16.msra.mxu1 %v1924_v49  ;;  %1436 = vmatmul.mubr.f32.vlgmr.msra.gmra.mrb[0].mxu0 %v873_v50  ;;  %v994_v49 = vld [vmem:[%s2937_s9 + $0x2c8] sm:$0xff]  ;;  %v2070_v50 = vpack.c.bf16 %v1120_v41, %v1118_v40  ;;  %v2072_v60 = vpack.c.bf16 %v1119_v48, %v1117_v47  ;;  %v2084_v33 = vpack.c.bf16 %v1131_v27, %v1129_v25  ;;  %v1005_v35 = vld [vmem:[%s2937_s9 + $0x320] sm:$0xff]  ;;  %v1012_v41 = vld [vmem:[%s2937_s9 + $0x358] sm:$0xff] }
  0xf3   : > { %2053 = vmatpush1.bf16.msra.mxu0 %v2052_v51  ;;  %1927 = vmatprep.subr.bf16.mxu1 %v1926_v52  ;;  %v996_v51 = vld [vmem:[%s2937_s9 + $0x2d8] sm:$0xff]  ;;  %v1122_v52 = vld [vmem:[%s2937_s9 + $0x6c8] sm:$0xff]  ;;  %v1133_v37 = vld [vmem:[%s2937_s9 + $0x720] sm:$0xff] }
  0xf4   : > { %2055 = vmatprep.subr.bf16.mxu0 %v2054_v56  ;;  %1263 = vmatprep.mubr.f32.mxu1 %v879_v62  ;;  %v896_v56 = vld [vmem:[%s3374_s0 + $0xd8] sm:$0xff]  ;;  %v1946_v61 = vpack.c.bf16 %v996_v51, %v994_v49  ;;  %v995_v62 = vld [vmem:[%s2937_s9 + $0x2d0] sm:$0xff]  ;;  %v1010_v40 = vld [vmem:[%s2937_s9 + $0x348] sm:$0xff] }
  0xf5   : > { %1441 = vmatprep.mubr.f32.mxu0 %v883_v0  ;;  %1264 = vmatmul.mubr.f32.gmra.mrb[2].mxu1 %v878_v1  ;;  %v1123_v0 = vld [vmem:[%s2937_s9 + $0x6d0] sm:$0xff]  ;;  %v2074_v1 = vpack.c.bf16 %v1124_v54, %v1122_v52  ;;  %v1009_v47 = vld [vmem:[%s2937_s9 + $0x340] sm:$0xff]  ;;  %v1014_v52 = vld [vmem:[%s2937_s9 + $0x368] sm:$0xff] }
  0xf6   : > { %1929 = vmatpush1.bf16.msra.mxu1 %v1928_v63  ;;  %1442 = vmatmul.mubr.f32.gmra.mrb[2].mxu0 %v882_v2  ;;  %v1121_v63 = vld [vmem:[%s2937_s9 + $0x6c0] sm:$0xff]  ;;  %v998_v2 = vld [vmem:[%s2937_s9 + $0x2e8] sm:$0xff]  ;;  %v1011_v48 = vld [vmem:[%s2937_s9 + $0x350] sm:$0xff] }
  0xf7   : > { %2057 = vmatpush1.bf16.msra.mxu0 %v2056_v3  ;;  %1931 = vmatprep.subr.bf16.mxu1 %v1930_v4  ;;  %v1000_v3 = vld [vmem:[%s2937_s9 + $0x2f8] sm:$0xff]  ;;  %v2076_v9 = vpack.c.bf16 %v1123_v0, %v1121_v63  ;;  %v1137_v49 = vld [vmem:[%s2937_s9 + $0x740] sm:$0xff]  ;;  %v1139_v51 = vld [vmem:[%s2937_s9 + $0x750] sm:$0xff] }
  0xf8   : > { %2059 = vmatprep.subr.bf16.mxu0 %v2058_v8  ;;  %1269 = vmatprep.mubr.f32.mxu1 %v888_v14  ;;  %v872_v4 = vld [vmem:[%s3374_s0 + $0x18] sm:$0xff]  ;;  %v1948_v8 = vpack.c.bf16 %v995_v62, %v993_v58  ;;  %v1950_v10 = vpack.c.bf16 %v1000_v3, %v998_v2  ;;  %v2078_v14 = vpack.c.bf16 %v1128_v6, %v1126_v5  ;;  %v1142_v54 = vld [vmem:[%s2937_s9 + $0x768] sm:$0xff]  ;;  %v1143_v63 = vld [vmem:[%s2937_s9 + $0x770] sm:$0xff] }
  0xf9   : > { %1447 = vmatprep.mubr.f32.mxu0 %v892_v16  ;;  %1270 = vmatmul.mubr.f32.gmra.mrb[4].mxu1 %v887_v17  ;;  %v1002_v16 = vld [vmem:[%s2937_s9 + $0x308] sm:$0xff]  ;;  %v1004_v17 = vld [vmem:[%s2937_s9 + $0x318] sm:$0xff] }
  0xfa   : > { %1933 = vmatpush1.bf16.msra.mxu1 %v1932_v15  ;;  %1448 = vmatmul.mubr.f32.gmra.mrb[4].mxu0 %v891_v18  ;;  %v1127_v15 = vld [vmem:[%s2937_s9 + $0x6f0] sm:$0xff]  ;;  %v1130_v18 = vld [vmem:[%s2937_s9 + $0x708] sm:$0xff]  ;;  %v1954_v22 = vpack.c.bf16 %v1004_v17, %v1002_v16  ;;  %v1148_v3 = vld [vmem:[%s2937_s9 + $0x798] sm:$0xff] }
  0xfb   : > { %2061 = vmatpush1.bf16.msra.mxu0 %v2060_v19  ;;  %1935 = vmatprep.subr.bf16.mxu1 %v1934_v20  ;;  %v1132_v19 = vld [vmem:[%s2937_s9 + $0x718] sm:$0xff]  ;;  %v1952_v20 = vpack.c.bf16 %v999_v12, %v997_v11  ;;  %v2080_v21 = vpack.c.bf16 %v1127_v15, %v1125_v13  ;;  %v1018_v0 = vld [vmem:[%s2937_s9 + $0x388] sm:$0xff]  ;;  %v1147_v11 = vld [vmem:[%s2937_s9 + $0x790] sm:$0xff] }
  0xfc   : > { %2063 = vmatprep.subr.bf16.mxu0 %v2062_v24  ;;  %1275 = vmatprep.mubr.f32.mxu1 %v897_v53  ;;  %v1003_v24 = vld [vmem:[%s2937_s9 + $0x310] sm:$0xff]  ;;  %v2082_v26 = vpack.c.bf16 %v1132_v19, %v1130_v18  ;;  %v1016_v53 = vld [vmem:[%s2937_s9 + $0x378] sm:$0xff]  ;;  %v1146_v2 = vld [vmem:[%s2937_s9 + $0x788] sm:$0xff] }
  0xfd   : > { %1453 = vmatprep.mubr.f32.mxu0 %v901_v55  ;;  %1276 = vmatmul.mubr.f32.gmra.mrb[6].mxu1 %v896_v56  ;;  %v1144_v55 = vld [vmem:[%s2937_s9 + $0x778] sm:$0xff]  ;;  %v1964_v56 = vpack.c.bf16 %v1011_v48, %v1009_v47  ;;  %v1966_v58 = vpack.c.bf16 %v1016_v53, %v1014_v52  ;;  %v1022_v12 = vld [vmem:[%s2937_s9 + $0x3a8] sm:$0xff]  ;;  %v1021_v19 = vld [vmem:[%s2937_s9 + $0x3a0] sm:$0xff] }
  0xfe   : > { %1937 = vmatpush1.bf16.msra.mxu1 %v1936_v30  ;;  %1454 = vmatmul.mubr.f32.gmra.mrb[6].mxu0 %v900_v59  ;;  %v1134_v30 = vld [vmem:[%s2937_s9 + $0x728] sm:$0xff]  ;;  %v1013_v59 = vld [vmem:[%s2937_s9 + $0x360] sm:$0xff]  ;;  %v2094_v62 = vpack.c.bf16 %v1144_v55, %v1142_v54  ;;  %v1024_v13 = vld [vmem:[%s2937_s9 + $0x3b8] sm:$0xff] }
  0xff   : > { %2065 = vmatpush1.bf16.msra.mxu0 %v2064_v31  ;;  %1939 = vmatprep.subr.bf16.mxu1 %v1938_v32  ;;  %v1136_v31 = vld [vmem:[%s2937_s9 + $0x738] sm:$0xff]  ;;  %v1956_v32 = vpack.c.bf16 %v1003_v24, %v1001_v23  ;;  %v1974_v18 = vpack.c.bf16 %v1024_v13, %v1022_v12  ;;  %v1151_v23 = vld [vmem:[%s2937_s9 + $0x7b0] sm:$0xff]  ;;  %v1026_v24 = vld [vmem:[%s2937_s9 + $0x3c8] sm:$0xff] }
 0x100   : > { %2067 = vmatprep.subr.bf16.mxu0 %v2066_v36  ;;  %1346 = vmatprep.mubr.f32.mxu1 %v872_v4  ;;  %v1007_v36 = vld [vmem:[%s2937_s9 + $0x330] sm:$0xff]  ;;  %v2086_v38 = vpack.c.bf16 %v1136_v31, %v1134_v30  ;;  %v1152_v15 = vld [vmem:[%s2937_s9 + $0x7b8] sm:$0xff]  ;;  %v1025_v31 = vld [vmem:[%s2937_s9 + $0x3c0] sm:$0xff] }
 0x101   : > { %1524 = vmatprep.mubr.f32.mxu0 %v876_v7  ;;  %v1960_v44 = vpack.c.bf16 %v1007_v36, %v1005_v35  ;;  %v1017_v7 = vld [vmem:[%s2937_s9 + $0x380] sm:$0xff]  ;;  %v1028_v25 = vld [vmem:[%s2937_s9 + $0x3d8] sm:$0xff]  ;;  %v1155_v35 = vld [vmem:[%s2937_s9 + $0x7d0] sm:$0xff] }
 0x102   : > { %1941 = vmatpush1.bf16.msra.mxu1 %v1940_v42  ;;  %v1138_v42 = vld [vmem:[%s2937_s9 + $0x748] sm:$0xff]  ;;  %v1156_v27 = vld [vmem:[%s2937_s9 + $0x7d8] sm:$0xff]  ;;  %v1978_v30 = vpack.c.bf16 %v1028_v25, %v1026_v24  ;;  %v1159_v47 = vld [vmem:[%s2937_s9 + $0x7f0] sm:$0xff] }
 0x103   : > { %2069 = vmatpush1.bf16.msra.mxu0 %v2068_v45  ;;  %1943 = vmatprep.subr.bf16.mxu1 %v1942_v46  ;;  %v2088_v45 = vpack.c.bf16 %v1135_v39, %v1133_v37  ;;  %v1962_v46 = vpack.c.bf16 %v1012_v41, %v1010_v40  ;;  %v1030_v36 = vld [vmem:[%s2937_s9 + $0x3e8] sm:$0xff]  ;;  %v1032_v37 = vld [vmem:[%s2937_s9 + $0x3f8] sm:$0xff]  ;;  %v1161_v53 = vld [vmem:[%s2937_s9 + $0x800] sm:$0xff] }
 0x104   : > { %2071 = vmatprep.subr.bf16.mxu0 %v2070_v50  ;;  %v2090_v50 = vpack.c.bf16 %v1140_v43, %v1138_v42  ;;  %v1160_v39 = vld [vmem:[%s2937_s9 + $0x7f8] sm:$0xff]  ;;  %v1982_v42 = vpack.c.bf16 %v1032_v37, %v1030_v36  ;;  %v1029_v43 = vld [vmem:[%s2937_s9 + $0x3e0] sm:$0xff]  ;;  %v1162_v48 = vld [vmem:[%s2937_s9 + $0x808] sm:$0xff]  ;;  %v2277_v37 = vmov 0.0  }
 0x105   : > { %v1163_v54 = vld [vmem:[%s2937_s9 + $0x810] sm:$0xff]  ;;  %v1166_v55 = vld [vmem:[%s2937_s9 + $0x828] sm:$0xff]  ;;  %v1176_v12 = vld [vmem:[%s2937_s9 + $0x878] sm:$0xff] }
 0x106   : > { %1945 = vmatpush1.bf16.msra.mxu1 %v1944_v57  ;;  %v2092_v57 = vpack.c.bf16 %v1139_v51, %v1137_v49  ;;  %v1164_v49 = vld [vmem:[%s2937_s9 + $0x818] sm:$0xff]  ;;  %v889_v13 = vld [vmem:[%s3374_s0 + $0xa0] sm:$0xff]  ;;  %v902_v25 = vld [vmem:[%s3374_s0 + $0x108] sm:$0xff] }
 0x107   : > { %2073 = vmatpush1.bf16.msra.mxu0 %v2072_v60  ;;  %1947 = vmatprep.subr.bf16.mxu1 %v1946_v61  ;;  %v1015_v60 = vld [vmem:[%s2937_s9 + $0x370] sm:$0xff]  ;;  %v1141_v61 = vld [vmem:[%s2937_s9 + $0x760] sm:$0xff]  ;;  %v2114_v52 = vpack.c.bf16 %v1164_v49, %v1162_v48  ;;  %v1188_v36 = vld [vmem:[%s2937_s9 + $0x8d8] sm:$0xff] }
 0x108   : > { %2075 = vmatprep.subr.bf16.mxu0 %v2074_v1  ;;  %v1020_v1 = vld [vmem:[%s2937_s9 + $0x398] sm:$0xff]  ;;  %v1968_v4 = vpack.c.bf16 %v1015_v60, %v1013_v59  ;;  %v2096_v5 = vpack.c.bf16 %v1143_v63, %v1141_v61  ;;  %v875_v59 = vld [vmem:[%s3374_s0 + $0x30] sm:$0xff]  ;;  %v1165_v60 = vld [vmem:[%s2937_s9 + $0x820] sm:$0xff] }
 0x109   : > { %v1970_v6 = vpack.c.bf16 %v1020_v1, %v1018_v0  ;;  %v1167_v61 = vld [vmem:[%s2937_s9 + $0x830] sm:$0xff]  ;;  %v885_v0 = vld [vmem:[%s3374_s0 + $0x80] sm:$0xff]  ;;  %v1170_v1 = vld [vmem:[%s2937_s9 + $0x848] sm:$0xff] }
 0x10a   : > { %1949 = vmatpush1.bf16.msra.mxu1 %v1948_v8  ;;  %v1019_v8 = vld [vmem:[%s2937_s9 + $0x390] sm:$0xff] }
 0x10b   : > { %2077 = vmatpush1.bf16.msra.mxu0 %v2076_v9  ;;  %1951 = vmatprep.subr.bf16.mxu1 %v1950_v10  ;;  %v1145_v9 = vld [vmem:[%s2937_s9 + $0x780] sm:$0xff]  ;;  %v2098_v10 = vpack.c.bf16 %v1148_v3, %v1146_v2  ;;  %v1972_v16 = vpack.c.bf16 %v1019_v8, %v1017_v7  ;;  %v1172_v2 = vld [vmem:[%s2937_s9 + $0x858] sm:$0xff]  ;;  %v1171_v7 = vld [vmem:[%s2937_s9 + $0x850] sm:$0xff] }
 0x10c   : > { %2079 = vmatprep.subr.bf16.mxu0 %v2078_v14  ;;  %v1150_v14 = vld [vmem:[%s2937_s9 + $0x7a8] sm:$0xff]  ;;  %v2100_v17 = vpack.c.bf16 %v1147_v11, %v1145_v9  ;;  %v880_v3 = vld [vmem:[%s3374_s0 + $0x58] sm:$0xff]  ;;  %v2122_v9 = vpack.c.bf16 %v1172_v2, %v1170_v1  ;;  %v895_v49 = vld [vmem:[%s3374_s0 + $0xd0] sm:$0xff] }
 0x10d   : > { %v890_v8 = vld [vmem:[%s3374_s0 + $0xa8] sm:$0xff] }
 0x10e   : > { %1953 = vmatpush1.bf16.msra.mxu1 %v1952_v20  ;;  %v1023_v20 = vld [vmem:[%s2937_s9 + $0x3b0] sm:$0xff]  ;;  %v1174_v11 = vld [vmem:[%s2937_s9 + $0x868] sm:$0xff] }
 0x10f   : > { %2081 = vmatpush1.bf16.msra.mxu0 %v2080_v21  ;;  %1955 = vmatprep.subr.bf16.mxu1 %v1954_v22  ;;  %v1149_v21 = vld [vmem:[%s2937_s9 + $0x7a0] sm:$0xff]  ;;  %v2102_v22 = vpack.c.bf16 %v1152_v15, %v1150_v14  ;;  %v1976_v28 = vpack.c.bf16 %v1023_v20, %v1021_v19  ;;  %v2126_v19 = vpack.c.bf16 %v1176_v12, %v1174_v11  ;;  %v1178_v20 = vld [vmem:[%s2937_s9 + $0x888] sm:$0xff] }
 0x110   : > { %2083 = vmatprep.subr.bf16.mxu0 %v2082_v26  ;;  %v1154_v26 = vld [vmem:[%s2937_s9 + $0x7c8] sm:$0xff]  ;;  %v2104_v29 = vpack.c.bf16 %v1151_v23, %v1149_v21  ;;  %v893_v15 = vld [vmem:[%s3374_s0 + $0xc0] sm:$0xff]  ;;  %v1180_v21 = vld [vmem:[%s2937_s9 + $0x898] sm:$0xff] }
 0x111   : > { %v898_v23 = vld [vmem:[%s3374_s0 + $0xe8] sm:$0xff] }
 0x112   : > { %1957 = vmatpush1.bf16.msra.mxu1 %v1956_v32  ;;  %v1027_v32 = vld [vmem:[%s2937_s9 + $0x3d0] sm:$0xff] }
 0x113   : > { %2085 = vmatpush1.bf16.msra.mxu0 %v2084_v33  ;;  %1959 = vmatprep.subr.bf16.mxu1 %v1958_v34  ;;  %v1153_v33 = vld [vmem:[%s2937_s9 + $0x7c0] sm:$0xff]  ;;  %v2106_v34 = vpack.c.bf16 %v1156_v27, %v1154_v26  ;;  %v1980_v40 = vpack.c.bf16 %v1027_v32, %v1025_v31  ;;  %v2130_v26 = vpack.c.bf16 %v1180_v21, %v1178_v20 }
 0x114   : > { %2087 = vmatprep.subr.bf16.mxu0 %v2086_v38  ;;  %v1158_v38 = vld [vmem:[%s2937_s9 + $0x7e8] sm:$0xff]  ;;  %v2108_v41 = vpack.c.bf16 %v1155_v35, %v1153_v33  ;;  %v1177_v27 = vld [vmem:[%s2937_s9 + $0x880] sm:$0xff] }
 0x115   : > { %v1181_v33 = vld [vmem:[%s2937_s9 + $0x8a0] sm:$0xff]  ;;  %v1186_v35 = vld [vmem:[%s2937_s9 + $0x8c8] sm:$0xff] }
 0x116   : > { %1961 = vmatpush1.bf16.msra.mxu1 %v1960_v44  ;;  %v1031_v44 = vld [vmem:[%s2937_s9 + $0x3f0] sm:$0xff] }
 0x117   : > { %2089 = vmatpush1.bf16.msra.mxu0 %v2088_v45  ;;  %1963 = vmatprep.subr.bf16.mxu1 %v1962_v46  ;;  %v1157_v45 = vld [vmem:[%s2937_s9 + $0x7e0] sm:$0xff]  ;;  %v2110_v46 = vpack.c.bf16 %v1160_v39, %v1158_v38  ;;  %v2138_v39 = vpack.c.bf16 %v1188_v36, %v1186_v35 }
 0x118   : > { %2091 = vmatprep.subr.bf16.mxu0 %v2090_v50  ;;  %v1984_v50 = vpack.c.bf16 %v1031_v44, %v1029_v43  ;;  %v2112_v51 = vpack.c.bf16 %v1159_v47, %v1157_v45  ;;  %v1192_v43 = vld [vmem:[%s2937_s9 + $0x8f8] sm:$0xff]  ;;  %v1191_v47 = vld [vmem:[%s2937_s9 + $0x8f0] sm:$0xff] }
 0x11a   : > { %1965 = vmatpush1.bf16.msra.mxu1 %v1964_v56  ;;  %v1168_v56 = vld [vmem:[%s2937_s9 + $0x838] sm:$0xff] }
 0x11b   : > { %2093 = vmatpush1.bf16.msra.mxu0 %v2092_v57  ;;  %1967 = vmatprep.subr.bf16.mxu1 %v1966_v58  ;;  %v871_v57 = vld [vmem:[%s3374_s0 + $0x10] sm:$0xff]  ;;  %v2116_v58 = vpack.c.bf16 %v1163_v54, %v1161_v53  ;;  %v2118_v63 = vpack.c.bf16 %v1168_v56, %v1166_v55 }
 0x11c   : > { %2095 = vmatprep.subr.bf16.mxu0 %v2094_v62  ;;  %v881_v62 = vld [vmem:[%s3374_s0 + $0x60] sm:$0xff] }
 0x11e   : > { %1969 = vmatpush1.bf16.msra.mxu1 %v1968_v4  ;;  %v2120_v4 = vpack.c.bf16 %v1167_v61, %v1165_v60 }
 0x11f   : > { %2097 = vmatpush1.bf16.msra.mxu0 %v2096_v5  ;;  %1971 = vmatprep.subr.bf16.mxu1 %v1970_v6  ;;  %v884_v5 = vld [vmem:[%s3374_s0 + $0x78] sm:$0xff]  ;;  %v1169_v6 = vld [vmem:[%s2937_s9 + $0x840] sm:$0xff] }
 0x120   : > { %2099 = vmatprep.subr.bf16.mxu0 %v2098_v10  ;;  %v894_v10 = vld [vmem:[%s3374_s0 + $0xc8] sm:$0xff]  ;;  %v2124_v14 = vpack.c.bf16 %v1171_v7, %v1169_v6 }
 0x122   : > { %1973 = vmatpush1.bf16.msra.mxu1 %v1972_v16  ;;  %v1173_v16 = vld [vmem:[%s2937_s9 + $0x860] sm:$0xff] }
 0x123   : > { %2101 = vmatpush1.bf16.msra.mxu0 %v2100_v17  ;;  %1975 = vmatprep.subr.bf16.mxu1 %v1974_v18  ;;  %v1175_v17 = vld [vmem:[%s2937_s9 + $0x870] sm:$0xff] }
 0x124   : > { %2103 = vmatprep.subr.bf16.mxu0 %v2102_v22  ;;  %v899_v18 = vld [vmem:[%s3374_s0 + $0xf0] sm:$0xff]  ;;  %v2128_v24 = vpack.c.bf16 %v1175_v17, %v1173_v16 }
 0x125   : > { %v903_v22 = vld [vmem:[%s3374_s0 + $0x110] sm:$0xff] }
 0x126   : > { %1977 = vmatpush1.bf16.msra.mxu1 %v1976_v28  ;;  %v1179_v28 = vld [vmem:[%s2937_s9 + $0x890] sm:$0xff] }
 0x127   : > { %2105 = vmatpush1.bf16.msra.mxu0 %v2104_v29  ;;  %1979 = vmatprep.subr.bf16.mxu1 %v1978_v30  ;;  %v1182_v29 = vld [vmem:[%s2937_s9 + $0x8a8] sm:$0xff]  ;;  %v1184_v30 = vld [vmem:[%s2937_s9 + $0x8b8] sm:$0xff]  ;;  %v2132_v31 = vpack.c.bf16 %v1179_v28, %v1177_v27 }
 0x128   : > { %2107 = vmatprep.subr.bf16.mxu0 %v2106_v34  ;;  %v2134_v32 = vpack.c.bf16 %v1184_v30, %v1182_v29  ;;  %v1183_v34 = vld [vmem:[%s2937_s9 + $0x8b0] sm:$0xff] }
 0x129   : > { %v2136_v38 = vpack.c.bf16 %v1183_v34, %v1181_v33 }
 0x12a   : > { %1981 = vmatpush1.bf16.msra.mxu1 %v1980_v40  ;;  %v1185_v40 = vld [vmem:[%s2937_s9 + $0x8c0] sm:$0xff] }
 0x12b   : > { %2109 = vmatpush1.bf16.msra.mxu0 %v2108_v41  ;;  %1983 = vmatprep.subr.bf16.mxu1 %v1982_v42  ;;  %v1187_v41 = vld [vmem:[%s2937_s9 + $0x8d0] sm:$0xff]  ;;  %v1190_v42 = vld [vmem:[%s2937_s9 + $0x8e8] sm:$0xff] }
 0x12c   : > { %2111 = vmatprep.subr.bf16.mxu0 %v2110_v46  ;;  %v2140_v44 = vpack.c.bf16 %v1187_v41, %v1185_v40  ;;  %v2142_v45 = vpack.c.bf16 %v1192_v43, %v1190_v42  ;;  %v1189_v46 = vld [vmem:[%s2937_s9 + $0x8e0] sm:$0xff] }
 0x12d   : > { %v2144_v48 = vpack.c.bf16 %v1191_v47, %v1189_v46 }
 0x12e   : > { %1985 = vmatpush1.bf16.msra.mxu1 %v1984_v50  ;;  %v877_v50 = vld [vmem:[%s3374_s0 + $0x40] sm:$0xff] }
 0x12f   : > { %2113 = vmatpush1.bf16.msra.mxu0 %v2112_v51  ;;  %2146 = vmatprep.subr.bf16.mxu1 %v2114_v52  ;;  %v904_v51 = vld [vmem:[%s3374_s0 + $0x118] sm:$0xff] }
 0x130   : > { %2115 = vmatprep.subr.bf16.mxu0 %v2114_v52  ;;  %v886_v52 = vld [vmem:[%s3374_s0 + $0x88] sm:$0xff] }
 0x131   : > { %1347 = vmatmul.mubr.f32.vlgmr.msra.gmra.mrb[0].mxu1 %v871_v57 }
 0x132   : > { %1525 = vmatmul.mubr.f32.vlgmr.msra.gmra.mrb[0].mxu0 %v875_v59  ;;  %2154 = vmatpush1.bf16.msra.mxu1 %v2116_v58 }
 0x133   : > { %2117 = vmatpush1.bf16.msra.mxu0 %v2116_v58  ;;  %1352 = vmatprep.mubr.f32.mxu1 %v881_v62 }
 0x134   : > { %1530 = vmatprep.mubr.f32.mxu0 %v885_v0  ;;  %2119 = vmatprep.subr.bf16.mxu0 %v2118_v63 }
 0x135   : > { %1353 = vmatmul.mubr.f32.gmra.mrb[2].mxu1 %v880_v3  ;;  %2147 = vmatprep.subr.bf16.mxu1 %v2118_v63 }
 0x136   : > { %1531 = vmatmul.mubr.f32.gmra.mrb[2].mxu0 %v884_v5  ;;  %2155 = vmatpush1.bf16.msra.mxu1 %v2120_v4  ;;  %v1667_v5 = vlaneseq }
 0x137   : > { %2121 = vmatpush1.bf16.msra.mxu0 %v2120_v4  ;;  %1358 = vmatprep.mubr.f32.mxu1 %v890_v8  ;;  %v1665_v8 = vld [vmem:[%s845_s18] sm:$0x3] }
 0x138   : > { %1536 = vmatprep.mubr.f32.mxu0 %v894_v10  ;;  %2123 = vmatprep.subr.bf16.mxu0 %v2122_v9  ;;  %v1668_v6 = vshrl.u32 %v1667_v5, 7 }
 0x139   : > { %1359 = vmatmul.mubr.f32.gmra.mrb[4].mxu1 %v889_v13  ;;  %2148 = vmatprep.subr.bf16.mxu1 %v2122_v9 }
 0x13a   : > { %1537 = vmatmul.mubr.f32.gmra.mrb[4].mxu0 %v893_v15  ;;  %2156 = vmatpush1.bf16.msra.mxu1 %v2124_v14  ;;  %v1669_v7 = vsub.s32 0, %v1668_v6  ;;  %v1673_v9 = vsub.s32 1, %v1668_v6 }
 0x13b   : > { %2125 = vmatpush1.bf16.msra.mxu0 %v2124_v14  ;;  %1364 = vmatprep.mubr.f32.mxu1 %v899_v18 }
 0x13c   : > { %1542 = vmatprep.mubr.f32.mxu0 %v903_v22  ;;  %2127 = vmatprep.subr.bf16.mxu0 %v2126_v19  ;;  %v1670_v10 = vrot.slane %v1665_v8, %v1669_v7  ;;  %v1674_v12 = vrot.slane %v1665_v8, %v1673_v9 }
 0x13d   : > { %1365 = vmatmul.mubr.f32.gmra.mrb[6].mxu1 %v898_v23  ;;  %2149 = vmatprep.subr.bf16.mxu1 %v2126_v19 }
 0x13e   : > { %1543 = vmatmul.mubr.f32.gmra.mrb[6].mxu0 %v902_v25  ;;  %2157 = vmatpush1.bf16.msra.mxu1 %v2128_v24 }
 0x13f   : > { %2129 = vmatpush1.bf16.msra.mxu0 %v2128_v24  ;;  %2150 = vmatprep.subr.bf16.mxu1 %v2130_v26 }
 0x140   : > { %2131 = vmatprep.subr.bf16.mxu0 %v2130_v26  ;;  %1613 = vmatprep.mubr.f32.mxu0 %v2277_v37 }
 0x141   : > { %1625 = vmatprep.mubr.f32.mxu1 %v2277_v37 }
 0x142   : > { %2158 = vmatpush1.bf16.msra.mxu1 %v2132_v31 }
 0x143   : > { %2133 = vmatpush1.bf16.msra.mxu0 %v2132_v31  ;;  %2151 = vmatprep.subr.bf16.mxu1 %v2134_v32 }
 0x144   : > { %2135 = vmatprep.subr.bf16.mxu0 %v2134_v32 }
 0x146   : > { %2159 = vmatpush1.bf16.msra.mxu1 %v2136_v38 }
 0x147   : > { %2137 = vmatpush1.bf16.msra.mxu0 %v2136_v38  ;;  %2152 = vmatprep.subr.bf16.mxu1 %v2138_v39 }
 0x148   : > { %2139 = vmatprep.subr.bf16.mxu0 %v2138_v39 }
 0x14a   : > { %2160 = vmatpush1.bf16.msra.mxu1 %v2140_v44 }
 0x14b   : > { %2141 = vmatpush1.bf16.msra.mxu0 %v2140_v44  ;;  %2153 = vmatprep.subr.bf16.mxu1 %v2142_v45 }
 0x14c   : > { %2143 = vmatprep.subr.bf16.mxu0 %v2142_v45 }
 0x14e   : > { %2161 = vmatpush1.bf16.msra.mxu1 %v2144_v48 }
 0x14f   : > { %2145 = vmatpush1.bf16.msra.mxu0 %v2144_v48 }
 0x151   : > { %1626 = vmatmul.mubr.f32.vlgmr.msra.gmra.mrb[8].mxu1 %v895_v49 }
 0x152   : > { %1614 = vmatmul.mubr.f32.vlgmr.msra.gmra.mrb[0].mxu0 %v877_v50  ;;  %1631 = vmatprep.mubr.f32.mxu1 %v2277_v37 }
 0x153   : > { %1619 = vmatprep.mubr.f32.mxu0 %v2277_v37 }
 0x155   : > { %1632 = vmatmul.mubr.f32.gmra.mrb[10].mxu1 %v904_v51 }
 0x156   : > { %1620 = vmatmul.mubr.f32.gmra.mrb[2].mxu0 %v886_v52 }
 0x204   : > { %v1348_v53 = vpop.f32.mrb[0].mxu1 }
 0x205   : > { %v1350_v54 = vpop.f32.mrb[1].mxu1 }
 0x208   : > { %v1354_v55 = vpop.f32.mrb[2].mxu1 }
 0x209   : > { %v1356_v56 = vpop.f32.mrb[3].mxu1 }
 0x20c   : > { %v1360_v57 = vpop.f32.mrb[4].mxu1 }
 0x20d   : > { %v1538_v58 = vpop.f32.mrb[4].mxu0  ;;  %v1362_v59 = vpop.f32.mrb[5].mxu1 }
 0x20e   : > { %v2166_v60 = vadd.f32 %v1538_v58, %v1360_v57  ;;  %v1540_v61 = vpop.f32.mrb[5].mxu0 }
 0x20f   : > { %v2168_v62 = vadd.f32 %v1540_v61, %v1362_v59 }
 0x210   : > { %v1366_v63 = vpop.f32.mrb[6].mxu1 }
 0x211   : > { %v1544_v0 = vpop.f32.mrb[6].mxu0  ;;  %v1368_v1 = vpop.f32.mrb[7].mxu1 }
 0x212   : > { %v2170_v2 = vadd.f32 %v1544_v0, %v1366_v63  ;;  %v1546_v3 = vpop.f32.mrb[7].mxu0 }
 0x213   : > { %v2172_v4 = vadd.f32 %v1546_v3, %v1368_v1 }
 0x224   : > { %v1627_v11 = vpop.f32.mrb[8].mxu1 }
 0x225   : > { %v1615_v13 = vpop.f32.mrb[0].mxu0  ;;  %v2167_v14 = vadd.f32 %v2166_v60, %v1627_v11  ;;  %v1629_v15 = vpop.f32.mrb[9].mxu1 }
 0x226   : > { %v2162_v16 = vadd.f32 %v1615_v13, %v1348_v53  ;;  %v1617_v17 = vpop.f32.mrb[1].mxu0  ;;  %v2169_v18 = vadd.f32 %v2168_v62, %v1629_v15 }
 0x227   : > { %v1681_v19 = vadd.f32 %v2167_v14, %v1670_v10  ;;  %v2163_v20 = vadd.f32 %v1617_v17, %v1350_v54 }
 0x228   : > { %v1677_v21 = vadd.f32 %v2162_v16, %v1670_v10  ;;  %v1682_v22 = vadd.f32 %v2169_v18, %v1674_v12  ;;  %v1633_v23 = vpop.f32.mrb[10].mxu1 }
 0x229   : > { %1689 = vst [vmem:[%s3335_s20 + $0x20] sm:$0xff] %v1681_v19  ;;  %v1678_v24 = vadd.f32 %v2163_v20, %v1674_v12  ;;  %v1621_v25 = vpop.f32.mrb[2].mxu0  ;;  %v2171_v26 = vadd.f32 %v2170_v2, %v1633_v23  ;;  %v1635_v27 = vpop.f32.mrb[11].mxu1  ;;  %1699 = sbr.rel (!%p2333_p6) target bundleno = 568 (0x238), region = 67 }
 0x22a   : > { %1685 = vst [vmem:[%s3335_s20] sm:$0xff] %v1677_v21  ;;  %1690 = vst [vmem:[%s3335_s20 + $0x28] sm:$0xff] %v1682_v22  ;;  %v2164_v28 = vadd.f32 %v1621_v25, %v1354_v55  ;;  %v1623_v29 = vpop.f32.mrb[3].mxu0  ;;  %v2173_v30 = vadd.f32 %v2172_v4, %v1635_v27 }
 0x22b   : > { %1686 = vst [vmem:[%s3335_s20 + $0x8] sm:$0xff] %v1678_v24  ;;  %v1683_v31 = vadd.f32 %v2171_v26, %v1670_v10  ;;  %v2165_v32 = vadd.f32 %v1623_v29, %v1356_v56 }
 0x22c   : > { %v1679_v33 = vadd.f32 %v2164_v28, %v1670_v10  ;;  %v1684_v34 = vadd.f32 %v2173_v30, %v1674_v12 }
 0x22d   : > { %1691 = vst [vmem:[%s3335_s20 + $0x30] sm:$0xff] %v1683_v31  ;;  %v1680_v35 = vadd.f32 %v2165_v32, %v1674_v12 }
 0x22e   : > { %1687 = vst [vmem:[%s3335_s20 + $0x10] sm:$0xff] %v1679_v33  ;;  %1692 = vst [vmem:[%s3335_s20 + $0x38] sm:$0xff] %v1684_v34 }
 0x22f   : > { %1688 = vst [vmem:[%s3335_s20 + $0x18] sm:$0xff] %v1680_v35 }
 0x230   : > { %v1726_v40 = vld [vmem:[%s3335_s20 + $0x20] sm:$0xff] }
 0x231   : > { %v1718_v36 = vld [vmem:[%s3335_s20] sm:$0xff]  ;;  %v1728_v41 = vld [vmem:[%s3335_s20 + $0x28] sm:$0xff]  ;;  %1727 = vst [vmem:[%s1705_s24 + $0x100] sm:$0xff] %v1726_v40 }
 0x232   : > { %v1720_v37 = vld [vmem:[%s3335_s20 + $0x8] sm:$0xff]  ;;  %1719 = vst [vmem:[%s1705_s24] sm:$0xff] %v1718_v36  ;;  %1729 = vst [vmem:[%s1705_s24 + $0x108] sm:$0xff] %v1728_v41 }
 0x233   : > { %1721 = vst [vmem:[%s1705_s24 + $0x8] sm:$0xff] %v1720_v37 }
 0x234   : > { %v1730_v42 = vld [vmem:[%s3335_s20 + $0x30] sm:$0xff] }
 0x235   : > { %v1722_v38 = vld [vmem:[%s3335_s20 + $0x10] sm:$0xff]  ;;  %v1732_v43 = vld [vmem:[%s3335_s20 + $0x38] sm:$0xff]  ;;  %1731 = vst [vmem:[%s1705_s24 + $0x180] sm:$0xff] %v1730_v42 }
 0x236   : > { %v1724_v39 = vld [vmem:[%s3335_s20 + $0x18] sm:$0xff]  ;;  %1723 = vst [vmem:[%s1705_s24 + $0x80] sm:$0xff] %v1722_v38  ;;  %1733 = vst [vmem:[%s1705_s24 + $0x188] sm:$0xff] %v1732_v43 }
 0x237   : > { %1725 = vst [vmem:[%s1705_s24 + $0x88] sm:$0xff] %v1724_v39 }
 0x238 PF: > { %s13_s16 = sadd.s32 1, %s2275_s16   ;;  %s3379_s12 = smov %s2263_s13 }
 0x239   : > { %p10_p12 = scmp.ge.s32.totalorder %s13_s16, 10   ;;  %s3380_s13 = smov %s2338_s22 }
 0x23a   : > { %s3381_s14 = smov %s2271_s15  ;;  %s3382_s15 = smov %s3384_s17 }
 0x23b   :  { %12 = sbr.rel (!%p10_p12) target bundleno = 3 (0x3), region = 127 }

// kernel: up_block.6
= control target key start
LH: loop header
LB: loop body
LE: loop exit
PB: predicated region body
PF: predicated region fallthrough
CT: control target
= control target key end

     0   :  { %s2497_s1 = inlined_call_operand.vmem [shape: f32[128,128], index: 1, kind: input, shape index: {}]   ;;  %s2498_s0 = inlined_call_operand.vmem [shape: f32[512,128], index: 0, kind: input, shape index: {}]   ;;  %s2499_s2 = inlined_call_operand.vmem [shape: f32[1,128], index: 2, kind: input, shape index: {}]   ;;  %s2500_s3 = inlined_call_operand.vmem [shape: f32[512,128], index: 3, kind: output, shape index: {}]  }
   0x1   :  { %v78_v0 = vld [vmem:[%s2497_s1] sm:$0xff]  ;;  %v79_v1 = vld [vmem:[%s2497_s1 + $0x8] sm:$0xff]  ;;  %v80_v2 = vld [vmem:[%s2497_s1 + $0x10] sm:$0xff] }
   0x2   :  { %v1275_v3 = vpack.c.bf16 %v79_v1, %v78_v0  ;;  %v81_v4 = vld [vmem:[%s2497_s1 + $0x18] sm:$0xff]  ;;  %v82_v6 = vld [vmem:[%s2497_s1 + $0x20] sm:$0xff]  ;;  %v83_v7 = vld [vmem:[%s2497_s1 + $0x28] sm:$0xff] }
   0x3   :  { %v1279_v5 = vpack.c.bf16 %v81_v4, %v80_v2  ;;  %v1283_v8 = vpack.c.bf16 %v83_v7, %v82_v6  ;;  %v1647_v9 = vld [vmem:[%s2498_s0] sm:$0xff]  ;;  %v84_v11 = vld [vmem:[%s2497_s1 + $0x30] sm:$0xff]  ;;  %v85_v12 = vld [vmem:[%s2497_s1 + $0x38] sm:$0xff] }
   0x4   :  { %1276 = vmatprep.subr.bf16.mxu0 %v1275_v3  ;;  %1307 = vmatprep.subr.bf16.mxu1 %v1275_v3  ;;  %v1652_v10 = vld [vmem:[%s2498_s0 + $0x100] sm:$0xff]  ;;  %v1287_v13 = vpack.c.bf16 %v85_v12, %v84_v11  ;;  %v87_v15 = vld [vmem:[%s2497_s1 + $0x48] sm:$0xff]  ;;  %v88_v17 = vld [vmem:[%s2497_s1 + $0x50] sm:$0xff] }
   0x5   :  { %1278 = vmatpush3.bf16.msra.mxu0 %v1275_v3  ;;  %1315 = vmatpush3.bf16.msra.mxu1 %v1275_v3  ;;  %v86_v14 = vld [vmem:[%s2497_s1 + $0x40] sm:$0xff]  ;;  %v89_v18 = vld [vmem:[%s2497_s1 + $0x58] sm:$0xff]  ;;  %v91_v21 = vld [vmem:[%s2497_s1 + $0x68] sm:$0xff] }
   0x6   :  { %1280 = vmatprep.subr.bf16.mxu0 %v1279_v5  ;;  %1308 = vmatprep.subr.bf16.mxu1 %v1279_v5  ;;  %v1291_v16 = vpack.c.bf16 %v87_v15, %v86_v14  ;;  %v1295_v19 = vpack.c.bf16 %v89_v18, %v88_v17  ;;  %v90_v20 = vld [vmem:[%s2497_s1 + $0x60] sm:$0xff]  ;;  %v92_v23 = vld [vmem:[%s2497_s1 + $0x70] sm:$0xff]  ;;  %v93_v24 = vld [vmem:[%s2497_s1 + $0x78] sm:$0xff] }
   0x7   :  { %1179 = vmatprep.mubr.f32.mxu0 %v1647_v9  ;;  %1227 = vmatprep.mubr.f32.mxu1 %v1652_v10  ;;  %v1299_v22 = vpack.c.bf16 %v91_v21, %v90_v20  ;;  %v1303_v25 = vpack.c.bf16 %v93_v24, %v92_v23  ;;  %v1689_v26 = vld [vmem:[%s2498_s0 + $0x8] sm:$0xff]  ;;  %v1699_v28 = vld [vmem:[%s2498_s0 + $0x10] sm:$0xff]  ;;  %v1713_v30 = vld [vmem:[%s2498_s0 + $0x18] sm:$0xff] }
   0x8   :  { %v1694_v27 = vld [vmem:[%s2498_s0 + $0x108] sm:$0xff]  ;;  %v1704_v29 = vld [vmem:[%s2498_s0 + $0x110] sm:$0xff]  ;;  %v1718_v31 = vld [vmem:[%s2498_s0 + $0x118] sm:$0xff] }
   0x9   :  { %1282 = vmatpush3.bf16.msra.mxu0 %v1279_v5  ;;  %1316 = vmatpush3.bf16.msra.mxu1 %v1279_v5  ;;  %v1723_v32 = vld [vmem:[%s2498_s0 + $0x20] sm:$0xff]  ;;  %v1737_v34 = vld [vmem:[%s2498_s0 + $0x28] sm:$0xff]  ;;  %v1747_v36 = vld [vmem:[%s2498_s0 + $0x30] sm:$0xff] }
   0xa   :  { %1284 = vmatprep.subr.bf16.mxu0 %v1283_v8  ;;  %1309 = vmatprep.subr.bf16.mxu1 %v1283_v8  ;;  %v1728_v33 = vld [vmem:[%s2498_s0 + $0x120] sm:$0xff]  ;;  %v1742_v35 = vld [vmem:[%s2498_s0 + $0x128] sm:$0xff]  ;;  %v1752_v37 = vld [vmem:[%s2498_s0 + $0x130] sm:$0xff] }
   0xb   :  { %v1761_v38 = vld [vmem:[%s2498_s0 + $0x38] sm:$0xff]  ;;  %v1771_v40 = vld [vmem:[%s2498_s0 + $0x40] sm:$0xff]  ;;  %v1785_v42 = vld [vmem:[%s2498_s0 + $0x48] sm:$0xff] }
   0xc   :  { %v1766_v39 = vld [vmem:[%s2498_s0 + $0x138] sm:$0xff]  ;;  %v1776_v41 = vld [vmem:[%s2498_s0 + $0x140] sm:$0xff]  ;;  %v1790_v43 = vld [vmem:[%s2498_s0 + $0x148] sm:$0xff] }
   0xd   :  { %1286 = vmatpush3.bf16.msra.mxu0 %v1283_v8  ;;  %1317 = vmatpush3.bf16.msra.mxu1 %v1283_v8  ;;  %v1795_v44 = vld [vmem:[%s2498_s0 + $0x50] sm:$0xff]  ;;  %v1809_v46 = vld [vmem:[%s2498_s0 + $0x58] sm:$0xff]  ;;  %v1819_v48 = vld [vmem:[%s2498_s0 + $0x60] sm:$0xff] }
   0xe   :  { %1288 = vmatprep.subr.bf16.mxu0 %v1287_v13  ;;  %1310 = vmatprep.subr.bf16.mxu1 %v1287_v13  ;;  %v1800_v45 = vld [vmem:[%s2498_s0 + $0x150] sm:$0xff]  ;;  %v1814_v47 = vld [vmem:[%s2498_s0 + $0x158] sm:$0xff]  ;;  %v1824_v49 = vld [vmem:[%s2498_s0 + $0x160] sm:$0xff] }
   0xf   :  { %v1833_v50 = vld [vmem:[%s2498_s0 + $0x68] sm:$0xff]  ;;  %v1843_v52 = vld [vmem:[%s2498_s0 + $0x70] sm:$0xff]  ;;  %v1857_v54 = vld [vmem:[%s2498_s0 + $0x78] sm:$0xff] }
  0x10   :  { %v1838_v51 = vld [vmem:[%s2498_s0 + $0x168] sm:$0xff]  ;;  %v1848_v53 = vld [vmem:[%s2498_s0 + $0x170] sm:$0xff]  ;;  %v1862_v55 = vld [vmem:[%s2498_s0 + $0x178] sm:$0xff] }
  0x11   :  { %1290 = vmatpush3.bf16.msra.mxu0 %v1287_v13  ;;  %1318 = vmatpush3.bf16.msra.mxu1 %v1287_v13  ;;  %v1867_v56 = vld [vmem:[%s2498_s0 + $0x80] sm:$0xff]  ;;  %v1878_v58 = vld [vmem:[%s2498_s0 + $0x88] sm:$0xff]  ;;  %v32_v60 = vld [vmem:[%s2498_s0 + $0x90] sm:$0xff] }
  0x12   :  { %1292 = vmatprep.subr.bf16.mxu0 %v1291_v16  ;;  %1311 = vmatprep.subr.bf16.mxu1 %v1291_v16  ;;  %2506 = vst [vmem:[#allocation2_spill] sm:$0xff] %v1867_v56  ;;  %v62_v57 = vld [vmem:[%s2498_s0 + $0x180] sm:$0xff]  ;;  %2507 = vst [vmem:[#allocation3_spill] sm:$0xff] %v1878_v58  ;;  %v1883_v59 = vld [vmem:[%s2498_s0 + $0x188] sm:$0xff] }
  0x13   :  { %2508 = vst [vmem:[#allocation4_spill] sm:$0xff] %v1883_v59  ;;  %v64_v61 = vld [vmem:[%s2498_s0 + $0x190] sm:$0xff]  ;;  %v1896_v62 = vld [vmem:[%s2498_s0 + $0x98] sm:$0xff]  ;;  %v34_v0 = vld [vmem:[%s2498_s0 + $0xa0] sm:$0xff] }
  0x14   :  { %2509 = vst [vmem:[#allocation5_spill] sm:$0xff] %v1896_v62  ;;  %v1901_v63 = vld [vmem:[%s2498_s0 + $0x198] sm:$0xff]  ;;  %v66_v1 = vld [vmem:[%s2498_s0 + $0x1a0] sm:$0xff]  ;;  %v35_v2 = vld [vmem:[%s2498_s0 + $0xa8] sm:$0xff] }
  0x15   :  { %1294 = vmatpush3.bf16.msra.mxu0 %v1291_v16  ;;  %1319 = vmatpush3.bf16.msra.mxu1 %v1291_v16  ;;  %2510 = vst [vmem:[#allocation6_spill] sm:$0xff] %v1901_v63  ;;  %v67_v3 = vld [vmem:[%s2498_s0 + $0x1a8] sm:$0xff]  ;;  %v36_v4 = vld [vmem:[%s2498_s0 + $0xb0] sm:$0xff]  ;;  %v37_v6 = vld [vmem:[%s2498_s0 + $0xb8] sm:$0xff] }
  0x16   :  { %1296 = vmatprep.subr.bf16.mxu0 %v1295_v19  ;;  %1312 = vmatprep.subr.bf16.mxu1 %v1295_v19  ;;  %v68_v5 = vld [vmem:[%s2498_s0 + $0x1b0] sm:$0xff]  ;;  %v69_v7 = vld [vmem:[%s2498_s0 + $0x1b8] sm:$0xff]  ;;  %v38_v8 = vld [vmem:[%s2498_s0 + $0xc0] sm:$0xff] }
  0x17   :  { %v70_v11 = vld [vmem:[%s2498_s0 + $0x1c0] sm:$0xff]  ;;  %v39_v12 = vld [vmem:[%s2498_s0 + $0xc8] sm:$0xff]  ;;  %v40_v14 = vld [vmem:[%s2498_s0 + $0xd0] sm:$0xff] }
  0x18   :  { %v71_v13 = vld [vmem:[%s2498_s0 + $0x1c8] sm:$0xff]  ;;  %v72_v15 = vld [vmem:[%s2498_s0 + $0x1d0] sm:$0xff]  ;;  %v41_v16 = vld [vmem:[%s2498_s0 + $0xd8] sm:$0xff] }
  0x19   :  { %1298 = vmatpush3.bf16.msra.mxu0 %v1295_v19  ;;  %1320 = vmatpush3.bf16.msra.mxu1 %v1295_v19  ;;  %v73_v17 = vld [vmem:[%s2498_s0 + $0x1d8] sm:$0xff]  ;;  %v42_v18 = vld [vmem:[%s2498_s0 + $0xe0] sm:$0xff]  ;;  %v43_v20 = vld [vmem:[%s2498_s0 + $0xe8] sm:$0xff] }
  0x1a   :  { %1300 = vmatprep.subr.bf16.mxu0 %v1299_v22  ;;  %1313 = vmatprep.subr.bf16.mxu1 %v1299_v22  ;;  %v74_v19 = vld [vmem:[%s2498_s0 + $0x1e0] sm:$0xff]  ;;  %v75_v21 = vld [vmem:[%s2498_s0 + $0x1e8] sm:$0xff]  ;;  %v76_v23 = vld [vmem:[%s2498_s0 + $0x1f0] sm:$0xff] }
  0x1b   :  { %v45_v24 = vld [vmem:[%s2498_s0 + $0xf8] sm:$0xff] }
  0x1d   :  { %1302 = vmatpush3.bf16.msra.mxu0 %v1299_v22  ;;  %1321 = vmatpush3.bf16.msra.mxu1 %v1299_v22  ;;  %v44_v22 = vld [vmem:[%s2498_s0 + $0xf0] sm:$0xff] }
  0x1e   :  { %1304 = vmatprep.subr.bf16.mxu0 %v1303_v25  ;;  %1314 = vmatprep.subr.bf16.mxu1 %v1303_v25 }
  0x21   :  { %1306 = vmatpush3.bf16.msra.mxu0 %v1303_v25  ;;  %1322 = vmatpush3.bf16.msra.mxu1 %v1303_v25  ;;  %v77_v25 = vld [vmem:[%s2498_s0 + $0x1f8] sm:$0xff] }
  0x24   :  { %1180 = vmatmul.mubr.f32.vlgmr.msra.gmra.mrb[0].mxu0 %v1689_v26  ;;  %1228 = vmatmul.mubr.f32.vlgmr.msra.gmra.mrb[0].mxu1 %v1694_v27 }
  0x25   :  { %1182 = vmatprep.mubr.f32.mxu0 %v1699_v28  ;;  %1230 = vmatprep.mubr.f32.mxu1 %v1704_v29 }
  0x28   :  { %1183 = vmatmul.mubr.f32.gmra.mrb[2].mxu0 %v1713_v30  ;;  %1231 = vmatmul.mubr.f32.gmra.mrb[2].mxu1 %v1718_v31 }
  0x29   :  { %1185 = vmatprep.mubr.f32.mxu0 %v1723_v32  ;;  %1233 = vmatprep.mubr.f32.mxu1 %v1728_v33 }
  0x2c   :  { %1186 = vmatmul.mubr.f32.gmra.mrb[4].mxu0 %v1737_v34  ;;  %1234 = vmatmul.mubr.f32.gmra.mrb[4].mxu1 %v1742_v35 }
  0x2d   :  { %1188 = vmatprep.mubr.f32.mxu0 %v1747_v36  ;;  %1236 = vmatprep.mubr.f32.mxu1 %v1752_v37 }
  0x30   :  { %1189 = vmatmul.mubr.f32.gmra.mrb[6].mxu0 %v1761_v38  ;;  %1237 = vmatmul.mubr.f32.gmra.mrb[6].mxu1 %v1766_v39 }
  0x31   :  { %1191 = vmatprep.mubr.f32.mxu0 %v1771_v40  ;;  %1239 = vmatprep.mubr.f32.mxu1 %v1776_v41 }
  0x34   :  { %1192 = vmatmul.mubr.f32.gmra.mrb[8].mxu0 %v1785_v42  ;;  %1240 = vmatmul.mubr.f32.gmra.mrb[8].mxu1 %v1790_v43 }
  0x35   :  { %1194 = vmatprep.mubr.f32.mxu0 %v1795_v44  ;;  %1242 = vmatprep.mubr.f32.mxu1 %v1800_v45 }
  0x38   :  { %1195 = vmatmul.mubr.f32.gmra.mrb[10].mxu0 %v1809_v46  ;;  %1243 = vmatmul.mubr.f32.gmra.mrb[10].mxu1 %v1814_v47 }
  0x39   :  { %1197 = vmatprep.mubr.f32.mxu0 %v1819_v48  ;;  %1245 = vmatprep.mubr.f32.mxu1 %v1824_v49 }
  0x3c   :  { %1198 = vmatmul.mubr.f32.gmra.mrb[12].mxu0 %v1833_v50  ;;  %1246 = vmatmul.mubr.f32.gmra.mrb[12].mxu1 %v1838_v51 }
  0x3d   :  { %1200 = vmatprep.mubr.f32.mxu0 %v1843_v52  ;;  %1248 = vmatprep.mubr.f32.mxu1 %v1848_v53 }
  0x40   :  { %1201 = vmatmul.mubr.f32.gmra.mrb[14].mxu0 %v1857_v54  ;;  %1249 = vmatmul.mubr.f32.gmra.mrb[14].mxu1 %v1862_v55 }
  0x41   :  { %1203 = vmatprep.mubr.f32.mxu0 %v1867_v56  ;;  %1251 = vmatprep.mubr.f32.mxu1 %v62_v57  ;;  %v1980_v57 = vld [vmem:[%s2499_s2] ss:$0 sm:$0xff] }
  0x44   :  { %1204 = vmatmul.mubr.f32.gmra.mrb[16].mxu0 %v1878_v58  ;;  %1252 = vmatmul.mubr.f32.gmra.mrb[16].mxu1 %v1883_v59 }
  0x45   :  { %1206 = vmatprep.mubr.f32.mxu0 %v32_v60  ;;  %1254 = vmatprep.mubr.f32.mxu1 %v64_v61 }
  0x48   :  { %1207 = vmatmul.mubr.f32.gmra.mrb[18].mxu0 %v1896_v62  ;;  %1255 = vmatmul.mubr.f32.gmra.mrb[18].mxu1 %v1901_v63 }
  0x49   :  { %1209 = vmatprep.mubr.f32.mxu0 %v34_v0  ;;  %1257 = vmatprep.mubr.f32.mxu1 %v66_v1 }
  0x4c   :  { %1210 = vmatmul.mubr.f32.gmra.mrb[20].mxu0 %v35_v2  ;;  %1258 = vmatmul.mubr.f32.gmra.mrb[20].mxu1 %v67_v3 }
  0x4d   :  { %1212 = vmatprep.mubr.f32.mxu0 %v36_v4  ;;  %1260 = vmatprep.mubr.f32.mxu1 %v68_v5 }
  0x50   :  { %1213 = vmatmul.mubr.f32.gmra.mrb[22].mxu0 %v37_v6  ;;  %1261 = vmatmul.mubr.f32.gmra.mrb[22].mxu1 %v69_v7 }
  0x51   :  { %1215 = vmatprep.mubr.f32.mxu0 %v38_v8  ;;  %1263 = vmatprep.mubr.f32.mxu1 %v70_v11 }
  0x54   :  { %1216 = vmatmul.mubr.f32.gmra.mrb[24].mxu0 %v39_v12  ;;  %1264 = vmatmul.mubr.f32.gmra.mrb[24].mxu1 %v71_v13 }
  0x55   :  { %1218 = vmatprep.mubr.f32.mxu0 %v40_v14  ;;  %1266 = vmatprep.mubr.f32.mxu1 %v72_v15 }
  0x58   :  { %1219 = vmatmul.mubr.f32.gmra.mrb[26].mxu0 %v41_v16  ;;  %1267 = vmatmul.mubr.f32.gmra.mrb[26].mxu1 %v73_v17 }
  0x59   :  { %1221 = vmatprep.mubr.f32.mxu0 %v42_v18  ;;  %1269 = vmatprep.mubr.f32.mxu1 %v74_v19 }
  0x5c   :  { %1222 = vmatmul.mubr.f32.gmra.mrb[28].mxu0 %v43_v20  ;;  %1270 = vmatmul.mubr.f32.gmra.mrb[28].mxu1 %v75_v21 }
  0x5d   :  { %1224 = vmatprep.mubr.f32.mxu0 %v44_v22  ;;  %1272 = vmatprep.mubr.f32.mxu1 %v76_v23 }
  0x60   :  { %1225 = vmatmul.mubr.f32.gmra.mrb[30].mxu0 %v45_v24  ;;  %1273 = vmatmul.mubr.f32.gmra.mrb[30].mxu1 %v77_v25 }
  0xf7   :  { %v1181_v60 = vpop.f32.mrb[0].mxu0  ;;  %v1229_v61 = vpop.f32.mrb[0].mxu1 }
  0xf8   :  { %v173_v0 = vadd.f32 %v1181_v60, %v1980_v57  ;;  %v333_v1 = vadd.f32 %v1229_v61, %v1980_v57  ;;  %v167_v2 = vpop.f32.mrb[1].mxu0  ;;  %v327_v3 = vpop.f32.mrb[1].mxu1 }
  0xf9   :  { %v168_v4 = vadd.f32 %v1980_v57, %v167_v2  ;;  %v328_v5 = vadd.f32 %v1980_v57, %v327_v3 }
  0xfa   :  { %v1004_v6 = vmul.f32 -1.442695, %v173_v0  ;;  %v1036_v7 = vmul.f32 -1.442695, %v333_v1 }
  0xfb   :  { %v1003_v8 = vmul.f32 -1.442695, %v168_v4  ;;  %v1035_v11 = vmul.f32 -1.442695, %v328_v5  ;;  %v1184_v12 = vpop.f32.mrb[2].mxu0  ;;  %v1232_v13 = vpop.f32.mrb[2].mxu1 }
  0xfc   :  { %1323 = vpow2.f32 %v1004_v6  ;;  %v183_v14 = vadd.f32 %v1184_v12, %v1980_v57  ;;  %v343_v15 = vadd.f32 %v1232_v13, %v1980_v57  ;;  %v177_v16 = vpop.f32.mrb[3].mxu0  ;;  %v337_v17 = vpop.f32.mrb[3].mxu1 }
  0xfd   :  { %1325 = vpow2.f32 %v1036_v7  ;;  %v178_v18 = vadd.f32 %v1980_v57, %v177_v16  ;;  %v338_v19 = vadd.f32 %v1980_v57, %v337_v17 }
  0xfe   :  { %1327 = vpow2.f32 %v1003_v8  ;;  %v1006_v20 = vmul.f32 -1.442695, %v183_v14  ;;  %v1038_v21 = vmul.f32 -1.442695, %v343_v15 }
  0xff   :  { %1329 = vpow2.f32 %v1035_v11  ;;  %v1005_v22 = vmul.f32 -1.442695, %v178_v18  ;;  %v1037_v23 = vmul.f32 -1.442695, %v338_v19  ;;  %v1187_v24 = vpop.f32.mrb[4].mxu0  ;;  %v1235_v25 = vpop.f32.mrb[4].mxu1 }
 0x100   :  { %1331 = vpow2.f32 %v1006_v20  ;;  %v193_v60 = vadd.f32 %v1187_v24, %v1980_v57  ;;  %v353_v61 = vadd.f32 %v1235_v25, %v1980_v57  ;;  %v187_v0 = vpop.f32.mrb[5].mxu0  ;;  %v347_v1 = vpop.f32.mrb[5].mxu1 }
 0x101   :  { %1333 = vpow2.f32 %v1038_v21  ;;  %v188_v2 = vadd.f32 %v1980_v57, %v187_v0  ;;  %v348_v3 = vadd.f32 %v1980_v57, %v347_v1 }
 0x102   :  { %1335 = vpow2.f32 %v1005_v22  ;;  %v1008_v4 = vmul.f32 -1.442695, %v193_v60  ;;  %v1040_v5 = vmul.f32 -1.442695, %v353_v61 }
 0x103   :  { %1337 = vpow2.f32 %v1037_v23  ;;  %v1007_v6 = vmul.f32 -1.442695, %v188_v2  ;;  %v1039_v7 = vmul.f32 -1.442695, %v348_v3  ;;  %v1190_v8 = vpop.f32.mrb[6].mxu0  ;;  %v1238_v11 = vpop.f32.mrb[6].mxu1 }
 0x104   :  { %1339 = vpow2.f32 %v1008_v4  ;;  %v203_v12 = vadd.f32 %v1190_v8, %v1980_v57  ;;  %v197_v13 = vpop.f32.mrb[7].mxu0  ;;  %v357_v14 = vpop.f32.mrb[7].mxu1 }
 0x105   :  { %1341 = vpow2.f32 %v1040_v5 }
 0x106   :  { %v1324_v15 = vpop.eup %1323  ;;  %1343 = vpow2.f32 %v1007_v6  ;;  %v1010_v16 = vmul.f32 -1.442695, %v203_v12 }
 0x107   :  { %v1326_v17 = vpop.eup %1325  ;;  %v679_v18 = vadd.f32 1.0, %v1324_v15  ;;  %1345 = vpow2.f32 %v1039_v7  ;;  %v1193_v19 = vpop.f32.mrb[8].mxu0 }
 0x108   :  { %v1328_v20 = vpop.eup %1327  ;;  %v711_v21 = vadd.f32 1.0, %v1326_v17  ;;  %1347 = vpow2.f32 %v1010_v16  ;;  %v1241_v22 = vpop.f32.mrb[8].mxu1 }
 0x109   :  { %v207_v23 = vpop.f32.mrb[9].mxu0  ;;  %v1330_v24 = vpop.eup %1329  ;;  %1349 = vrcp.f32 %v679_v18  ;;  %v678_v25 = vadd.f32 1.0, %v1328_v20  ;;  %v363_v18 = vadd.f32 %v1238_v11, %v1980_v57  ;;  %v213_v11 = vadd.f32 %v1193_v19, %v1980_v57 }
 0x10a   :  { %v367_v60 = vpop.f32.mrb[9].mxu1  ;;  %v1332_v61 = vpop.eup %1331  ;;  %1351 = vrcp.f32 %v711_v21  ;;  %v710_v0 = vadd.f32 1.0, %v1330_v24  ;;  %v198_v24 = vadd.f32 %v1980_v57, %v197_v13  ;;  %v208_v56 = vadd.f32 %v1980_v57, %v207_v23 }
 0x10b   :  { %v1334_v1 = vpop.eup %1333  ;;  %1353 = vrcp.f32 %v678_v25  ;;  %v681_v2 = vadd.f32 1.0, %v1332_v61  ;;  %v1196_v3 = vpop.f32.mrb[10].mxu0  ;;  %v1042_v63 = vmul.f32 -1.442695, %v363_v18  ;;  %v368_v58 = vadd.f32 %v1980_v57, %v367_v60 }
 0x10c   :  { %v1336_v4 = vpop.eup %1335  ;;  %1355 = vrcp.f32 %v710_v0  ;;  %v713_v5 = vadd.f32 1.0, %v1334_v1  ;;  %v1244_v6 = vpop.f32.mrb[10].mxu1  ;;  %v358_v1 = vadd.f32 %v1980_v57, %v357_v14  ;;  %v1009_v62 = vmul.f32 -1.442695, %v198_v24 }
 0x10d   :  { %v217_v7 = vpop.f32.mrb[11].mxu0  ;;  %v1338_v8 = vpop.eup %1337  ;;  %1357 = vrcp.f32 %v681_v2  ;;  %v680_v12 = vadd.f32 1.0, %v1336_v4  ;;  %v1012_v24 = vmul.f32 -1.442695, %v213_v11  ;;  %v223_v23 = vadd.f32 %v1196_v3, %v1980_v57 }
 0x10e   :  { %v1995_v15 = vpop.f32.mrb[11].mxu1  ;;  %v1340_v16 = vpop.eup %1339  ;;  %1359 = vrcp.f32 %v713_v5  ;;  %v712_v17 = vadd.f32 1.0, %v1338_v8  ;;  %v1041_v19 = vmul.f32 -1.442695, %v358_v1  ;;  %v383_v1 = vadd.f32 %v1244_v6, %v1980_v57 }
 0x10f   :  { %v1342_v20 = vpop.eup %1341  ;;  %1361 = vrcp.f32 %v680_v12  ;;  %v683_v21 = vadd.f32 1.0, %v1340_v16  ;;  %v1999_v25 = vpop.f32.mrb[12].mxu0  ;;  %v1011_v3 = vmul.f32 -1.442695, %v208_v56  ;;  %v218_v11 = vadd.f32 %v1980_v57, %v217_v7 }
 0x110   :  { %v1344_v61 = vpop.eup %1343  ;;  %1363 = vrcp.f32 %v712_v17  ;;  %v715_v0 = vadd.f32 1.0, %v1342_v20  ;;  %v2002_v2 = vpop.f32.mrb[12].mxu1  ;;  %v373_v17 = vadd.f32 %v1241_v22, %v1980_v57  ;;  %v1043_v6 = vmul.f32 -1.442695, %v368_v58 }
 0x111   :  { %v2004_v4 = vpop.f32.mrb[13].mxu0  ;;  %v1346_v5 = vpop.eup %1345  ;;  %1365 = vrcp.f32 %v683_v21  ;;  %v682_v8 = vadd.f32 1.0, %v1344_v61 }
 0x112   :  { %v2007_v12 = vpop.f32.mrb[13].mxu1  ;;  %v1348_v16 = vpop.eup %1347  ;;  %1367 = vrcp.f32 %v715_v0  ;;  %v714_v13 = vadd.f32 1.0, %v1346_v5  ;;  %v1044_v60 = vmul.f32 -1.442695, %v373_v17 }
 0x113   :  { %v1350_v20 = vpop.eup %1349  ;;  %1369 = vrcp.f32 %v682_v8  ;;  %v685_v14 = vadd.f32 1.0, %v1348_v16  ;;  %v2011_v59 = vpop.f32.mrb[14].mxu0 }
 0x114   :  { %v1352_v21 = vpop.eup %1351  ;;  %v871_v61 = vmul.f32 %v1350_v20, %v1689_v26  ;;  %1371 = vrcp.f32 %v714_v13  ;;  %v2015_v0 = vpop.f32.mrb[14].mxu1 }
 0x115   :  { %v2017_v18 = vpop.f32.mrb[15].mxu0  ;;  %v1354_v22 = vpop.eup %1353  ;;  %v903_v5 = vmul.f32 %v1352_v21, %v1694_v27  ;;  %1373 = vrcp.f32 %v685_v14  ;;  %v1014_v21 = vmul.f32 -1.442695, %v223_v23 }
 0x116   :  { %v2021_v8 = vpop.f32.mrb[15].mxu1  ;;  %v1356_v16 = vpop.eup %1355  ;;  %935 = vst [vmem:[%s2500_s3 + $0x8] sm:$0xff] %v871_v61  ;;  %v870_v26 = vmul.f32 %v1354_v22, %v1647_v9  ;;  %1375 = vpow2.f32 %v1042_v63  ;;  %v1046_v61 = vmul.f32 -1.442695, %v383_v1 }
 0x117   :  { %v1358_v13 = vpop.eup %1357  ;;  %967 = vst [vmem:[%s2500_s3 + $0x108] sm:$0xff] %v903_v5  ;;  %v902_v27 = vmul.f32 %v1356_v16, %v1652_v10  ;;  %1377 = vpow2.f32 %v1009_v62  ;;  %v2033_v20 = vpop.f32.mrb[16].mxu0  ;;  %v378_v10 = vadd.f32 %v1980_v57, %v1995_v15  ;;  %v228_v16 = vadd.f32 %v1980_v57, %v2004_v4 }
 0x118   :  { %v2035_v14 = vpop.f32.mrb[16].mxu1  ;;  %v1360_v9 = vpop.eup %1359  ;;  %934 = vst [vmem:[%s2500_s3] sm:$0xff] %v870_v26  ;;  %v873_v63 = vmul.f32 %v1358_v13, %v1713_v30  ;;  %1379 = vpow2.f32 %v1041_v19  ;;  %v233_v30 = vadd.f32 %v1999_v25, %v1980_v57  ;;  %v393_v19 = vadd.f32 %v2002_v2, %v1980_v57 }
 0x119   :  { %v2043_v62 = vpop.f32.mrb[17].mxu0  ;;  %v2045_v56 = vpop.f32.mrb[17].mxu1  ;;  %966 = vst [vmem:[%s2500_s3 + $0x100] sm:$0xff] %v902_v27  ;;  %v905_v17 = vmul.f32 %v1360_v9, %v1718_v31  ;;  %1381 = vpow2.f32 %v1012_v24  ;;  %v1013_v25 = vmul.f32 -1.442695, %v218_v11 }
 0x11a   :  { %v1362_v7 = vpop.eup %1361  ;;  %937 = vst [vmem:[%s2500_s3 + $0x18] sm:$0xff] %v873_v63  ;;  %1383 = vpow2.f32 %v1044_v60  ;;  %v1045_v2 = vmul.f32 -1.442695, %v378_v10  ;;  %v1016_v13 = vmul.f32 -1.442695, %v233_v30  ;;  %v388_v63 = vadd.f32 %v1980_v57, %v2007_v12 }
 0x11b   :  { %v1364_v58 = vpop.eup %1363  ;;  %v872_v15 = vmul.f32 %v1362_v7, %v1699_v28  ;;  %969 = vst [vmem:[%s2500_s3 + $0x118] sm:$0xff] %v905_v17  ;;  %1385 = vpow2.f32 %v1011_v3  ;;  %v2063_v5 = vpop.f32.mrb[18].mxu0  ;;  %v1048_v3 = vmul.f32 -1.442695, %v393_v19  ;;  %v2112_v19 = vmul.f32 -1.442695, %v228_v16 }
 0x11c   :  { %v1366_v22 = vpop.eup %1365  ;;  %v904_v31 = vmul.f32 %v1364_v58, %v1704_v29  ;;  %v2065_v24 = vpop.f32.mrb[18].mxu1  ;;  %1387 = vpow2.f32 %v1043_v6 }
 0x11d   :  { %v1368_v23 = vpop.eup %1367  ;;  %936 = vst [vmem:[%s2500_s3 + $0x10] sm:$0xff] %v872_v15  ;;  %v875_v28 = vmul.f32 %v1366_v22, %v1737_v34  ;;  %v257_v26 = vpop.f32.mrb[19].mxu0  ;;  %1389 = vpow2.f32 %v1014_v21 }
 0x11e   :  { %v417_v29 = vpop.f32.mrb[19].mxu1  ;;  %v1370_v60 = vpop.eup %1369  ;;  %968 = vst [vmem:[%s2500_s3 + $0x110] sm:$0xff] %v904_v31  ;;  %v907_v1 = vmul.f32 %v1368_v23, %v1742_v35  ;;  %v2078_v27 = vadd.f32 %v1980_v57, %v257_v26  ;;  %1391 = vpow2.f32 %v1046_v61  ;;  %v2117_v23 = vmul.f32 -1.442695, %v388_v63 }
 0x11f   :  { %v1372_v34 = vpop.eup %1371  ;;  %939 = vst [vmem:[%s2500_s3 + $0x28] sm:$0xff] %v875_v28  ;;  %v874_v4 = vmul.f32 %v1370_v60, %v1723_v32  ;;  %v2085_v11 = vadd.f32 %v1980_v57, %v417_v29  ;;  %1393 = vpow2.f32 %v1013_v25  ;;  %v1211_v6 = vpop.f32.mrb[20].mxu0  ;;  %v243_v28 = vadd.f32 %v2011_v59, %v1980_v57 }
 0x120   :  { %v1374_v9 = vpop.eup %1373  ;;  %971 = vst [vmem:[%s2500_s3 + $0x128] sm:$0xff] %v907_v1  ;;  %v906_v35 = vmul.f32 %v1372_v34, %v1728_v33  ;;  %v1259_v10 = vpop.f32.mrb[20].mxu1  ;;  %1395 = vpow2.f32 %v1045_v2  ;;  %v2098_v17 = vadd.f32 %v1211_v6, %v1980_v57  ;;  %v403_v60 = vadd.f32 %v2015_v0, %v1980_v57 }
 0x121   :  { %v1376_v7 = vpop.eup %1375  ;;  %938 = vst [vmem:[%s2500_s3 + $0x20] sm:$0xff] %v874_v4  ;;  %v877_v32 = vmul.f32 %v1374_v9, %v1761_v38  ;;  %v267_v21 = vpop.f32.mrb[21].mxu0  ;;  %1397 = vpow2.f32 %v1016_v13  ;;  %v2104_v58 = vadd.f32 %v1259_v10, %v1980_v57  ;;  %v238_v0 = vadd.f32 %v1980_v57, %v2017_v18 }
 0x122   :  { %v427_v30 = vpop.f32.mrb[21].mxu1  ;;  %v1378_v33 = vpop.eup %1377  ;;  %970 = vst [vmem:[%s2500_s3 + $0x120] sm:$0xff] %v906_v35  ;;  %v717_v12 = vadd.f32 1.0, %v1376_v7  ;;  %v2107_v15 = vadd.f32 %v1980_v57, %v267_v21  ;;  %1399 = vpow2.f32 %v1048_v3  ;;  %v398_v21 = vadd.f32 %v1980_v57, %v2021_v8 }
 0x123   :  { %v1380_v38 = vpop.eup %1379  ;;  %941 = vst [vmem:[%s2500_s3 + $0x38] sm:$0xff] %v877_v32  ;;  %v684_v61 = vadd.f32 1.0, %v1378_v33  ;;  %v2115_v22 = vadd.f32 %v1980_v57, %v427_v30  ;;  %v1214_v2 = vpop.f32.mrb[22].mxu0  ;;  %v2137_v32 = vmul.f32 -1.442695, %v243_v28 }
 0x124   :  { %v1382_v31 = vpop.eup %1381  ;;  %1401 = vrcp.f32 %v717_v12  ;;  %v716_v25 = vadd.f32 1.0, %v1380_v38  ;;  %v2124_v16 = vadd.f32 %v1214_v2, %v1980_v57  ;;  %v1262_v1 = vpop.f32.mrb[22].mxu1  ;;  %v2141_v38 = vmul.f32 -1.442695, %v403_v60 }
 0x125   :  { %v1384_v26 = vpop.eup %1383  ;;  %1403 = vrcp.f32 %v684_v61  ;;  %v687_v29 = vadd.f32 1.0, %v1382_v31  ;;  %v277_v13 = vpop.f32.mrb[23].mxu0  ;;  %v2127_v3 = vadd.f32 %v1262_v1, %v1980_v57  ;;  %v2152_v60 = vmul.f32 -1.442695, %v238_v0 }
 0x126   :  { %v1386_v34 = vpop.eup %1385  ;;  %1405 = vrcp.f32 %v716_v25  ;;  %v719_v4 = vadd.f32 1.0, %v1384_v26  ;;  %v2130_v59 = vadd.f32 %v1980_v57, %v277_v13  ;;  %v437_v9 = vpop.f32.mrb[23].mxu1 }
 0x127   :  { %v1388_v35 = vpop.eup %1387  ;;  %1407 = vrcp.f32 %v687_v29  ;;  %v686_v63 = vadd.f32 1.0, %v1386_v34  ;;  %v2135_v6 = vadd.f32 %v1980_v57, %v437_v9  ;;  %v1217_v30 = vpop.f32.mrb[24].mxu0  ;;  %v2157_v9 = vmul.f32 -1.442695, %v398_v21 }
 0x128   :  { %v1390_v10 = vpop.eup %1389  ;;  %1409 = vrcp.f32 %v719_v4  ;;  %v718_v7 = vadd.f32 1.0, %v1388_v35  ;;  %v2144_v61 = vadd.f32 %v1217_v30, %v1980_v57  ;;  %v1265_v18 = vpop.f32.mrb[24].mxu1  ;;  %v253_v35 = vadd.f32 %v2033_v20, %v1980_v57 }
 0x129   :  { %v1392_v33 = vpop.eup %1391  ;;  %1411 = vrcp.f32 %v686_v63  ;;  %v689_v12 = vadd.f32 1.0, %v1390_v10  ;;  %v287_v31 = vpop.f32.mrb[25].mxu0  ;;  %v2147_v28 = vadd.f32 %v1265_v18, %v1980_v57  ;;  %v413_v30 = vadd.f32 %v2035_v14, %v1980_v57 }
 0x12a   :  { %v1394_v25 = vpop.eup %1393  ;;  %1413 = vrcp.f32 %v718_v7  ;;  %v721_v2 = vadd.f32 1.0, %v1392_v33  ;;  %v2150_v26 = vadd.f32 %v1980_v57, %v287_v31  ;;  %v447_v8 = vpop.f32.mrb[25].mxu1  ;;  %v248_v14 = vadd.f32 %v1980_v57, %v2043_v62 }
 0x12b   :  { %v1396_v29 = vpop.eup %1395  ;;  %1415 = vrcp.f32 %v689_v12  ;;  %v688_v1 = vadd.f32 1.0, %v1394_v25  ;;  %v2155_v13 = vadd.f32 %v1980_v57, %v447_v8  ;;  %v1220_v63 = vpop.f32.mrb[26].mxu0  ;;  %v1052_v62 = vmul.f32 -1.442695, %v413_v30 }
 0x12c   :  { %v1398_v34 = vpop.eup %1397  ;;  %1417 = vrcp.f32 %v721_v2  ;;  %v720_v4 = vadd.f32 1.0, %v1396_v29  ;;  %v2164_v0 = vadd.f32 %v1220_v63, %v1980_v57  ;;  %v1268_v33 = vpop.f32.mrb[26].mxu1  ;;  %v408_v63 = vadd.f32 %v1980_v57, %v2045_v56 }
 0x12d   :  { %v1400_v10 = vpop.eup %1399  ;;  %1419 = vrcp.f32 %v688_v1  ;;  %v691_v7 = vadd.f32 1.0, %v1398_v34  ;;  %v297_v12 = vpop.f32.mrb[27].mxu0  ;;  %v2167_v21 = vadd.f32 %v1268_v33, %v1980_v57 }
 0x12e   :  { %v1402_v18 = vpop.eup %1401  ;;  %1421 = vrcp.f32 %v720_v4  ;;  %v723_v31 = vadd.f32 1.0, %v1400_v10  ;;  %v2170_v20 = vadd.f32 %v1980_v57, %v297_v12  ;;  %v457_v25 = vpop.f32.mrb[27].mxu1  ;;  %v1020_v4 = vmul.f32 -1.442695, %v253_v35 }
 0x12f   :  { %v1404_v2 = vpop.eup %1403  ;;  %v909_v8 = vmul.f32 %v1402_v18, %v1766_v39  ;;  %1423 = vrcp.f32 %v691_v7  ;;  %v2176_v29 = vadd.f32 %v1980_v57, %v457_v25  ;;  %v1223_v10 = vpop.f32.mrb[28].mxu0 }
 0x130   :  { %v1406_v1 = vpop.eup %1405  ;;  %v876_v34 = vmul.f32 %v1404_v2, %v1747_v36  ;;  %1425 = vrcp.f32 %v723_v31  ;;  %v1271_v33 = vpop.f32.mrb[28].mxu1  ;;  %v2187_v7 = vadd.f32 %v1223_v10, %v1980_v57  ;;  %v1051_v10 = vmul.f32 -1.442695, %v408_v63 }
 0x131   :  { %v1408_v12 = vpop.eup %1407  ;;  %973 = vst [vmem:[%s2500_s3 + $0x138] sm:$0xff] %v909_v8  ;;  %v908_v39 = vmul.f32 %v1406_v1, %v1752_v37  ;;  %1427 = vpow2.f32 %v2112_v19  ;;  %v307_v36 = vpop.f32.mrb[29].mxu0  ;;  %v2195_v31 = vadd.f32 %v1271_v33, %v1980_v57  ;;  %v1019_v8 = vmul.f32 -1.442695, %v248_v14 }
 0x132   :  { %v467_v35 = vpop.f32.mrb[29].mxu1  ;;  %v1410_v18 = vpop.eup %1409  ;;  %940 = vst [vmem:[%s2500_s3 + $0x30] sm:$0xff] %v876_v34  ;;  %v879_v56 = vmul.f32 %v1408_v12, %v1785_v42  ;;  %1429 = vpow2.f32 %v2117_v23  ;;  %v2198_v37 = vadd.f32 %v1980_v57, %v307_v36  ;;  %v263_v42 = vadd.f32 %v2063_v5, %v1980_v57 }
 0x133   :  { %v1412_v19 = vpop.eup %1411  ;;  %972 = vst [vmem:[%s2500_s3 + $0x130] sm:$0xff] %v908_v39  ;;  %v911_v30 = vmul.f32 %v1410_v18, %v1790_v43  ;;  %1431 = vpow2.f32 %v2137_v32  ;;  %v2208_v23 = vadd.f32 %v1980_v57, %v467_v35  ;;  %v423_v43 = vadd.f32 %v2065_v24, %v1980_v57  ;;  %v1226_v32 = vpop.f32.mrb[30].mxu0 }
 0x134   :  { %v1414_v25 = vpop.eup %1413  ;;  %943 = vst [vmem:[%s2500_s3 + $0x48] sm:$0xff] %v879_v56  ;;  %v878_v2 = vmul.f32 %v1412_v19, %v1771_v40  ;;  %1433 = vpow2.f32 %v2141_v38  ;;  %v1274_v1 = vpop.f32.mrb[30].mxu1  ;;  %v2223_v40 = vadd.f32 %v1226_v32, %v1980_v57  ;;  %v1022_v39 = vmul.f32 -1.442695, %v263_v42 }
 0x135   :  { %v1416_v34 = vpop.eup %1415  ;;  %975 = vst [vmem:[%s2500_s3 + $0x148] sm:$0xff] %v911_v30  ;;  %v910_v5 = vmul.f32 %v1414_v25, %v1776_v41  ;;  %1435 = vpow2.f32 %v2152_v60  ;;  %v317_v38 = vpop.f32.mrb[31].mxu0  ;;  %v2231_v12 = vadd.f32 %v1274_v1, %v1980_v57  ;;  %v1054_v35 = vmul.f32 -1.442695, %v423_v43 }
 0x136   :  { %v477_v14 = vpop.f32.mrb[31].mxu1  ;;  %v1418_v33 = vpop.eup %1417  ;;  %942 = vst [vmem:[%s2500_s3 + $0x40] sm:$0xff] %v878_v2  ;;  %v881_v24 = vmul.f32 %v1416_v34, %v1809_v46  ;;  %1437 = vpow2.f32 %v2157_v9  ;;  %v2234_v41 = vadd.f32 %v1980_v57, %v317_v38 }
 0x137   :  { %v1420_v60 = vpop.eup %1419  ;;  %974 = vst [vmem:[%s2500_s3 + $0x140] sm:$0xff] %v910_v5  ;;  %v913_v63 = vmul.f32 %v1418_v33, %v1814_v47  ;;  %1439 = vpow2.f32 %v1020_v4  ;;  %v2241_v36 = vadd.f32 %v1980_v57, %v477_v14  ;;  %v1021_v57 = vmul.f32 -1.442695, %v2078_v27 }
 0x138   :  { %v1422_v46 = vpop.eup %1421  ;;  %945 = vst [vmem:[%s2500_s3 + $0x58] sm:$0xff] %v881_v24  ;;  %v880_v9 = vmul.f32 %v1420_v60, %v1795_v44  ;;  %1441 = vpow2.f32 %v1052_v62 }
 0x139   :  { %v1424_v18 = vpop.eup %1423  ;;  %977 = vst [vmem:[%s2500_s3 + $0x158] sm:$0xff] %v913_v63  ;;  %v912_v47 = vmul.f32 %v1422_v46, %v1800_v45  ;;  %1443 = vpow2.f32 %v1019_v8 }
 0x13a   :  { %v1426_v4 = vpop.eup %1425  ;;  %944 = vst [vmem:[%s2500_s3 + $0x50] sm:$0xff] %v880_v9  ;;  %v883_v56 = vmul.f32 %v1424_v18, %v1833_v50  ;;  %1445 = vpow2.f32 %v1051_v10  ;;  %v1053_v9 = vmul.f32 -1.442695, %v2085_v11 }
 0x13b   :  { %v1428_v44 = vpop.eup %1427  ;;  %976 = vst [vmem:[%s2500_s3 + $0x150] sm:$0xff] %v912_v47  ;;  %v915_v62 = vmul.f32 %v1426_v4, %v1838_v51  ;;  %1447 = vpow2.f32 %v1022_v39  ;;  %v1024_v47 = vmul.f32 -1.442695, %v2098_v17  ;;  %v1055_v17 = vmul.f32 -1.442695, %v2115_v22 }
 0x13c   :  { %v1430_v45 = vpop.eup %1429  ;;  %947 = vst [vmem:[%s2500_s3 + $0x68] sm:$0xff] %v883_v56  ;;  %v690_v27 = vadd.f32 1.0, %v1428_v44  ;;  %1449 = vpow2.f32 %v1054_v35  ;;  %v1056_v56 = vmul.f32 -1.442695, %v2104_v58  ;;  %v1026_v58 = vmul.f32 -1.442695, %v2124_v16 }
 0x13d   :  { %v1432_v19 = vpop.eup %1431  ;;  %979 = vst [vmem:[%s2500_s3 + $0x168] sm:$0xff] %v915_v62  ;;  %v722_v50 = vadd.f32 1.0, %v1430_v45  ;;  %1451 = vpow2.f32 %v1021_v57  ;;  %v1023_v45 = vmul.f32 -1.442695, %v2107_v15  ;;  %v1058_v22 = vmul.f32 -1.442695, %v2127_v3 }
 0x13e   :  { %v1434_v30 = vpop.eup %1433  ;;  %1453 = vrcp.f32 %v690_v27  ;;  %v693_v42 = vadd.f32 1.0, %v1432_v19  ;;  %v1025_v16 = vmul.f32 -1.442695, %v2130_v59  ;;  %v1057_v3 = vmul.f32 -1.442695, %v2135_v6 }
 0x13f   :  { %v1436_v25 = vpop.eup %1435  ;;  %1455 = vrcp.f32 %v722_v50  ;;  %v725_v51 = vadd.f32 1.0, %v1434_v30  ;;  %v2511_v30 = vld [vmem:[#allocation3_spill] sm:$0xff]  ;;  %v1028_v59 = vmul.f32 -1.442695, %v2144_v61  ;;  %v1060_v6 = vmul.f32 -1.442695, %v2147_v28 }
 0x140   :  { %v1438_v2 = vpop.eup %1437  ;;  %1457 = vrcp.f32 %v693_v42  ;;  %v692_v8 = vadd.f32 1.0, %v1436_v25  ;;  %v2512_v25 = vld [vmem:[#allocation4_spill] sm:$0xff] }
 0x141   :  { %v1440_v43 = vpop.eup %1439  ;;  %1459 = vrcp.f32 %v725_v51  ;;  %v724_v32 = vadd.f32 1.0, %v1438_v2  ;;  %v2513_v2 = vld [vmem:[#allocation2_spill] sm:$0xff] }
 0x142   :  { %v1442_v1 = vpop.eup %1441  ;;  %1461 = vrcp.f32 %v692_v8  ;;  %v695_v34 = vadd.f32 1.0, %v1440_v43 }
 0x143   :  { %v1444_v5 = vpop.eup %1443  ;;  %1463 = vrcp.f32 %v724_v32  ;;  %v727_v10 = vadd.f32 1.0, %v1442_v1  ;;  %v1579_v32 = vld [vmem:[%s2498_s0 + $0x180] sm:$0xff]  ;;  %v1027_v1 = vmul.f32 -1.442695, %v2150_v26  ;;  %v1580_v26 = vld [vmem:[%s2498_s0 + $0x90] sm:$0xff] }
 0x144   :  { %v1446_v38 = vpop.eup %1445  ;;  %1465 = vrcp.f32 %v695_v34  ;;  %v694_v14 = vadd.f32 1.0, %v1444_v5  ;;  %v2514_v5 = vld [vmem:[#allocation5_spill] sm:$0xff] }
 0x145   :  { %v1448_v33 = vpop.eup %1447  ;;  %1467 = vrcp.f32 %v727_v10  ;;  %v726_v24 = vadd.f32 1.0, %v1446_v38  ;;  %v1059_v10 = vmul.f32 -1.442695, %v2155_v13 }
 0x146   :  { %v1450_v60 = vpop.eup %1449  ;;  %1469 = vrcp.f32 %v694_v14  ;;  %v697_v63 = vadd.f32 1.0, %v1448_v33  ;;  %v2515_v14 = vld [vmem:[#allocation6_spill] sm:$0xff] }
 0x147   :  { %v1452_v39 = vpop.eup %1451  ;;  %1471 = vrcp.f32 %v726_v24  ;;  %v729_v46 = vadd.f32 1.0, %v1450_v60 }
 0x148   :  { %v1454_v35 = vpop.eup %1453  ;;  %1473 = vrcp.f32 %v697_v63  ;;  %v696_v18 = vadd.f32 1.0, %v1452_v39 }
 0x149   :  { %v1456_v57 = vpop.eup %1455  ;;  %v882_v4 = vmul.f32 %v1454_v35, %v1819_v48  ;;  %1475 = vrcp.f32 %v729_v46 }
 0x14a   :  { %v1458_v44 = vpop.eup %1457  ;;  %v914_v62 = vmul.f32 %v1456_v57, %v1824_v49  ;;  %1477 = vrcp.f32 %v696_v18 }
 0x14b   :  { %v1460_v27 = vpop.eup %1459  ;;  %946 = vst [vmem:[%s2500_s3 + $0x60] sm:$0xff] %v882_v4  ;;  %v885_v11 = vmul.f32 %v1458_v44, %v1857_v54  ;;  %1479 = vpow2.f32 %v1053_v9 }
 0x14c   :  { %v1462_v48 = vpop.eup %1461  ;;  %978 = vst [vmem:[%s2500_s3 + $0x160] sm:$0xff] %v914_v62  ;;  %v917_v49 = vmul.f32 %v1460_v27, %v1862_v55  ;;  %1481 = vpow2.f32 %v1024_v47 }
 0x14d   :  { %v1464_v15 = vpop.eup %1463  ;;  %949 = vst [vmem:[%s2500_s3 + $0x78] sm:$0xff] %v885_v11  ;;  %v884_v54 = vmul.f32 %v1462_v48, %v1843_v52  ;;  %1483 = vpow2.f32 %v1056_v56 }
 0x14e   :  { %v1466_v19 = vpop.eup %1465  ;;  %981 = vst [vmem:[%s2500_s3 + $0x178] sm:$0xff] %v917_v49  ;;  %v916_v55 = vmul.f32 %v1464_v15, %v1848_v53  ;;  %1485 = vpow2.f32 %v1023_v45 }
 0x14f   :  { %v1468_v50 = vpop.eup %1467  ;;  %948 = vst [vmem:[%s2500_s3 + $0x70] sm:$0xff] %v884_v54  ;;  %v887_v52 = vmul.f32 %v1466_v19, %v2511_v30  ;;  %1487 = vpow2.f32 %v1055_v17  ;;  %v1062_v30 = vmul.f32 -1.442695, %v2167_v21  ;;  %v1583_v21 = vld [vmem:[%s2498_s0 + $0x1a8] sm:$0xff] }
 0x150   :  { %v1470_v42 = vpop.eup %1469  ;;  %980 = vst [vmem:[%s2500_s3 + $0x170] sm:$0xff] %v916_v55  ;;  %v919_v53 = vmul.f32 %v1468_v50, %v2512_v25  ;;  %1489 = vpow2.f32 %v1026_v58  ;;  %v1030_v55 = vmul.f32 -1.442695, %v2164_v0  ;;  %v1029_v25 = vmul.f32 -1.442695, %v2170_v20 }
 0x151   :  { %v1472_v51 = vpop.eup %1471  ;;  %951 = vst [vmem:[%s2500_s3 + $0x88] sm:$0xff] %v887_v52  ;;  %v886_v8 = vmul.f32 %v1470_v42, %v2513_v2  ;;  %1491 = vpow2.f32 %v1058_v22  ;;  %v1032_v20 = vmul.f32 -1.442695, %v2187_v7  ;;  %v1585_v7 = vld [vmem:[%s2498_s0 + $0x1a0] sm:$0xff] }
 0x152   :  { %v1474_v43 = vpop.eup %1473  ;;  %983 = vst [vmem:[%s2500_s3 + $0x188] sm:$0xff] %v919_v53  ;;  %v918_v61 = vmul.f32 %v1579_v32, %v1472_v51  ;;  %1493 = vpow2.f32 %v1025_v16  ;;  %v1061_v51 = vmul.f32 -1.442695, %v2176_v29  ;;  %v1584_v29 = vld [vmem:[%s2498_s0 + $0xa0] sm:$0xff]  ;;  %v1064_v32 = vmul.f32 -1.442695, %v2195_v31 }
 0x153   :  { %v1476_v34 = vpop.eup %1475  ;;  %950 = vst [vmem:[%s2500_s3 + $0x80] sm:$0xff] %v886_v8  ;;  %v889_v28 = vmul.f32 %v1474_v43, %v2514_v5  ;;  %1495 = vpow2.f32 %v1057_v3  ;;  %v1581_v3 = vld [vmem:[%s2498_s0 + $0x190] sm:$0xff]  ;;  %v1586_v31 = vld [vmem:[%s2498_s0 + $0xb8] sm:$0xff] }
 0x154   :  { %v1478_v38 = vpop.eup %1477  ;;  %982 = vst [vmem:[%s2500_s3 + $0x180] sm:$0xff] %v918_v61  ;;  %v921_v33 = vmul.f32 %v1476_v34, %v2515_v14  ;;  %1497 = vpow2.f32 %v1028_v59  ;;  %v1582_v59 = vld [vmem:[%s2498_s0 + $0xa8] sm:$0xff]  ;;  %v1031_v34 = vmul.f32 -1.442695, %v2198_v37  ;;  %v1587_v37 = vld [vmem:[%s2498_s0 + $0x1b8] sm:$0xff] }
 0x155   :  { %v1480_v24 = vpop.eup %1479  ;;  %953 = vst [vmem:[%s2500_s3 + $0x98] sm:$0xff] %v889_v28  ;;  %v888_v60 = vmul.f32 %v1580_v26, %v1478_v38  ;;  %1499 = vpow2.f32 %v1060_v6 }
 0x156   :  { %v1482_v13 = vpop.eup %1481  ;;  %985 = vst [vmem:[%s2500_s3 + $0x198] sm:$0xff] %v921_v33  ;;  %v728_v63 = vadd.f32 1.0, %v1480_v24  ;;  %1501 = vpow2.f32 %v1027_v1  ;;  %v1034_v33 = vmul.f32 -1.442695, %v2223_v40  ;;  %v1589_v40 = vld [vmem:[%s2498_s0 + $0x1b0] sm:$0xff] }
 0x157   :  { %v1484_v39 = vpop.eup %1483  ;;  %952 = vst [vmem:[%s2500_s3 + $0x90] sm:$0xff] %v888_v60  ;;  %v699_v46 = vadd.f32 1.0, %v1482_v13  ;;  %1503 = vpow2.f32 %v1059_v10  ;;  %v1063_v10 = vmul.f32 -1.442695, %v2208_v23  ;;  %v1588_v23 = vld [vmem:[%s2498_s0 + $0xb0] sm:$0xff] }
 0x158   :  { %v1486_v9 = vpop.eup %1485  ;;  %1505 = vrcp.f32 %v728_v63  ;;  %v731_v35 = vadd.f32 1.0, %v1484_v39  ;;  %v1066_v60 = vmul.f32 -1.442695, %v2231_v12  ;;  %v1033_v39 = vmul.f32 -1.442695, %v2234_v41  ;;  %v1590_v12 = vld [vmem:[%s2498_s0 + $0xc8] sm:$0xff] }
 0x159   :  { %v1488_v18 = vpop.eup %1487  ;;  %1507 = vrcp.f32 %v699_v46  ;;  %v698_v47 = vadd.f32 1.0, %v1486_v9  ;;  %v1591_v41 = vld [vmem:[%s2498_s0 + $0x1c8] sm:$0xff] }
 0x15a   :  { %v1490_v57 = vpop.eup %1489  ;;  %1509 = vrcp.f32 %v731_v35  ;;  %v730_v4 = vadd.f32 1.0, %v1488_v18  ;;  %v1065_v35 = vmul.f32 -1.442695, %v2241_v36  ;;  %v1592_v36 = vld [vmem:[%s2498_s0 + $0xc0] sm:$0xff] }
 0x15b   :  { %v1492_v56 = vpop.eup %1491  ;;  %1511 = vrcp.f32 %v698_v47  ;;  %v701_v44 = vadd.f32 1.0, %v1490_v57 }
 0x15c   :  { %v1494_v62 = vpop.eup %1493  ;;  %1513 = vrcp.f32 %v730_v4  ;;  %v733_v45 = vadd.f32 1.0, %v1492_v56 }
 0x15d   :  { %v1496_v27 = vpop.eup %1495  ;;  %1515 = vrcp.f32 %v701_v44  ;;  %v700_v11 = vadd.f32 1.0, %v1494_v62  ;;  %v1593_v44 = vld [vmem:[%s2498_s0 + $0x1c0] sm:$0xff] }
 0x15e   :  { %v1498_v17 = vpop.eup %1497  ;;  %1517 = vrcp.f32 %v733_v45  ;;  %v732_v48 = vadd.f32 1.0, %v1496_v27 }
 0x15f   :  { %v1500_v49 = vpop.eup %1499  ;;  %1519 = vrcp.f32 %v700_v11  ;;  %v703_v58 = vadd.f32 1.0, %v1498_v17 }
 0x160   :  { %v1502_v15 = vpop.eup %1501  ;;  %1521 = vrcp.f32 %v732_v48  ;;  %v735_v54 = vadd.f32 1.0, %v1500_v49 }
 0x161   :  { %v1504_v22 = vpop.eup %1503  ;;  %1523 = vrcp.f32 %v703_v58  ;;  %v702_v19 = vadd.f32 1.0, %v1502_v15 }
 0x162   :  { %v1506_v16 = vpop.eup %1505  ;;  %1525 = vrcp.f32 %v735_v54  ;;  %v734_v50 = vadd.f32 1.0, %v1504_v22 }
 0x163   :  { %v1508_v52 = vpop.eup %1507  ;;  %v920_v42 = vmul.f32 %v1581_v3, %v1506_v16  ;;  %1527 = vrcp.f32 %v702_v19 }
 0x164   :  { %v1510_v53 = vpop.eup %1509  ;;  %v891_v0 = vmul.f32 %v1582_v59, %v1508_v52  ;;  %1529 = vrcp.f32 %v734_v50 }
 0x165   :  { %v1512_v2 = vpop.eup %1511  ;;  %984 = vst [vmem:[%s2500_s3 + $0x190] sm:$0xff] %v920_v42  ;;  %v923_v8 = vmul.f32 %v1583_v21, %v1510_v53  ;;  %1531 = vpow2.f32 %v1030_v55 }
 0x166   :  { %v1514_v6 = vpop.eup %1513  ;;  %955 = vst [vmem:[%s2500_s3 + $0xa8] sm:$0xff] %v891_v0  ;;  %v890_v43 = vmul.f32 %v1584_v29, %v1512_v2  ;;  %1533 = vpow2.f32 %v1062_v30  ;;  %v1595_v29 = vld [vmem:[%s2498_s0 + $0x1d8] sm:$0xff] }
 0x167   :  { %v1516_v61 = vpop.eup %1515  ;;  %987 = vst [vmem:[%s2500_s3 + $0x1a8] sm:$0xff] %v923_v8  ;;  %v922_v1 = vmul.f32 %v1585_v7, %v1514_v6  ;;  %1535 = vpow2.f32 %v1029_v25  ;;  %v1594_v8 = vld [vmem:[%s2498_s0 + $0xd8] sm:$0xff] }
 0x168   :  { %v1518_v5 = vpop.eup %1517  ;;  %954 = vst [vmem:[%s2500_s3 + $0xa0] sm:$0xff] %v890_v43  ;;  %v893_v28 = vmul.f32 %v1586_v31, %v1516_v61  ;;  %1537 = vpow2.f32 %v1061_v51  ;;  %v1596_v61 = vld [vmem:[%s2498_s0 + $0xd0] sm:$0xff] }
 0x169   :  { %v1520_v38 = vpop.eup %1519  ;;  %986 = vst [vmem:[%s2500_s3 + $0x1a0] sm:$0xff] %v922_v1  ;;  %v925_v14 = vmul.f32 %v1587_v37, %v1518_v5  ;;  %1539 = vpow2.f32 %v1032_v20  ;;  %v1599_v37 = vld [vmem:[%s2498_s0 + $0x1e8] sm:$0xff] }
 0x16a   :  { %v1522_v24 = vpop.eup %1521  ;;  %957 = vst [vmem:[%s2500_s3 + $0xb8] sm:$0xff] %v893_v28  ;;  %v892_v26 = vmul.f32 %v1588_v23, %v1520_v38  ;;  %1541 = vpow2.f32 %v1064_v32  ;;  %v1598_v28 = vld [vmem:[%s2498_s0 + $0xe8] sm:$0xff] }
 0x16b   :  { %v1524_v13 = vpop.eup %1523  ;;  %989 = vst [vmem:[%s2500_s3 + $0x1b8] sm:$0xff] %v925_v14  ;;  %v924_v63 = vmul.f32 %v1589_v40, %v1522_v24  ;;  %1543 = vpow2.f32 %v1031_v34  ;;  %v1597_v34 = vld [vmem:[%s2498_s0 + $0x1d0] sm:$0xff]  ;;  %v1600_v24 = vld [vmem:[%s2498_s0 + $0xe0] sm:$0xff] }
 0x16c   :  { %v1526_v46 = vpop.eup %1525  ;;  %956 = vst [vmem:[%s2500_s3 + $0xb0] sm:$0xff] %v892_v26  ;;  %v895_v9 = vmul.f32 %v1590_v12, %v1524_v13  ;;  %1545 = vpow2.f32 %v1063_v10  ;;  %v1603_v12 = vld [vmem:[%s2498_s0 + $0x1f8] sm:$0xff] }
 0x16d   :  { %v1528_v18 = vpop.eup %1527  ;;  %988 = vst [vmem:[%s2500_s3 + $0x1b0] sm:$0xff] %v924_v63  ;;  %v927_v47 = vmul.f32 %v1591_v41, %v1526_v46  ;;  %1547 = vpow2.f32 %v1034_v33  ;;  %v1602_v63 = vld [vmem:[%s2498_s0 + $0xf8] sm:$0xff] }
 0x16e   :  { %v1530_v57 = vpop.eup %1529  ;;  %959 = vst [vmem:[%s2500_s3 + $0xc8] sm:$0xff] %v895_v9  ;;  %v894_v4 = vmul.f32 %v1592_v36, %v1528_v18  ;;  %1549 = vpow2.f32 %v1066_v60  ;;  %v1601_v60 = vld [vmem:[%s2498_s0 + $0x1e0] sm:$0xff]  ;;  %v1604_v18 = vld [vmem:[%s2498_s0 + $0xf0] sm:$0xff] }
 0x16f   :  { %v1532_v56 = vpop.eup %1531  ;;  %991 = vst [vmem:[%s2500_s3 + $0x1c8] sm:$0xff] %v927_v47  ;;  %v926_v62 = vmul.f32 %v1593_v44, %v1530_v57  ;;  %1551 = vpow2.f32 %v1033_v39  ;;  %v1605_v47 = vld [vmem:[%s2498_s0 + $0x1f0] sm:$0xff] }
 0x170   :  { %v1534_v45 = vpop.eup %1533  ;;  %958 = vst [vmem:[%s2500_s3 + $0xc0] sm:$0xff] %v894_v4  ;;  %v705_v27 = vadd.f32 1.0, %v1532_v56  ;;  %1553 = vpow2.f32 %v1065_v35 }
 0x171   :  { %v1536_v11 = vpop.eup %1535  ;;  %990 = vst [vmem:[%s2500_s3 + $0x1c0] sm:$0xff] %v926_v62  ;;  %v737_v17 = vadd.f32 1.0, %v1534_v45 }
 0x172   :  { %v1538_v48 = vpop.eup %1537  ;;  %1555 = vrcp.f32 %v705_v27  ;;  %v704_v49 = vadd.f32 1.0, %v1536_v11 }
 0x173   :  { %v1540_v58 = vpop.eup %1539  ;;  %1557 = vrcp.f32 %v737_v17  ;;  %v736_v15 = vadd.f32 1.0, %v1538_v48 }
 0x174   :  { %v1542_v54 = vpop.eup %1541  ;;  %1559 = vrcp.f32 %v704_v49  ;;  %v707_v22 = vadd.f32 1.0, %v1540_v58 }
 0x175   :  { %v1544_v19 = vpop.eup %1543  ;;  %1561 = vrcp.f32 %v736_v15  ;;  %v739_v55 = vadd.f32 1.0, %v1542_v54 }
 0x176   :  { %v1546_v16 = vpop.eup %1545  ;;  %1563 = vrcp.f32 %v707_v22  ;;  %v706_v50 = vadd.f32 1.0, %v1544_v19 }
 0x177   :  { %v1548_v30 = vpop.eup %1547  ;;  %1565 = vrcp.f32 %v739_v55  ;;  %v738_v52 = vadd.f32 1.0, %v1546_v16 }
 0x178   :  { %v1550_v3 = vpop.eup %1549  ;;  %1567 = vrcp.f32 %v706_v50  ;;  %v709_v42 = vadd.f32 1.0, %v1548_v30 }
 0x179   :  { %v1552_v25 = vpop.eup %1551  ;;  %1569 = vrcp.f32 %v738_v52  ;;  %v741_v53 = vadd.f32 1.0, %v1550_v3 }
 0x17a   :  { %v1554_v59 = vpop.eup %1553  ;;  %1571 = vrcp.f32 %v709_v42  ;;  %v708_v0 = vadd.f32 1.0, %v1552_v25 }
 0x17b   :  { %1573 = vrcp.f32 %v741_v53  ;;  %v740_v51 = vadd.f32 1.0, %v1554_v59 }
 0x17c   :  { %v1556_v2 = vpop.eup %1555  ;;  %1575 = vrcp.f32 %v708_v0 }
 0x17d   :  { %v1558_v21 = vpop.eup %1557  ;;  %v897_v20 = vmul.f32 %v1594_v8, %v1556_v2  ;;  %1577 = vrcp.f32 %v740_v51 }
 0x17e   :  { %v1560_v6 = vpop.eup %1559  ;;  %v929_v43 = vmul.f32 %v1595_v29, %v1558_v21 }
 0x17f   :  { %v1562_v32 = vpop.eup %1561  ;;  %961 = vst [vmem:[%s2500_s3 + $0xd8] sm:$0xff] %v897_v20  ;;  %v896_v7 = vmul.f32 %v1596_v61, %v1560_v6 }
 0x180   :  { %v1564_v1 = vpop.eup %1563  ;;  %993 = vst [vmem:[%s2500_s3 + $0x1d8] sm:$0xff] %v929_v43  ;;  %v928_v5 = vmul.f32 %v1597_v34, %v1562_v32 }
 0x181   :  { %v1566_v31 = vpop.eup %1565  ;;  %960 = vst [vmem:[%s2500_s3 + $0xd0] sm:$0xff] %v896_v7  ;;  %v899_v10 = vmul.f32 %v1598_v28, %v1564_v1 }
 0x182   :  { %v1568_v38 = vpop.eup %1567  ;;  %992 = vst [vmem:[%s2500_s3 + $0x1d0] sm:$0xff] %v928_v5  ;;  %v931_v14 = vmul.f32 %v1599_v37, %v1566_v31 }
 0x183   :  { %v1570_v33 = vpop.eup %1569  ;;  %963 = vst [vmem:[%s2500_s3 + $0xe8] sm:$0xff] %v899_v10  ;;  %v898_v23 = vmul.f32 %v1600_v24, %v1568_v38 }
 0x184   :  { %v1572_v26 = vpop.eup %1571  ;;  %995 = vst [vmem:[%s2500_s3 + $0x1e8] sm:$0xff] %v931_v14  ;;  %v930_v13 = vmul.f32 %v1601_v60, %v1570_v33 }
 0x185   :  { %v1574_v40 = vpop.eup %1573  ;;  %962 = vst [vmem:[%s2500_s3 + $0xe0] sm:$0xff] %v898_v23  ;;  %v901_v39 = vmul.f32 %v1602_v63, %v1572_v26 }
 0x186   :  { %v1576_v46 = vpop.eup %1575  ;;  %994 = vst [vmem:[%s2500_s3 + $0x1e0] sm:$0xff] %v930_v13  ;;  %v933_v9 = vmul.f32 %v1603_v12, %v1574_v40 }
 0x187   :  { %v1578_v35 = vpop.eup %1577  ;;  %965 = vst [vmem:[%s2500_s3 + $0xf8] sm:$0xff] %v901_v39  ;;  %v900_v41 = vmul.f32 %v1604_v18, %v1576_v46 }
 0x188   :  { %997 = vst [vmem:[%s2500_s3 + $0x1f8] sm:$0xff] %v933_v9  ;;  %v932_v57 = vmul.f32 %v1605_v47, %v1578_v35 }
 0x189   :  { %964 = vst [vmem:[%s2500_s3 + $0xf0] sm:$0xff] %v900_v41 }
 0x18a   :  { %996 = vst [vmem:[%s2500_s3 + $0x1f0] sm:$0xff] %v932_v57 }

// kernel: up_block.7
= control target key start
LH: loop header
LB: loop body
LE: loop exit
PB: predicated region body
PF: predicated region fallthrough
CT: control target
= control target key end

     0   :  { %s2294_s12 = smov 0   ;;  %s2296_s13 = smov 0   ;;  %s2832_s0 = inlined_call_operand.vmem [shape: f32[32,8192], index: 0, kind: input, shape index: {}]   ;;  %s2833_s1 = inlined_call_operand.vmem [shape: f32[8192,128], index: 1, kind: input, shape index: {}]   ;;  %s2834_s2 = inlined_call_operand.vmem [shape: f32[1,128], index: 2, kind: input, shape index: {}]   ;;  %s2835_s3 = inlined_call_operand.vmem [shape: f32[32,128], index: 3, kind: output, shape index: {}]  }
   0x1   :  { %s2298_s14 = smov 0   ;;  %s2300_s15 = smov 0  }
   0x2   :  { %s2302_s16 = smov 0  }
   0x3 LB: > { %s25_s17 = sadd.s32 1, %s2267_s15  ;;  %p48_p1 = scmp.ne.s32.totalorder %s2259_s13, %s2255_s12  ;;  %s2271_s16 = sphi %s2302_s16, %s13_s16   ;;  %s2267_s15 = sphi %s2300_s15, %s2839_s15   ;;  %s2263_s14 = sphi %s2298_s14, %s2838_s14   ;;  %s2259_s13 = sphi %s2296_s13, %s2837_s13   ;;  %s2255_s12 = sphi %s2294_s12, %s2836_s12  }
   0x4   : > { %p26_p0 = scmp.ge.s32.totalorder %s25_s17, 4  ;;  %p49_p2 = scmp.eq.s32.totalorder %s2271_s16, 0 }
   0x5   : > { %s41_s19 = sadd.s32 1, %s2259_s13  ;;  %p1568_p5 = scmp.ge.s32.totalorder %s2271_s16, 4 }
   0x6   : > { %s2841_s17 = smov (%p26_p0, %s25_s17), 0  ;;  %p50_p3 = por %p49_p2, %p48_p1 }
   0x7   : > { %s37_s18 = ssub.s32 %s2267_s15, %s2841_s17  ;;  %162 = sbr.rel (%p1568_p5) target bundleno = 50 (0x32), region = 20 }
   0x8   : > { %p39_p4 = scmp.eq.s32.totalorder %s37_s18, 0 }
   0xa   : > { %s2329_s20 = scalar_select %p39_p4, %s2259_s13, %s41_s19  }
   0xe   : > { %165 = sbr.rel (!%p50_p3) target bundleno = 50 (0x32), region = 24  ;;  %s167_s21 = sand.u32 (%p50_p3), 1, %s2259_s13  }
   0xf   : > { %s1583_s22 = sshll.u32 (%p50_p3), %s2267_s15, 7  ;;  %s1569_s23 = sshll.u32 (%p50_p3), %s167_s21, 9 }
  0x10   : > { %s2337_s26 = scalar_lea.vmem (%p50_p3), %s2832_s0, %s1583_s22  ;;  %s2342_s27 = scalar_lea.vmem (%p50_p3), [#allocation3], %s1569_s23 }
  0x11   : > { %v188_v0 = vld [vmem:[%s2337_s26] sm:$0xff] (%p50_p3)  ;;  %v190_v1 = vld [vmem:[%s2337_s26 + $0x8] sm:$0xff] (%p50_p3)  ;;  %v192_v2 = vld [vmem:[%s2337_s26 + $0x10] sm:$0xff] (%p50_p3) }
  0x12   : > { %189 = vst [vmem:[%s2342_s27] sm:$0xff] (%p50_p3), %v188_v0  ;;  %191 = vst [vmem:[%s2342_s27 + $0x8] sm:$0xff] (%p50_p3), %v190_v1  ;;  %v194_v3 = vld [vmem:[%s2337_s26 + $0x18] sm:$0xff] (%p50_p3)  ;;  %v196_v4 = vld [vmem:[%s2337_s26 + $0x20] sm:$0xff] (%p50_p3) }
  0x13   : > { %193 = vst [vmem:[%s2342_s27 + $0x10] sm:$0xff] (%p50_p3), %v192_v2  ;;  %v198_v5 = vld [vmem:[%s2337_s26 + $0x28] sm:$0xff] (%p50_p3)  ;;  %195 = vst [vmem:[%s2342_s27 + $0x18] sm:$0xff] (%p50_p3), %v194_v3  ;;  %v200_v6 = vld [vmem:[%s2337_s26 + $0x30] sm:$0xff] (%p50_p3) }
  0x14   : > { %197 = vst [vmem:[%s2342_s27 + $0x20] sm:$0xff] (%p50_p3), %v196_v4  ;;  %199 = vst [vmem:[%s2342_s27 + $0x28] sm:$0xff] (%p50_p3), %v198_v5  ;;  %v202_v7 = vld [vmem:[%s2337_s26 + $0x38] sm:$0xff] (%p50_p3)  ;;  %v204_v8 = vld [vmem:[%s2337_s26 + $0x40] sm:$0xff] (%p50_p3) }
  0x15   : > { %201 = vst [vmem:[%s2342_s27 + $0x30] sm:$0xff] %v200_v6  ;;  %203 = vst [vmem:[%s2342_s27 + $0x38] sm:$0xff] %v202_v7  ;;  %v206_v9 = vld [vmem:[%s2337_s26 + $0x48] sm:$0xff]  ;;  %v208_v10 = vld [vmem:[%s2337_s26 + $0x50] sm:$0xff] }
  0x16   : > { %205 = vst [vmem:[%s2342_s27 + $0x40] sm:$0xff] %v204_v8  ;;  %v210_v11 = vld [vmem:[%s2337_s26 + $0x58] sm:$0xff]  ;;  %207 = vst [vmem:[%s2342_s27 + $0x48] sm:$0xff] %v206_v9  ;;  %v212_v12 = vld [vmem:[%s2337_s26 + $0x60] sm:$0xff] }
  0x17   : > { %209 = vst [vmem:[%s2342_s27 + $0x50] sm:$0xff] %v208_v10  ;;  %211 = vst [vmem:[%s2342_s27 + $0x58] sm:$0xff] %v210_v11  ;;  %v214_v13 = vld [vmem:[%s2337_s26 + $0x68] sm:$0xff]  ;;  %v216_v14 = vld [vmem:[%s2337_s26 + $0x70] sm:$0xff] }
  0x18   : > { %213 = vst [vmem:[%s2342_s27 + $0x60] sm:$0xff] %v212_v12  ;;  %215 = vst [vmem:[%s2342_s27 + $0x68] sm:$0xff] %v214_v13  ;;  %v218_v15 = vld [vmem:[%s2337_s26 + $0x78] sm:$0xff]  ;;  %v220_v16 = vld [vmem:[%s2337_s26 + $0x200] sm:$0xff] }
  0x19   : > { %217 = vst [vmem:[%s2342_s27 + $0x70] sm:$0xff] %v216_v14  ;;  %v222_v17 = vld [vmem:[%s2337_s26 + $0x208] sm:$0xff]  ;;  %219 = vst [vmem:[%s2342_s27 + $0x78] sm:$0xff] %v218_v15  ;;  %v224_v18 = vld [vmem:[%s2337_s26 + $0x210] sm:$0xff] }
  0x1a   : > { %221 = vst [vmem:[%s2342_s27 + $0x80] sm:$0xff] %v220_v16  ;;  %223 = vst [vmem:[%s2342_s27 + $0x88] sm:$0xff] %v222_v17  ;;  %v226_v19 = vld [vmem:[%s2337_s26 + $0x218] sm:$0xff]  ;;  %v228_v20 = vld [vmem:[%s2337_s26 + $0x220] sm:$0xff] }
  0x1b   : > { %225 = vst [vmem:[%s2342_s27 + $0x90] sm:$0xff] %v224_v18  ;;  %227 = vst [vmem:[%s2342_s27 + $0x98] sm:$0xff] %v226_v19  ;;  %v230_v21 = vld [vmem:[%s2337_s26 + $0x228] sm:$0xff]  ;;  %v232_v22 = vld [vmem:[%s2337_s26 + $0x230] sm:$0xff] }
  0x1c   : > { %229 = vst [vmem:[%s2342_s27 + $0xa0] sm:$0xff] %v228_v20  ;;  %v234_v23 = vld [vmem:[%s2337_s26 + $0x238] sm:$0xff]  ;;  %231 = vst [vmem:[%s2342_s27 + $0xa8] sm:$0xff] %v230_v21  ;;  %v236_v24 = vld [vmem:[%s2337_s26 + $0x240] sm:$0xff] }
  0x1d   : > { %233 = vst [vmem:[%s2342_s27 + $0xb0] sm:$0xff] %v232_v22  ;;  %235 = vst [vmem:[%s2342_s27 + $0xb8] sm:$0xff] %v234_v23  ;;  %v238_v25 = vld [vmem:[%s2337_s26 + $0x248] sm:$0xff]  ;;  %v240_v26 = vld [vmem:[%s2337_s26 + $0x250] sm:$0xff] }
  0x1e   : > { %237 = vst [vmem:[%s2342_s27 + $0xc0] sm:$0xff] %v236_v24  ;;  %239 = vst [vmem:[%s2342_s27 + $0xc8] sm:$0xff] %v238_v25  ;;  %v242_v27 = vld [vmem:[%s2337_s26 + $0x258] sm:$0xff]  ;;  %v244_v28 = vld [vmem:[%s2337_s26 + $0x260] sm:$0xff] }
  0x1f   : > { %241 = vst [vmem:[%s2342_s27 + $0xd0] sm:$0xff] %v240_v26  ;;  %v246_v29 = vld [vmem:[%s2337_s26 + $0x268] sm:$0xff]  ;;  %243 = vst [vmem:[%s2342_s27 + $0xd8] sm:$0xff] %v242_v27  ;;  %v248_v30 = vld [vmem:[%s2337_s26 + $0x270] sm:$0xff] }
  0x20   : > { %245 = vst [vmem:[%s2342_s27 + $0xe0] sm:$0xff] %v244_v28  ;;  %247 = vst [vmem:[%s2342_s27 + $0xe8] sm:$0xff] %v246_v29  ;;  %v250_v31 = vld [vmem:[%s2337_s26 + $0x278] sm:$0xff]  ;;  %v252_v32 = vld [vmem:[%s2337_s26 + $0x400] sm:$0xff] }
  0x21   : > { %249 = vst [vmem:[%s2342_s27 + $0xf0] sm:$0xff] %v248_v30  ;;  %251 = vst [vmem:[%s2342_s27 + $0xf8] sm:$0xff] %v250_v31  ;;  %v254_v33 = vld [vmem:[%s2337_s26 + $0x408] sm:$0xff]  ;;  %v256_v34 = vld [vmem:[%s2337_s26 + $0x410] sm:$0xff] }
  0x22   : > { %253 = vst [vmem:[%s2342_s27 + $0x100] sm:$0xff] %v252_v32  ;;  %v258_v35 = vld [vmem:[%s2337_s26 + $0x418] sm:$0xff]  ;;  %255 = vst [vmem:[%s2342_s27 + $0x108] sm:$0xff] %v254_v33  ;;  %v260_v36 = vld [vmem:[%s2337_s26 + $0x420] sm:$0xff] }
  0x23   : > { %257 = vst [vmem:[%s2342_s27 + $0x110] sm:$0xff] %v256_v34  ;;  %259 = vst [vmem:[%s2342_s27 + $0x118] sm:$0xff] %v258_v35  ;;  %v262_v37 = vld [vmem:[%s2337_s26 + $0x428] sm:$0xff]  ;;  %v264_v38 = vld [vmem:[%s2337_s26 + $0x430] sm:$0xff] }
  0x24   : > { %261 = vst [vmem:[%s2342_s27 + $0x120] sm:$0xff] %v260_v36  ;;  %263 = vst [vmem:[%s2342_s27 + $0x128] sm:$0xff] %v262_v37  ;;  %v266_v39 = vld [vmem:[%s2337_s26 + $0x438] sm:$0xff]  ;;  %v268_v40 = vld [vmem:[%s2337_s26 + $0x440] sm:$0xff] }
  0x25   : > { %265 = vst [vmem:[%s2342_s27 + $0x130] sm:$0xff] %v264_v38  ;;  %v270_v41 = vld [vmem:[%s2337_s26 + $0x448] sm:$0xff]  ;;  %267 = vst [vmem:[%s2342_s27 + $0x138] sm:$0xff] %v266_v39  ;;  %v272_v42 = vld [vmem:[%s2337_s26 + $0x450] sm:$0xff] }
  0x26   : > { %269 = vst [vmem:[%s2342_s27 + $0x140] sm:$0xff] %v268_v40  ;;  %271 = vst [vmem:[%s2342_s27 + $0x148] sm:$0xff] %v270_v41  ;;  %v274_v43 = vld [vmem:[%s2337_s26 + $0x458] sm:$0xff]  ;;  %v276_v44 = vld [vmem:[%s2337_s26 + $0x460] sm:$0xff] }
  0x27   : > { %273 = vst [vmem:[%s2342_s27 + $0x150] sm:$0xff] %v272_v42  ;;  %275 = vst [vmem:[%s2342_s27 + $0x158] sm:$0xff] %v274_v43  ;;  %v278_v45 = vld [vmem:[%s2337_s26 + $0x468] sm:$0xff]  ;;  %v280_v46 = vld [vmem:[%s2337_s26 + $0x470] sm:$0xff] }
  0x28   : > { %277 = vst [vmem:[%s2342_s27 + $0x160] sm:$0xff] %v276_v44  ;;  %v282_v47 = vld [vmem:[%s2337_s26 + $0x478] sm:$0xff]  ;;  %279 = vst [vmem:[%s2342_s27 + $0x168] sm:$0xff] %v278_v45  ;;  %v284_v48 = vld [vmem:[%s2337_s26 + $0x600] sm:$0xff] }
  0x29   : > { %281 = vst [vmem:[%s2342_s27 + $0x170] sm:$0xff] %v280_v46  ;;  %283 = vst [vmem:[%s2342_s27 + $0x178] sm:$0xff] %v282_v47  ;;  %v286_v49 = vld [vmem:[%s2337_s26 + $0x608] sm:$0xff]  ;;  %v288_v50 = vld [vmem:[%s2337_s26 + $0x610] sm:$0xff] }
  0x2a   : > { %285 = vst [vmem:[%s2342_s27 + $0x180] sm:$0xff] %v284_v48  ;;  %287 = vst [vmem:[%s2342_s27 + $0x188] sm:$0xff] %v286_v49  ;;  %v290_v51 = vld [vmem:[%s2337_s26 + $0x618] sm:$0xff]  ;;  %v292_v52 = vld [vmem:[%s2337_s26 + $0x620] sm:$0xff] }
  0x2b   : > { %289 = vst [vmem:[%s2342_s27 + $0x190] sm:$0xff] %v288_v50  ;;  %v294_v53 = vld [vmem:[%s2337_s26 + $0x628] sm:$0xff]  ;;  %291 = vst [vmem:[%s2342_s27 + $0x198] sm:$0xff] %v290_v51  ;;  %v296_v54 = vld [vmem:[%s2337_s26 + $0x630] sm:$0xff] }
  0x2c   : > { %293 = vst [vmem:[%s2342_s27 + $0x1a0] sm:$0xff] %v292_v52  ;;  %295 = vst [vmem:[%s2342_s27 + $0x1a8] sm:$0xff] %v294_v53  ;;  %v298_v55 = vld [vmem:[%s2337_s26 + $0x638] sm:$0xff]  ;;  %v300_v56 = vld [vmem:[%s2337_s26 + $0x640] sm:$0xff] }
  0x2d   : > { %297 = vst [vmem:[%s2342_s27 + $0x1b0] sm:$0xff] %v296_v54  ;;  %299 = vst [vmem:[%s2342_s27 + $0x1b8] sm:$0xff] %v298_v55  ;;  %v302_v57 = vld [vmem:[%s2337_s26 + $0x648] sm:$0xff]  ;;  %v304_v58 = vld [vmem:[%s2337_s26 + $0x650] sm:$0xff] }
  0x2e   : > { %301 = vst [vmem:[%s2342_s27 + $0x1c0] sm:$0xff] %v300_v56  ;;  %v306_v59 = vld [vmem:[%s2337_s26 + $0x658] sm:$0xff]  ;;  %303 = vst [vmem:[%s2342_s27 + $0x1c8] sm:$0xff] %v302_v57  ;;  %v308_v60 = vld [vmem:[%s2337_s26 + $0x660] sm:$0xff] }
  0x2f   : > { %305 = vst [vmem:[%s2342_s27 + $0x1d0] sm:$0xff] %v304_v58  ;;  %307 = vst [vmem:[%s2342_s27 + $0x1d8] sm:$0xff] %v306_v59  ;;  %v310_v61 = vld [vmem:[%s2337_s26 + $0x668] sm:$0xff]  ;;  %v312_v62 = vld [vmem:[%s2337_s26 + $0x670] sm:$0xff] }
  0x30   : > { %309 = vst [vmem:[%s2342_s27 + $0x1e0] sm:$0xff] %v308_v60  ;;  %311 = vst [vmem:[%s2342_s27 + $0x1e8] sm:$0xff] %v310_v61  ;;  %v314_v63 = vld [vmem:[%s2337_s26 + $0x678] sm:$0xff] }
  0x31   : > { %313 = vst [vmem:[%s2342_s27 + $0x1f0] sm:$0xff] %v312_v62  ;;  %315 = vst [vmem:[%s2342_s27 + $0x1f8] sm:$0xff] %v314_v63 }
  0x32 PF: > { %p1572_p6 = scmp.ge.s32.totalorder %s2271_s16, 1  ;;  %p332_p7 = scmp.lt.s32.totalorder %s2271_s16, 5 }
  0x34   : > { %p333_p8 = pnand %p1572_p6, %p332_p7 }
  0x35   : > { %s339_s28 = sand.u32 (!%p333_p8), 1, %s2255_s12   ;;  %s1574_s29 = sshll.u32 (!%p333_p8), %s2263_s14, 8 }
  0x36   : > { %336 = sbr.rel (%p333_p8) target bundleno = 447 (0x1bf), region = 51  ;;  %s1573_s30 = sshll.u32 (!%p333_p8), %s339_s28, 9 }
  0x37   : > { %p379_p9 = scmp.lt.s32.totalorder (!%p333_p8), %s1574_s29, 1023  ;;  %s2478_s8 = scalar_lea.vmem (!%p333_p8), [#allocation3], %s1573_s30 }
  0x38   : > { %p1576_p10 = scmp.ne.s32.totalorder (!%p333_p8), %s2263_s14, 0 }
  0x3d   : > { %s2843_s29 = smov (!%p379_p9, %s1574_s29), 1023  ;;  %402 = sbr.rel (%p1576_p10) target bundleno = 68 (0x44), region = 59 }
  0x3e   : > { %s1575_s4 = sshll.u32 %s2843_s29, 3  ;;  %v2273_v0 = vmov (!%p1576_p10), 0.0  }
  0x3f   : > { %s2476_s7 = scalar_lea.vmem %s2833_s1, %s1575_s4  ;;  %403 = vst [vmem:[#allocation2] sm:$0xff] (!%p1576_p10), %v2273_v0  ;;  %404 = vst [vmem:[#allocation2 + $0x8] sm:$0xff] (!%p1576_p10), %v2273_v0 }
  0x40   : > { %405 = vst [vmem:[#allocation2 + $0x10] sm:$0xff] (!%p1576_p10), %v2273_v0  ;;  %406 = vst [vmem:[#allocation2 + $0x18] sm:$0xff] (!%p1576_p10), %v2273_v0 }
  0x44 PF: > { %v491_v1 = vld [vmem:[%s2476_s7 + $0x80] sm:$0xff]  ;;  %v492_v2 = vld [vmem:[%s2476_s7 + $0x88] sm:$0xff]  ;;  %v493_v12 = vld [vmem:[%s2476_s7 + $0x90] sm:$0xff]  ;;  %p1577_p11 = scmp.ne.s32.totalorder %s2263_s14, 3 }
  0x45   : > { %v523_v3 = vld [vmem:[%s2476_s7 + $0x180] sm:$0xff]  ;;  %v1936_v4 = vpack.c.bf16 %v492_v2, %v491_v1  ;;  %v524_v5 = vld [vmem:[%s2476_s7 + $0x188] sm:$0xff]  ;;  %v494_v14 = vld [vmem:[%s2476_s7 + $0x98] sm:$0xff] }
  0x46   : > { %v475_v6 = vld [vmem:[%s2476_s7] sm:$0xff]  ;;  %v476_v7 = vld [vmem:[%s2476_s7 + $0x8] sm:$0xff]  ;;  %v1968_v8 = vpack.c.bf16 %v524_v5, %v523_v3  ;;  %v525_v15 = vld [vmem:[%s2476_s7 + $0x190] sm:$0xff]  ;;  %v1940_v17 = vpack.c.bf16 %v494_v14, %v493_v12 }
  0x47   : > { %v1938_v9 = vpack.c.bf16 %v476_v7, %v475_v6  ;;  %v507_v10 = vld [vmem:[%s2476_s7 + $0x100] sm:$0xff]  ;;  %v508_v11 = vld [vmem:[%s2476_s7 + $0x108] sm:$0xff]  ;;  %1937 = vmatprep.subr.bf16.mxu0 %v1936_v4  ;;  %v526_v16 = vld [vmem:[%s2476_s7 + $0x198] sm:$0xff] }
  0x48   : > { %v1970_v13 = vpack.c.bf16 %v508_v11, %v507_v10  ;;  %1969 = vmatprep.subr.bf16.mxu1 %v1968_v8  ;;  %v1972_v18 = vpack.c.bf16 %v526_v16, %v525_v15  ;;  %v477_v19 = vld [vmem:[%s2476_s7 + $0x10] sm:$0xff]  ;;  %v478_v20 = vld [vmem:[%s2476_s7 + $0x18] sm:$0xff]  ;;  %v495_v24 = vld [vmem:[%s2476_s7 + $0xa0] sm:$0xff] }
  0x49   : > { %1939 = vmatpush3.bf16.msra.mxu0 %v1938_v9  ;;  %v509_v21 = vld [vmem:[%s2476_s7 + $0x110] sm:$0xff]  ;;  %v1942_v22 = vpack.c.bf16 %v478_v20, %v477_v19  ;;  %v510_v23 = vld [vmem:[%s2476_s7 + $0x118] sm:$0xff]  ;;  %v496_v25 = vld [vmem:[%s2476_s7 + $0xa8] sm:$0xff] }
  0x4a   : > { %1971 = vmatpush3.bf16.msra.mxu1 %v1970_v13  ;;  %1941 = vmatprep.subr.bf16.mxu0 %v1940_v17  ;;  %v1974_v26 = vpack.c.bf16 %v510_v23, %v509_v21  ;;  %v1944_v27 = vpack.c.bf16 %v496_v25, %v495_v24  ;;  %v527_v28 = vld [vmem:[%s2476_s7 + $0x1a0] sm:$0xff]  ;;  %v528_v29 = vld [vmem:[%s2476_s7 + $0x1a8] sm:$0xff]  ;;  %v497_v36 = vld [vmem:[%s2476_s7 + $0xb0] sm:$0xff] }
  0x4b   : > { %1973 = vmatprep.subr.bf16.mxu1 %v1972_v18  ;;  %v479_v30 = vld [vmem:[%s2476_s7 + $0x20] sm:$0xff]  ;;  %v1976_v31 = vpack.c.bf16 %v528_v29, %v527_v28  ;;  %v480_v32 = vld [vmem:[%s2476_s7 + $0x28] sm:$0xff]  ;;  %v498_v37 = vld [vmem:[%s2476_s7 + $0xb8] sm:$0xff] }
  0x4c   : > { %v511_v33 = vld [vmem:[%s2476_s7 + $0x120] sm:$0xff]  ;;  %v512_v34 = vld [vmem:[%s2476_s7 + $0x128] sm:$0xff]  ;;  %v1946_v35 = vpack.c.bf16 %v480_v32, %v479_v30  ;;  %v529_v38 = vld [vmem:[%s2476_s7 + $0x1b0] sm:$0xff]  ;;  %v1948_v40 = vpack.c.bf16 %v498_v37, %v497_v36 }
  0x4d   : > { %1943 = vmatpush3.bf16.msra.mxu0 %v1942_v22  ;;  %v1978_v39 = vpack.c.bf16 %v512_v34, %v511_v33  ;;  %v530_v41 = vld [vmem:[%s2476_s7 + $0x1b8] sm:$0xff]  ;;  %v481_v42 = vld [vmem:[%s2476_s7 + $0x30] sm:$0xff]  ;;  %v499_v47 = vld [vmem:[%s2476_s7 + $0xc0] sm:$0xff] }
  0x4e   : > { %1975 = vmatpush3.bf16.msra.mxu1 %v1974_v26  ;;  %1945 = vmatprep.subr.bf16.mxu0 %v1944_v27  ;;  %v482_v43 = vld [vmem:[%s2476_s7 + $0x38] sm:$0xff]  ;;  %v1980_v44 = vpack.c.bf16 %v530_v41, %v529_v38  ;;  %v513_v45 = vld [vmem:[%s2476_s7 + $0x130] sm:$0xff]  ;;  %v500_v48 = vld [vmem:[%s2476_s7 + $0xc8] sm:$0xff] }
  0x4f   : > { %1977 = vmatprep.subr.bf16.mxu1 %v1976_v31  ;;  %v514_v46 = vld [vmem:[%s2476_s7 + $0x138] sm:$0xff]  ;;  %v531_v49 = vld [vmem:[%s2476_s7 + $0x1c0] sm:$0xff]  ;;  %v532_v50 = vld [vmem:[%s2476_s7 + $0x1c8] sm:$0xff]  ;;  %v1950_v51 = vpack.c.bf16 %v482_v43, %v481_v42  ;;  %v1952_v53 = vpack.c.bf16 %v500_v48, %v499_v47 }
  0x50   : > { %v1982_v52 = vpack.c.bf16 %v514_v46, %v513_v45  ;;  %v483_v54 = vld [vmem:[%s2476_s7 + $0x40] sm:$0xff]  ;;  %v484_v55 = vld [vmem:[%s2476_s7 + $0x48] sm:$0xff]  ;;  %v1984_v57 = vpack.c.bf16 %v532_v50, %v531_v49  ;;  %v501_v59 = vld [vmem:[%s2476_s7 + $0xd0] sm:$0xff] }
  0x51   : > { %1947 = vmatpush3.bf16.msra.mxu0 %v1946_v35  ;;  %v515_v56 = vld [vmem:[%s2476_s7 + $0x140] sm:$0xff]  ;;  %v516_v58 = vld [vmem:[%s2476_s7 + $0x148] sm:$0xff]  ;;  %v502_v60 = vld [vmem:[%s2476_s7 + $0xd8] sm:$0xff]  ;;  %v1954_v63 = vpack.c.bf16 %v484_v55, %v483_v54 }
  0x52   : > { %1979 = vmatpush3.bf16.msra.mxu1 %v1978_v39  ;;  %1949 = vmatprep.subr.bf16.mxu0 %v1948_v40  ;;  %v533_v61 = vld [vmem:[%s2476_s7 + $0x1d0] sm:$0xff]  ;;  %v534_v62 = vld [vmem:[%s2476_s7 + $0x1d8] sm:$0xff]  ;;  %v1986_v0 = vpack.c.bf16 %v516_v58, %v515_v56  ;;  %v1956_v1 = vpack.c.bf16 %v502_v60, %v501_v59  ;;  %v503_v7 = vld [vmem:[%s2476_s7 + $0xe0] sm:$0xff] }
  0x53   : > { %1981 = vmatprep.subr.bf16.mxu1 %v1980_v44  ;;  %v485_v2 = vld [vmem:[%s2476_s7 + $0x50] sm:$0xff]  ;;  %v486_v3 = vld [vmem:[%s2476_s7 + $0x58] sm:$0xff]  ;;  %v1988_v5 = vpack.c.bf16 %v534_v62, %v533_v61  ;;  %v504_v8 = vld [vmem:[%s2476_s7 + $0xe8] sm:$0xff] }
  0x54   : > { %v517_v4 = vld [vmem:[%s2476_s7 + $0x150] sm:$0xff]  ;;  %v518_v6 = vld [vmem:[%s2476_s7 + $0x158] sm:$0xff]  ;;  %v535_v9 = vld [vmem:[%s2476_s7 + $0x1e0] sm:$0xff]  ;;  %v1958_v11 = vpack.c.bf16 %v486_v3, %v485_v2  ;;  %v1960_v15 = vpack.c.bf16 %v504_v8, %v503_v7 }
  0x55   : > { %1951 = vmatpush3.bf16.msra.mxu0 %v1950_v51  ;;  %v536_v10 = vld [vmem:[%s2476_s7 + $0x1e8] sm:$0xff]  ;;  %v487_v12 = vld [vmem:[%s2476_s7 + $0x60] sm:$0xff]  ;;  %v1990_v14 = vpack.c.bf16 %v518_v6, %v517_v4  ;;  %v414_v18 = vld [vmem:[%s2478_s8 + $0x18] sm:$0xff] }
  0x56   : > { %1983 = vmatpush3.bf16.msra.mxu1 %v1982_v52  ;;  %1953 = vmatprep.subr.bf16.mxu0 %v1952_v53  ;;  %v488_v13 = vld [vmem:[%s2476_s7 + $0x68] sm:$0xff]  ;;  %v519_v16 = vld [vmem:[%s2476_s7 + $0x160] sm:$0xff]  ;;  %v1992_v19 = vpack.c.bf16 %v536_v10, %v535_v9  ;;  %v505_v21 = vld [vmem:[%s2476_s7 + $0xf0] sm:$0xff] }
  0x57   : > { %1985 = vmatprep.subr.bf16.mxu1 %v1984_v57  ;;  %v412_v17 = vld [vmem:[%s2478_s8 + $0x8] sm:$0xff]  ;;  %v506_v22 = vld [vmem:[%s2476_s7 + $0xf8] sm:$0xff]  ;;  %v537_v23 = vld [vmem:[%s2476_s7 + $0x1f0] sm:$0xff]  ;;  %880 = vmatprep.mubr.f32.mxu1 %v414_v18  ;;  %v1962_v25 = vpack.c.bf16 %v488_v13, %v487_v12 }
  0x58   : > { %v520_v20 = vld [vmem:[%s2476_s7 + $0x168] sm:$0xff]  ;;  %795 = vmatprep.mubr.f32.mxu0 %v412_v17  ;;  %v538_v24 = vld [vmem:[%s2476_s7 + $0x1f8] sm:$0xff]  ;;  %v1964_v27 = vpack.c.bf16 %v506_v22, %v505_v21  ;;  %v489_v28 = vld [vmem:[%s2476_s7 + $0x70] sm:$0xff] }
  0x59   : > { %1955 = vmatpush3.bf16.msra.mxu0 %v1954_v63  ;;  %v1994_v26 = vpack.c.bf16 %v520_v20, %v519_v16  ;;  %v490_v29 = vld [vmem:[%s2476_s7 + $0x78] sm:$0xff]  ;;  %v521_v30 = vld [vmem:[%s2476_s7 + $0x170] sm:$0xff]  ;;  %v1996_v31 = vpack.c.bf16 %v538_v24, %v537_v23  ;;  %v555_v33 = vld [vmem:[%s2476_s7 + $0x280] sm:$0xff] }
  0x5a   : > { %1987 = vmatpush3.bf16.msra.mxu1 %v1986_v0  ;;  %1957 = vmatprep.subr.bf16.mxu0 %v1956_v1  ;;  %v522_v32 = vld [vmem:[%s2476_s7 + $0x178] sm:$0xff]  ;;  %v556_v34 = vld [vmem:[%s2476_s7 + $0x288] sm:$0xff]  ;;  %v587_v35 = vld [vmem:[%s2476_s7 + $0x380] sm:$0xff]  ;;  %v1966_v37 = vpack.c.bf16 %v490_v29, %v489_v28 }
  0x5b   : > { %1989 = vmatprep.subr.bf16.mxu1 %v1988_v5  ;;  %v588_v36 = vld [vmem:[%s2476_s7 + $0x388] sm:$0xff]  ;;  %v1998_v38 = vpack.c.bf16 %v522_v32, %v521_v30  ;;  %v2000_v39 = vpack.c.bf16 %v556_v34, %v555_v33  ;;  %v539_v40 = vld [vmem:[%s2476_s7 + $0x200] sm:$0xff]  ;;  %v557_v45 = vld [vmem:[%s2476_s7 + $0x290] sm:$0xff] }
  0x5c   : > { %v540_v41 = vld [vmem:[%s2476_s7 + $0x208] sm:$0xff]  ;;  %v571_v42 = vld [vmem:[%s2476_s7 + $0x300] sm:$0xff]  ;;  %v2032_v43 = vpack.c.bf16 %v588_v36, %v587_v35  ;;  %v558_v46 = vld [vmem:[%s2476_s7 + $0x298] sm:$0xff] }
  0x5d   : > { %1959 = vmatpush3.bf16.msra.mxu0 %v1958_v11  ;;  %v572_v44 = vld [vmem:[%s2476_s7 + $0x308] sm:$0xff]  ;;  %v589_v47 = vld [vmem:[%s2476_s7 + $0x390] sm:$0xff]  ;;  %v590_v48 = vld [vmem:[%s2476_s7 + $0x398] sm:$0xff]  ;;  %v2002_v51 = vpack.c.bf16 %v540_v41, %v539_v40  ;;  %v2004_v53 = vpack.c.bf16 %v558_v46, %v557_v45 }
  0x5e   : > { %1991 = vmatpush3.bf16.msra.mxu1 %v1990_v14  ;;  %1961 = vmatprep.subr.bf16.mxu0 %v1960_v15  ;;  %v411_v49 = vld [vmem:[%s2478_s8] sm:$0xff]  ;;  %v413_v50 = vld [vmem:[%s2478_s8 + $0x10] sm:$0xff]  ;;  %v2034_v52 = vpack.c.bf16 %v572_v44, %v571_v42  ;;  %v542_v55 = vld [vmem:[%s2476_s7 + $0x218] sm:$0xff]  ;;  %v2036_v57 = vpack.c.bf16 %v590_v48, %v589_v47 }
  0x5f   : > { %1993 = vmatprep.subr.bf16.mxu1 %v1992_v19  ;;  %v541_v54 = vld [vmem:[%s2476_s7 + $0x210] sm:$0xff]  ;;  %v574_v58 = vld [vmem:[%s2476_s7 + $0x318] sm:$0xff]  ;;  %v559_v59 = vld [vmem:[%s2476_s7 + $0x2a0] sm:$0xff] }
  0x60   : > { %v573_v56 = vld [vmem:[%s2476_s7 + $0x310] sm:$0xff]  ;;  %v560_v60 = vld [vmem:[%s2476_s7 + $0x2a8] sm:$0xff]  ;;  %v543_v61 = vld [vmem:[%s2476_s7 + $0x220] sm:$0xff]  ;;  %v2006_v0 = vpack.c.bf16 %v542_v55, %v541_v54 }
  0x61   : > { %1963 = vmatpush3.bf16.msra.mxu0 %v1962_v25  ;;  %v591_v62 = vld [vmem:[%s2476_s7 + $0x3a0] sm:$0xff]  ;;  %v592_v63 = vld [vmem:[%s2476_s7 + $0x3a8] sm:$0xff]  ;;  %v430_v2 = vld [vmem:[%s2478_s8 + $0x98] sm:$0xff]  ;;  %v2038_v4 = vpack.c.bf16 %v574_v58, %v573_v56  ;;  %v2008_v5 = vpack.c.bf16 %v560_v60, %v559_v59 }
  0x62   : > { %1995 = vmatpush3.bf16.msra.mxu1 %v1994_v26  ;;  %1965 = vmatprep.subr.bf16.mxu0 %v1964_v27  ;;  %v428_v1 = vld [vmem:[%s2478_s8 + $0x88] sm:$0xff]  ;;  %v427_v3 = vld [vmem:[%s2478_s8 + $0x80] sm:$0xff]  ;;  %v429_v8 = vld [vmem:[%s2478_s8 + $0x90] sm:$0xff]  ;;  %v2040_v9 = vpack.c.bf16 %v592_v63, %v591_v62 }
  0x63   : > { %1997 = vmatprep.subr.bf16.mxu1 %v1996_v31  ;;  %v544_v6 = vld [vmem:[%s2476_s7 + $0x228] sm:$0xff]  ;;  %v575_v7 = vld [vmem:[%s2476_s7 + $0x320] sm:$0xff]  ;;  %v561_v11 = vld [vmem:[%s2476_s7 + $0x2b0] sm:$0xff] }
  0x64   : > { %v576_v10 = vld [vmem:[%s2476_s7 + $0x328] sm:$0xff]  ;;  %v562_v12 = vld [vmem:[%s2476_s7 + $0x2b8] sm:$0xff]  ;;  %v545_v13 = vld [vmem:[%s2476_s7 + $0x230] sm:$0xff]  ;;  %v2010_v16 = vpack.c.bf16 %v544_v6, %v543_v61 }
  0x65   : > { %1967 = vmatpush3.bf16.msra.mxu0 %v1966_v37  ;;  %v593_v14 = vld [vmem:[%s2476_s7 + $0x3b0] sm:$0xff]  ;;  %v594_v15 = vld [vmem:[%s2476_s7 + $0x3b8] sm:$0xff]  ;;  %v444_v17 = vld [vmem:[%s2478_s8 + $0x108] sm:$0xff]  ;;  %v2042_v20 = vpack.c.bf16 %v576_v10, %v575_v7  ;;  %v2012_v21 = vpack.c.bf16 %v562_v12, %v561_v11 }
  0x66   : > { %1999 = vmatpush3.bf16.msra.mxu1 %v1998_v38  ;;  %2001 = vmatprep.subr.bf16.mxu0 %v2000_v39  ;;  %v446_v18 = vld [vmem:[%s2478_s8 + $0x118] sm:$0xff]  ;;  %v443_v19 = vld [vmem:[%s2478_s8 + $0x100] sm:$0xff]  ;;  %v577_v23 = vld [vmem:[%s2476_s7 + $0x330] sm:$0xff]  ;;  %v2044_v25 = vpack.c.bf16 %v594_v15, %v593_v14 }
  0x67   : > { %2033 = vmatprep.subr.bf16.mxu1 %v2032_v43  ;;  %v546_v22 = vld [vmem:[%s2476_s7 + $0x238] sm:$0xff]  ;;  %v445_v24 = vld [vmem:[%s2478_s8 + $0x110] sm:$0xff]  ;;  %v563_v27 = vld [vmem:[%s2476_s7 + $0x2c0] sm:$0xff] }
  0x68   : > { %796 = vmatmul.mubr.f32.vlgmr.msra.gmra.mrb[0].mxu0 %v411_v49  ;;  %v578_v26 = vld [vmem:[%s2476_s7 + $0x338] sm:$0xff]  ;;  %v564_v28 = vld [vmem:[%s2476_s7 + $0x2c8] sm:$0xff]  ;;  %v547_v29 = vld [vmem:[%s2476_s7 + $0x240] sm:$0xff]  ;;  %v2014_v32 = vpack.c.bf16 %v546_v22, %v545_v13 }
  0x69   : > { %881 = vmatmul.mubr.f32.vlgmr.msra.gmra.mrb[0].mxu1 %v413_v50  ;;  %2003 = vmatpush3.bf16.msra.mxu0 %v2002_v51  ;;  %v595_v30 = vld [vmem:[%s2476_s7 + $0x3c0] sm:$0xff]  ;;  %v596_v31 = vld [vmem:[%s2476_s7 + $0x3c8] sm:$0xff]  ;;  %v462_v34 = vld [vmem:[%s2478_s8 + $0x198] sm:$0xff]  ;;  %v2046_v36 = vpack.c.bf16 %v578_v26, %v577_v23  ;;  %v2016_v37 = vpack.c.bf16 %v564_v28, %v563_v27 }
  0x6a   : > { %2035 = vmatpush3.bf16.msra.mxu1 %v2034_v52  ;;  %2005 = vmatprep.subr.bf16.mxu0 %v2004_v53  ;;  %v460_v33 = vld [vmem:[%s2478_s8 + $0x188] sm:$0xff]  ;;  %v459_v35 = vld [vmem:[%s2478_s8 + $0x180] sm:$0xff]  ;;  %v461_v40 = vld [vmem:[%s2478_s8 + $0x190] sm:$0xff]  ;;  %v2048_v41 = vpack.c.bf16 %v596_v31, %v595_v30 }
  0x6b   : > { %2037 = vmatprep.subr.bf16.mxu1 %v2036_v57  ;;  %800 = vmatprep.mubr.f32.mxu0 %v428_v1  ;;  %v548_v38 = vld [vmem:[%s2476_s7 + $0x248] sm:$0xff]  ;;  %v579_v39 = vld [vmem:[%s2476_s7 + $0x340] sm:$0xff]  ;;  %v565_v43 = vld [vmem:[%s2476_s7 + $0x2d0] sm:$0xff] }
  0x6c   : > { %885 = vmatprep.mubr.f32.mxu1 %v430_v2  ;;  %801 = vmatmul.mubr.f32.gmra.mrb[2].mxu0 %v427_v3  ;;  %v580_v42 = vld [vmem:[%s2476_s7 + $0x348] sm:$0xff]  ;;  %v566_v44 = vld [vmem:[%s2476_s7 + $0x2d8] sm:$0xff]  ;;  %v597_v45 = vld [vmem:[%s2476_s7 + $0x3d0] sm:$0xff]  ;;  %v2018_v47 = vpack.c.bf16 %v548_v38, %v547_v29 }
  0x6d   : > { %2007 = vmatpush3.bf16.msra.mxu0 %v2006_v0  ;;  %886 = vmatmul.mubr.f32.gmra.mrb[2].mxu1 %v429_v8  ;;  %v598_v46 = vld [vmem:[%s2476_s7 + $0x3d8] sm:$0xff]  ;;  %v549_v48 = vld [vmem:[%s2476_s7 + $0x250] sm:$0xff]  ;;  %v416_v49 = vld [vmem:[%s2478_s8 + $0x28] sm:$0xff]  ;;  %v2050_v50 = vpack.c.bf16 %v580_v42, %v579_v39  ;;  %v2020_v51 = vpack.c.bf16 %v566_v44, %v565_v43 }
  0x6e   : > { %2039 = vmatpush3.bf16.msra.mxu1 %v2038_v4  ;;  %2009 = vmatprep.subr.bf16.mxu0 %v2008_v5  ;;  %v550_v52 = vld [vmem:[%s2476_s7 + $0x258] sm:$0xff]  ;;  %v581_v53 = vld [vmem:[%s2476_s7 + $0x350] sm:$0xff]  ;;  %v2052_v55 = vpack.c.bf16 %v598_v46, %v597_v45  ;;  %v567_v57 = vld [vmem:[%s2476_s7 + $0x2e0] sm:$0xff] }
  0x6f   : > { %2041 = vmatprep.subr.bf16.mxu1 %v2040_v9  ;;  %805 = vmatprep.mubr.f32.mxu0 %v444_v17  ;;  %v418_v54 = vld [vmem:[%s2478_s8 + $0x38] sm:$0xff]  ;;  %v568_v58 = vld [vmem:[%s2476_s7 + $0x2e8] sm:$0xff]  ;;  %v599_v59 = vld [vmem:[%s2476_s7 + $0x3e0] sm:$0xff]  ;;  %v2022_v61 = vpack.c.bf16 %v550_v52, %v549_v48 }
  0x70   : > { %890 = vmatprep.mubr.f32.mxu1 %v446_v18  ;;  %806 = vmatmul.mubr.f32.gmra.mrb[4].mxu0 %v443_v19  ;;  %v582_v56 = vld [vmem:[%s2476_s7 + $0x358] sm:$0xff]  ;;  %v600_v60 = vld [vmem:[%s2476_s7 + $0x3e8] sm:$0xff]  ;;  %v2024_v63 = vpack.c.bf16 %v568_v58, %v567_v57  ;;  %v551_v0 = vld [vmem:[%s2476_s7 + $0x260] sm:$0xff] }
  0x71   : > { %2011 = vmatpush3.bf16.msra.mxu0 %v2010_v16  ;;  %891 = vmatmul.mubr.f32.gmra.mrb[4].mxu1 %v445_v24  ;;  %v2054_v62 = vpack.c.bf16 %v582_v56, %v581_v53  ;;  %v552_v1 = vld [vmem:[%s2476_s7 + $0x268] sm:$0xff]  ;;  %v583_v2 = vld [vmem:[%s2476_s7 + $0x360] sm:$0xff]  ;;  %v2056_v3 = vpack.c.bf16 %v600_v60, %v599_v59  ;;  %v569_v5 = vld [vmem:[%s2476_s7 + $0x2f0] sm:$0xff] }
  0x72   : > { %2043 = vmatpush3.bf16.msra.mxu1 %v2042_v20  ;;  %2013 = vmatprep.subr.bf16.mxu0 %v2012_v21  ;;  %v584_v4 = vld [vmem:[%s2476_s7 + $0x368] sm:$0xff]  ;;  %v570_v6 = vld [vmem:[%s2476_s7 + $0x2f8] sm:$0xff]  ;;  %v601_v7 = vld [vmem:[%s2476_s7 + $0x3f0] sm:$0xff]  ;;  %v2026_v9 = vpack.c.bf16 %v552_v1, %v551_v0 }
  0x73   : > { %2045 = vmatprep.subr.bf16.mxu1 %v2044_v25  ;;  %810 = vmatprep.mubr.f32.mxu0 %v460_v33  ;;  %v602_v8 = vld [vmem:[%s2476_s7 + $0x3f8] sm:$0xff]  ;;  %v2058_v10 = vpack.c.bf16 %v584_v4, %v583_v2  ;;  %v2028_v11 = vpack.c.bf16 %v570_v6, %v569_v5  ;;  %v553_v12 = vld [vmem:[%s2476_s7 + $0x270] sm:$0xff]  ;;  %v619_v17 = vld [vmem:[%s2476_s7 + $0x480] sm:$0xff] }
  0x74   : > { %895 = vmatprep.mubr.f32.mxu1 %v462_v34  ;;  %811 = vmatmul.mubr.f32.gmra.mrb[6].mxu0 %v459_v35  ;;  %v554_v13 = vld [vmem:[%s2476_s7 + $0x278] sm:$0xff]  ;;  %v585_v14 = vld [vmem:[%s2476_s7 + $0x370] sm:$0xff]  ;;  %v2060_v15 = vpack.c.bf16 %v602_v8, %v601_v7  ;;  %v620_v18 = vld [vmem:[%s2476_s7 + $0x488] sm:$0xff] }
  0x75   : > { %2015 = vmatpush3.bf16.msra.mxu0 %v2014_v32  ;;  %896 = vmatmul.mubr.f32.gmra.mrb[6].mxu1 %v461_v40  ;;  %v586_v16 = vld [vmem:[%s2476_s7 + $0x378] sm:$0xff]  ;;  %v651_v19 = vld [vmem:[%s2476_s7 + $0x580] sm:$0xff]  ;;  %v652_v20 = vld [vmem:[%s2476_s7 + $0x588] sm:$0xff]  ;;  %v2030_v21 = vpack.c.bf16 %v554_v13, %v553_v12  ;;  %v2064_v23 = vpack.c.bf16 %v620_v18, %v619_v17 }
  0x76   : > { %2047 = vmatpush3.bf16.msra.mxu1 %v2046_v36  ;;  %2017 = vmatprep.subr.bf16.mxu0 %v2016_v37  ;;  %v2062_v22 = vpack.c.bf16 %v586_v16, %v585_v14  ;;  %v603_v24 = vld [vmem:[%s2476_s7 + $0x400] sm:$0xff]  ;;  %v604_v25 = vld [vmem:[%s2476_s7 + $0x408] sm:$0xff]  ;;  %v2096_v26 = vpack.c.bf16 %v652_v20, %v651_v19  ;;  %v621_v30 = vld [vmem:[%s2476_s7 + $0x490] sm:$0xff] }
  0x77   : > { %2049 = vmatprep.subr.bf16.mxu1 %v2048_v41  ;;  %965 = vmatprep.mubr.f32.mxu0 %v416_v49  ;;  %v635_v27 = vld [vmem:[%s2476_s7 + $0x500] sm:$0xff]  ;;  %v636_v28 = vld [vmem:[%s2476_s7 + $0x508] sm:$0xff]  ;;  %v622_v31 = vld [vmem:[%s2476_s7 + $0x498] sm:$0xff]  ;;  %v2066_v32 = vpack.c.bf16 %v604_v25, %v603_v24 }
  0x78   : > { %1050 = vmatprep.mubr.f32.mxu1 %v418_v54  ;;  %v415_v29 = vld [vmem:[%s2478_s8 + $0x20] sm:$0xff]  ;;  %v417_v33 = vld [vmem:[%s2478_s8 + $0x30] sm:$0xff]  ;;  %v654_v35 = vld [vmem:[%s2476_s7 + $0x598] sm:$0xff]  ;;  %v2098_v36 = vpack.c.bf16 %v636_v28, %v635_v27  ;;  %v2068_v41 = vpack.c.bf16 %v622_v31, %v621_v30 }
  0x79   : > { %2019 = vmatpush3.bf16.msra.mxu0 %v2018_v47  ;;  %v653_v34 = vld [vmem:[%s2476_s7 + $0x590] sm:$0xff]  ;;  %v432_v37 = vld [vmem:[%s2478_s8 + $0xa8] sm:$0xff]  ;;  %v606_v39 = vld [vmem:[%s2476_s7 + $0x418] sm:$0xff] }
  0x7a   : > { %2051 = vmatpush3.bf16.msra.mxu1 %v2050_v50  ;;  %2021 = vmatprep.subr.bf16.mxu0 %v2020_v51  ;;  %v605_v38 = vld [vmem:[%s2476_s7 + $0x410] sm:$0xff]  ;;  %v431_v40 = vld [vmem:[%s2478_s8 + $0xa0] sm:$0xff]  ;;  %v638_v43 = vld [vmem:[%s2476_s7 + $0x518] sm:$0xff]  ;;  %v2100_v45 = vpack.c.bf16 %v654_v35, %v653_v34 }
  0x7b   : > { %2053 = vmatprep.subr.bf16.mxu1 %v2052_v55  ;;  %v637_v42 = vld [vmem:[%s2476_s7 + $0x510] sm:$0xff]  ;;  %v434_v44 = vld [vmem:[%s2478_s8 + $0xb8] sm:$0xff]  ;;  %v623_v46 = vld [vmem:[%s2476_s7 + $0x4a0] sm:$0xff]  ;;  %v2070_v48 = vpack.c.bf16 %v606_v39, %v605_v38 }
  0x7c   : > { %v624_v47 = vld [vmem:[%s2476_s7 + $0x4a8] sm:$0xff]  ;;  %v433_v49 = vld [vmem:[%s2478_s8 + $0xb0] sm:$0xff]  ;;  %v655_v50 = vld [vmem:[%s2476_s7 + $0x5a0] sm:$0xff]  ;;  %v2102_v52 = vpack.c.bf16 %v638_v43, %v637_v42 }
  0x7d   : > { %2023 = vmatpush3.bf16.msra.mxu0 %v2022_v61  ;;  %v656_v51 = vld [vmem:[%s2476_s7 + $0x5a8] sm:$0xff]  ;;  %v607_v54 = vld [vmem:[%s2476_s7 + $0x420] sm:$0xff]  ;;  %v2072_v57 = vpack.c.bf16 %v624_v47, %v623_v46  ;;  %v450_v58 = vld [vmem:[%s2478_s8 + $0x138] sm:$0xff] }
  0x7e   : > { %2055 = vmatpush3.bf16.msra.mxu1 %v2054_v62  ;;  %2025 = vmatprep.subr.bf16.mxu0 %v2024_v63  ;;  %v448_v53 = vld [vmem:[%s2478_s8 + $0x128] sm:$0xff]  ;;  %v447_v56 = vld [vmem:[%s2478_s8 + $0x120] sm:$0xff]  ;;  %v2104_v61 = vpack.c.bf16 %v656_v51, %v655_v50  ;;  %v449_v62 = vld [vmem:[%s2478_s8 + $0x130] sm:$0xff] }
  0x7f   : > { %2057 = vmatprep.subr.bf16.mxu1 %v2056_v3  ;;  %v608_v55 = vld [vmem:[%s2476_s7 + $0x428] sm:$0xff]  ;;  %v639_v59 = vld [vmem:[%s2476_s7 + $0x520] sm:$0xff]  ;;  %v625_v63 = vld [vmem:[%s2476_s7 + $0x4b0] sm:$0xff] }
  0x80   : > { %v640_v60 = vld [vmem:[%s2476_s7 + $0x528] sm:$0xff]  ;;  %v626_v0 = vld [vmem:[%s2476_s7 + $0x4b8] sm:$0xff]  ;;  %v2074_v1 = vpack.c.bf16 %v608_v55, %v607_v54  ;;  %v657_v3 = vld [vmem:[%s2476_s7 + $0x5b0] sm:$0xff] }
  0x81   : > { %2027 = vmatpush3.bf16.msra.mxu0 %v2026_v9  ;;  %v464_v2 = vld [vmem:[%s2478_s8 + $0x1a8] sm:$0xff]  ;;  %v658_v4 = vld [vmem:[%s2476_s7 + $0x5b8] sm:$0xff]  ;;  %v2106_v5 = vpack.c.bf16 %v640_v60, %v639_v59  ;;  %v609_v6 = vld [vmem:[%s2476_s7 + $0x430] sm:$0xff]  ;;  %v2076_v9 = vpack.c.bf16 %v626_v0, %v625_v63 }
  0x82   : > { %2059 = vmatpush3.bf16.msra.mxu1 %v2058_v10  ;;  %2029 = vmatprep.subr.bf16.mxu0 %v2028_v11  ;;  %v610_v7 = vld [vmem:[%s2476_s7 + $0x438] sm:$0xff]  ;;  %v641_v8 = vld [vmem:[%s2476_s7 + $0x530] sm:$0xff]  ;;  %v627_v11 = vld [vmem:[%s2476_s7 + $0x4c0] sm:$0xff]  ;;  %v2108_v14 = vpack.c.bf16 %v658_v4, %v657_v3 }
  0x83   : > { %2061 = vmatprep.subr.bf16.mxu1 %v2060_v15  ;;  %v642_v10 = vld [vmem:[%s2476_s7 + $0x538] sm:$0xff]  ;;  %v628_v12 = vld [vmem:[%s2476_s7 + $0x4c8] sm:$0xff]  ;;  %v659_v15 = vld [vmem:[%s2476_s7 + $0x5c0] sm:$0xff]  ;;  %v2078_v18 = vpack.c.bf16 %v610_v7, %v609_v6 }
  0x84   : > { %v466_v13 = vld [vmem:[%s2478_s8 + $0x1b8] sm:$0xff]  ;;  %v660_v16 = vld [vmem:[%s2476_s7 + $0x5c8] sm:$0xff]  ;;  %v463_v17 = vld [vmem:[%s2478_s8 + $0x1a0] sm:$0xff]  ;;  %v2110_v20 = vpack.c.bf16 %v642_v10, %v641_v8 }
  0x85   : > { %2031 = vmatpush3.bf16.msra.mxu0 %v2030_v21  ;;  %v465_v19 = vld [vmem:[%s2478_s8 + $0x1b0] sm:$0xff]  ;;  %v2080_v21 = vpack.c.bf16 %v628_v12, %v627_v11  ;;  %v643_v24 = vld [vmem:[%s2476_s7 + $0x540] sm:$0xff]  ;;  %v2112_v25 = vpack.c.bf16 %v660_v16, %v659_v15  ;;  %v630_v28 = vld [vmem:[%s2476_s7 + $0x4d8] sm:$0xff] }
  0x86   : > { %2063 = vmatpush3.bf16.msra.mxu1 %v2062_v22  ;;  %2065 = vmatprep.subr.bf16.mxu0 %v2064_v23  ;;  %v611_v22 = vld [vmem:[%s2476_s7 + $0x440] sm:$0xff]  ;;  %v612_v23 = vld [vmem:[%s2476_s7 + $0x448] sm:$0xff]  ;;  %v629_v27 = vld [vmem:[%s2476_s7 + $0x4d0] sm:$0xff] }
  0x87   : > { %2097 = vmatprep.subr.bf16.mxu1 %v2096_v26  ;;  %v644_v26 = vld [vmem:[%s2476_s7 + $0x548] sm:$0xff]  ;;  %v662_v30 = vld [vmem:[%s2476_s7 + $0x5d8] sm:$0xff]  ;;  %v2084_v35 = vpack.c.bf16 %v630_v28, %v629_v27  ;;  %v645_v38 = vld [vmem:[%s2476_s7 + $0x550] sm:$0xff] }
  0x88   : > { %966 = vmatmul.mubr.f32.vlgmr.msra.gmra.mrb[8].mxu0 %v415_v29  ;;  %v661_v29 = vld [vmem:[%s2476_s7 + $0x5d0] sm:$0xff]  ;;  %v420_v31 = vld [vmem:[%s2478_s8 + $0x48] sm:$0xff]  ;;  %v2114_v34 = vpack.c.bf16 %v644_v26, %v643_v24  ;;  %v663_v43 = vld [vmem:[%s2476_s7 + $0x5e0] sm:$0xff] }
  0x89   : > { %2067 = vmatpush3.bf16.msra.mxu0 %v2066_v32  ;;  %1051 = vmatmul.mubr.f32.vlgmr.msra.gmra.mrb[8].mxu1 %v417_v33  ;;  %v2082_v32 = vpack.c.bf16 %v612_v23, %v611_v22  ;;  %v422_v33 = vld [vmem:[%s2478_s8 + $0x58] sm:$0xff]  ;;  %v2116_v39 = vpack.c.bf16 %v662_v30, %v661_v29  ;;  %v632_v42 = vld [vmem:[%s2476_s7 + $0x4e8] sm:$0xff]  ;;  %v647_v50 = vld [vmem:[%s2476_s7 + $0x560] sm:$0xff] }
  0x8a   : > { %2099 = vmatpush3.bf16.msra.mxu1 %v2098_v36  ;;  %970 = vmatprep.mubr.f32.mxu0 %v432_v37  ;;  %v613_v36 = vld [vmem:[%s2476_s7 + $0x450] sm:$0xff]  ;;  %v614_v37 = vld [vmem:[%s2476_s7 + $0x458] sm:$0xff]  ;;  %v715_v3 = vld [vmem:[%s2476_s7 + $0x780] sm:$0xff] }
  0x8b   : > { %2069 = vmatprep.subr.bf16.mxu0 %v2068_v41  ;;  %1055 = vmatprep.mubr.f32.mxu1 %v434_v44  ;;  %v631_v41 = vld [vmem:[%s2476_s7 + $0x4e0] sm:$0xff]  ;;  %v664_v44 = vld [vmem:[%s2476_s7 + $0x5e8] sm:$0xff]  ;;  %v634_v54 = vld [vmem:[%s2476_s7 + $0x4f8] sm:$0xff] }
  0x8c   : > { %971 = vmatmul.mubr.f32.gmra.mrb[10].mxu0 %v431_v40  ;;  %2101 = vmatprep.subr.bf16.mxu1 %v2100_v45  ;;  %v646_v40 = vld [vmem:[%s2476_s7 + $0x558] sm:$0xff]  ;;  %v2086_v45 = vpack.c.bf16 %v614_v37, %v613_v36  ;;  %v2088_v47 = vpack.c.bf16 %v632_v42, %v631_v41  ;;  %v2120_v51 = vpack.c.bf16 %v664_v44, %v663_v43  ;;  %v665_v55 = vld [vmem:[%s2476_s7 + $0x5f0] sm:$0xff]  ;;  %v716_v4 = vld [vmem:[%s2476_s7 + $0x788] sm:$0xff] }
  0x8d   : > { %2071 = vmatpush3.bf16.msra.mxu0 %v2070_v48  ;;  %1056 = vmatmul.mubr.f32.gmra.mrb[10].mxu1 %v433_v49  ;;  %v2118_v46 = vpack.c.bf16 %v646_v40, %v645_v38  ;;  %v615_v48 = vld [vmem:[%s2476_s7 + $0x460] sm:$0xff]  ;;  %v616_v49 = vld [vmem:[%s2476_s7 + $0x468] sm:$0xff]  ;;  %v617_v60 = vld [vmem:[%s2476_s7 + $0x470] sm:$0xff]  ;;  %v2160_v10 = vpack.c.bf16 %v716_v4, %v715_v3 }
  0x8e   : > { %2103 = vmatpush3.bf16.msra.mxu1 %v2102_v52  ;;  %975 = vmatprep.mubr.f32.mxu0 %v448_v53  ;;  %v648_v52 = vld [vmem:[%s2476_s7 + $0x568] sm:$0xff]  ;;  %v633_v53 = vld [vmem:[%s2476_s7 + $0x4f0] sm:$0xff]  ;;  %v650_v0 = vld [vmem:[%s2476_s7 + $0x578] sm:$0xff] }
  0x8f   : > { %2073 = vmatprep.subr.bf16.mxu0 %v2072_v57  ;;  %1060 = vmatprep.mubr.f32.mxu1 %v450_v58  ;;  %v2090_v57 = vpack.c.bf16 %v616_v49, %v615_v48  ;;  %v2122_v58 = vpack.c.bf16 %v648_v52, %v647_v50  ;;  %v2092_v59 = vpack.c.bf16 %v634_v54, %v633_v53  ;;  %v667_v8 = vld [vmem:[%s2476_s7 + $0x600] sm:$0xff]  ;;  %v700_v12 = vld [vmem:[%s2476_s7 + $0x708] sm:$0xff]  ;;  %v686_v15 = vld [vmem:[%s2476_s7 + $0x698] sm:$0xff] }
  0x90   : > { %976 = vmatmul.mubr.f32.gmra.mrb[12].mxu0 %v447_v56  ;;  %2105 = vmatprep.subr.bf16.mxu1 %v2104_v61  ;;  %v666_v56 = vld [vmem:[%s2476_s7 + $0x5f8] sm:$0xff]  ;;  %v699_v11 = vld [vmem:[%s2476_s7 + $0x700] sm:$0xff]  ;;  %v669_v22 = vld [vmem:[%s2476_s7 + $0x610] sm:$0xff] }
  0x91   : > { %2075 = vmatpush3.bf16.msra.mxu0 %v2074_v1  ;;  %1061 = vmatmul.mubr.f32.gmra.mrb[12].mxu1 %v449_v62  ;;  %v618_v61 = vld [vmem:[%s2476_s7 + $0x478] sm:$0xff]  ;;  %v649_v62 = vld [vmem:[%s2476_s7 + $0x570] sm:$0xff]  ;;  %v2124_v63 = vpack.c.bf16 %v666_v56, %v665_v55  ;;  %v683_v1 = vld [vmem:[%s2476_s7 + $0x680] sm:$0xff] }
  0x92   : > { %2107 = vmatpush3.bf16.msra.mxu1 %v2106_v5  ;;  %980 = vmatprep.mubr.f32.mxu0 %v464_v2  ;;  %v684_v2 = vld [vmem:[%s2476_s7 + $0x688] sm:$0xff]  ;;  %v2094_v5 = vpack.c.bf16 %v618_v61, %v617_v60  ;;  %v2126_v6 = vpack.c.bf16 %v650_v0, %v649_v62  ;;  %v670_v23 = vld [vmem:[%s2476_s7 + $0x618] sm:$0xff]  ;;  %v435_v24 = vld [vmem:[%s2478_s8 + $0xc0] sm:$0xff] }
  0x93   : > { %2077 = vmatprep.subr.bf16.mxu0 %v2076_v9  ;;  %1065 = vmatprep.mubr.f32.mxu1 %v466_v13  ;;  %v2128_v7 = vpack.c.bf16 %v684_v2, %v683_v1  ;;  %v668_v9 = vld [vmem:[%s2476_s7 + $0x608] sm:$0xff]  ;;  %v419_v13 = vld [vmem:[%s2478_s8 + $0x40] sm:$0xff]  ;;  %v701_v26 = vld [vmem:[%s2476_s7 + $0x710] sm:$0xff] }
  0x94   : > { %981 = vmatmul.mubr.f32.gmra.mrb[14].mxu0 %v463_v17  ;;  %2109 = vmatprep.subr.bf16.mxu1 %v2108_v14  ;;  %v685_v14 = vld [vmem:[%s2476_s7 + $0x690] sm:$0xff]  ;;  %v2130_v16 = vpack.c.bf16 %v668_v9, %v667_v8  ;;  %v702_v27 = vld [vmem:[%s2476_s7 + $0x718] sm:$0xff]  ;;  %v687_v30 = vld [vmem:[%s2476_s7 + $0x6a0] sm:$0xff] }
  0x95   : > { %2079 = vmatpush3.bf16.msra.mxu0 %v2078_v18  ;;  %1066 = vmatmul.mubr.f32.gmra.mrb[14].mxu1 %v465_v19  ;;  %v421_v17 = vld [vmem:[%s2478_s8 + $0x50] sm:$0xff]  ;;  %v718_v19 = vld [vmem:[%s2476_s7 + $0x798] sm:$0xff]  ;;  %v2166_v36 = vpack.c.bf16 %v702_v27, %v701_v26  ;;  %v452_v37 = vld [vmem:[%s2478_s8 + $0x148] sm:$0xff] }
  0x96   : > { %2111 = vmatpush3.bf16.msra.mxu1 %v2110_v20  ;;  %2081 = vmatprep.subr.bf16.mxu0 %v2080_v21  ;;  %v717_v18 = vld [vmem:[%s2476_s7 + $0x790] sm:$0xff]  ;;  %v2162_v20 = vpack.c.bf16 %v700_v12, %v699_v11  ;;  %v436_v21 = vld [vmem:[%s2478_s8 + $0xc8] sm:$0xff]  ;;  %v438_v28 = vld [vmem:[%s2478_s8 + $0xd8] sm:$0xff] }
  0x97   : > { %2113 = vmatprep.subr.bf16.mxu1 %v2112_v25  ;;  %1135 = vmatprep.mubr.f32.mxu0 %v420_v31  ;;  %v2132_v25 = vpack.c.bf16 %v686_v15, %v685_v14  ;;  %v2164_v29 = vpack.c.bf16 %v718_v19, %v717_v18  ;;  %v688_v31 = vld [vmem:[%s2476_s7 + $0x6a8] sm:$0xff]  ;;  %v671_v38 = vld [vmem:[%s2476_s7 + $0x620] sm:$0xff]  ;;  %v454_v42 = vld [vmem:[%s2478_s8 + $0x158] sm:$0xff] }
  0x98   : > { %1220 = vmatprep.mubr.f32.mxu1 %v422_v33  ;;  %v437_v33 = vld [vmem:[%s2478_s8 + $0xd0] sm:$0xff]  ;;  %v451_v40 = vld [vmem:[%s2478_s8 + $0x140] sm:$0xff]  ;;  %v2136_v41 = vpack.c.bf16 %v688_v31, %v687_v30  ;;  %v704_v44 = vld [vmem:[%s2476_s7 + $0x728] sm:$0xff] }
  0x99   : > { %2083 = vmatpush3.bf16.msra.mxu0 %v2082_v32  ;;  %v2134_v32 = vpack.c.bf16 %v670_v23, %v669_v22  ;;  %v703_v43 = vld [vmem:[%s2476_s7 + $0x720] sm:$0xff]  ;;  %v690_v48 = vld [vmem:[%s2476_s7 + $0x6b8] sm:$0xff]  ;;  %v468_v50 = vld [vmem:[%s2478_s8 + $0x1c8] sm:$0xff] }
  0x9a   : > { %2115 = vmatpush3.bf16.msra.mxu1 %v2114_v34  ;;  %2085 = vmatprep.subr.bf16.mxu0 %v2084_v35  ;;  %v719_v34 = vld [vmem:[%s2476_s7 + $0x7a0] sm:$0xff]  ;;  %v720_v35 = vld [vmem:[%s2476_s7 + $0x7a8] sm:$0xff]  ;;  %v722_v52 = vld [vmem:[%s2476_s7 + $0x7b8] sm:$0xff]  ;;  %v2170_v53 = vpack.c.bf16 %v704_v44, %v703_v43 }
  0x9b   : > { %2117 = vmatprep.subr.bf16.mxu1 %v2116_v39  ;;  %v672_v39 = vld [vmem:[%s2476_s7 + $0x628] sm:$0xff]  ;;  %v673_v54 = vld [vmem:[%s2476_s7 + $0x630] sm:$0xff]  ;;  %v674_v55 = vld [vmem:[%s2476_s7 + $0x638] sm:$0xff] }
  0x9c   : > { %v2138_v49 = vpack.c.bf16 %v672_v39, %v671_v38  ;;  %v705_v56 = vld [vmem:[%s2476_s7 + $0x730] sm:$0xff]  ;;  %v692_v60 = vld [vmem:[%s2476_s7 + $0x6c8] sm:$0xff]  ;;  %v470_v61 = vld [vmem:[%s2478_s8 + $0x1d8] sm:$0xff]  ;;  %v2142_v2 = vpack.c.bf16 %v674_v55, %v673_v54 }
  0x9d   : > { %2087 = vmatpush3.bf16.msra.mxu0 %v2086_v45  ;;  %v2168_v45 = vpack.c.bf16 %v720_v35, %v719_v34  ;;  %v724_v0 = vld [vmem:[%s2476_s7 + $0x7c8] sm:$0xff]  ;;  %v467_v1 = vld [vmem:[%s2478_s8 + $0x1c0] sm:$0xff]  ;;  %v469_v3 = vld [vmem:[%s2478_s8 + $0x1d0] sm:$0xff] }
  0x9e   : > { %2119 = vmatpush3.bf16.msra.mxu1 %v2118_v46  ;;  %2089 = vmatprep.subr.bf16.mxu0 %v2088_v47  ;;  %v453_v46 = vld [vmem:[%s2478_s8 + $0x150] sm:$0xff]  ;;  %v707_v8 = vld [vmem:[%s2476_s7 + $0x740] sm:$0xff]  ;;  %v694_v12 = vld [vmem:[%s2476_s7 + $0x6d8] sm:$0xff] }
  0x9f   : > { %2121 = vmatprep.subr.bf16.mxu1 %v2120_v51  ;;  %v689_v47 = vld [vmem:[%s2476_s7 + $0x6b0] sm:$0xff]  ;;  %v726_v14 = vld [vmem:[%s2476_s7 + $0x7d8] sm:$0xff]  ;;  %v424_v15 = vld [vmem:[%s2478_s8 + $0x68] sm:$0xff] }
  0xa0   : > { %v721_v51 = vld [vmem:[%s2476_s7 + $0x7b0] sm:$0xff]  ;;  %v696_v26 = vld [vmem:[%s2476_s7 + $0x6e8] sm:$0xff]  ;;  %v727_v27 = vld [vmem:[%s2476_s7 + $0x7e0] sm:$0xff] }
  0xa1   : > { %2091 = vmatpush3.bf16.msra.mxu0 %v2090_v57  ;;  %v2140_v57 = vpack.c.bf16 %v690_v48, %v689_v47  ;;  %v2172_v62 = vpack.c.bf16 %v722_v52, %v721_v51  ;;  %v693_v11 = vld [vmem:[%s2476_s7 + $0x6d0] sm:$0xff]  ;;  %v711_v34 = vld [vmem:[%s2476_s7 + $0x760] sm:$0xff]  ;;  %v698_v38 = vld [vmem:[%s2476_s7 + $0x6f8] sm:$0xff] }
  0xa2   : > { %2123 = vmatpush3.bf16.msra.mxu1 %v2122_v58  ;;  %2093 = vmatprep.subr.bf16.mxu0 %v2092_v59  ;;  %v706_v58 = vld [vmem:[%s2476_s7 + $0x738] sm:$0xff]  ;;  %v691_v59 = vld [vmem:[%s2476_s7 + $0x6c0] sm:$0xff]  ;;  %v2148_v19 = vpack.c.bf16 %v694_v12, %v693_v11  ;;  %v709_v22 = vld [vmem:[%s2476_s7 + $0x750] sm:$0xff] }
  0xa3   : > { %2125 = vmatprep.subr.bf16.mxu1 %v2124_v63  ;;  %v723_v63 = vld [vmem:[%s2476_s7 + $0x7c0] sm:$0xff]  ;;  %v2174_v4 = vpack.c.bf16 %v706_v58, %v705_v56  ;;  %v729_v39 = vld [vmem:[%s2476_s7 + $0x7f0] sm:$0xff]  ;;  %v714_v48 = vld [vmem:[%s2476_s7 + $0x778] sm:$0xff] }
  0xa4   : > { %v2176_v9 = vpack.c.bf16 %v724_v0, %v723_v63  ;;  %v681_v44 = vld [vmem:[%s2476_s7 + $0x670] sm:$0xff]  ;;  %v423_v51 = vld [vmem:[%s2478_s8 + $0x60] sm:$0xff]  ;;  %v442_v54 = vld [vmem:[%s2478_s8 + $0xf8] sm:$0xff] }
  0xa5   : > { %2095 = vmatpush3.bf16.msra.mxu0 %v2094_v5  ;;  %v2144_v5 = vpack.c.bf16 %v692_v60, %v691_v59  ;;  %v713_v47 = vld [vmem:[%s2476_s7 + $0x770] sm:$0xff]  ;;  %v439_v55 = vld [vmem:[%s2478_s8 + $0xe0] sm:$0xff]  ;;  %v458_v58 = vld [vmem:[%s2478_s8 + $0x178] sm:$0xff] }
  0xa6   : > { %2127 = vmatpush3.bf16.msra.mxu1 %v2126_v6  ;;  %2129 = vmatprep.subr.bf16.mxu0 %v2128_v7  ;;  %v675_v6 = vld [vmem:[%s2476_s7 + $0x640] sm:$0xff]  ;;  %v676_v7 = vld [vmem:[%s2476_s7 + $0x648] sm:$0xff]  ;;  %v425_v52 = vld [vmem:[%s2478_s8 + $0x70] sm:$0xff] }
  0xa7   : > { %2161 = vmatprep.subr.bf16.mxu1 %v2160_v10  ;;  %v708_v10 = vld [vmem:[%s2476_s7 + $0x748] sm:$0xff]  ;;  %v441_v56 = vld [vmem:[%s2478_s8 + $0xf0] sm:$0xff]  ;;  %v455_v59 = vld [vmem:[%s2478_s8 + $0x160] sm:$0xff] }
  0xa8   : > { %1136 = vmatmul.mubr.f32.vlgmr.msra.gmra.mrb[16].mxu0 %v419_v13  ;;  %v725_v13 = vld [vmem:[%s2476_s7 + $0x7d0] sm:$0xff]  ;;  %v2178_v18 = vpack.c.bf16 %v708_v10, %v707_v8  ;;  %v471_v63 = vld [vmem:[%s2478_s8 + $0x1e0] sm:$0xff] }
  0xa9   : > { %2131 = vmatpush3.bf16.msra.mxu0 %v2130_v16  ;;  %1221 = vmatmul.mubr.f32.vlgmr.msra.gmra.mrb[16].mxu1 %v421_v17  ;;  %v2146_v16 = vpack.c.bf16 %v676_v7, %v675_v6  ;;  %v426_v17 = vld [vmem:[%s2478_s8 + $0x78] sm:$0xff]  ;;  %v2180_v23 = vpack.c.bf16 %v726_v14, %v725_v13  ;;  %v457_v60 = vld [vmem:[%s2478_s8 + $0x170] sm:$0xff] }
  0xaa   : > { %2163 = vmatpush3.bf16.msra.mxu1 %v2162_v20  ;;  %1140 = vmatprep.mubr.f32.mxu0 %v436_v21  ;;  %v677_v20 = vld [vmem:[%s2476_s7 + $0x650] sm:$0xff]  ;;  %v678_v21 = vld [vmem:[%s2476_s7 + $0x658] sm:$0xff] }
  0xab   : > { %2133 = vmatprep.subr.bf16.mxu0 %v2132_v25  ;;  %1225 = vmatprep.mubr.f32.mxu1 %v438_v28  ;;  %v695_v25 = vld [vmem:[%s2476_s7 + $0x6e0] sm:$0xff]  ;;  %v728_v28 = vld [vmem:[%s2476_s7 + $0x7e8] sm:$0xff]  ;;  %v473_v0 = vld [vmem:[%s2478_s8 + $0x1f0] sm:$0xff] }
  0xac   : > { %1141 = vmatmul.mubr.f32.gmra.mrb[18].mxu0 %v435_v24  ;;  %2165 = vmatprep.subr.bf16.mxu1 %v2164_v29  ;;  %v710_v24 = vld [vmem:[%s2476_s7 + $0x758] sm:$0xff]  ;;  %v2150_v29 = vpack.c.bf16 %v678_v21, %v677_v20  ;;  %v2152_v31 = vpack.c.bf16 %v696_v26, %v695_v25  ;;  %v2184_v35 = vpack.c.bf16 %v728_v28, %v727_v27 }
  0xad   : > { %2135 = vmatpush3.bf16.msra.mxu0 %v2134_v32  ;;  %1226 = vmatmul.mubr.f32.gmra.mrb[18].mxu1 %v437_v33  ;;  %v2182_v30 = vpack.c.bf16 %v710_v24, %v709_v22  ;;  %v679_v32 = vld [vmem:[%s2476_s7 + $0x660] sm:$0xff]  ;;  %v680_v33 = vld [vmem:[%s2476_s7 + $0x668] sm:$0xff] }
  0xae   : > { %2167 = vmatpush3.bf16.msra.mxu1 %v2166_v36  ;;  %1145 = vmatprep.mubr.f32.mxu0 %v452_v37  ;;  %v712_v36 = vld [vmem:[%s2476_s7 + $0x768] sm:$0xff]  ;;  %v697_v37 = vld [vmem:[%s2476_s7 + $0x6f0] sm:$0xff] }
  0xaf   : > { %2137 = vmatprep.subr.bf16.mxu0 %v2136_v41  ;;  %1230 = vmatprep.mubr.f32.mxu1 %v454_v42  ;;  %v2154_v41 = vpack.c.bf16 %v680_v33, %v679_v32  ;;  %v2186_v42 = vpack.c.bf16 %v712_v36, %v711_v34  ;;  %v2156_v43 = vpack.c.bf16 %v698_v38, %v697_v37 }
  0xb0   : > { %1146 = vmatmul.mubr.f32.gmra.mrb[20].mxu0 %v451_v40  ;;  %2169 = vmatprep.subr.bf16.mxu1 %v2168_v45  ;;  %v730_v40 = vld [vmem:[%s2476_s7 + $0x7f8] sm:$0xff] }
  0xb1   : > { %2139 = vmatpush3.bf16.msra.mxu0 %v2138_v49  ;;  %1231 = vmatmul.mubr.f32.gmra.mrb[20].mxu1 %v453_v46  ;;  %v682_v45 = vld [vmem:[%s2476_s7 + $0x678] sm:$0xff]  ;;  %v2188_v46 = vpack.c.bf16 %v730_v40, %v729_v39 }
  0xb2   : > { %2171 = vmatpush3.bf16.msra.mxu1 %v2170_v53  ;;  %1150 = vmatprep.mubr.f32.mxu0 %v468_v50  ;;  %v2158_v49 = vpack.c.bf16 %v682_v45, %v681_v44  ;;  %v2190_v50 = vpack.c.bf16 %v714_v48, %v713_v47  ;;  %v440_v53 = vld [vmem:[%s2478_s8 + $0xe8] sm:$0xff] }
  0xb3   : > { %2141 = vmatprep.subr.bf16.mxu0 %v2140_v57  ;;  %1235 = vmatprep.mubr.f32.mxu1 %v470_v61  ;;  %v456_v57 = vld [vmem:[%s2478_s8 + $0x168] sm:$0xff] }
  0xb4   : > { %1151 = vmatmul.mubr.f32.gmra.mrb[22].mxu0 %v467_v1  ;;  %2173 = vmatprep.subr.bf16.mxu1 %v2172_v62  ;;  %v472_v61 = vld [vmem:[%s2478_s8 + $0x1e8] sm:$0xff]  ;;  %v474_v62 = vld [vmem:[%s2478_s8 + $0x1f8] sm:$0xff] }
  0xb5   : > { %2143 = vmatpush3.bf16.msra.mxu0 %v2142_v2  ;;  %1236 = vmatmul.mubr.f32.gmra.mrb[22].mxu1 %v469_v3 }
  0xb6   : > { %2175 = vmatpush3.bf16.msra.mxu1 %v2174_v4  ;;  %2145 = vmatprep.subr.bf16.mxu0 %v2144_v5 }
  0xb7   : > { %2177 = vmatprep.subr.bf16.mxu1 %v2176_v9  ;;  %1305 = vmatprep.mubr.f32.mxu0 %v424_v15 }
  0xb8   : > { %1390 = vmatprep.mubr.f32.mxu1 %v426_v17 }
  0xb9   : > { %2147 = vmatpush3.bf16.msra.mxu0 %v2146_v16 }
  0xba   : > { %2179 = vmatpush3.bf16.msra.mxu1 %v2178_v18  ;;  %2149 = vmatprep.subr.bf16.mxu0 %v2148_v19 }
  0xbb   : > { %2181 = vmatprep.subr.bf16.mxu1 %v2180_v23 }
  0xbd   : > { %2151 = vmatpush3.bf16.msra.mxu0 %v2150_v29 }
  0xbe   : > { %2183 = vmatpush3.bf16.msra.mxu1 %v2182_v30  ;;  %2153 = vmatprep.subr.bf16.mxu0 %v2152_v31 }
  0xbf   : > { %2185 = vmatprep.subr.bf16.mxu1 %v2184_v35 }
  0xc1   : > { %2155 = vmatpush3.bf16.msra.mxu0 %v2154_v41 }
  0xc2   : > { %2187 = vmatpush3.bf16.msra.mxu1 %v2186_v42  ;;  %2157 = vmatprep.subr.bf16.mxu0 %v2156_v43 }
  0xc3   : > { %2189 = vmatprep.subr.bf16.mxu1 %v2188_v46 }
  0xc5   : > { %2159 = vmatpush3.bf16.msra.mxu0 %v2158_v49 }
  0xc6   : > { %2191 = vmatpush3.bf16.msra.mxu1 %v2190_v50 }
  0xc8   : > { %1306 = vmatmul.mubr.f32.vlgmr.msra.gmra.mrb[24].mxu0 %v423_v51 }
  0xc9   : > { %1391 = vmatmul.mubr.f32.vlgmr.msra.gmra.mrb[24].mxu1 %v425_v52  ;;  %1310 = vmatprep.mubr.f32.mxu0 %v440_v53 }
  0xca   : > { %1395 = vmatprep.mubr.f32.mxu1 %v442_v54 }
  0xcc   : > { %1311 = vmatmul.mubr.f32.gmra.mrb[26].mxu0 %v439_v55 }
  0xcd   : > { %1396 = vmatmul.mubr.f32.gmra.mrb[26].mxu1 %v441_v56  ;;  %1315 = vmatprep.mubr.f32.mxu0 %v456_v57 }
  0xce   : > { %1400 = vmatprep.mubr.f32.mxu1 %v458_v58 }
  0xd0   : > { %1316 = vmatmul.mubr.f32.gmra.mrb[28].mxu0 %v455_v59 }
  0xd1   : > { %1401 = vmatmul.mubr.f32.gmra.mrb[28].mxu1 %v457_v60  ;;  %1320 = vmatprep.mubr.f32.mxu0 %v472_v61 }
  0xd2   : > { %1405 = vmatprep.mubr.f32.mxu1 %v474_v62 }
  0xd4   : > { %1321 = vmatmul.mubr.f32.gmra.mrb[30].mxu0 %v471_v63 }
  0xd5   : > { %1406 = vmatmul.mubr.f32.gmra.mrb[30].mxu1 %v473_v0 }
 0x13b   : > { %v1616_v1 = vpop.f32.mrb[0].mxu0 }
 0x13c   : > { %v1660_v2 = vpop.f32.mrb[0].mxu1  ;;  %v1617_v3 = vpop.f32.mrb[1].mxu0 }
 0x13d   : > { %v1618_v4 = vadd.f32 %v1617_v3, %v1616_v1  ;;  %v1661_v5 = vpop.f32.mrb[1].mxu1 }
 0x13e   : > { %v1662_v6 = vadd.f32 %v1661_v5, %v1660_v2 }
 0x13f   : > { %v1619_v7 = vpop.f32.mrb[2].mxu0 }
 0x140   : > { %v883_v8 = vadd.f32 %v1662_v6, %v1618_v4  ;;  %v1663_v9 = vpop.f32.mrb[2].mxu1  ;;  %v1620_v10 = vpop.f32.mrb[3].mxu0 }
 0x141   : > { %v1621_v11 = vadd.f32 %v1620_v10, %v1619_v7  ;;  %v1664_v12 = vpop.f32.mrb[3].mxu1 }
 0x142   : > { %v1665_v13 = vadd.f32 %v1664_v12, %v1663_v9 }
 0x143   : > { %v1622_v14 = vpop.f32.mrb[4].mxu0 }
 0x144   : > { %v888_v15 = vadd.f32 %v1665_v13, %v1621_v11  ;;  %v1666_v16 = vpop.f32.mrb[4].mxu1  ;;  %v1623_v17 = vpop.f32.mrb[5].mxu0 }
 0x145   : > { %v1624_v18 = vadd.f32 %v1623_v17, %v1622_v14  ;;  %v1667_v19 = vpop.f32.mrb[5].mxu1 }
 0x146   : > { %v1668_v20 = vadd.f32 %v1667_v19, %v1666_v16 }
 0x147   : > { %v1625_v21 = vpop.f32.mrb[6].mxu0 }
 0x148   : > { %v893_v22 = vadd.f32 %v1668_v20, %v1624_v18  ;;  %v1669_v23 = vpop.f32.mrb[6].mxu1  ;;  %v1626_v24 = vpop.f32.mrb[7].mxu0 }
 0x149   : > { %v1627_v25 = vadd.f32 %v1626_v24, %v1625_v21  ;;  %v1670_v26 = vpop.f32.mrb[7].mxu1 }
 0x14a   : > { %v1671_v27 = vadd.f32 %v1670_v26, %v1669_v23 }
 0x14c   : > { %v898_v28 = vadd.f32 %v1671_v27, %v1627_v25 }
 0x15b   : > { %v1704_v29 = vpop.f32.mrb[8].mxu0 }
 0x15c   : > { %v1705_v30 = vpop.f32.mrb[9].mxu0  ;;  %v1748_v31 = vpop.f32.mrb[8].mxu1 }
 0x15d   : > { %v1706_v32 = vadd.f32 %v1705_v30, %v1704_v29  ;;  %v1749_v33 = vpop.f32.mrb[9].mxu1 }
 0x15e   : > { %v1750_v34 = vadd.f32 %v1749_v33, %v1748_v31 }
 0x15f   : > { %v968_v35 = vadd.f32 %v1706_v32, %v883_v8  ;;  %v1707_v36 = vpop.f32.mrb[10].mxu0 }
 0x160   : > { %v1708_v37 = vpop.f32.mrb[11].mxu0  ;;  %v1751_v38 = vpop.f32.mrb[10].mxu1 }
 0x161   : > { %v1053_v39 = vadd.f32 %v1750_v34, %v968_v35  ;;  %v1709_v40 = vadd.f32 %v1708_v37, %v1707_v36  ;;  %v1752_v41 = vpop.f32.mrb[11].mxu1  ;;  %v407_v37 = vld [vmem:[#allocation2] sm:$0xff] }
 0x162   : > { %v1753_v42 = vadd.f32 %v1752_v41, %v1751_v38 }
 0x163   : > { %v973_v43 = vadd.f32 %v1709_v40, %v888_v15  ;;  %v1710_v44 = vpop.f32.mrb[12].mxu0 }
 0x164   : > { %v1711_v45 = vpop.f32.mrb[13].mxu0  ;;  %v1754_v46 = vpop.f32.mrb[12].mxu1 }
 0x165   : > { %v1058_v47 = vadd.f32 %v1753_v42, %v973_v43  ;;  %v1712_v48 = vadd.f32 %v1711_v45, %v1710_v44  ;;  %v1755_v49 = vpop.f32.mrb[13].mxu1 }
 0x166   : > { %v1756_v50 = vadd.f32 %v1755_v49, %v1754_v46 }
 0x167   : > { %v978_v51 = vadd.f32 %v1712_v48, %v893_v22  ;;  %v1713_v52 = vpop.f32.mrb[14].mxu0 }
 0x168   : > { %v1714_v53 = vpop.f32.mrb[15].mxu0  ;;  %v1757_v54 = vpop.f32.mrb[14].mxu1 }
 0x169   : > { %v1063_v55 = vadd.f32 %v1756_v50, %v978_v51  ;;  %v1715_v56 = vadd.f32 %v1714_v53, %v1713_v52  ;;  %v1758_v57 = vpop.f32.mrb[15].mxu1 }
 0x16a   : > { %v1759_v58 = vadd.f32 %v1758_v57, %v1757_v54  ;;  %v409_v57 = vld [vmem:[#allocation2 + $0x10] sm:$0xff] }
 0x16b   : > { %v983_v59 = vadd.f32 %v1715_v56, %v898_v28 }
 0x16d   : > { %v1068_v60 = vadd.f32 %v1759_v58, %v983_v59 }
 0x17b   : > { %v1792_v61 = vpop.f32.mrb[16].mxu0 }
 0x17c   : > { %v1793_v62 = vpop.f32.mrb[17].mxu0  ;;  %v1836_v63 = vpop.f32.mrb[16].mxu1 }
 0x17d   : > { %v1794_v0 = vadd.f32 %v1793_v62, %v1792_v61  ;;  %v1837_v1 = vpop.f32.mrb[17].mxu1 }
 0x17e   : > { %v1838_v2 = vadd.f32 %v1837_v1, %v1836_v63 }
 0x17f   : > { %v1138_v3 = vadd.f32 %v1794_v0, %v1053_v39  ;;  %v1795_v4 = vpop.f32.mrb[18].mxu0 }
 0x180   : > { %v1796_v5 = vpop.f32.mrb[19].mxu0  ;;  %v1839_v6 = vpop.f32.mrb[18].mxu1 }
 0x181   : > { %v1223_v7 = vadd.f32 %v1838_v2, %v1138_v3  ;;  %v1797_v8 = vadd.f32 %v1796_v5, %v1795_v4  ;;  %v1840_v9 = vpop.f32.mrb[19].mxu1  ;;  %v410_v2 = vld [vmem:[#allocation2 + $0x18] sm:$0xff] }
 0x182   : > { %v1841_v10 = vadd.f32 %v1840_v9, %v1839_v6  ;;  %v1578_v6 = vld [vmem:[%s2834_s2] ss:$0 sm:$0xff] (!%p1577_p11) }
 0x183   : > { %v1143_v11 = vadd.f32 %v1797_v8, %v1058_v47  ;;  %v1798_v12 = vpop.f32.mrb[20].mxu0  ;;  %v408_v47 = vld [vmem:[#allocation2 + $0x8] sm:$0xff] }
 0x184   : > { %v1799_v13 = vpop.f32.mrb[21].mxu0  ;;  %v1842_v14 = vpop.f32.mrb[20].mxu1 }
 0x185   : > { %v1228_v15 = vadd.f32 %v1841_v10, %v1143_v11  ;;  %v1800_v16 = vadd.f32 %v1799_v13, %v1798_v12  ;;  %v1843_v17 = vpop.f32.mrb[21].mxu1 }
 0x186   : > { %v1844_v18 = vadd.f32 %v1843_v17, %v1842_v14 }
 0x187   : > { %v1148_v19 = vadd.f32 %v1800_v16, %v1063_v55  ;;  %v1801_v20 = vpop.f32.mrb[22].mxu0 }
 0x188   : > { %v1802_v21 = vpop.f32.mrb[23].mxu0  ;;  %v1845_v22 = vpop.f32.mrb[22].mxu1 }
 0x189   : > { %v1233_v23 = vadd.f32 %v1844_v18, %v1148_v19  ;;  %v1803_v24 = vadd.f32 %v1802_v21, %v1801_v20  ;;  %v1846_v25 = vpop.f32.mrb[23].mxu1 }
 0x18a   : > { %v1847_v26 = vadd.f32 %v1846_v25, %v1845_v22 }
 0x18b   : > { %v1153_v27 = vadd.f32 %v1803_v24, %v1068_v60 }
 0x18d   : > { %v1238_v28 = vadd.f32 %v1847_v26, %v1153_v27 }
 0x19b   : > { %v1880_v29 = vpop.f32.mrb[24].mxu0 }
 0x19c   : > { %v1881_v30 = vpop.f32.mrb[25].mxu0  ;;  %v1924_v31 = vpop.f32.mrb[24].mxu1 }
 0x19d   : > { %v1882_v32 = vadd.f32 %v1881_v30, %v1880_v29  ;;  %v1925_v33 = vpop.f32.mrb[25].mxu1 }
 0x19e   : > { %v1926_v34 = vadd.f32 %v1925_v33, %v1924_v31 }
 0x19f   : > { %v1308_v35 = vadd.f32 %v1882_v32, %v1223_v7  ;;  %v1883_v36 = vpop.f32.mrb[26].mxu0 }
 0x1a0   : > { %v1884_v38 = vpop.f32.mrb[27].mxu0  ;;  %v1927_v39 = vpop.f32.mrb[26].mxu1 }
 0x1a1   : > { %v1393_v40 = vadd.f32 %v1926_v34, %v1308_v35  ;;  %v1885_v41 = vadd.f32 %v1884_v38, %v1883_v36  ;;  %v1928_v42 = vpop.f32.mrb[27].mxu1 }
 0x1a2   : > { %v1929_v43 = vadd.f32 %v1928_v42, %v1927_v39 }
 0x1a3   : > { %v1411_v44 = vadd.f32 %v1393_v40, %v407_v37  ;;  %v1313_v45 = vadd.f32 %v1885_v41, %v1228_v15  ;;  %v1886_v46 = vpop.f32.mrb[28].mxu0 }
 0x1a4   : > { %v1887_v48 = vpop.f32.mrb[29].mxu0  ;;  %v1930_v49 = vpop.f32.mrb[28].mxu1 }
 0x1a5   : > { %1415 = vst [vmem:[#allocation2] sm:$0xff] %v1411_v44  ;;  %v1398_v50 = vadd.f32 %v1929_v43, %v1313_v45  ;;  %v1888_v51 = vadd.f32 %v1887_v48, %v1886_v46  ;;  %v1931_v52 = vpop.f32.mrb[29].mxu1 }
 0x1a6   : > { %v1932_v53 = vadd.f32 %v1931_v52, %v1930_v49 }
 0x1a7   : > { %v1412_v54 = vadd.f32 %v1398_v50, %v408_v47  ;;  %v1318_v55 = vadd.f32 %v1888_v51, %v1233_v23  ;;  %v1889_v56 = vpop.f32.mrb[30].mxu0 }
 0x1a8   : > { %v1890_v58 = vpop.f32.mrb[31].mxu0  ;;  %v1933_v59 = vpop.f32.mrb[30].mxu1 }
 0x1a9   : > { %1416 = vst [vmem:[#allocation2 + $0x8] sm:$0xff] %v1412_v54  ;;  %v1403_v60 = vadd.f32 %v1932_v53, %v1318_v55  ;;  %v1891_v61 = vadd.f32 %v1890_v58, %v1889_v56  ;;  %v1934_v62 = vpop.f32.mrb[31].mxu1 }
 0x1aa   : > { %v1935_v63 = vadd.f32 %v1934_v62, %v1933_v59 }
 0x1ab   : > { %v1413_v0 = vadd.f32 %v1403_v60, %v409_v57  ;;  %v1323_v1 = vadd.f32 %v1891_v61, %v1238_v28  ;;  %1422 = sbr.rel (%p1577_p11) target bundleno = 447 (0x1bf), region = 63 }
 0x1ac   : > { %v1423_v5 = vld [vmem:[#allocation2] sm:$0xff] (!%p1577_p11) }
 0x1ad   : > { %1417 = vst [vmem:[#allocation2 + $0x10] sm:$0xff] %v1413_v0  ;;  %v1408_v3 = vadd.f32 %v1935_v63, %v1323_v1  ;;  %v1434_v8 = vadd.f32 (!%p1577_p11), %v1578_v6, %v1423_v5 }
 0x1af   : > { %v1414_v4 = vadd.f32 %v1408_v3, %v410_v2  ;;  %vm1438_vm0 = vcmp.ge.f32.partialorder (!%p1577_p11), %v1434_v8, 0.0  ;;  %v1442_v14 = vmul.f32 (!%p1577_p11), 0.2, %v1434_v8 }
 0x1b0   : > { %v1424_v7 = vld [vmem:[#allocation2 + $0x8] sm:$0xff] (!%p1577_p11) }
 0x1b1   : > { %1418 = vst [vmem:[#allocation2 + $0x18] sm:$0xff] %v1414_v4  ;;  %v1435_v9 = vadd.f32 (!%p1577_p11), %v1578_v6, %v1424_v7  ;;  %v1446_v18 = vsel (!%p1577_p11), %vm1438_vm0, %v1434_v8, %v1442_v14 }
 0x1b2   : > { %1450 = vst [vmem:[%s2835_s3] sm:$0xff] %v1446_v18 }
 0x1b3   : > { %vm1439_vm1 = vcmp.ge.f32.partialorder %v1435_v9, 0.0  ;;  %v1443_v15 = vmul.f32 0.2, %v1435_v9 }
 0x1b4   : > { %v1425_v10 = vld [vmem:[#allocation2 + $0x10] sm:$0xff] }
 0x1b5   : > { %v1436_v12 = vadd.f32 %v1578_v6, %v1425_v10  ;;  %v1447_v19 = vsel %vm1439_vm1, %v1435_v9, %v1443_v15 }
 0x1b6   : > { %1451 = vst [vmem:[%s2835_s3 + $0x8] sm:$0xff] %v1447_v19 }
 0x1b7   : > { %vm1440_vm2 = vcmp.ge.f32.partialorder %v1436_v12, 0.0  ;;  %v1444_v16 = vmul.f32 0.2, %v1436_v12 }
 0x1b8   : > { %v1426_v11 = vld [vmem:[#allocation2 + $0x18] sm:$0xff] }
 0x1b9   : > { %v1437_v13 = vadd.f32 %v1578_v6, %v1426_v11  ;;  %v1448_v20 = vsel %vm1440_vm2, %v1436_v12, %v1444_v16 }
 0x1ba   : > { %1452 = vst [vmem:[%s2835_s3 + $0x10] sm:$0xff] %v1448_v20 }
 0x1bb   : > { %vm1441_vm3 = vcmp.ge.f32.partialorder %v1437_v13, 0.0  ;;  %v1445_v17 = vmul.f32 0.2, %v1437_v13 }
 0x1bd   : > { %v1449_v21 = vsel %vm1441_vm3, %v1437_v13, %v1445_v17 }
 0x1be   : > { %1453 = vst [vmem:[%s2835_s3 + $0x18] sm:$0xff] %v1449_v21 }
 0x1bf PF: > { %s13_s16 = sadd.s32 1, %s2271_s16   ;;  %s2836_s12 = smov %s2259_s13 }
 0x1c0   : > { %p10_p12 = scmp.ge.s32.totalorder %s13_s16, 6   ;;  %s2837_s13 = smov %s2329_s20 }
 0x1c1   : > { %s2838_s14 = smov %s2267_s15  ;;  %s2839_s15 = smov %s2841_s17 }
 0x1c2   :  { %12 = sbr.rel (!%p10_p12) target bundleno = 3 (0x3), region = 104 }

// kernel: up_block.9
= control target key start
LH: loop header
LB: loop body
LE: loop exit
PB: predicated region body
PF: predicated region fallthrough
CT: control target
= control target key end

     0   :  { %s2673_s0 = inlined_call_operand.vmem [shape: f32[512,128], index: 0, kind: input, shape index: {}]   ;;  %s2674_s1 = inlined_call_operand.vmem [shape: f32[128,128], index: 1, kind: input, shape index: {}]   ;;  %s2675_s2 = inlined_call_operand.vmem [shape: f32[1,128], index: 2, kind: input, shape index: {}]   ;;  %s2676_s3 = inlined_call_operand.vmem [shape: f32[512,128], index: 3, kind: input, shape index: {}]   ;;  %s2677_s4 = inlined_call_operand.hbm [shape: f32[512,128], index: 4, kind: output, shape index: {}]  }
   0x1   :  { %v82_v0 = vld [vmem:[%s2674_s1] sm:$0xff]  ;;  %v83_v1 = vld [vmem:[%s2674_s1 + $0x8] sm:$0xff]  ;;  %v84_v2 = vld [vmem:[%s2674_s1 + $0x10] sm:$0xff] }
   0x2   :  { %v1419_v3 = vpack.c.bf16 %v83_v1, %v82_v0  ;;  %v85_v4 = vld [vmem:[%s2674_s1 + $0x18] sm:$0xff]  ;;  %v86_v6 = vld [vmem:[%s2674_s1 + $0x20] sm:$0xff]  ;;  %v87_v7 = vld [vmem:[%s2674_s1 + $0x28] sm:$0xff] }
   0x3   :  { %v1423_v5 = vpack.c.bf16 %v85_v4, %v84_v2  ;;  %v1427_v8 = vpack.c.bf16 %v87_v7, %v86_v6  ;;  %v1838_v9 = vld [vmem:[%s2673_s0] sm:$0xff]  ;;  %v88_v11 = vld [vmem:[%s2674_s1 + $0x30] sm:$0xff]  ;;  %v89_v12 = vld [vmem:[%s2674_s1 + $0x38] sm:$0xff] }
   0x4   :  { %1420 = vmatprep.subr.bf16.mxu0 %v1419_v3  ;;  %1451 = vmatprep.subr.bf16.mxu1 %v1419_v3  ;;  %v1843_v10 = vld [vmem:[%s2673_s0 + $0x100] sm:$0xff]  ;;  %v1431_v13 = vpack.c.bf16 %v89_v12, %v88_v11  ;;  %v91_v15 = vld [vmem:[%s2674_s1 + $0x48] sm:$0xff]  ;;  %v92_v17 = vld [vmem:[%s2674_s1 + $0x50] sm:$0xff] }
   0x5   :  { %1422 = vmatpush3.bf16.msra.mxu0 %v1419_v3  ;;  %1459 = vmatpush3.bf16.msra.mxu1 %v1419_v3  ;;  %v90_v14 = vld [vmem:[%s2674_s1 + $0x40] sm:$0xff]  ;;  %v93_v18 = vld [vmem:[%s2674_s1 + $0x58] sm:$0xff]  ;;  %v95_v21 = vld [vmem:[%s2674_s1 + $0x68] sm:$0xff] }
   0x6   :  { %1424 = vmatprep.subr.bf16.mxu0 %v1423_v5  ;;  %1452 = vmatprep.subr.bf16.mxu1 %v1423_v5  ;;  %v1435_v16 = vpack.c.bf16 %v91_v15, %v90_v14  ;;  %v1439_v19 = vpack.c.bf16 %v93_v18, %v92_v17  ;;  %v94_v20 = vld [vmem:[%s2674_s1 + $0x60] sm:$0xff]  ;;  %v96_v23 = vld [vmem:[%s2674_s1 + $0x70] sm:$0xff]  ;;  %v97_v24 = vld [vmem:[%s2674_s1 + $0x78] sm:$0xff] }
   0x7   :  { %1323 = vmatprep.mubr.f32.mxu0 %v1838_v9  ;;  %1371 = vmatprep.mubr.f32.mxu1 %v1843_v10  ;;  %v1443_v22 = vpack.c.bf16 %v95_v21, %v94_v20  ;;  %v1447_v25 = vpack.c.bf16 %v97_v24, %v96_v23 }
   0x9   :  { %1426 = vmatpush3.bf16.msra.mxu0 %v1423_v5  ;;  %1460 = vmatpush3.bf16.msra.mxu1 %v1423_v5 }
   0xa   :  { %1428 = vmatprep.subr.bf16.mxu0 %v1427_v8  ;;  %1453 = vmatprep.subr.bf16.mxu1 %v1427_v8 }
   0xd   :  { %1430 = vmatpush3.bf16.msra.mxu0 %v1427_v8  ;;  %1461 = vmatpush3.bf16.msra.mxu1 %v1427_v8 }
   0xe   :  { %1432 = vmatprep.subr.bf16.mxu0 %v1431_v13  ;;  %1454 = vmatprep.subr.bf16.mxu1 %v1431_v13 }
  0x11   :  { %1434 = vmatpush3.bf16.msra.mxu0 %v1431_v13  ;;  %1462 = vmatpush3.bf16.msra.mxu1 %v1431_v13 }
  0x12   :  { %1436 = vmatprep.subr.bf16.mxu0 %v1435_v16  ;;  %1455 = vmatprep.subr.bf16.mxu1 %v1435_v16 }
  0x15   :  { %1438 = vmatpush3.bf16.msra.mxu0 %v1435_v16  ;;  %1463 = vmatpush3.bf16.msra.mxu1 %v1435_v16 }
  0x16   :  { %1440 = vmatprep.subr.bf16.mxu0 %v1439_v19  ;;  %1456 = vmatprep.subr.bf16.mxu1 %v1439_v19 }
  0x19   :  { %1442 = vmatpush3.bf16.msra.mxu0 %v1439_v19  ;;  %1464 = vmatpush3.bf16.msra.mxu1 %v1439_v19 }
  0x1a   :  { %1444 = vmatprep.subr.bf16.mxu0 %v1443_v22  ;;  %1457 = vmatprep.subr.bf16.mxu1 %v1443_v22 }
  0x1b   :  { %9 = vsyncpa [#allocation3], 0  ;;  %v1880_v26 = vld [vmem:[%s2673_s0 + $0x8] sm:$0xff]  ;;  %v1890_v28 = vld [vmem:[%s2673_s0 + $0x10] sm:$0xff]  ;;  %s1789_s23 = smov [#allocation2]  }
  0x1c   :  { %v1885_v27 = vld [vmem:[%s2673_s0 + $0x108] sm:$0xff]  ;;  %v1895_v29 = vld [vmem:[%s2673_s0 + $0x110] sm:$0xff]  ;;  %v1904_v30 = vld [vmem:[%s2673_s0 + $0x18] sm:$0xff]  ;;  %s1135_s24 = sshll.u32 %s1789_s23, 4  ;;  %s1136_s24 = int_to_ptr.vmem [resolvable:$true] %s1135_s24 }
  0x1d   :  { %1446 = vmatpush3.bf16.msra.mxu0 %v1443_v22  ;;  %1465 = vmatpush3.bf16.msra.mxu1 %v1443_v22  ;;  %v1909_v31 = vld [vmem:[%s2673_s0 + $0x118] sm:$0xff]  ;;  %v1914_v32 = vld [vmem:[%s2673_s0 + $0x20] sm:$0xff]  ;;  %v1928_v34 = vld [vmem:[%s2673_s0 + $0x28] sm:$0xff]  ;;  %s1765_s30 = scalar_lea.vmem %s1136_s24, 8192  ;;  %p1770_p1 = scmp.lt.s32.totalorder %s1136_s24, %s1136_s24 }
  0x1e   :  { %1448 = vmatprep.subr.bf16.mxu0 %v1447_v25  ;;  %1458 = vmatprep.subr.bf16.mxu1 %v1447_v25  ;;  %v1919_v33 = vld [vmem:[%s2673_s0 + $0x120] sm:$0xff]  ;;  %v1933_v35 = vld [vmem:[%s2673_s0 + $0x128] sm:$0xff]  ;;  %v1938_v36 = vld [vmem:[%s2673_s0 + $0x30] sm:$0xff]  ;;  %p1766_p0 = scmp.ne.s32.totalorder %s1136_s24, %s1765_s30  ;;  %p1771_p2 = scmp.lt.s32.totalorder %s1765_s30, %s1765_s30 }
  0x1f   :  { %v1943_v37 = vld [vmem:[%s2673_s0 + $0x130] sm:$0xff]  ;;  %v1952_v38 = vld [vmem:[%s2673_s0 + $0x38] sm:$0xff]  ;;  %v1962_v40 = vld [vmem:[%s2673_s0 + $0x40] sm:$0xff] }
  0x20   :  { %v1957_v39 = vld [vmem:[%s2673_s0 + $0x138] sm:$0xff]  ;;  %v1967_v41 = vld [vmem:[%s2673_s0 + $0x140] sm:$0xff]  ;;  %v1976_v42 = vld [vmem:[%s2673_s0 + $0x48] sm:$0xff]  ;;  %p1772_p3 = por %p1771_p2, %p1770_p1 }
  0x21   :  { %1450 = vmatpush3.bf16.msra.mxu0 %v1447_v25  ;;  %1466 = vmatpush3.bf16.msra.mxu1 %v1447_v25  ;;  %v1981_v43 = vld [vmem:[%s2673_s0 + $0x148] sm:$0xff]  ;;  %v1986_v44 = vld [vmem:[%s2673_s0 + $0x50] sm:$0xff]  ;;  %v2000_v46 = vld [vmem:[%s2673_s0 + $0x58] sm:$0xff] }
  0x22   :  { %v1991_v45 = vld [vmem:[%s2673_s0 + $0x150] sm:$0xff]  ;;  %v2005_v47 = vld [vmem:[%s2673_s0 + $0x158] sm:$0xff]  ;;  %v30_v48 = vld [vmem:[%s2673_s0 + $0x60] sm:$0xff]  ;;  %p1773_p4 = pnand %p1772_p3, %p1766_p0 }
  0x23   :  { %v62_v49 = vld [vmem:[%s2673_s0 + $0x160] sm:$0xff]  ;;  %v2018_v50 = vld [vmem:[%s2673_s0 + $0x68] sm:$0xff]  ;;  %v32_v52 = vld [vmem:[%s2673_s0 + $0x70] sm:$0xff] }
  0x24   :  { %1324 = vmatmul.mubr.f32.vlgmr.msra.gmra.mrb[0].mxu0 %v1880_v26  ;;  %1372 = vmatmul.mubr.f32.vlgmr.msra.gmra.mrb[0].mxu1 %v1885_v27  ;;  %v2023_v51 = vld [vmem:[%s2673_s0 + $0x168] sm:$0xff]  ;;  %v64_v53 = vld [vmem:[%s2673_s0 + $0x170] sm:$0xff]  ;;  %v33_v54 = vld [vmem:[%s2673_s0 + $0x78] sm:$0xff] }
  0x25   :  { %1326 = vmatprep.mubr.f32.mxu0 %v1890_v28  ;;  %1374 = vmatprep.mubr.f32.mxu1 %v1895_v29  ;;  %v65_v55 = vld [vmem:[%s2673_s0 + $0x178] sm:$0xff]  ;;  %v34_v56 = vld [vmem:[%s2673_s0 + $0x80] sm:$0xff]  ;;  %v35_v58 = vld [vmem:[%s2673_s0 + $0x88] sm:$0xff] }
  0x26   :  { %v66_v57 = vld [vmem:[%s2673_s0 + $0x180] sm:$0xff]  ;;  %v67_v59 = vld [vmem:[%s2673_s0 + $0x188] sm:$0xff]  ;;  %v36_v60 = vld [vmem:[%s2673_s0 + $0x90] sm:$0xff] }
  0x27   :  { %v68_v61 = vld [vmem:[%s2673_s0 + $0x190] sm:$0xff]  ;;  %v37_v62 = vld [vmem:[%s2673_s0 + $0x98] sm:$0xff]  ;;  %v38_v0 = vld [vmem:[%s2673_s0 + $0xa0] sm:$0xff] }
  0x28   :  { %1327 = vmatmul.mubr.f32.gmra.mrb[2].mxu0 %v1904_v30  ;;  %1375 = vmatmul.mubr.f32.gmra.mrb[2].mxu1 %v1909_v31  ;;  %v69_v63 = vld [vmem:[%s2673_s0 + $0x198] sm:$0xff]  ;;  %v70_v1 = vld [vmem:[%s2673_s0 + $0x1a0] sm:$0xff]  ;;  %v39_v2 = vld [vmem:[%s2673_s0 + $0xa8] sm:$0xff] }
  0x29   :  { %1329 = vmatprep.mubr.f32.mxu0 %v1914_v32  ;;  %1377 = vmatprep.mubr.f32.mxu1 %v1919_v33  ;;  %v71_v3 = vld [vmem:[%s2673_s0 + $0x1a8] sm:$0xff]  ;;  %v40_v4 = vld [vmem:[%s2673_s0 + $0xb0] sm:$0xff]  ;;  %v41_v6 = vld [vmem:[%s2673_s0 + $0xb8] sm:$0xff] }
  0x2a   :  { %v72_v5 = vld [vmem:[%s2673_s0 + $0x1b0] sm:$0xff]  ;;  %v73_v7 = vld [vmem:[%s2673_s0 + $0x1b8] sm:$0xff]  ;;  %v42_v8 = vld [vmem:[%s2673_s0 + $0xc0] sm:$0xff] }
  0x2b   :  { %v74_v11 = vld [vmem:[%s2673_s0 + $0x1c0] sm:$0xff]  ;;  %v43_v12 = vld [vmem:[%s2673_s0 + $0xc8] sm:$0xff]  ;;  %v44_v14 = vld [vmem:[%s2673_s0 + $0xd0] sm:$0xff] }
  0x2c   :  { %1330 = vmatmul.mubr.f32.gmra.mrb[4].mxu0 %v1928_v34  ;;  %1378 = vmatmul.mubr.f32.gmra.mrb[4].mxu1 %v1933_v35  ;;  %v75_v13 = vld [vmem:[%s2673_s0 + $0x1c8] sm:$0xff]  ;;  %v76_v15 = vld [vmem:[%s2673_s0 + $0x1d0] sm:$0xff]  ;;  %v45_v16 = vld [vmem:[%s2673_s0 + $0xd8] sm:$0xff] }
  0x2d   :  { %1332 = vmatprep.mubr.f32.mxu0 %v1938_v36  ;;  %1380 = vmatprep.mubr.f32.mxu1 %v1943_v37  ;;  %v77_v17 = vld [vmem:[%s2673_s0 + $0x1d8] sm:$0xff]  ;;  %v46_v18 = vld [vmem:[%s2673_s0 + $0xe0] sm:$0xff]  ;;  %v47_v20 = vld [vmem:[%s2673_s0 + $0xe8] sm:$0xff] }
  0x2e   :  { %v78_v19 = vld [vmem:[%s2673_s0 + $0x1e0] sm:$0xff]  ;;  %v79_v21 = vld [vmem:[%s2673_s0 + $0x1e8] sm:$0xff]  ;;  %v48_v22 = vld [vmem:[%s2673_s0 + $0xf0] sm:$0xff] }
  0x2f   :  { %v80_v23 = vld [vmem:[%s2673_s0 + $0x1f0] sm:$0xff]  ;;  %v49_v24 = vld [vmem:[%s2673_s0 + $0xf8] sm:$0xff] }
  0x30   :  { %1333 = vmatmul.mubr.f32.gmra.mrb[6].mxu0 %v1952_v38  ;;  %1381 = vmatmul.mubr.f32.gmra.mrb[6].mxu1 %v1957_v39  ;;  %v81_v25 = vld [vmem:[%s2673_s0 + $0x1f8] sm:$0xff] }
  0x31   :  { %1335 = vmatprep.mubr.f32.mxu0 %v1962_v40  ;;  %1383 = vmatprep.mubr.f32.mxu1 %v1967_v41 }
  0x34   :  { %1336 = vmatmul.mubr.f32.gmra.mrb[8].mxu0 %v1976_v42  ;;  %1384 = vmatmul.mubr.f32.gmra.mrb[8].mxu1 %v1981_v43 }
  0x35   :  { %1338 = vmatprep.mubr.f32.mxu0 %v1986_v44  ;;  %1386 = vmatprep.mubr.f32.mxu1 %v1991_v45 }
  0x38   :  { %1339 = vmatmul.mubr.f32.gmra.mrb[10].mxu0 %v2000_v46  ;;  %1387 = vmatmul.mubr.f32.gmra.mrb[10].mxu1 %v2005_v47 }
  0x39   :  { %1341 = vmatprep.mubr.f32.mxu0 %v30_v48  ;;  %1389 = vmatprep.mubr.f32.mxu1 %v62_v49  ;;  %v2138_v48 = vld [vmem:[%s2675_s2] ss:$0 sm:$0xff] }
  0x3c   :  { %1342 = vmatmul.mubr.f32.gmra.mrb[12].mxu0 %v2018_v50  ;;  %1390 = vmatmul.mubr.f32.gmra.mrb[12].mxu1 %v2023_v51 }
  0x3d   :  { %1344 = vmatprep.mubr.f32.mxu0 %v32_v52  ;;  %1392 = vmatprep.mubr.f32.mxu1 %v64_v53 }
  0x40   :  { %1345 = vmatmul.mubr.f32.gmra.mrb[14].mxu0 %v33_v54  ;;  %1393 = vmatmul.mubr.f32.gmra.mrb[14].mxu1 %v65_v55 }
  0x41   :  { %1347 = vmatprep.mubr.f32.mxu0 %v34_v56  ;;  %1395 = vmatprep.mubr.f32.mxu1 %v66_v57 }
  0x44   :  { %1348 = vmatmul.mubr.f32.gmra.mrb[16].mxu0 %v35_v58  ;;  %1396 = vmatmul.mubr.f32.gmra.mrb[16].mxu1 %v67_v59 }
  0x45   :  { %1350 = vmatprep.mubr.f32.mxu0 %v36_v60  ;;  %1398 = vmatprep.mubr.f32.mxu1 %v68_v61 }
  0x48   :  { %1351 = vmatmul.mubr.f32.gmra.mrb[18].mxu0 %v37_v62  ;;  %1399 = vmatmul.mubr.f32.gmra.mrb[18].mxu1 %v69_v63 }
  0x49   :  { %1353 = vmatprep.mubr.f32.mxu0 %v38_v0  ;;  %1401 = vmatprep.mubr.f32.mxu1 %v70_v1 }
  0x4c   :  { %1354 = vmatmul.mubr.f32.gmra.mrb[20].mxu0 %v39_v2  ;;  %1402 = vmatmul.mubr.f32.gmra.mrb[20].mxu1 %v71_v3 }
  0x4d   :  { %1356 = vmatprep.mubr.f32.mxu0 %v40_v4  ;;  %1404 = vmatprep.mubr.f32.mxu1 %v72_v5 }
  0x50   :  { %1357 = vmatmul.mubr.f32.gmra.mrb[22].mxu0 %v41_v6  ;;  %1405 = vmatmul.mubr.f32.gmra.mrb[22].mxu1 %v73_v7 }
  0x51   :  { %1359 = vmatprep.mubr.f32.mxu0 %v42_v8  ;;  %1407 = vmatprep.mubr.f32.mxu1 %v74_v11 }
  0x54   :  { %1360 = vmatmul.mubr.f32.gmra.mrb[24].mxu0 %v43_v12  ;;  %1408 = vmatmul.mubr.f32.gmra.mrb[24].mxu1 %v75_v13 }
  0x55   :  { %1362 = vmatprep.mubr.f32.mxu0 %v44_v14  ;;  %1410 = vmatprep.mubr.f32.mxu1 %v76_v15 }
  0x58   :  { %1363 = vmatmul.mubr.f32.gmra.mrb[26].mxu0 %v45_v16  ;;  %1411 = vmatmul.mubr.f32.gmra.mrb[26].mxu1 %v77_v17 }
  0x59   :  { %1365 = vmatprep.mubr.f32.mxu0 %v46_v18  ;;  %1413 = vmatprep.mubr.f32.mxu1 %v78_v19 }
  0x5c   :  { %1366 = vmatmul.mubr.f32.gmra.mrb[28].mxu0 %v47_v20  ;;  %1414 = vmatmul.mubr.f32.gmra.mrb[28].mxu1 %v79_v21 }
  0x5d   :  { %1368 = vmatprep.mubr.f32.mxu0 %v48_v22  ;;  %1416 = vmatprep.mubr.f32.mxu1 %v80_v23 }
  0x60   :  { %1369 = vmatmul.mubr.f32.gmra.mrb[30].mxu0 %v49_v24  ;;  %1417 = vmatmul.mubr.f32.gmra.mrb[30].mxu1 %v81_v25 }
  0xf7   :  { %v1325_v49 = vpop.f32.mrb[0].mxu0  ;;  %v1373_v52 = vpop.f32.mrb[0].mxu1 }
  0xf8   :  { %v177_v53 = vadd.f32 %v1325_v49, %v2138_v48  ;;  %v337_v54 = vadd.f32 %v1373_v52, %v2138_v48  ;;  %v171_v55 = vpop.f32.mrb[1].mxu0  ;;  %v331_v56 = vpop.f32.mrb[1].mxu1 }
  0xf9   :  { %v172_v57 = vadd.f32 %v2138_v48, %v171_v55  ;;  %v332_v58 = vadd.f32 %v2138_v48, %v331_v56 }
  0xfa   :  { %v1148_v59 = vmul.f32 -1.442695, %v177_v53  ;;  %v1180_v60 = vmul.f32 -1.442695, %v337_v54 }
  0xfb   :  { %v1147_v61 = vmul.f32 -1.442695, %v172_v57  ;;  %v1179_v62 = vmul.f32 -1.442695, %v332_v58  ;;  %v1328_v63 = vpop.f32.mrb[2].mxu0  ;;  %v1376_v0 = vpop.f32.mrb[2].mxu1 }
  0xfc   :  { %1470 = vpow2.f32 %v1148_v59  ;;  %v187_v1 = vadd.f32 %v1328_v63, %v2138_v48  ;;  %v347_v2 = vadd.f32 %v1376_v0, %v2138_v48  ;;  %v181_v3 = vpop.f32.mrb[3].mxu0  ;;  %v341_v4 = vpop.f32.mrb[3].mxu1 }
  0xfd   :  { %1472 = vpow2.f32 %v1180_v60  ;;  %v182_v5 = vadd.f32 %v2138_v48, %v181_v3  ;;  %v342_v6 = vadd.f32 %v2138_v48, %v341_v4 }
  0xfe   :  { %1474 = vpow2.f32 %v1147_v61  ;;  %v1150_v7 = vmul.f32 -1.442695, %v187_v1  ;;  %v1182_v8 = vmul.f32 -1.442695, %v347_v2 }
  0xff   :  { %1476 = vpow2.f32 %v1179_v62  ;;  %v1149_v11 = vmul.f32 -1.442695, %v182_v5  ;;  %v1181_v12 = vmul.f32 -1.442695, %v342_v6  ;;  %v1331_v13 = vpop.f32.mrb[4].mxu0  ;;  %v1379_v14 = vpop.f32.mrb[4].mxu1 }
 0x100   :  { %1478 = vpow2.f32 %v1150_v7  ;;  %v197_v15 = vadd.f32 %v1331_v13, %v2138_v48  ;;  %v357_v16 = vadd.f32 %v1379_v14, %v2138_v48  ;;  %v191_v17 = vpop.f32.mrb[5].mxu0  ;;  %v351_v18 = vpop.f32.mrb[5].mxu1 }
 0x101   :  { %1480 = vpow2.f32 %v1182_v8  ;;  %v192_v19 = vadd.f32 %v2138_v48, %v191_v17  ;;  %v352_v20 = vadd.f32 %v2138_v48, %v351_v18 }
 0x102   :  { %1482 = vpow2.f32 %v1149_v11  ;;  %v1152_v21 = vmul.f32 -1.442695, %v197_v15  ;;  %v1184_v22 = vmul.f32 -1.442695, %v357_v16 }
 0x103   :  { %1484 = vpow2.f32 %v1181_v12  ;;  %v1151_v23 = vmul.f32 -1.442695, %v192_v19  ;;  %v1183_v24 = vmul.f32 -1.442695, %v352_v20  ;;  %v1334_v25 = vpop.f32.mrb[6].mxu0  ;;  %v1382_v49 = vpop.f32.mrb[6].mxu1 }
 0x104   :  { %1486 = vpow2.f32 %v1152_v21  ;;  %v207_v52 = vadd.f32 %v1334_v25, %v2138_v48  ;;  %v201_v53 = vpop.f32.mrb[7].mxu0  ;;  %v361_v54 = vpop.f32.mrb[7].mxu1  ;;  %v367_v12 = vadd.f32 %v1382_v49, %v2138_v48 }
 0x105   :  { %1488 = vpow2.f32 %v1184_v22  ;;  %v202_v17 = vadd.f32 %v2138_v48, %v201_v53  ;;  %v362_v21 = vadd.f32 %v2138_v48, %v361_v54 }
 0x106   :  { %v1471_v55 = vpop.eup %1470  ;;  %1490 = vpow2.f32 %v1151_v23  ;;  %v1154_v56 = vmul.f32 -1.442695, %v207_v52 }
 0x107   :  { %v1473_v57 = vpop.eup %1472  ;;  %v683_v58 = vadd.f32 1.0, %v1471_v55  ;;  %1492 = vpow2.f32 %v1183_v24  ;;  %v1337_v59 = vpop.f32.mrb[8].mxu0 }
 0x108   :  { %v1475_v60 = vpop.eup %1474  ;;  %v715_v61 = vadd.f32 1.0, %v1473_v57  ;;  %1494 = vpow2.f32 %v1154_v56  ;;  %v1385_v62 = vpop.f32.mrb[8].mxu1  ;;  %v217_v24 = vadd.f32 %v1337_v59, %v2138_v48  ;;  %v1186_v56 = vmul.f32 -1.442695, %v367_v12 }
 0x109   :  { %v211_v63 = vpop.f32.mrb[9].mxu0  ;;  %v1477_v0 = vpop.eup %1476  ;;  %1496 = vrcp.f32 %v683_v58  ;;  %v682_v1 = vadd.f32 1.0, %v1475_v60  ;;  %v377_v25 = vadd.f32 %v1385_v62, %v2138_v48 }
 0x10a   :  { %v371_v2 = vpop.f32.mrb[9].mxu1  ;;  %v1479_v3 = vpop.eup %1478  ;;  %1498 = vrcp.f32 %v715_v61  ;;  %v714_v4 = vadd.f32 1.0, %v1477_v0  ;;  %v212_v53 = vadd.f32 %v2138_v48, %v211_v63  ;;  %v1153_v61 = vmul.f32 -1.442695, %v202_v17 }
 0x10b   :  { %v1481_v5 = vpop.eup %1480  ;;  %1500 = vrcp.f32 %v682_v1  ;;  %v685_v6 = vadd.f32 1.0, %v1479_v3  ;;  %v1340_v7 = vpop.f32.mrb[10].mxu0  ;;  %v372_v59 = vadd.f32 %v2138_v48, %v371_v2  ;;  %v939_v1 = vld [vmem:[%s2676_s3 + $0x8] sm:$0xff]  ;;  %v1185_v63 = vmul.f32 -1.442695, %v362_v21 }
 0x10c   :  { %v1483_v8 = vpop.eup %1482  ;;  %1502 = vrcp.f32 %v714_v4  ;;  %v717_v11 = vadd.f32 1.0, %v1481_v5  ;;  %v1388_v13 = vpop.f32.mrb[10].mxu1  ;;  %v227_v4 = vadd.f32 %v1340_v7, %v2138_v48  ;;  %v1155_v17 = vmul.f32 -1.442695, %v212_v53  ;;  %v970_v53 = vld [vmem:[%s2676_s3 + $0x100] sm:$0xff] }
 0x10d   :  { %v221_v14 = vpop.f32.mrb[11].mxu0  ;;  %v1485_v15 = vpop.eup %1484  ;;  %1504 = vrcp.f32 %v685_v6  ;;  %v684_v16 = vadd.f32 1.0, %v1483_v8  ;;  %v1156_v8 = vmul.f32 -1.442695, %v217_v24 }
 0x10e   :  { %v381_v18 = vpop.f32.mrb[11].mxu1  ;;  %v1487_v19 = vpop.eup %1486  ;;  %1506 = vrcp.f32 %v717_v11  ;;  %v716_v20 = vadd.f32 1.0, %v1485_v15  ;;  %v1188_v11 = vmul.f32 -1.442695, %v377_v25  ;;  %v222_v24 = vadd.f32 %v2138_v48, %v221_v14  ;;  %v941_v14 = vld [vmem:[%s2676_s3 + $0x18] sm:$0xff] }
 0x10f   :  { %v1489_v22 = vpop.eup %1488  ;;  %1508 = vrcp.f32 %v684_v16  ;;  %v687_v23 = vadd.f32 1.0, %v1487_v19  ;;  %v2158_v49 = vpop.f32.mrb[12].mxu0  ;;  %v971_v16 = vld [vmem:[%s2676_s3 + $0x108] sm:$0xff]  ;;  %v387_v19 = vadd.f32 %v1388_v13, %v2138_v48 }
 0x110   :  { %v1491_v52 = vpop.eup %1490  ;;  %1510 = vrcp.f32 %v716_v20  ;;  %v719_v55 = vadd.f32 1.0, %v1489_v22  ;;  %v2161_v57 = vpop.f32.mrb[12].mxu1 }
 0x111   :  { %v2163_v58 = vpop.f32.mrb[13].mxu0  ;;  %v1493_v54 = vpop.eup %1492  ;;  %1512 = vrcp.f32 %v687_v23  ;;  %v686_v60 = vadd.f32 1.0, %v1491_v52  ;;  %v938_v23 = vld [vmem:[%s2676_s3] sm:$0xff] }
 0x112   :  { %v2166_v0 = vpop.f32.mrb[13].mxu1  ;;  %v1495_v62 = vpop.eup %1494  ;;  %1514 = vrcp.f32 %v719_v55  ;;  %v718_v3 = vadd.f32 1.0, %v1493_v54 }
 0x113   :  { %v1497_v5 = vpop.eup %1496  ;;  %1516 = vrcp.f32 %v686_v60  ;;  %v689_v6 = vadd.f32 1.0, %v1495_v62  ;;  %v2172_v12 = vpop.f32.mrb[14].mxu0 }
 0x114   :  { %v1499_v2 = vpop.eup %1498  ;;  %v875_v15 = vmul.f32 %v1497_v5, %v1880_v26  ;;  %1518 = vrcp.f32 %v718_v3  ;;  %v2179_v20 = vpop.f32.mrb[14].mxu1  ;;  %v1187_v26 = vmul.f32 -1.442695, %v372_v59  ;;  %v382_v59 = vadd.f32 %v2138_v48, %v381_v18 }
 0x115   :  { %v2181_v7 = vpop.f32.mrb[15].mxu0  ;;  %v1501_v21 = vpop.eup %1500  ;;  %v907_v22 = vmul.f32 %v1499_v2, %v1885_v27  ;;  %1520 = vrcp.f32 %v689_v6  ;;  %v1158_v27 = vmul.f32 -1.442695, %v227_v4  ;;  %v1190_v4 = vmul.f32 -1.442695, %v387_v19 }
 0x116   :  { %v2188_v25 = vpop.f32.mrb[15].mxu1  ;;  %v1503_v52 = vpop.eup %1502  ;;  %v1003_v55 = vadd.f32 %v939_v1, %v875_v15  ;;  %v874_v13 = vmul.f32 %v1501_v21, %v1838_v9  ;;  %1522 = vpow2.f32 %v1186_v56 }
 0x117   :  { %v1505_v54 = vpop.eup %1504  ;;  %v1035_v60 = vadd.f32 %v971_v16, %v907_v22  ;;  %v906_v62 = vmul.f32 %v1503_v52, %v1843_v10  ;;  %1524 = vpow2.f32 %v1153_v61  ;;  %v2199_v1 = vpop.f32.mrb[16].mxu0  ;;  %v973_v10 = vld [vmem:[%s2676_s3 + $0x118] sm:$0xff]  ;;  %v940_v16 = vld [vmem:[%s2676_s3 + $0x10] sm:$0xff] }
 0x118   :  { %v2201_v9 = vpop.f32.mrb[16].mxu1  ;;  %v1507_v3 = vpop.eup %1506  ;;  %1067 = vst [vmem:[#allocation2 + $0x8] sm:$0xff] %v1003_v55  ;;  %v1002_v5 = vadd.f32 %v938_v23, %v874_v13  ;;  %v877_v56 = vmul.f32 %v1505_v54, %v1904_v30  ;;  %1526 = vpow2.f32 %v1185_v63  ;;  %v237_v30 = vadd.f32 %v2158_v49, %v2138_v48  ;;  %v972_v22 = vld [vmem:[%s2676_s3 + $0x110] sm:$0xff]  ;;  %v943_v49 = vld [vmem:[%s2676_s3 + $0x28] sm:$0xff] }
 0x119   :  { %v2207_v6 = vpop.f32.mrb[17].mxu0  ;;  %v2209_v61 = vpop.f32.mrb[17].mxu1  ;;  %1099 = vst [vmem:[#allocation2 + $0x108] sm:$0xff] %v1035_v60  ;;  %v1034_v2 = vadd.f32 %v970_v53, %v906_v62  ;;  %v909_v15 = vmul.f32 %v1507_v3, %v1909_v31  ;;  %1528 = vpow2.f32 %v1156_v8  ;;  %v397_v31 = vadd.f32 %v2161_v57, %v2138_v48  ;;  %v975_v54 = vld [vmem:[%s2676_s3 + $0x128] sm:$0xff]  ;;  %v942_v3 = vld [vmem:[%s2676_s3 + $0x20] sm:$0xff] }
 0x11a   :  { %v1509_v18 = vpop.eup %1508  ;;  %1066 = vst [vmem:[#allocation2] sm:$0xff] %v1002_v5  ;;  %v1005_v63 = vadd.f32 %v941_v14, %v877_v56  ;;  %1530 = vpow2.f32 %v1188_v11  ;;  %v1157_v55 = vmul.f32 -1.442695, %v222_v24 }
 0x11b   :  { %v1511_v21 = vpop.eup %1510  ;;  %v876_v19 = vmul.f32 %v1509_v18, %v1890_v28  ;;  %1098 = vst [vmem:[#allocation2 + $0x100] sm:$0xff] %v1034_v2  ;;  %v1037_v52 = vadd.f32 %v973_v10, %v909_v15  ;;  %1532 = vpow2.f32 %v1155_v17  ;;  %v2227_v28 = vpop.f32.mrb[18].mxu0  ;;  %v1192_v10 = vmul.f32 -1.442695, %v397_v31 }
 0x11c   :  { %v1513_v23 = vpop.eup %1512  ;;  %v908_v8 = vmul.f32 %v1511_v21, %v1895_v29  ;;  %v2229_v13 = vpop.f32.mrb[18].mxu1  ;;  %1069 = vst [vmem:[#allocation2 + $0x18] sm:$0xff] %v1005_v63  ;;  %1534 = vpow2.f32 %v1187_v26  ;;  %v1189_v29 = vmul.f32 -1.442695, %v382_v59  ;;  %v974_v59 = vld [vmem:[%s2676_s3 + $0x120] sm:$0xff] }
 0x11d   :  { %v1515_v53 = vpop.eup %1514  ;;  %v1004_v11 = vadd.f32 %v940_v16, %v876_v19  ;;  %v879_v57 = vmul.f32 %v1513_v23, %v1928_v34  ;;  %v2235_v60 = vpop.f32.mrb[19].mxu0  ;;  %1101 = vst [vmem:[#allocation2 + $0x118] sm:$0xff] %v1037_v52  ;;  %1536 = vpow2.f32 %v1158_v27  ;;  %v1160_v34 = vmul.f32 -1.442695, %v237_v30  ;;  %v945_v27 = vld [vmem:[%s2676_s3 + $0x38] sm:$0xff] }
 0x11e   :  { %v2237_v62 = vpop.f32.mrb[19].mxu1  ;;  %v1517_v17 = vpop.eup %1516  ;;  %v1036_v24 = vadd.f32 %v972_v22, %v908_v8  ;;  %v911_v14 = vmul.f32 %v1515_v53, %v1933_v35  ;;  %1538 = vpow2.f32 %v1190_v4 }
 0x11f   :  { %v1519_v5 = vpop.eup %1518  ;;  %1068 = vst [vmem:[#allocation2 + $0x10] sm:$0xff] %v1004_v11  ;;  %v1007_v56 = vadd.f32 %v943_v49, %v879_v57  ;;  %v878_v26 = vmul.f32 %v1517_v17, %v1914_v32  ;;  %1540 = vpow2.f32 %v1157_v55  ;;  %v2251_v15 = vpop.f32.mrb[20].mxu0  ;;  %v232_v57 = vadd.f32 %v2138_v48, %v2163_v58 }
 0x120   :  { %v1521_v18 = vpop.eup %1520  ;;  %1100 = vst [vmem:[#allocation2 + $0x110] sm:$0xff] %v1036_v24  ;;  %v1039_v35 = vadd.f32 %v975_v54, %v911_v14  ;;  %v910_v2 = vmul.f32 %v1519_v5, %v1919_v33  ;;  %v2253_v16 = vpop.f32.mrb[20].mxu1  ;;  %1542 = vpow2.f32 %v1189_v29 }
 0x121   :  { %v1523_v32 = vpop.eup %1522  ;;  %1071 = vst [vmem:[#allocation2 + $0x28] sm:$0xff] %v1007_v56  ;;  %v1006_v30 = vadd.f32 %v942_v3, %v878_v26  ;;  %v881_v4 = vmul.f32 %v1521_v18, %v1952_v38  ;;  %v2256_v21 = vpop.f32.mrb[21].mxu0  ;;  %1544 = vpow2.f32 %v1160_v34  ;;  %v392_v18 = vadd.f32 %v2138_v48, %v2166_v0 }
 0x122   :  { %v2258_v63 = vpop.f32.mrb[21].mxu1  ;;  %v1525_v33 = vpop.eup %1524  ;;  %1103 = vst [vmem:[#allocation2 + $0x128] sm:$0xff] %v1039_v35  ;;  %v1038_v19 = vadd.f32 %v974_v59, %v910_v2  ;;  %v721_v22 = vadd.f32 1.0, %v1523_v32  ;;  %1546 = vpow2.f32 %v1192_v10  ;;  %v1159_v10 = vmul.f32 -1.442695, %v232_v57 }
 0x123   :  { %v1527_v31 = vpop.eup %1526  ;;  %1070 = vst [vmem:[#allocation2 + $0x20] sm:$0xff] %v1006_v30  ;;  %v1009_v23 = vadd.f32 %v945_v27, %v881_v4  ;;  %v688_v52 = vadd.f32 1.0, %v1525_v33  ;;  %v2260_v38 = vpop.f32.mrb[22].mxu0  ;;  %v247_v30 = vadd.f32 %v2172_v12, %v2138_v48  ;;  %v407_v4 = vadd.f32 %v2179_v20, %v2138_v48 }
 0x124   :  { %v1529_v8 = vpop.eup %1528  ;;  %1102 = vst [vmem:[#allocation2 + $0x120] sm:$0xff] %v1038_v19  ;;  %1548 = vrcp.f32 %v721_v22  ;;  %v720_v49 = vadd.f32 1.0, %v1527_v31  ;;  %v2262_v55 = vpop.f32.mrb[22].mxu1  ;;  %v242_v22 = vadd.f32 %v2138_v48, %v2181_v7  ;;  %v402_v0 = vadd.f32 %v2138_v48, %v2188_v25 }
 0x125   :  { %v1531_v53 = vpop.eup %1530  ;;  %1073 = vst [vmem:[#allocation2 + $0x38] sm:$0xff] %v1009_v23  ;;  %1550 = vrcp.f32 %v688_v52  ;;  %v691_v11 = vadd.f32 1.0, %v1529_v8  ;;  %v2266_v54 = vpop.f32.mrb[23].mxu0  ;;  %v257_v52 = vadd.f32 %v2199_v1, %v2138_v48  ;;  %v417_v12 = vadd.f32 %v2201_v9, %v2138_v48  ;;  %v977_v1 = vld [vmem:[%s2676_s3 + $0x138] sm:$0xff] }
 0x126   :  { %v2268_v29 = vpop.f32.mrb[23].mxu1  ;;  %v1533_v17 = vpop.eup %1532  ;;  %1552 = vrcp.f32 %v720_v49  ;;  %v723_v24 = vadd.f32 1.0, %v1531_v53  ;;  %v1191_v7 = vmul.f32 -1.442695, %v392_v18  ;;  %v252_v25 = vadd.f32 %v2138_v48, %v2207_v6  ;;  %v944_v6 = vld [vmem:[%s2676_s3 + $0x30] sm:$0xff] }
 0x127   :  { %v1535_v14 = vpop.eup %1534  ;;  %1554 = vrcp.f32 %v691_v11  ;;  %v690_v3 = vadd.f32 1.0, %v1533_v17  ;;  %v2270_v56 = vpop.f32.mrb[24].mxu0 }
 0x128   :  { %v1537_v34 = vpop.eup %1536  ;;  %1556 = vrcp.f32 %v723_v24  ;;  %v722_v5 = vadd.f32 1.0, %v1535_v14  ;;  %v2272_v26 = vpop.f32.mrb[24].mxu1  ;;  %v1162_v24 = vmul.f32 -1.442695, %v247_v30  ;;  %v1194_v14 = vmul.f32 -1.442695, %v407_v4 }
 0x129   :  { %v1539_v59 = vpop.eup %1538  ;;  %1558 = vrcp.f32 %v690_v3  ;;  %v693_v58 = vadd.f32 1.0, %v1537_v34  ;;  %v2276_v35 = vpop.f32.mrb[25].mxu0  ;;  %v1196_v30 = vmul.f32 -1.442695, %v417_v12 }
 0x12a   :  { %v2278_v2 = vpop.f32.mrb[25].mxu1  ;;  %v1541_v27 = vpop.eup %1540  ;;  %1560 = vrcp.f32 %v722_v5  ;;  %v725_v32 = vadd.f32 1.0, %v1539_v59  ;;  %v976_v5 = vld [vmem:[%s2676_s3 + $0x130] sm:$0xff]  ;;  %v1161_v59 = vmul.f32 -1.442695, %v242_v22 }
 0x12b   :  { %v1543_v33 = vpop.eup %1542  ;;  %1562 = vrcp.f32 %v693_v58  ;;  %v692_v19 = vadd.f32 1.0, %v1541_v27  ;;  %v2292_v8 = vpop.f32.mrb[26].mxu0  ;;  %v1193_v58 = vmul.f32 -1.442695, %v402_v0  ;;  %v1163_v22 = vmul.f32 -1.442695, %v252_v25 }
 0x12c   :  { %v1545_v31 = vpop.eup %1544  ;;  %1564 = vrcp.f32 %v725_v32  ;;  %v724_v23 = vadd.f32 1.0, %v1543_v33  ;;  %v2294_v20 = vpop.f32.mrb[26].mxu1  ;;  %v1164_v32 = vmul.f32 -1.442695, %v257_v52 }
 0x12d   :  { %v1547_v49 = vpop.eup %1546  ;;  %1566 = vrcp.f32 %v692_v19  ;;  %v695_v53 = vadd.f32 1.0, %v1545_v31  ;;  %v2298_v11 = vpop.f32.mrb[27].mxu0 }
 0x12e   :  { %v2300_v57 = vpop.f32.mrb[27].mxu1  ;;  %v1549_v17 = vpop.eup %1548  ;;  %1568 = vrcp.f32 %v724_v23  ;;  %v727_v9 = vadd.f32 1.0, %v1547_v49  ;;  %v947_v23 = vld [vmem:[%s2676_s3 + $0x48] sm:$0xff] }
 0x12f   :  { %v1551_v3 = vpop.eup %1550  ;;  %v913_v34 = vmul.f32 %v1549_v17, %v1957_v39  ;;  %1570 = vrcp.f32 %v695_v53  ;;  %v2313_v4 = vpop.f32.mrb[28].mxu0  ;;  %v979_v53 = vld [vmem:[%s2676_s3 + $0x148] sm:$0xff] }
 0x130   :  { %v1553_v18 = vpop.eup %1552  ;;  %v880_v27 = vmul.f32 %v1551_v3, %v1938_v36  ;;  %1572 = vrcp.f32 %v727_v9  ;;  %v2315_v39 = vpop.f32.mrb[28].mxu1 }
 0x131   :  { %v1555_v33 = vpop.eup %1554  ;;  %v1041_v19 = vadd.f32 %v977_v1, %v913_v34  ;;  %v912_v31 = vmul.f32 %v1553_v18, %v1943_v37  ;;  %1574 = vpow2.f32 %v1159_v10  ;;  %v2321_v0 = vpop.f32.mrb[29].mxu0  ;;  %v412_v37 = vadd.f32 %v2138_v48, %v2209_v61  ;;  %v946_v1 = vld [vmem:[%s2676_s3 + $0x40] sm:$0xff] }
 0x132   :  { %v2323_v36 = vpop.f32.mrb[29].mxu1  ;;  %v1557_v52 = vpop.eup %1556  ;;  %v1008_v12 = vadd.f32 %v944_v6, %v880_v27  ;;  %v883_v49 = vmul.f32 %v1555_v33, %v1976_v42  ;;  %1576 = vpow2.f32 %v1191_v7  ;;  %v267_v42 = vadd.f32 %v2227_v28, %v2138_v48  ;;  %v978_v61 = vld [vmem:[%s2676_s3 + $0x140] sm:$0xff] }
 0x133   :  { %v1559_v17 = vpop.eup %1558  ;;  %1105 = vst [vmem:[#allocation2 + $0x138] sm:$0xff] %v1041_v19  ;;  %v1040_v10 = vadd.f32 %v976_v5, %v912_v31  ;;  %v915_v25 = vmul.f32 %v1557_v52, %v1981_v43  ;;  %1578 = vpow2.f32 %v1162_v24  ;;  %v427_v43 = vadd.f32 %v2229_v13, %v2138_v48  ;;  %v2343_v34 = vpop.f32.mrb[30].mxu0  ;;  %v948_v52 = vld [vmem:[%s2676_s3 + $0x50] sm:$0xff] }
 0x134   :  { %v1561_v9 = vpop.eup %1560  ;;  %1072 = vst [vmem:[#allocation2 + $0x30] sm:$0xff] %v1008_v12  ;;  %v1011_v3 = vadd.f32 %v947_v23, %v883_v49  ;;  %v882_v7 = vmul.f32 %v1559_v17, %v1962_v40  ;;  %1580 = vpow2.f32 %v1194_v14  ;;  %v2345_v6 = vpop.f32.mrb[30].mxu1  ;;  %v949_v40 = vld [vmem:[%s2676_s3 + $0x58] sm:$0xff]  ;;  %v262_v14 = vadd.f32 %v2138_v48, %v2235_v60 }
 0x135   :  { %v1563_v24 = vpop.eup %1562  ;;  %1104 = vst [vmem:[#allocation2 + $0x130] sm:$0xff] %v1040_v10  ;;  %v1043_v28 = vadd.f32 %v979_v53, %v915_v25  ;;  %v914_v5 = vmul.f32 %v1561_v9, %v1967_v41  ;;  %1582 = vpow2.f32 %v1161_v59  ;;  %v2353_v18 = vpop.f32.mrb[31].mxu0  ;;  %v981_v41 = vld [vmem:[%s2676_s3 + $0x158] sm:$0xff]  ;;  %v1195_v31 = vmul.f32 -1.442695, %v412_v37 }
 0x136   :  { %v2355_v13 = vpop.f32.mrb[31].mxu1  ;;  %v1565_v27 = vpop.eup %1564  ;;  %1075 = vst [vmem:[#allocation2 + $0x48] sm:$0xff] %v1011_v3  ;;  %v1010_v33 = vadd.f32 %v946_v1, %v882_v7  ;;  %v885_v19 = vmul.f32 %v1563_v24, %v2000_v46  ;;  %1584 = vpow2.f32 %v1193_v58  ;;  %v1166_v12 = vmul.f32 -1.442695, %v267_v42  ;;  %v980_v58 = vld [vmem:[%s2676_s3 + $0x150] sm:$0xff] }
 0x137   :  { %v1567_v23 = vpop.eup %1566  ;;  %1107 = vst [vmem:[#allocation2 + $0x148] sm:$0xff] %v1043_v28  ;;  %v1042_v59 = vadd.f32 %v978_v61, %v914_v5  ;;  %v917_v60 = vmul.f32 %v1565_v27, %v2005_v47  ;;  %1586 = vpow2.f32 %v1164_v32  ;;  %v1198_v37 = vmul.f32 -1.442695, %v427_v43  ;;  %v951_v32 = vld [vmem:[%s2676_s3 + $0x68] sm:$0xff] }
 0x138   :  { %v1569_v49 = vpop.eup %1568  ;;  %1074 = vst [vmem:[#allocation2 + $0x40] sm:$0xff] %v1010_v33  ;;  %v1013_v46 = vadd.f32 %v949_v40, %v885_v19  ;;  %v884_v53 = vmul.f32 %v1567_v23, %v1986_v44  ;;  %1588 = vpow2.f32 %v1196_v30  ;;  %v1165_v25 = vmul.f32 -1.442695, %v262_v14  ;;  %v983_v30 = vld [vmem:[%s2676_s3 + $0x168] sm:$0xff] }
 0x139   :  { %v1571_v17 = vpop.eup %1570  ;;  %1106 = vst [vmem:[#allocation2 + $0x140] sm:$0xff] %v1042_v59  ;;  %v1045_v47 = vadd.f32 %v981_v41, %v917_v60  ;;  %v916_v10 = vmul.f32 %v1569_v49, %v1991_v45  ;;  %1590 = vpow2.f32 %v1163_v22  ;;  %v422_v33 = vadd.f32 %v2138_v48, %v2237_v62 }
 0x13a   :  { %v1573_v1 = vpop.eup %1572  ;;  %1077 = vst [vmem:[#allocation2 + $0x58] sm:$0xff] %v1013_v46  ;;  %v1012_v44 = vadd.f32 %v948_v52, %v884_v53  ;;  %v887_v42 = vmul.f32 %v1571_v17, %v2018_v50  ;;  %1592 = vpow2.f32 %v1195_v31  ;;  %v277_v52 = vadd.f32 %v2251_v15, %v2138_v48 }
 0x13b   :  { %v1575_v9 = vpop.eup %1574  ;;  %1109 = vst [vmem:[#allocation2 + $0x158] sm:$0xff] %v1045_v47  ;;  %v1044_v3 = vadd.f32 %v980_v58, %v916_v10  ;;  %v919_v45 = vmul.f32 %v1573_v1, %v2023_v51  ;;  %1594 = vpow2.f32 %v1166_v12  ;;  %v437_v12 = vadd.f32 %v2253_v16, %v2138_v48 }
 0x13c   :  { %v1577_v7 = vpop.eup %1576  ;;  %1076 = vst [vmem:[#allocation2 + $0x50] sm:$0xff] %v1012_v44  ;;  %v1015_v22 = vadd.f32 %v951_v32, %v887_v42  ;;  %v694_v61 = vadd.f32 1.0, %v1575_v9  ;;  %1596 = vpow2.f32 %v1198_v37  ;;  %v1197_v53 = vmul.f32 -1.442695, %v422_v33 }
 0x13d   :  { %v1579_v43 = vpop.eup %1578  ;;  %1108 = vst [vmem:[#allocation2 + $0x150] sm:$0xff] %v1044_v3  ;;  %v1047_v24 = vadd.f32 %v983_v30, %v919_v45  ;;  %v726_v50 = vadd.f32 1.0, %v1577_v7  ;;  %1598 = vpow2.f32 %v1165_v25  ;;  %v272_v62 = vadd.f32 %v2138_v48, %v2256_v21  ;;  %v982_v45 = vld [vmem:[%s2676_s3 + $0x160] sm:$0xff] }
 0x13e   :  { %v1581_v28 = vpop.eup %1580  ;;  %1079 = vst [vmem:[#allocation2 + $0x68] sm:$0xff] %v1015_v22  ;;  %1600 = vrcp.f32 %v694_v61  ;;  %v697_v5 = vadd.f32 1.0, %v1579_v43  ;;  %v432_v17 = vadd.f32 %v2138_v48, %v2258_v63  ;;  %v287_v47 = vadd.f32 %v2260_v38, %v2138_v48  ;;  %v950_v63 = vld [vmem:[%s2676_s3 + $0x60] sm:$0xff] }
 0x13f   :  { %v1583_v40 = vpop.eup %1582  ;;  %1111 = vst [vmem:[#allocation2 + $0x168] sm:$0xff] %v1047_v24  ;;  %1602 = vrcp.f32 %v726_v50  ;;  %v729_v14 = vadd.f32 1.0, %v1581_v28  ;;  %v447_v16 = vadd.f32 %v2262_v55, %v2138_v48  ;;  %v282_v32 = vadd.f32 %v2138_v48, %v2266_v54  ;;  %v1726_v54 = vld [vmem:[%s2673_s0 + $0x60] sm:$0xff] }
 0x140   :  { %v1585_v51 = vpop.eup %1584  ;;  %1604 = vrcp.f32 %v697_v5  ;;  %v696_v27 = vadd.f32 1.0, %v1583_v40  ;;  %v1168_v1 = vmul.f32 -1.442695, %v277_v52  ;;  %v1200_v44 = vmul.f32 -1.442695, %v437_v12  ;;  %v1727_v43 = vld [vmem:[%s2673_s0 + $0x160] sm:$0xff] }
 0x141   :  { %v1587_v19 = vpop.eup %1586  ;;  %1606 = vrcp.f32 %v729_v14  ;;  %v728_v41 = vadd.f32 1.0, %v1585_v51  ;;  %v1167_v30 = vmul.f32 -1.442695, %v272_v62  ;;  %v442_v9 = vadd.f32 %v2138_v48, %v2268_v29  ;;  %v953_v29 = vld [vmem:[%s2676_s3 + $0x78] sm:$0xff] }
 0x142   :  { %v1589_v31 = vpop.eup %1588  ;;  %1608 = vrcp.f32 %v696_v27  ;;  %v699_v23 = vadd.f32 1.0, %v1587_v19  ;;  %v1199_v7 = vmul.f32 -1.442695, %v432_v17  ;;  %v1170_v22 = vmul.f32 -1.442695, %v287_v47  ;;  %v1728_v14 = vld [vmem:[%s2673_s0 + $0x78] sm:$0xff] }
 0x143   :  { %v1591_v59 = vpop.eup %1590  ;;  %1610 = vrcp.f32 %v728_v41  ;;  %v731_v60 = vadd.f32 1.0, %v1589_v31  ;;  %v1202_v50 = vmul.f32 -1.442695, %v447_v16  ;;  %v1169_v28 = vmul.f32 -1.442695, %v282_v32  ;;  %v985_v27 = vld [vmem:[%s2676_s3 + $0x178] sm:$0xff] }
 0x144   :  { %v1593_v49 = vpop.eup %1592  ;;  %1612 = vrcp.f32 %v699_v23  ;;  %v698_v46 = vadd.f32 1.0, %v1591_v59  ;;  %v297_v33 = vadd.f32 %v2270_v56, %v2138_v48  ;;  %v1729_v31 = vld [vmem:[%s2673_s0 + $0x178] sm:$0xff]  ;;  %v952_v59 = vld [vmem:[%s2676_s3 + $0x70] sm:$0xff]  ;;  %v955_v47 = vld [vmem:[%s2676_s3 + $0x88] sm:$0xff] }
 0x145   :  { %v1595_v58 = vpop.eup %1594  ;;  %1614 = vrcp.f32 %v731_v60  ;;  %v730_v37 = vadd.f32 1.0, %v1593_v49  ;;  %v1201_v60 = vmul.f32 -1.442695, %v442_v9  ;;  %v1730_v56 = vld [vmem:[%s2673_s0 + $0x70] sm:$0xff] }
 0x146   :  { %v1597_v15 = vpop.eup %1596  ;;  %1616 = vrcp.f32 %v698_v46  ;;  %v701_v10 = vadd.f32 1.0, %v1595_v58  ;;  %v984_v46 = vld [vmem:[%s2676_s3 + $0x170] sm:$0xff] }
 0x147   :  { %v1599_v25 = vpop.eup %1598  ;;  %1618 = vrcp.f32 %v730_v37  ;;  %v733_v21 = vadd.f32 1.0, %v1597_v15  ;;  %v1731_v37 = vld [vmem:[%s2673_s0 + $0x170] sm:$0xff]  ;;  %v292_v15 = vadd.f32 %v2138_v48, %v2276_v35  ;;  %v1733_v35 = vld [vmem:[%s2673_s0 + $0x188] sm:$0xff] }
 0x148   :  { %v1601_v42 = vpop.eup %1600  ;;  %1620 = vrcp.f32 %v701_v10  ;;  %v700_v38 = vadd.f32 1.0, %v1599_v25  ;;  %v987_v25 = vld [vmem:[%s2676_s3 + $0x188] sm:$0xff] }
 0x149   :  { %v1603_v55 = vpop.eup %1602  ;;  %v886_v3 = vmul.f32 %v1726_v54, %v1601_v42  ;;  %1622 = vrcp.f32 %v733_v21  ;;  %v452_v21 = vadd.f32 %v2138_v48, %v2278_v2 }
 0x14a   :  { %v1605_v61 = vpop.eup %1604  ;;  %v918_v24 = vmul.f32 %v1727_v43, %v1603_v55  ;;  %1624 = vrcp.f32 %v700_v38  ;;  %v1172_v38 = vmul.f32 -1.442695, %v297_v33  ;;  %v986_v55 = vld [vmem:[%s2676_s3 + $0x180] sm:$0xff]  ;;  %v1171_v43 = vmul.f32 -1.442695, %v292_v15 }
 0x14b   :  { %v1607_v5 = vpop.eup %1606  ;;  %v1014_v40 = vadd.f32 %v950_v63, %v886_v3  ;;  %v889_v51 = vmul.f32 %v1728_v14, %v1605_v61  ;;  %1626 = vpow2.f32 %v1197_v53  ;;  %v457_v53 = vadd.f32 %v2272_v26, %v2138_v48  ;;  %v1732_v26 = vld [vmem:[%s2673_s0 + $0x88] sm:$0xff]  ;;  %v954_v63 = vld [vmem:[%s2676_s3 + $0x80] sm:$0xff]  ;;  %v957_v61 = vld [vmem:[%s2676_s3 + $0x98] sm:$0xff] }
 0x14c   :  { %v1609_v19 = vpop.eup %1608  ;;  %v1046_v41 = vadd.f32 %v982_v45, %v918_v24  ;;  %v921_v23 = vmul.f32 %v1729_v31, %v1607_v5  ;;  %1628 = vpow2.f32 %v1168_v1  ;;  %v1734_v48 = vld [vmem:[%s2673_s0 + $0x80] sm:$0xff]  ;;  %v1203_v14 = vmul.f32 -1.442695, %v452_v21 }
 0x14d   :  { %v1611_v52 = vpop.eup %1610  ;;  %1078 = vst [vmem:[#allocation2 + $0x60] sm:$0xff] %v1014_v40  ;;  %v1017_v12 = vadd.f32 %v953_v29, %v889_v51  ;;  %v888_v49 = vmul.f32 %v1730_v56, %v1609_v19  ;;  %1630 = vpow2.f32 %v1200_v44  ;;  %v1204_v54 = vmul.f32 -1.442695, %v457_v53  ;;  %v989_v40 = vld [vmem:[%s2676_s3 + $0x198] sm:$0xff]  ;;  %v956_v19 = vld [vmem:[%s2676_s3 + $0x90] sm:$0xff] }
 0x14e   :  { %v1613_v62 = vpop.eup %1612  ;;  %1110 = vst [vmem:[#allocation2 + $0x160] sm:$0xff] %v1046_v41  ;;  %v1049_v58 = vadd.f32 %v985_v27, %v921_v23  ;;  %v920_v17 = vmul.f32 %v1731_v37, %v1611_v52  ;;  %1632 = vpow2.f32 %v1167_v30  ;;  %v1738_v23 = vld [vmem:[%s2673_s0 + $0x90] sm:$0xff]  ;;  %v2485_v21 = vld [vmem:[%s2675_s2] ss:$0 sm:$0xff] }
 0x14f   :  { %v1615_v10 = vpop.eup %1614  ;;  %1081 = vst [vmem:[#allocation2 + $0x78] sm:$0xff] %v1017_v12  ;;  %v1016_v16 = vadd.f32 %v952_v59, %v888_v49  ;;  %v891_v32 = vmul.f32 %v1732_v26, %v1613_v62  ;;  %1634 = vpow2.f32 %v1199_v7  ;;  %v1735_v7 = vld [vmem:[%s2673_s0 + $0x180] sm:$0xff] }
 0x150   :  { %v1617_v1 = vpop.eup %1616  ;;  %1113 = vst [vmem:[#allocation2 + $0x178] sm:$0xff] %v1049_v58  ;;  %v1048_v44 = vadd.f32 %v984_v46, %v920_v17  ;;  %v923_v42 = vmul.f32 %v1733_v35, %v1615_v10  ;;  %1636 = vpow2.f32 %v1170_v22 }
 0x151   :  { %v1619_v30 = vpop.eup %1618  ;;  %1080 = vst [vmem:[#allocation2 + $0x70] sm:$0xff] %v1016_v16  ;;  %v1019_v9 = vadd.f32 %v955_v47, %v891_v32  ;;  %v890_v2 = vmul.f32 %v1734_v48, %v1617_v1  ;;  %1638 = vpow2.f32 %v1202_v50  ;;  %v1736_v50 = vld [vmem:[%s2673_s0 + $0x98] sm:$0xff]  ;;  %v307_v1 = vadd.f32 %v2485_v21, %v2292_v8 }
 0x152   :  { %v1621_v3 = vpop.eup %1620  ;;  %1112 = vst [vmem:[#allocation2 + $0x170] sm:$0xff] %v1048_v44  ;;  %v1051_v45 = vadd.f32 %v987_v25, %v923_v42  ;;  %v922_v22 = vmul.f32 %v1735_v7, %v1619_v30  ;;  %1640 = vpow2.f32 %v1169_v28  ;;  %v1737_v28 = vld [vmem:[%s2673_s0 + $0x198] sm:$0xff]  ;;  %v467_v44 = vadd.f32 %v2485_v21, %v2294_v20 }
 0x153   :  { %v1623_v24 = vpop.eup %1622  ;;  %1083 = vst [vmem:[#allocation2 + $0x88] sm:$0xff] %v1019_v9  ;;  %v1018_v29 = vadd.f32 %v954_v63, %v890_v2  ;;  %v893_v5 = vmul.f32 %v1736_v50, %v1621_v3  ;;  %1642 = vpow2.f32 %v1201_v60  ;;  %v302_v63 = vadd.f32 %v2485_v21, %v2298_v11 }
 0x154   :  { %v1625_v51 = vpop.eup %1624  ;;  %1115 = vst [vmem:[#allocation2 + $0x188] sm:$0xff] %v1051_v45  ;;  %v1050_v27 = vadd.f32 %v986_v55, %v922_v22  ;;  %v925_v33 = vmul.f32 %v1737_v28, %v1623_v24  ;;  %1644 = vpow2.f32 %v1172_v38  ;;  %v462_v38 = vadd.f32 %v2485_v21, %v2300_v57  ;;  %v959_v24 = vld [vmem:[%s2676_s3 + $0xa8] sm:$0xff] }
 0x155   :  { %v1627_v41 = vpop.eup %1626  ;;  %1082 = vst [vmem:[#allocation2 + $0x80] sm:$0xff] %v1018_v29  ;;  %v1021_v31 = vadd.f32 %v957_v61, %v893_v5  ;;  %v892_v59 = vmul.f32 %v1738_v23, %v1625_v51  ;;  %1646 = vpow2.f32 %v1204_v54  ;;  %v317_v48 = vadd.f32 %v2485_v21, %v2313_v4  ;;  %v988_v4 = vld [vmem:[%s2676_s3 + $0x190] sm:$0xff]  ;;  %v991_v51 = vld [vmem:[%s2676_s3 + $0x1a8] sm:$0xff]  ;;  %v958_v23 = vld [vmem:[%s2676_s3 + $0xa0] sm:$0xff] }
 0x156   :  { %v1629_v60 = vpop.eup %1628  ;;  %1114 = vst [vmem:[#allocation2 + $0x180] sm:$0xff] %v1050_v27  ;;  %v1053_v52 = vadd.f32 %v989_v40, %v925_v33  ;;  %v732_v12 = vadd.f32 1.0, %v1627_v41  ;;  %1648 = vpow2.f32 %v1171_v43  ;;  %v477_v8 = vadd.f32 %v2485_v21, %v2315_v39  ;;  %v1741_v40 = vld [vmem:[%s2673_s0 + $0xa8] sm:$0xff] }
 0x157   :  { %v1631_v56 = vpop.eup %1630  ;;  %1085 = vst [vmem:[#allocation2 + $0x98] sm:$0xff] %v1021_v31  ;;  %v1020_v49 = vadd.f32 %v956_v19, %v892_v59  ;;  %v703_v46 = vadd.f32 1.0, %v1629_v60  ;;  %1650 = vpow2.f32 %v1203_v14  ;;  %v312_v55 = vadd.f32 %v2485_v21, %v2321_v0  ;;  %v1740_v0 = vld [vmem:[%s2673_s0 + $0x190] sm:$0xff]  ;;  %v1742_v41 = vld [vmem:[%s2673_s0 + $0x1a8] sm:$0xff] }
 0x158   :  { %v1633_v53 = vpop.eup %1632  ;;  %1117 = vst [vmem:[#allocation2 + $0x198] sm:$0xff] %v1053_v52  ;;  %1652 = vrcp.f32 %v732_v12  ;;  %v735_v62 = vadd.f32 1.0, %v1631_v56  ;;  %v472_v11 = vadd.f32 %v2485_v21, %v2323_v36  ;;  %v1174_v3 = vmul.f32 -1.442695, %v307_v1  ;;  %v1743_v12 = vld [vmem:[%s2673_s0 + $0xa0] sm:$0xff] }
 0x159   :  { %v1635_v58 = vpop.eup %1634  ;;  %1084 = vst [vmem:[#allocation2 + $0x90] sm:$0xff] %v1020_v49  ;;  %1654 = vrcp.f32 %v703_v46  ;;  %v702_v37 = vadd.f32 1.0, %v1633_v53  ;;  %v1206_v45 = vmul.f32 -1.442695, %v467_v44  ;;  %v1173_v22 = vmul.f32 -1.442695, %v302_v63 }
 0x15a   :  { %v1637_v17 = vpop.eup %1636  ;;  %1656 = vrcp.f32 %v735_v62  ;;  %v734_v47 = vadd.f32 1.0, %v1635_v58  ;;  %v1205_v61 = vmul.f32 -1.442695, %v462_v38  ;;  %v1176_v29 = vmul.f32 -1.442695, %v317_v48  ;;  %v990_v49 = vld [vmem:[%s2676_s3 + $0x1a0] sm:$0xff] }
 0x15b   :  { %v1639_v15 = vpop.eup %1638  ;;  %1658 = vrcp.f32 %v702_v37  ;;  %v705_v10 = vadd.f32 1.0, %v1637_v17  ;;  %v1208_v50 = vmul.f32 -1.442695, %v477_v8  ;;  %v1175_v27 = vmul.f32 -1.442695, %v312_v55  ;;  %v961_v37 = vld [vmem:[%s2676_s3 + $0xb8] sm:$0xff] }
 0x15c   :  { %v1641_v16 = vpop.eup %1640  ;;  %1660 = vrcp.f32 %v734_v47  ;;  %v737_v26 = vadd.f32 1.0, %v1639_v15  ;;  %v1207_v28 = vmul.f32 -1.442695, %v472_v11  ;;  %v327_v59 = vadd.f32 %v2485_v21, %v2343_v34  ;;  %v1744_v34 = vld [vmem:[%s2673_s0 + $0x1a0] sm:$0xff]  ;;  %v960_v44 = vld [vmem:[%s2676_s3 + $0xb0] sm:$0xff] }
 0x15d   :  { %v1643_v32 = vpop.eup %1642  ;;  %1662 = vrcp.f32 %v705_v10  ;;  %v704_v25 = vadd.f32 1.0, %v1641_v16  ;;  %v487_v46 = vadd.f32 %v2485_v21, %v2345_v6  ;;  %v322_v17 = vadd.f32 %v2485_v21, %v2353_v18  ;;  %v1745_v6 = vld [vmem:[%s2673_s0 + $0xb8] sm:$0xff]  ;;  %v992_v38 = vld [vmem:[%s2676_s3 + $0x1b0] sm:$0xff] }
 0x15e   :  { %v1645_v35 = vpop.eup %1644  ;;  %1664 = vrcp.f32 %v737_v26  ;;  %v736_v42 = vadd.f32 1.0, %v1643_v32  ;;  %v993_v16 = vld [vmem:[%s2676_s3 + $0x1b8] sm:$0xff]  ;;  %v482_v26 = vadd.f32 %v2485_v21, %v2355_v13  ;;  %v1747_v13 = vld [vmem:[%s2673_s0 + $0xb0] sm:$0xff] }
 0x15f   :  { %v1647_v30 = vpop.eup %1646  ;;  %1666 = vrcp.f32 %v704_v25  ;;  %v707_v9 = vadd.f32 1.0, %v1645_v35  ;;  %v1746_v18 = vld [vmem:[%s2673_s0 + $0x1b8] sm:$0xff]  ;;  %v1178_v35 = vmul.f32 -1.442695, %v327_v59  ;;  %v1748_v8 = vld [vmem:[%s2673_s0 + $0x1b0] sm:$0xff] }
 0x160   :  { %v1649_v2 = vpop.eup %1648  ;;  %1668 = vrcp.f32 %v736_v42  ;;  %v739_v20 = vadd.f32 1.0, %v1647_v30  ;;  %v1210_v30 = vmul.f32 -1.442695, %v487_v46  ;;  %v1177_v55 = vmul.f32 -1.442695, %v322_v17 }
 0x161   :  { %v1651_v54 = vpop.eup %1650  ;;  %1670 = vrcp.f32 %v707_v9  ;;  %v706_v57 = vadd.f32 1.0, %v1649_v2 }
 0x162   :  { %v1653_v7 = vpop.eup %1652  ;;  %1672 = vrcp.f32 %v739_v20  ;;  %v738_v39 = vadd.f32 1.0, %v1651_v54  ;;  %v963_v20 = vld [vmem:[%s2676_s3 + $0xc8] sm:$0xff] }
 0x163   :  { %v1655_v43 = vpop.eup %1654  ;;  %v924_v36 = vmul.f32 %v1740_v0, %v1653_v7  ;;  %1674 = vrcp.f32 %v706_v57  ;;  %v1749_v57 = vld [vmem:[%s2673_s0 + $0xc8] sm:$0xff]  ;;  %v1209_v7 = vmul.f32 -1.442695, %v482_v26 }
 0x164   :  { %v1657_v5 = vpop.eup %1656  ;;  %v895_v14 = vmul.f32 %v1741_v40, %v1655_v43  ;;  %1676 = vrcp.f32 %v738_v39  ;;  %v962_v43 = vld [vmem:[%s2676_s3 + $0xc0] sm:$0xff] }
 0x165   :  { %v1659_v33 = vpop.eup %1658  ;;  %v1052_v19 = vadd.f32 %v988_v4, %v924_v36  ;;  %v927_v31 = vmul.f32 %v1742_v41, %v1657_v5  ;;  %1678 = vpow2.f32 %v1174_v3 }
 0x166   :  { %v1661_v60 = vpop.eup %1660  ;;  %v1023_v52 = vadd.f32 %v959_v24, %v895_v14  ;;  %v894_v56 = vmul.f32 %v1743_v12, %v1659_v33  ;;  %1680 = vpow2.f32 %v1206_v45  ;;  %v995_v45 = vld [vmem:[%s2676_s3 + $0x1c8] sm:$0xff]  ;;  %v1751_v24 = vld [vmem:[%s2673_s0 + $0xc0] sm:$0xff] }
 0x167   :  { %v1663_v53 = vpop.eup %1662  ;;  %1116 = vst [vmem:[#allocation2 + $0x190] sm:$0xff] %v1052_v19  ;;  %v1055_v62 = vadd.f32 %v991_v51, %v927_v31  ;;  %v926_v58 = vmul.f32 %v1744_v34, %v1661_v60  ;;  %1682 = vpow2.f32 %v1173_v22  ;;  %v1750_v22 = vld [vmem:[%s2673_s0 + $0x1c8] sm:$0xff]  ;;  %v1752_v14 = vld [vmem:[%s2673_s0 + $0x1c0] sm:$0xff] }
 0x168   :  { %v1665_v47 = vpop.eup %1664  ;;  %1087 = vst [vmem:[#allocation2 + $0xa8] sm:$0xff] %v1023_v52  ;;  %v1022_v15 = vadd.f32 %v958_v23, %v894_v56  ;;  %v897_v10 = vmul.f32 %v1745_v6, %v1663_v53  ;;  %1684 = vpow2.f32 %v1205_v61 }
 0x169   :  { %v1667_v32 = vpop.eup %1666  ;;  %1119 = vst [vmem:[#allocation2 + $0x1a8] sm:$0xff] %v1055_v62  ;;  %v1054_v25 = vadd.f32 %v990_v49, %v926_v58  ;;  %v929_v1 = vmul.f32 %v1746_v18, %v1665_v47  ;;  %1686 = vpow2.f32 %v1176_v29  ;;  %v1753_v18 = vld [vmem:[%s2673_s0 + $0xd8] sm:$0xff] }
 0x16a   :  { %v1669_v42 = vpop.eup %1668  ;;  %1086 = vst [vmem:[#allocation2 + $0xa0] sm:$0xff] %v1022_v15  ;;  %v1025_v63 = vadd.f32 %v961_v37, %v897_v10  ;;  %v896_v21 = vmul.f32 %v1747_v13, %v1667_v32  ;;  %1688 = vpow2.f32 %v1208_v50  ;;  %v994_v50 = vld [vmem:[%s2676_s3 + $0x1c0] sm:$0xff]  ;;  %v965_v32 = vld [vmem:[%s2676_s3 + $0xd8] sm:$0xff]  ;;  %v964_v13 = vld [vmem:[%s2676_s3 + $0xd0] sm:$0xff] }
 0x16b   :  { %v1671_v9 = vpop.eup %1670  ;;  %1118 = vst [vmem:[#allocation2 + $0x1a0] sm:$0xff] %v1054_v25  ;;  %v1057_v48 = vadd.f32 %v993_v16, %v929_v1  ;;  %v928_v2 = vmul.f32 %v1748_v8, %v1669_v42  ;;  %1690 = vpow2.f32 %v1175_v27  ;;  %v1754_v42 = vld [vmem:[%s2673_s0 + $0x1d8] sm:$0xff] }
 0x16c   :  { %v1673_v11 = vpop.eup %1672  ;;  %1089 = vst [vmem:[#allocation2 + $0xb8] sm:$0xff] %v1025_v63  ;;  %v1024_v54 = vadd.f32 %v960_v44, %v896_v21  ;;  %v899_v3 = vmul.f32 %v1749_v57, %v1671_v9  ;;  %1692 = vpow2.f32 %v1207_v28  ;;  %v997_v44 = vld [vmem:[%s2676_s3 + $0x1d8] sm:$0xff] }
 0x16d   :  { %v1675_v4 = vpop.eup %1674  ;;  %1121 = vst [vmem:[#allocation2 + $0x1b8] sm:$0xff] %v1057_v48  ;;  %v1056_v39 = vadd.f32 %v992_v38, %v928_v2  ;;  %v931_v61 = vmul.f32 %v1750_v22, %v1673_v11  ;;  %1694 = vpow2.f32 %v1178_v35  ;;  %v996_v48 = vld [vmem:[%s2676_s3 + $0x1d0] sm:$0xff]  ;;  %v967_v11 = vld [vmem:[%s2676_s3 + $0xe8] sm:$0xff] }
 0x16e   :  { %v1677_v0 = vpop.eup %1676  ;;  %1088 = vst [vmem:[#allocation2 + $0xb0] sm:$0xff] %v1024_v54  ;;  %v1027_v36 = vadd.f32 %v963_v20, %v899_v3  ;;  %v898_v29 = vmul.f32 %v1751_v24, %v1675_v4  ;;  %1696 = vpow2.f32 %v1210_v30  ;;  %v1755_v30 = vld [vmem:[%s2673_s0 + $0xd0] sm:$0xff]  ;;  %v1757_v3 = vld [vmem:[%s2673_s0 + $0xe8] sm:$0xff]  ;;  %v1759_v24 = vld [vmem:[%s2673_s0 + $0xe0] sm:$0xff] }
 0x16f   :  { %v1679_v5 = vpop.eup %1678  ;;  %1120 = vst [vmem:[#allocation2 + $0x1b0] sm:$0xff] %v1056_v39  ;;  %v1059_v40 = vadd.f32 %v995_v45, %v931_v61  ;;  %v930_v51 = vmul.f32 %v1752_v14, %v1677_v0  ;;  %1698 = vpow2.f32 %v1177_v55  ;;  %v1756_v20 = vld [vmem:[%s2673_s0 + $0x1d0] sm:$0xff]  ;;  %v1758_v22 = vld [vmem:[%s2673_s0 + $0x1e8] sm:$0xff]  ;;  %v1760_v14 = vld [vmem:[%s2673_s0 + $0x1e0] sm:$0xff] }
 0x170   :  { %v1681_v27 = vpop.eup %1680  ;;  %1091 = vst [vmem:[#allocation2 + $0xc8] sm:$0xff] %v1027_v36  ;;  %v1026_v28 = vadd.f32 %v962_v43, %v898_v29  ;;  %v709_v33 = vadd.f32 1.0, %v1679_v5  ;;  %1700 = vpow2.f32 %v1209_v7  ;;  %v999_v7 = vld [vmem:[%s2676_s3 + $0x1e8] sm:$0xff]  ;;  %v966_v43 = vld [vmem:[%s2676_s3 + $0xe0] sm:$0xff] }
 0x171   :  { %v1683_v19 = vpop.eup %1682  ;;  %1123 = vst [vmem:[#allocation2 + $0x1c8] sm:$0xff] %v1059_v40  ;;  %v1058_v41 = vadd.f32 %v994_v50, %v930_v51  ;;  %v741_v31 = vadd.f32 1.0, %v1681_v27  ;;  %v998_v50 = vld [vmem:[%s2676_s3 + $0x1e0] sm:$0xff]  ;;  %v969_v27 = vld [vmem:[%s2676_s3 + $0xf8] sm:$0xff] }
 0x172   :  { %v1685_v23 = vpop.eup %1684  ;;  %1090 = vst [vmem:[#allocation2 + $0xc0] sm:$0xff] %v1026_v28  ;;  %1702 = vrcp.f32 %v709_v33  ;;  %v708_v59 = vadd.f32 1.0, %v1683_v19  ;;  %v1761_v19 = vld [vmem:[%s2673_s0 + $0xf8] sm:$0xff] }
 0x173   :  { %v1687_v60 = vpop.eup %1686  ;;  %1122 = vst [vmem:[#allocation2 + $0x1c0] sm:$0xff] %v1058_v41  ;;  %1704 = vrcp.f32 %v741_v31  ;;  %v740_v52 = vadd.f32 1.0, %v1685_v23  ;;  %v1001_v31 = vld [vmem:[%s2676_s3 + $0x1f8] sm:$0xff] }
 0x174   :  { %v1689_v12 = vpop.eup %1688  ;;  %1706 = vrcp.f32 %v708_v59  ;;  %v711_v56 = vadd.f32 1.0, %v1687_v60  ;;  %v1762_v60 = vld [vmem:[%s2673_s0 + $0x1f8] sm:$0xff] }
 0x175   :  { %v1691_v49 = vpop.eup %1690  ;;  %1708 = vrcp.f32 %v740_v52  ;;  %v743_v46 = vadd.f32 1.0, %v1689_v12  ;;  %v968_v12 = vld [vmem:[%s2676_s3 + $0xf0] sm:$0xff] }
 0x176   :  { %v1693_v53 = vpop.eup %1692  ;;  %1710 = vrcp.f32 %v711_v56  ;;  %v710_v62 = vadd.f32 1.0, %v1691_v49 }
 0x177   :  { %v1695_v34 = vpop.eup %1694  ;;  %1712 = vrcp.f32 %v743_v46  ;;  %v742_v58 = vadd.f32 1.0, %v1693_v53  ;;  %v1763_v46 = vld [vmem:[%s2673_s0 + $0xf0] sm:$0xff] }
 0x178   :  { %v1697_v37 = vpop.eup %1696  ;;  %1714 = vrcp.f32 %v710_v62  ;;  %v713_v17 = vadd.f32 1.0, %v1695_v34  ;;  %v1000_v62 = vld [vmem:[%s2676_s3 + $0x1f0] sm:$0xff] }
 0x179   :  { %v1699_v47 = vpop.eup %1698  ;;  %1716 = vrcp.f32 %v742_v58  ;;  %v745_v15 = vadd.f32 1.0, %v1697_v37  ;;  %v1764_v58 = vld [vmem:[%s2673_s0 + $0x1f0] sm:$0xff] }
 0x17a   :  { %v1701_v6 = vpop.eup %1700  ;;  %1718 = vrcp.f32 %v713_v17  ;;  %v712_v10 = vadd.f32 1.0, %v1699_v47 }
 0x17b   :  { %1720 = vrcp.f32 %v745_v15  ;;  %v744_v16 = vadd.f32 1.0, %v1701_v6 }
 0x17c   :  { %v1703_v26 = vpop.eup %1702  ;;  %1722 = vrcp.f32 %v712_v10 }
 0x17d   :  { %v1705_v25 = vpop.eup %1704  ;;  %v901_v1 = vmul.f32 %v1753_v18, %v1703_v26  ;;  %1724 = vrcp.f32 %v744_v16 }
 0x17e   :  { %v1707_v35 = vpop.eup %1706  ;;  %v933_v63 = vmul.f32 %v1754_v42, %v1705_v25 }
 0x17f   :  { %v1709_v21 = vpop.eup %1708  ;;  %v1029_v38 = vadd.f32 %v965_v32, %v901_v1  ;;  %v900_v9 = vmul.f32 %v1755_v30, %v1707_v35 }
 0x180   :  { %v1711_v8 = vpop.eup %1710  ;;  %v1061_v2 = vadd.f32 %v997_v44, %v933_v63  ;;  %v932_v55 = vmul.f32 %v1756_v20, %v1709_v21 }
 0x181   :  { %v1713_v54 = vpop.eup %1712  ;;  %1093 = vst [vmem:[#allocation2 + $0xd8] sm:$0xff] %v1029_v38  ;;  %v1028_v57 = vadd.f32 %v964_v13, %v900_v9  ;;  %v903_v45 = vmul.f32 %v1757_v3, %v1711_v8 }
 0x182   :  { %v1715_v4 = vpop.eup %1714  ;;  %1125 = vst [vmem:[#allocation2 + $0x1d8] sm:$0xff] %v1061_v2  ;;  %v1060_v39 = vadd.f32 %v996_v48, %v932_v55  ;;  %v935_v61 = vmul.f32 %v1758_v22, %v1713_v54 }
 0x183   :  { %v1717_v0 = vpop.eup %1716  ;;  %1092 = vst [vmem:[#allocation2 + $0xd0] sm:$0xff] %v1028_v57  ;;  %v1031_v36 = vadd.f32 %v967_v11, %v903_v45  ;;  %v902_v29 = vmul.f32 %v1759_v24, %v1715_v4 }
 0x184   :  { %v1719_v5 = vpop.eup %1718  ;;  %1124 = vst [vmem:[#allocation2 + $0x1d0] sm:$0xff] %v1060_v39  ;;  %v1063_v40 = vadd.f32 %v999_v7, %v935_v61  ;;  %v934_v51 = vmul.f32 %v1760_v14, %v1717_v0 }
 0x185   :  { %v1721_v28 = vpop.eup %1720  ;;  %1095 = vst [vmem:[#allocation2 + $0xe8] sm:$0xff] %v1031_v36  ;;  %v1030_v33 = vadd.f32 %v966_v43, %v902_v29  ;;  %v905_v41 = vmul.f32 %v1761_v19, %v1719_v5 }
 0x186   :  { %v1723_v23 = vpop.eup %1722  ;;  %1127 = vst [vmem:[#allocation2 + $0x1e8] sm:$0xff] %v1063_v40  ;;  %v1062_v59 = vadd.f32 %v998_v50, %v934_v51  ;;  %v937_v52 = vmul.f32 %v1762_v60, %v1721_v28 }
 0x187   :  { %v1725_v56 = vpop.eup %1724  ;;  %1094 = vst [vmem:[#allocation2 + $0xe0] sm:$0xff] %v1030_v33  ;;  %v1033_v49 = vadd.f32 %v969_v27, %v905_v41  ;;  %v904_v53 = vmul.f32 %v1763_v46, %v1723_v23 }
 0x188   :  { %1126 = vst [vmem:[#allocation2 + $0x1e0] sm:$0xff] %v1062_v59  ;;  %v1065_v34 = vadd.f32 %v1001_v31, %v937_v52  ;;  %v936_v37 = vmul.f32 %v1764_v58, %v1725_v56 }
 0x189   :  { %1097 = vst [vmem:[#allocation2 + $0xf8] sm:$0xff] %v1033_v49  ;;  %v1032_v17 = vadd.f32 %v968_v12, %v904_v53 }
 0x18a   :  { %1129 = vst [vmem:[#allocation2 + $0x1f8] sm:$0xff] %v1065_v34  ;;  %v1064_v47 = vadd.f32 %v1000_v62, %v936_v37 }
 0x18b   :  { %1096 = vst [vmem:[#allocation2 + $0xf0] sm:$0xff] %v1032_v17 }
 0x18c   :  { %1128 = vst [vmem:[#allocation2 + $0x1f0] sm:$0xff] %v1064_v47 }
 0x18d   :  { %1776 = shalt.err (!%p1773_p4)
}
 0x18e   :  { %s1777_s6 = scalar_lea.hbm %s2677_s4, 8192 }
 0x18f   :  { %p1778_p5 = scmp.ne.s32.totalorder %s2677_s4, %s1777_s6  ;;  %p1781_p6 = scmp.lt.u32.totalorder %s1777_s6, %s2677_s4 }
 0x191   :  { %p1783_p7 = pnand %p1781_p6, %p1778_p5 }
 0x193   :  { %1786 = shalt.err (!%p1783_p7)
}
 0x194   :  { %s1790_s10 = smov 128   ;;  %s1791_s11 = smov 8  }
 0x195   :  { %1141 = dma.vmem_to_hbm [thread:$0]  %s1136_s24, 8192, %s2677_s4, [#allocation3], %s1790_s10, %s1790_s10, %s1791_s11  }
 0x196   :  { %1787 = dma.done.wait [#allocation3], 8192  }
 0x197   :  { %1788 = vsyncadd [#allocation3], 4294959104 }
 0x198   :  { %1145 = vsyncpa [#allocation3], 1 }

</bundles_post_ra>
